<compile_context>
chip_gen: v7x
topology: tpu7x:2x2x1
jax: 0.10.0
libtpu: 0.0.40
codegen_flags: <defaults>
</compile_context>

<pallas_src>
import functools

import jax
import jax.numpy as jnp
from jax.experimental import pallas as pl
from jax.experimental.pallas import tpu as pltpu

# Model hyperparameters (scaled-down demo config, consistent with the module).
HIDDEN = 32          # hidden_size
NHEAD = 4            # nhead
HEAD_DIM = HIDDEN // NHEAD
NUM_LAYERS = 2       # num_layers
FFN = 64             # dim_feedforward (PyTorch default 2048; scaled down for demo)
EPS = 1e-5           # LayerNorm eps (PyTorch default)

MAX_B_TILE = 512     # sequences per grid step (cap; keeps VMEM well under 32 MiB)


# ---------------------------------------------------------------------------
# LayerNorm helpers
# ---------------------------------------------------------------------------
def _layernorm_cols(x, w, b):
    """LayerNorm over axis 0 (features) of a (H, N) slab; w, b are (H, 1)."""
    mu = jnp.mean(x, axis=0, keepdims=True)
    var = jnp.mean((x - mu) ** 2, axis=0, keepdims=True)
    return (x - mu) * jax.lax.rsqrt(var + EPS) * w + b


def _layernorm_rows(x, w, b):
    """LayerNorm over the last axis (used only by the pure-JAX reference)."""
    mu = jnp.mean(x, axis=-1, keepdims=True)
    var = jnp.mean((x - mu) ** 2, axis=-1, keepdims=True)
    return (x - mu) * jax.lax.rsqrt(var + EPS) * w + b


# ---------------------------------------------------------------------------
# Pallas kernel
# ---------------------------------------------------------------------------
def behrt_lab_kernel(lab_ref, tok_w_ref, posb_ref,
                     ipw_ref, ipb_ref, opw_ref, opb_ref,
                     l1w_ref, l1b_ref, l2w_ref, l2b_ref,
                     n1w_ref, n1b_ref, n2w_ref, n2b_ref,
                     out_ref, *, seq_len):
    f32 = jnp.float32
    bf16 = jnp.bfloat16
    H, HD, NH = HIDDEN, HEAD_DIM, NHEAD
    T = seq_len
    N = lab_ref.shape[-1]          # = T * b_tile lanes
    bt = N // T                    # sequences in this grid step
    scale = 1.0 / (HD ** 0.5)

    # --- token embedding (Linear(1, H)) + positional embedding -------------
    # Column j = t * bt + b  holds token t of local sequence b.
    lab_row = lab_ref[0]                                   # (1, N)
    x = tok_w_ref[...] * lab_row + posb_ref[...]           # (H, N), f32

    for l in range(NUM_LAYERS):
        # --- fused QKV projection: (3H, H) @ (H, N) on the MXU (bf16 in, f32 acc)
        qkv = jnp.dot(ipw_ref[l], x.astype(bf16),
                      preferred_element_type=f32) + ipb_ref[l]     # (3H, N)
        q = qkv[0:H, :] * scale
        k = qkv[H:2 * H, :]
        v = qkv[2 * H:3 * H, :]

        # --- per-sequence (block-diagonal) multi-head attention -------------
        # Token blocks are contiguous lane blocks, head blocks are aligned
        # sublane blocks -> everything below is cheap slices + VPU/XLU work.
        head_outs = []
        for n in range(NH):
            qn = q[n * HD:(n + 1) * HD, :]                 # (HD, N)
            kn = k[n * HD:(n + 1) * HD, :]
            vn = v[n * HD:(n + 1) * HD, :]

            # scores: one (1, N) row per key token (lane j = query_t*bt + b)
            srows = []
            for kt in range(T):
                kblk = kn[:, kt * bt:(kt + 1) * bt]                    # (HD, bt)
                krep = jnp.concatenate([kblk] * T, axis=1)             # (HD, N)
                srows.append(jnp.sum(qn * krep, axis=0, keepdims=True))

            # softmax over the key-token dimension (list reduction, f32)
            m = srows[0]
            for s in srows[1:]:
                m = jnp.maximum(m, s)
            erows = [jnp.exp(s - m) for s in srows]
            denom = erows[0]
            for e in erows[1:]:
                denom = denom + e
            inv = pl.reciprocal(denom, approx=True)                    # (1, N)

            # weighted sum of values
            on = jnp.zeros((HD, N), f32)
            for kt in range(T):
                vblk = vn[:, kt * bt:(kt + 1) * bt]                    # (HD, bt)
                vrep = jnp.concatenate([vblk] * T, axis=1)             # (HD, N)
                on = on + (erows[kt] * inv) * vrep
            head_outs.append(on)

        attn = jnp.concatenate(head_outs, axis=0)                      # (H, N)
        attn = jnp.dot(opw_ref[l], attn.astype(bf16),
                       preferred_element_type=f32) + opb_ref[l]

        # --- residual + LayerNorm 1 (post-LN) -------------------------------
        x = _layernorm_cols(x + attn, n1w_ref[l], n1b_ref[l])

        # --- FFN: Linear(H, F) -> ReLU -> Linear(F, H) ----------------------
        h1 = jnp.dot(l1w_ref[l], x.astype(bf16),
                     preferred_element_type=f32) + l1b_ref[l]          # (F, N)
        h1 = jnp.maximum(h1, 0.0)
        ff = jnp.dot(l2w_ref[l], h1.astype(bf16),
                     preferred_element_type=f32) + l2b_ref[l]          # (H, N)

        # --- residual + LayerNorm 2 ------------------------------------------
        x = _layernorm_cols(x + ff, n2w_ref[l], n2b_ref[l])

    # --- mean over tokens: average the T lane blocks -> lane-dense (H, bt) ---
    acc = x[:, 0:bt]
    for t in range(1, T):
        acc = acc + x[:, t * bt:(t + 1) * bt]
    out_ref[...] = acc * (1.0 / T)


# ---------------------------------------------------------------------------
# Host-side packing / wrapper
# ---------------------------------------------------------------------------
def pack_params(params, b_tile):
    """Kernel-ready parameter list: weights kept in PyTorch (out, in) orientation
    (the kernel computes W @ x_T), matmul weights cast to bf16, biases given a
    broadcast lane dim, and pos_embedding + token bias pre-expanded to the
    (H, T*b_tile) lane layout."""
    H, L, F = HIDDEN, NUM_LAYERS, FFN
    f32, bf16 = jnp.float32, jnp.bfloat16
    pos_wide = jnp.repeat(params["pos"].T.astype(f32), b_tile, axis=1)  # (H, T*b_tile)
    posb = pos_wide + params["tok_b"].astype(f32).reshape(H, 1)
    return [
        params["tok_w"].astype(f32).reshape(H, 1),
        posb,
        params["ipw"].astype(bf16),                         # (L, 3H, H)
        params["ipb"].astype(f32).reshape(L, 3 * H, 1),
        params["opw"].astype(bf16),                         # (L, H, H)
        params["opb"].astype(f32).reshape(L, H, 1),
        params["l1w"].astype(bf16),                         # (L, F, H)
        params["l1b"].astype(f32).reshape(L, F, 1),
        params["l2w"].astype(bf16),                         # (L, H, F)
        params["l2b"].astype(f32).reshape(L, H, 1),
        params["n1w"].astype(f32).reshape(L, H, 1),
        params["n1b"].astype(f32).reshape(L, H, 1),
        params["n2w"].astype(f32).reshape(L, H, 1),
        params["n2b"].astype(f32).reshape(L, H, 1),
    ]


def _choose_b_tile(batch):
    """Adaptive batch tile: minimal padding for small batches, capped at
    MAX_B_TILE, split into >=2 tiles when possible (v7x megacore)."""
    b8 = ((batch + 7) // 8) * 8
    if b8 <= MAX_B_TILE:
        if b8 >= 256 and b8 % 256 == 0:
            return b8 // 2
        return b8
    return MAX_B_TILE


def behrt_lab_forward(lab_features, params, *, b_tile=None):
    """lab_features: (B, T) float32 -> (B, HIDDEN) float32."""
    B, T = lab_features.shape
    if b_tile is None:
        b_tile = _choose_b_tile(B)
    num_tiles = pl.cdiv(B, b_tile)
    Bp = num_tiles * b_tile

    lab = lab_features.astype(jnp.float32)
    if Bp != B:        # pad only when needed (padded rows computed & dropped)
        lab = jnp.concatenate([lab, jnp.zeros((Bp - B, T), jnp.float32)], axis=0)

    # Per-tile lane layout: column j = token * b_tile + local_batch.
    lab_tiles = (lab.reshape(num_tiles, b_tile, T)
                    .transpose(0, 2, 1)
                    .reshape(num_tiles, 1, T * b_tile))

    consts = pack_params(params, b_tile)

    def _const_spec(arr):
        nd = arr.ndim
        return pl.BlockSpec(arr.shape, lambda i, _nd=nd: (0,) * _nd)

    in_specs = [pl.BlockSpec((1, 1, T * b_tile), lambda i: (i, 0, 0))]
    in_specs += [_const_spec(a) for a in consts]

    out = pl.pallas_call(
        functools.partial(behrt_lab_kernel, seq_len=T),
        out_shape=jax.ShapeDtypeStruct((HIDDEN, Bp), jnp.float32),
        grid=(num_tiles,),
        in_specs=in_specs,
        out_specs=pl.BlockSpec((HIDDEN, b_tile), lambda i: (0, i)),
        compiler_params=pltpu.CompilerParams(
            dimension_semantics=("parallel",),
            vmem_limit_bytes=32 * 1024 * 1024),
    )(lab_tiles, *consts)

    return out[:, :B].T            # lane-dense store; transpose back on host


# ---------------------------------------------------------------------------
# Parameter init (PyTorch orientation) + pure-JAX reference
# ---------------------------------------------------------------------------
def init_params(key, lab_token_count):
    H, L, F = HIDDEN, NUM_LAYERS, FFN
    ks = jax.random.split(key, 12)
    w = lambda k, shape, s=0.02: (s * jax.random.normal(k, shape)).astype(jnp.float32)
    return {
        # token_embedding: nn.Linear(1, H) -> weight (H, 1), bias (H,)
        "tok_w": w(ks[0], (H, 1), 0.5),
        "tok_b": w(ks[1], (H,), 0.1),
        # pos_embedding: nn.Parameter(torch.randn(T, H))
        "pos": (0.1 * jax.random.normal(ks[2], (lab_token_count, H))).astype(jnp.float32),
        # per-layer MHA in/out projections (PyTorch (out, in) orientation)
        "ipw": w(ks[3], (L, 3 * H, H)),
        "ipb": w(ks[4], (L, 3 * H), 0.01),
        "opw": w(ks[5], (L, H, H)),
        "opb": w(ks[6], (L, H), 0.01),
        # per-layer FFN
        "l1w": w(ks[7], (L, F, H)),
        "l1b": w(ks[8], (L, F), 0.01),
        "l2w": w(ks[9], (L, H, F)),
        "l2b": w(ks[10], (L, H), 0.01),
        # per-layer LayerNorms (PyTorch init: weight=1, bias=0)
        "n1w": jnp.ones((L, H), jnp.float32),
        "n1b": jnp.zeros((L, H), jnp.float32),
        "n2w": jnp.ones((L, H), jnp.float32),
        "n2b": jnp.zeros((L, H), jnp.float32),
    }


def behrt_lab_reference(lab, p):
    """Pure-JAX (non-Pallas) reference of the same forward pass."""
    H, HD = HIDDEN, HEAD_DIM
    B, T = lab.shape
    x = lab[:, :, None] * p["tok_w"][:, 0] + p["tok_b"]     # (B, T, H)
    x = x + p["pos"][None]
    for l in range(NUM_LAYERS):
        qkv = jnp.einsum('bth,kh->btk', x, p["ipw"][l]) + p["ipb"][l]
        q, k, v = qkv[..., :H], qkv[..., H:2 * H], qkv[..., 2 * H:]
        qh = q.reshape(B, T, NHEAD, HD)
        kh = k.reshape(B, T, NHEAD, HD)
        vh = v.reshape(B, T, NHEAD, HD)
        sc = jnp.einsum('bqnd,bknd->bnqk', qh, kh) / jnp.sqrt(float(HD))
        a = jax.nn.softmax(sc, axis=-1)
        oh = jnp.einsum('bnqk,bknd->bqnd', a, vh).reshape(B, T, H)
        attn = jnp.einsum('bth,oh->bto', oh, p["opw"][l]) + p["opb"][l]
        x = _layernorm_rows(x + attn, p["n1w"][l], p["n1b"][l])
        h1 = jax.nn.relu(jnp.einsum('bth,fh->btf', x, p["l1w"][l]) + p["l1b"][l])
        ff = jnp.einsum('btf,hf->bth', h1, p["l2w"][l]) + p["l2b"][l]
        x = _layernorm_rows(x + ff, p["n2w"][l], p["n2b"][l])
    return x.mean(axis=1)


if __name__ == "__main__":
    # TODO(synk): dropout inside nn.TransformerEncoderLayer is identity here (eval mode).
    B = 2                 # batch
    T = 8                 # lab_token_count
    key = jax.random.PRNGKey(0)
    k_in, k_par = jax.random.split(key)

    lab_features = jax.random.normal(k_in, (B, T), dtype=jnp.float32)
    params = init_params(k_par, T)

    emb = jax.block_until_ready(behrt_lab_forward(lab_features, params))
    assert emb.shape == (B, HIDDEN)
    assert bool(jnp.all(jnp.isfinite(emb)))

    ref = behrt_lab_reference(lab_features, params)
    max_err = float(jnp.max(jnp.abs(emb - ref)))
    assert bool(jnp.allclose(emb, ref, atol=2e-2, rtol=2e-2)), max_err

    # Also exercise a multi-tile, 128-lane-aligned batch (2 grid steps of 128).
    B2 = 256
    lab2 = jax.random.normal(jax.random.PRNGKey(1), (B2, T), dtype=jnp.float32)
    emb2 = jax.block_until_ready(behrt_lab_forward(lab2, params))
    assert emb2.shape == (B2, HIDDEN)
    ref2 = behrt_lab_reference(lab2, params)
    max_err2 = float(jnp.max(jnp.abs(emb2 - ref2)))
    assert bool(jnp.allclose(emb2, ref2, atol=2e-2, rtol=2e-2)), max_err2

    print("KERNEL_OK")
</pallas_src>

<mosaic_0001>
module attributes {stable_mosaic.version = 11 : i64} {
  func.func @behrt_lab_kernel(%arg0: i32, %arg1: memref<1x1x64xf32, #tpu.memory_space<vmem>>, %arg2: memref<32x1xf32, #tpu.memory_space<vmem>>, %arg3: memref<32x64xf32, #tpu.memory_space<vmem>>, %arg4: memref<2x96x32xbf16, #tpu.memory_space<vmem>>, %arg5: memref<2x96x1xf32, #tpu.memory_space<vmem>>, %arg6: memref<2x32x32xbf16, #tpu.memory_space<vmem>>, %arg7: memref<2x32x1xf32, #tpu.memory_space<vmem>>, %arg8: memref<2x64x32xbf16, #tpu.memory_space<vmem>>, %arg9: memref<2x64x1xf32, #tpu.memory_space<vmem>>, %arg10: memref<2x32x64xbf16, #tpu.memory_space<vmem>>, %arg11: memref<2x32x1xf32, #tpu.memory_space<vmem>>, %arg12: memref<2x32x1xf32, #tpu.memory_space<vmem>>, %arg13: memref<2x32x1xf32, #tpu.memory_space<vmem>>, %arg14: memref<2x32x1xf32, #tpu.memory_space<vmem>>, %arg15: memref<2x32x1xf32, #tpu.memory_space<vmem>>, %arg16: memref<32x8xf32, #tpu.memory_space<vmem>>) attributes {dimension_semantics = [#tpu.dimension_semantics<parallel>], iteration_bounds = array<i64: 1>, scalar_prefetch = 0 : i64, scratch_operands = 0 : i64, tpu.core_type = #tpu.core_type<tc>, window_params = [{transform_indices = @transform_0, window_bounds = array<i64: 1, 1, 64>}, {pipeline_mode = #tpu.pipeline_mode<synchronous>, transform_indices = @transform_1, window_bounds = array<i64: 32, 1>}, {pipeline_mode = #tpu.pipeline_mode<synchronous>, transform_indices = @transform_2, window_bounds = array<i64: 32, 64>}, {pipeline_mode = #tpu.pipeline_mode<synchronous>, transform_indices = @transform_3, window_bounds = array<i64: 2, 96, 32>}, {pipeline_mode = #tpu.pipeline_mode<synchronous>, transform_indices = @transform_4, window_bounds = array<i64: 2, 96, 1>}, {pipeline_mode = #tpu.pipeline_mode<synchronous>, transform_indices = @transform_5, window_bounds = array<i64: 2, 32, 32>}, {pipeline_mode = #tpu.pipeline_mode<synchronous>, transform_indices = @transform_6, window_bounds = array<i64: 2, 32, 1>}, {pipeline_mode = #tpu.pipeline_mode<synchronous>, transform_indices = @transform_7, window_bounds = array<i64: 2, 64, 32>}, {pipeline_mode = #tpu.pipeline_mode<synchronous>, transform_indices = @transform_8, window_bounds = array<i64: 2, 64, 1>}, {pipeline_mode = #tpu.pipeline_mode<synchronous>, transform_indices = @transform_9, window_bounds = array<i64: 2, 32, 64>}, {pipeline_mode = #tpu.pipeline_mode<synchronous>, transform_indices = @transform_10, window_bounds = array<i64: 2, 32, 1>}, {pipeline_mode = #tpu.pipeline_mode<synchronous>, transform_indices = @transform_11, window_bounds = array<i64: 2, 32, 1>}, {pipeline_mode = #tpu.pipeline_mode<synchronous>, transform_indices = @transform_12, window_bounds = array<i64: 2, 32, 1>}, {pipeline_mode = #tpu.pipeline_mode<synchronous>, transform_indices = @transform_13, window_bounds = array<i64: 2, 32, 1>}, {pipeline_mode = #tpu.pipeline_mode<synchronous>, transform_indices = @transform_14, window_bounds = array<i64: 2, 32, 1>}, {transform_indices = @transform_15, window_bounds = array<i64: 32, 8>}]} {
    %c0 = arith.constant 0 : index
    %c0_0 = arith.constant 0 : index
    %c0_1 = arith.constant 0 : index
    %0 = vector.load %arg1[%c0, %c0_0, %c0_1] : memref<1x1x64xf32, #tpu.memory_space<vmem>>, vector<1x1x64xf32>
    %1 = vector.shape_cast %0 : vector<1x1x64xf32> to vector<1x64xf32>
    %c0_2 = arith.constant 0 : index
    %c0_3 = arith.constant 0 : index
    %2 = vector.load %arg2[%c0_2, %c0_3] : memref<32x1xf32, #tpu.memory_space<vmem>>, vector<32x1xf32>
    %3 = vector.broadcast %2 : vector<32x1xf32> to vector<32x64xf32>
    %4 = vector.broadcast %1 : vector<1x64xf32> to vector<32x64xf32>
    %5 = arith.mulf %3, %4 : vector<32x64xf32>
    %c0_4 = arith.constant 0 : index
    %c0_5 = arith.constant 0 : index
    %6 = vector.load %arg3[%c0_4, %c0_5] : memref<32x64xf32, #tpu.memory_space<vmem>>, vector<32x64xf32>
    %7 = arith.addf %5, %6 : vector<32x64xf32>
    %c0_6 = arith.constant 0 : index
    %c0_7 = arith.constant 0 : index
    %c0_8 = arith.constant 0 : index
    %8 = vector.load %arg4[%c0_6, %c0_7, %c0_8] : memref<2x96x32xbf16, #tpu.memory_space<vmem>>, vector<1x96x32xbf16>
    %9 = vector.shape_cast %8 : vector<1x96x32xbf16> to vector<96x32xbf16>
    %10 = arith.truncf %7 : vector<32x64xf32> to vector<32x64xbf16>
    %cst = arith.constant dense<0.000000e+00> : vector<96x64xf32>
    %11 = tpu.matmul %9, %10, %cst {dimension_numbers = #tpu.dot_dimension_numbers<[1], [0], [0], [1], [0, 0, 1, 1], [], []>} : vector<96x32xbf16>, vector<32x64xbf16>, vector<96x64xf32> -> vector<96x64xf32>
    %c0_9 = arith.constant 0 : index
    %c0_10 = arith.constant 0 : index
    %c0_11 = arith.constant 0 : index
    %12 = vector.load %arg5[%c0_9, %c0_10, %c0_11] : memref<2x96x1xf32, #tpu.memory_space<vmem>>, vector<1x96x1xf32>
    %13 = vector.shape_cast %12 : vector<1x96x1xf32> to vector<96x1xf32>
    %14 = vector.broadcast %13 : vector<96x1xf32> to vector<96x64xf32>
    %15 = arith.addf %11, %14 : vector<96x64xf32>
    %16 = vector.extract_strided_slice %15 {offsets = [0, 0], sizes = [32, 64], strides = [1, 1]} : vector<96x64xf32> to vector<32x64xf32>
    %cst_12 = arith.constant 0.353553385 : f32
    %17 = vector.broadcast %cst_12 : f32 to vector<32x64xf32>
    %18 = arith.mulf %16, %17 : vector<32x64xf32>
    %19 = vector.extract_strided_slice %15 {offsets = [32, 0], sizes = [32, 64], strides = [1, 1]} : vector<96x64xf32> to vector<32x64xf32>
    %20 = vector.extract_strided_slice %15 {offsets = [64, 0], sizes = [32, 64], strides = [1, 1]} : vector<96x64xf32> to vector<32x64xf32>
    %21 = vector.extract_strided_slice %18 {offsets = [0, 0], sizes = [8, 64], strides = [1, 1]} : vector<32x64xf32> to vector<8x64xf32>
    %22 = vector.extract_strided_slice %19 {offsets = [0, 0], sizes = [8, 64], strides = [1, 1]} : vector<32x64xf32> to vector<8x64xf32>
    %23 = vector.extract_strided_slice %20 {offsets = [0, 0], sizes = [8, 64], strides = [1, 1]} : vector<32x64xf32> to vector<8x64xf32>
    %24 = vector.extract_strided_slice %22 {offsets = [0, 0], sizes = [8, 8], strides = [1, 1]} : vector<8x64xf32> to vector<8x8xf32>
    %25 = tpu.concatenate %24, %24, %24, %24, %24, %24, %24, %24 in 1 : vector<8x8xf32>, vector<8x8xf32>, vector<8x8xf32>, vector<8x8xf32>, vector<8x8xf32>, vector<8x8xf32>, vector<8x8xf32>, vector<8x8xf32> -> vector<8x64xf32>
    %26 = arith.mulf %21, %25 : vector<8x64xf32>
    %cst_13 = arith.constant dense<0.000000e+00> : vector<64xf32>
    %27 = vector.multi_reduction <add>, %26, %cst_13 [0] : vector<8x64xf32> to vector<64xf32>
    %28 = vector.shape_cast %27 : vector<64xf32> to vector<1x64xf32>
    %29 = vector.extract_strided_slice %22 {offsets = [0, 8], sizes = [8, 8], strides = [1, 1]} : vector<8x64xf32> to vector<8x8xf32>
    %30 = tpu.concatenate %29, %29, %29, %29, %29, %29, %29, %29 in 1 : vector<8x8xf32>, vector<8x8xf32>, vector<8x8xf32>, vector<8x8xf32>, vector<8x8xf32>, vector<8x8xf32>, vector<8x8xf32>, vector<8x8xf32> -> vector<8x64xf32>
    %31 = arith.mulf %21, %30 : vector<8x64xf32>
    %cst_14 = arith.constant dense<0.000000e+00> : vector<64xf32>
    %32 = vector.multi_reduction <add>, %31, %cst_14 [0] : vector<8x64xf32> to vector<64xf32>
    %33 = vector.shape_cast %32 : vector<64xf32> to vector<1x64xf32>
    %34 = vector.extract_strided_slice %22 {offsets = [0, 16], sizes = [8, 8], strides = [1, 1]} : vector<8x64xf32> to vector<8x8xf32>
    %35 = tpu.concatenate %34, %34, %34, %34, %34, %34, %34, %34 in 1 : vector<8x8xf32>, vector<8x8xf32>, vector<8x8xf32>, vector<8x8xf32>, vector<8x8xf32>, vector<8x8xf32>, vector<8x8xf32>, vector<8x8xf32> -> vector<8x64xf32>
    %36 = arith.mulf %21, %35 : vector<8x64xf32>
    %cst_15 = arith.constant dense<0.000000e+00> : vector<64xf32>
    %37 = vector.multi_reduction <add>, %36, %cst_15 [0] : vector<8x64xf32> to vector<64xf32>
    %38 = vector.shape_cast %37 : vector<64xf32> to vector<1x64xf32>
    %39 = vector.extract_strided_slice %22 {offsets = [0, 24], sizes = [8, 8], strides = [1, 1]} : vector<8x64xf32> to vector<8x8xf32>
    %40 = tpu.concatenate %39, %39, %39, %39, %39, %39, %39, %39 in 1 : vector<8x8xf32>, vector<8x8xf32>, vector<8x8xf32>, vector<8x8xf32>, vector<8x8xf32>, vector<8x8xf32>, vector<8x8xf32>, vector<8x8xf32> -> vector<8x64xf32>
    %41 = arith.mulf %21, %40 : vector<8x64xf32>
    %cst_16 = arith.constant dense<0.000000e+00> : vector<64xf32>
    %42 = vector.multi_reduction <add>, %41, %cst_16 [0] : vector<8x64xf32> to vector<64xf32>
    %43 = vector.shape_cast %42 : vector<64xf32> to vector<1x64xf32>
    %44 = vector.extract_strided_slice %22 {offsets = [0, 32], sizes = [8, 8], strides = [1, 1]} : vector<8x64xf32> to vector<8x8xf32>
    %45 = tpu.concatenate %44, %44, %44, %44, %44, %44, %44, %44 in 1 : vector<8x8xf32>, vector<8x8xf32>, vector<8x8xf32>, vector<8x8xf32>, vector<8x8xf32>, vector<8x8xf32>, vector<8x8xf32>, vector<8x8xf32> -> vector<8x64xf32>
    %46 = arith.mulf %21, %45 : vector<8x64xf32>
    %cst_17 = arith.constant dense<0.000000e+00> : vector<64xf32>
    %47 = vector.multi_reduction <add>, %46, %cst_17 [0] : vector<8x64xf32> to vector<64xf32>
    %48 = vector.shape_cast %47 : vector<64xf32> to vector<1x64xf32>
    %49 = vector.extract_strided_slice %22 {offsets = [0, 40], sizes = [8, 8], strides = [1, 1]} : vector<8x64xf32> to vector<8x8xf32>
    %50 = tpu.concatenate %49, %49, %49, %49, %49, %49, %49, %49 in 1 : vector<8x8xf32>, vector<8x8xf32>, vector<8x8xf32>, vector<8x8xf32>, vector<8x8xf32>, vector<8x8xf32>, vector<8x8xf32>, vector<8x8xf32> -> vector<8x64xf32>
    %51 = arith.mulf %21, %50 : vector<8x64xf32>
    %cst_18 = arith.constant dense<0.000000e+00> : vector<64xf32>
    %52 = vector.multi_reduction <add>, %51, %cst_18 [0] : vector<8x64xf32> to vector<64xf32>
    %53 = vector.shape_cast %52 : vector<64xf32> to vector<1x64xf32>
    %54 = vector.extract_strided_slice %22 {offsets = [0, 48], sizes = [8, 8], strides = [1, 1]} : vector<8x64xf32> to vector<8x8xf32>
    %55 = tpu.concatenate %54, %54, %54, %54, %54, %54, %54, %54 in 1 : vector<8x8xf32>, vector<8x8xf32>, vector<8x8xf32>, vector<8x8xf32>, vector<8x8xf32>, vector<8x8xf32>, vector<8x8xf32>, vector<8x8xf32> -> vector<8x64xf32>
    %56 = arith.mulf %21, %55 : vector<8x64xf32>
    %cst_19 = arith.constant dense<0.000000e+00> : vector<64xf32>
    %57 = vector.multi_reduction <add>, %56, %cst_19 [0] : vector<8x64xf32> to vector<64xf32>
    %58 = vector.shape_cast %57 : vector<64xf32> to vector<1x64xf32>
    %59 = vector.extract_strided_slice %22 {offsets = [0, 56], sizes = [8, 8], strides = [1, 1]} : vector<8x64xf32> to vector<8x8xf32>
    %60 = tpu.concatenate %59, %59, %59, %59, %59, %59, %59, %59 in 1 : vector<8x8xf32>, vector<8x8xf32>, vector<8x8xf32>, vector<8x8xf32>, vector<8x8xf32>, vector<8x8xf32>, vector<8x8xf32>, vector<8x8xf32> -> vector<8x64xf32>
    %61 = arith.mulf %21, %60 : vector<8x64xf32>
    %cst_20 = arith.constant dense<0.000000e+00> : vector<64xf32>
    %62 = vector.multi_reduction <add>, %61, %cst_20 [0] : vector<8x64xf32> to vector<64xf32>
    %63 = vector.shape_cast %62 : vector<64xf32> to vector<1x64xf32>
    %64 = arith.maximumf %28, %33 : vector<1x64xf32>
    %65 = arith.maximumf %64, %38 : vector<1x64xf32>
    %66 = arith.maximumf %65, %43 : vector<1x64xf32>
    %67 = arith.maximumf %66, %48 : vector<1x64xf32>
    %68 = arith.maximumf %67, %53 : vector<1x64xf32>
    %69 = arith.maximumf %68, %58 : vector<1x64xf32>
    %70 = arith.maximumf %69, %63 : vector<1x64xf32>
    %71 = arith.subf %28, %70 : vector<1x64xf32>
    %72 = math.exp %71 : vector<1x64xf32>
    %73 = arith.subf %33, %70 : vector<1x64xf32>
    %74 = math.exp %73 : vector<1x64xf32>
    %75 = arith.subf %38, %70 : vector<1x64xf32>
    %76 = math.exp %75 : vector<1x64xf32>
    %77 = arith.subf %43, %70 : vector<1x64xf32>
    %78 = math.exp %77 : vector<1x64xf32>
    %79 = arith.subf %48, %70 : vector<1x64xf32>
    %80 = math.exp %79 : vector<1x64xf32>
    %81 = arith.subf %53, %70 : vector<1x64xf32>
    %82 = math.exp %81 : vector<1x64xf32>
    %83 = arith.subf %58, %70 : vector<1x64xf32>
    %84 = math.exp %83 : vector<1x64xf32>
    %85 = arith.subf %63, %70 : vector<1x64xf32>
    %86 = math.exp %85 : vector<1x64xf32>
    %87 = arith.addf %72, %74 : vector<1x64xf32>
    %88 = arith.addf %87, %76 : vector<1x64xf32>
    %89 = arith.addf %88, %78 : vector<1x64xf32>
    %90 = arith.addf %89, %80 : vector<1x64xf32>
    %91 = arith.addf %90, %82 : vector<1x64xf32>
    %92 = arith.addf %91, %84 : vector<1x64xf32>
    %93 = arith.addf %92, %86 : vector<1x64xf32>
    %94 = tpu.reciprocal %93 {approx = true} : vector<1x64xf32> -> vector<1x64xf32>
    %cst_21 = arith.constant 0.000000e+00 : f32
    %95 = vector.broadcast %cst_21 : f32 to vector<8x64xf32>
    %96 = vector.extract_strided_slice %23 {offsets = [0, 0], sizes = [8, 8], strides = [1, 1]} : vector<8x64xf32> to vector<8x8xf32>
    %97 = tpu.concatenate %96, %96, %96, %96, %96, %96, %96, %96 in 1 : vector<8x8xf32>, vector<8x8xf32>, vector<8x8xf32>, vector<8x8xf32>, vector<8x8xf32>, vector<8x8xf32>, vector<8x8xf32>, vector<8x8xf32> -> vector<8x64xf32>
    %98 = arith.mulf %72, %94 : vector<1x64xf32>
    %99 = vector.broadcast %98 : vector<1x64xf32> to vector<8x64xf32>
    %100 = arith.mulf %99, %97 : vector<8x64xf32>
    %101 = arith.addf %95, %100 : vector<8x64xf32>
    %102 = vector.extract_strided_slice %23 {offsets = [0, 8], sizes = [8, 8], strides = [1, 1]} : vector<8x64xf32> to vector<8x8xf32>
    %103 = tpu.concatenate %102, %102, %102, %102, %102, %102, %102, %102 in 1 : vector<8x8xf32>, vector<8x8xf32>, vector<8x8xf32>, vector<8x8xf32>, vector<8x8xf32>, vector<8x8xf32>, vector<8x8xf32>, vector<8x8xf32> -> vector<8x64xf32>
    %104 = arith.mulf %74, %94 : vector<1x64xf32>
    %105 = vector.broadcast %104 : vector<1x64xf32> to vector<8x64xf32>
    %106 = arith.mulf %105, %103 : vector<8x64xf32>
    %107 = arith.addf %101, %106 : vector<8x64xf32>
    %108 = vector.extract_strided_slice %23 {offsets = [0, 16], sizes = [8, 8], strides = [1, 1]} : vector<8x64xf32> to vector<8x8xf32>
    %109 = tpu.concatenate %108, %108, %108, %108, %108, %108, %108, %108 in 1 : vector<8x8xf32>, vector<8x8xf32>, vector<8x8xf32>, vector<8x8xf32>, vector<8x8xf32>, vector<8x8xf32>, vector<8x8xf32>, vector<8x8xf32> -> vector<8x64xf32>
    %110 = arith.mulf %76, %94 : vector<1x64xf32>
    %111 = vector.broadcast %110 : vector<1x64xf32> to vector<8x64xf32>
    %112 = arith.mulf %111, %109 : vector<8x64xf32>
    %113 = arith.addf %107, %112 : vector<8x64xf32>
    %114 = vector.extract_strided_slice %23 {offsets = [0, 24], sizes = [8, 8], strides = [1, 1]} : vector<8x64xf32> to vector<8x8xf32>
    %115 = tpu.concatenate %114, %114, %114, %114, %114, %114, %114, %114 in 1 : vector<8x8xf32>, vector<8x8xf32>, vector<8x8xf32>, vector<8x8xf32>, vector<8x8xf32>, vector<8x8xf32>, vector<8x8xf32>, vector<8x8xf32> -> vector<8x64xf32>
    %116 = arith.mulf %78, %94 : vector<1x64xf32>
    %117 = vector.broadcast %116 : vector<1x64xf32> to vector<8x64xf32>
    %118 = arith.mulf %117, %115 : vector<8x64xf32>
    %119 = arith.addf %113, %118 : vector<8x64xf32>
    %120 = vector.extract_strided_slice %23 {offsets = [0, 32], sizes = [8, 8], strides = [1, 1]} : vector<8x64xf32> to vector<8x8xf32>
    %121 = tpu.concatenate %120, %120, %120, %120, %120, %120, %120, %120 in 1 : vector<8x8xf32>, vector<8x8xf32>, vector<8x8xf32>, vector<8x8xf32>, vector<8x8xf32>, vector<8x8xf32>, vector<8x8xf32>, vector<8x8xf32> -> vector<8x64xf32>
    %122 = arith.mulf %80, %94 : vector<1x64xf32>
    %123 = vector.broadcast %122 : vector<1x64xf32> to vector<8x64xf32>
    %124 = arith.mulf %123, %121 : vector<8x64xf32>
    %125 = arith.addf %119, %124 : vector<8x64xf32>
    %126 = vector.extract_strided_slice %23 {offsets = [0, 40], sizes = [8, 8], strides = [1, 1]} : vector<8x64xf32> to vector<8x8xf32>
    %127 = tpu.concatenate %126, %126, %126, %126, %126, %126, %126, %126 in 1 : vector<8x8xf32>, vector<8x8xf32>, vector<8x8xf32>, vector<8x8xf32>, vector<8x8xf32>, vector<8x8xf32>, vector<8x8xf32>, vector<8x8xf32> -> vector<8x64xf32>
    %128 = arith.mulf %82, %94 : vector<1x64xf32>
    %129 = vector.broadcast %128 : vector<1x64xf32> to vector<8x64xf32>
    %130 = arith.mulf %129, %127 : vector<8x64xf32>
    %131 = arith.addf %125, %130 : vector<8x64xf32>
    %132 = vector.extract_strided_slice %23 {offsets = [0, 48], sizes = [8, 8], strides = [1, 1]} : vector<8x64xf32> to vector<8x8xf32>
    %133 = tpu.concatenate %132, %132, %132, %132, %132, %132, %132, %132 in 1 : vector<8x8xf32>, vector<8x8xf32>, vector<8x8xf32>, vector<8x8xf32>, vector<8x8xf32>, vector<8x8xf32>, vector<8x8xf32>, vector<8x8xf32> -> vector<8x64xf32>
    %134 = arith.mulf %84, %94 : vector<1x64xf32>
    %135 = vector.broadcast %134 : vector<1x64xf32> to vector<8x64xf32>
    %136 = arith.mulf %135, %133 : vector<8x64xf32>
    %137 = arith.addf %131, %136 : vector<8x64xf32>
    %138 = vector.extract_strided_slice %23 {offsets = [0, 56], sizes = [8, 8], strides = [1, 1]} : vector<8x64xf32> to vector<8x8xf32>
    %139 = tpu.concatenate %138, %138, %138, %138, %138, %138, %138, %138 in 1 : vector<8x8xf32>, vector<8x8xf32>, vector<8x8xf32>, vector<8x8xf32>, vector<8x8xf32>, vector<8x8xf32>, vector<8x8xf32>, vector<8x8xf32> -> vector<8x64xf32>
    %140 = arith.mulf %86, %94 : vector<1x64xf32>
    %141 = vector.broadcast %140 : vector<1x64xf32> to vector<8x64xf32>
    %142 = arith.mulf %141, %139 : vector<8x64xf32>
    %143 = arith.addf %137, %142 : vector<8x64xf32>
    %144 = vector.extract_strided_slice %18 {offsets = [8, 0], sizes = [8, 64], strides = [1, 1]} : vector<32x64xf32> to vector<8x64xf32>
    %145 = vector.extract_strided_slice %19 {offsets = [8, 0], sizes = [8, 64], strides = [1, 1]} : vector<32x64xf32> to vector<8x64xf32>
    %146 = vector.extract_strided_slice %20 {offsets = [8, 0], sizes = [8, 64], strides = [1, 1]} : vector<32x64xf32> to vector<8x64xf32>
    %147 = vector.extract_strided_slice %145 {offsets = [0, 0], sizes = [8, 8], strides = [1, 1]} : vector<8x64xf32> to vector<8x8xf32>
    %148 = tpu.concatenate %147, %147, %147, %147, %147, %147, %147, %147 in 1 : vector<8x8xf32>, vector<8x8xf32>, vector<8x8xf32>, vector<8x8xf32>, vector<8x8xf32>, vector<8x8xf32>, vector<8x8xf32>, vector<8x8xf32> -> vector<8x64xf32>
    %149 = arith.mulf %144, %148 : vector<8x64xf32>
    %cst_22 = arith.constant dense<0.000000e+00> : vector<64xf32>
    %150 = vector.multi_reduction <add>, %149, %cst_22 [0] : vector<8x64xf32> to vector<64xf32>
    %151 = vector.shape_cast %150 : vector<64xf32> to vector<1x64xf32>
    %152 = vector.extract_strided_slice %145 {offsets = [0, 8], sizes = [8, 8], strides = [1, 1]} : vector<8x64xf32> to vector<8x8xf32>
    %153 = tpu.concatenate %152, %152, %152, %152, %152, %152, %152, %152 in 1 : vector<8x8xf32>, vector<8x8xf32>, vector<8x8xf32>, vector<8x8xf32>, vector<8x8xf32>, vector<8x8xf32>, vector<8x8xf32>, vector<8x8xf32> -> vector<8x64xf32>
    %154 = arith.mulf %144, %153 : vector<8x64xf32>
    %cst_23 = arith.constant dense<0.000000e+00> : vector<64xf32>
    %155 = vector.multi_reduction <add>, %154, %cst_23 [0] : vector<8x64xf32> to vector<64xf32>
    %156 = vector.shape_cast %155 : vector<64xf32> to vector<1x64xf32>
    %157 = vector.extract_strided_slice %145 {offsets = [0, 16], sizes = [8, 8], strides = [1, 1]} : vector<8x64xf32> to vector<8x8xf32>
    %158 = tpu.concatenate %157, %157, %157, %157, %157, %157, %157, %157 in 1 : vector<8x8xf32>, vector<8x8xf32>, vector<8x8xf32>, vector<8x8xf32>, vector<8x8xf32>, vector<8x8xf32>, vector<8x8xf32>, vector<8x8xf32> -> vector<8x64xf32>
    %159 = arith.mulf %144, %158 : vector<8x64xf32>
    %cst_24 = arith.constant dense<0.000000e+00> : vector<64xf32>
    %160 = vector.multi_reduction <add>, %159, %cst_24 [0] : vector<8x64xf32> to vector<64xf32>
    %161 = vector.shape_cast %160 : vector<64xf32> to vector<1x64xf32>
    %162 = vector.extract_strided_slice %145 {offsets = [0, 24], sizes = [8, 8], strides = [1, 1]} : vector<8x64xf32> to vector<8x8xf32>
    %163 = tpu.concatenate %162, %162, %162, %162, %162, %162, %162, %162 in 1 : vector<8x8xf32>, vector<8x8xf32>, vector<8x8xf32>, vector<8x8xf32>, vector<8x8xf32>, vector<8x8xf32>, vector<8x8xf32>, vector<8x8xf32> -> vector<8x64xf32>
    %164 = arith.mulf %144, %163 : vector<8x64xf32>
    %cst_25 = arith.constant dense<0.000000e+00> : vector<64xf32>
    %165 = vector.multi_reduction <add>, %164, %cst_25 [0] : vector<8x64xf32> to vector<64xf32>
    %166 = vector.shape_cast %165 : vector<64xf32> to vector<1x64xf32>
    %167 = vector.extract_strided_slice %145 {offsets = [0, 32], sizes = [8, 8], strides = [1, 1]} : vector<8x64xf32> to vector<8x8xf32>
    %168 = tpu.concatenate %167, %167, %167, %167, %167, %167, %167, %167 in 1 : vector<8x8xf32>, vector<8x8xf32>, vector<8x8xf32>, vector<8x8xf32>, vector<8x8xf32>, vector<8x8xf32>, vector<8x8xf32>, vector<8x8xf32> -> vector<8x64xf32>
    %169 = arith.mulf %144, %168 : vector<8x64xf32>
    %cst_26 = arith.constant dense<0.000000e+00> : vector<64xf32>
    %170 = vector.multi_reduction <add>, %169, %cst_26 [0] : vector<8x64xf32> to vector<64xf32>
    %171 = vector.shape_cast %170 : vector<64xf32> to vector<1x64xf32>
    %172 = vector.extract_strided_slice %145 {offsets = [0, 40], sizes = [8, 8], strides = [1, 1]} : vector<8x64xf32> to vector<8x8xf32>
    %173 = tpu.concatenate %172, %172, %172, %172, %172, %172, %172, %172 in 1 : vector<8x8xf32>, vector<8x8xf32>, vector<8x8xf32>, vector<8x8xf32>, vector<8x8xf32>, vector<8x8xf32>, vector<8x8xf32>, vector<8x8xf32> -> vector<8x64xf32>
    %174 = arith.mulf %144, %173 : vector<8x64xf32>
    %cst_27 = arith.constant dense<0.000000e+00> : vector<64xf32>
    %175 = vector.multi_reduction <add>, %174, %cst_27 [0] : vector<8x64xf32> to vector<64xf32>
    %176 = vector.shape_cast %175 : vector<64xf32> to vector<1x64xf32>
    %177 = vector.extract_strided_slice %145 {offsets = [0, 48], sizes = [8, 8], strides = [1, 1]} : vector<8x64xf32> to vector<8x8xf32>
    %178 = tpu.concatenate %177, %177, %177, %177, %177, %177, %177, %177 in 1 : vector<8x8xf32>, vector<8x8xf32>, vector<8x8xf32>, vector<8x8xf32>, vector<8x8xf32>, vector<8x8xf32>, vector<8x8xf32>, vector<8x8xf32> -> vector<8x64xf32>
    %179 = arith.mulf %144, %178 : vector<8x64xf32>
    %cst_28 = arith.constant dense<0.000000e+00> : vector<64xf32>
    %180 = vector.multi_reduction <add>, %179, %cst_28 [0] : vector<8x64xf32> to vector<64xf32>
    %181 = vector.shape_cast %180 : vector<64xf32> to vector<1x64xf32>
    %182 = vector.extract_strided_slice %145 {offsets = [0, 56], sizes = [8, 8], strides = [1, 1]} : vector<8x64xf32> to vector<8x8xf32>
    %183 = tpu.concatenate %182, %182, %182, %182, %182, %182, %182, %182 in 1 : vector<8x8xf32>, vector<8x8xf32>, vector<8x8xf32>, vector<8x8xf32>, vector<8x8xf32>, vector<8x8xf32>, vector<8x8xf32>, vector<8x8xf32> -> vector<8x64xf32>
    %184 = arith.mulf %144, %183 : vector<8x64xf32>
    %cst_29 = arith.constant dense<0.000000e+00> : vector<64xf32>
    %185 = vector.multi_reduction <add>, %184, %cst_29 [0] : vector<8x64xf32> to vector<64xf32>
    %186 = vector.shape_cast %185 : vector<64xf32> to vector<1x64xf32>
    %187 = arith.maximumf %151, %156 : vector<1x64xf32>
    %188 = arith.maximumf %187, %161 : vector<1x64xf32>
    %189 = arith.maximumf %188, %166 : vector<1x64xf32>
    %190 = arith.maximumf %189, %171 : vector<1x64xf32>
    %191 = arith.maximumf %190, %176 : vector<1x64xf32>
    %192 = arith.maximumf %191, %181 : vector<1x64xf32>
    %193 = arith.maximumf %192, %186 : vector<1x64xf32>
    %194 = arith.subf %151, %193 : vector<1x64xf32>
    %195 = math.exp %194 : vector<1x64xf32>
    %196 = arith.subf %156, %193 : vector<1x64xf32>
    %197 = math.exp %196 : vector<1x64xf32>
    %198 = arith.subf %161, %193 : vector<1x64xf32>
    %199 = math.exp %198 : vector<1x64xf32>
    %200 = arith.subf %166, %193 : vector<1x64xf32>
    %201 = math.exp %200 : vector<1x64xf32>
    %202 = arith.subf %171, %193 : vector<1x64xf32>
    %203 = math.exp %202 : vector<1x64xf32>
    %204 = arith.subf %176, %193 : vector<1x64xf32>
    %205 = math.exp %204 : vector<1x64xf32>
    %206 = arith.subf %181, %193 : vector<1x64xf32>
    %207 = math.exp %206 : vector<1x64xf32>
    %208 = arith.subf %186, %193 : vector<1x64xf32>
    %209 = math.exp %208 : vector<1x64xf32>
    %210 = arith.addf %195, %197 : vector<1x64xf32>
    %211 = arith.addf %210, %199 : vector<1x64xf32>
    %212 = arith.addf %211, %201 : vector<1x64xf32>
    %213 = arith.addf %212, %203 : vector<1x64xf32>
    %214 = arith.addf %213, %205 : vector<1x64xf32>
    %215 = arith.addf %214, %207 : vector<1x64xf32>
    %216 = arith.addf %215, %209 : vector<1x64xf32>
    %217 = tpu.reciprocal %216 {approx = true} : vector<1x64xf32> -> vector<1x64xf32>
    %cst_30 = arith.constant 0.000000e+00 : f32
    %218 = vector.broadcast %cst_30 : f32 to vector<8x64xf32>
    %219 = vector.extract_strided_slice %146 {offsets = [0, 0], sizes = [8, 8], strides = [1, 1]} : vector<8x64xf32> to vector<8x8xf32>
    %220 = tpu.concatenate %219, %219, %219, %219, %219, %219, %219, %219 in 1 : vector<8x8xf32>, vector<8x8xf32>, vector<8x8xf32>, vector<8x8xf32>, vector<8x8xf32>, vector<8x8xf32>, vector<8x8xf32>, vector<8x8xf32> -> vector<8x64xf32>
    %221 = arith.mulf %195, %217 : vector<1x64xf32>
    %222 = vector.broadcast %221 : vector<1x64xf32> to vector<8x64xf32>
    %223 = arith.mulf %222, %220 : vector<8x64xf32>
    %224 = arith.addf %218, %223 : vector<8x64xf32>
    %225 = vector.extract_strided_slice %146 {offsets = [0, 8], sizes = [8, 8], strides = [1, 1]} : vector<8x64xf32> to vector<8x8xf32>
    %226 = tpu.concatenate %225, %225, %225, %225, %225, %225, %225, %225 in 1 : vector<8x8xf32>, vector<8x8xf32>, vector<8x8xf32>, vector<8x8xf32>, vector<8x8xf32>, vector<8x8xf32>, vector<8x8xf32>, vector<8x8xf32> -> vector<8x64xf32>
    %227 = arith.mulf %197, %217 : vector<1x64xf32>
    %228 = vector.broadcast %227 : vector<1x64xf32> to vector<8x64xf32>
    %229 = arith.mulf %228, %226 : vector<8x64xf32>
    %230 = arith.addf %224, %229 : vector<8x64xf32>
    %231 = vector.extract_strided_slice %146 {offsets = [0, 16], sizes = [8, 8], strides = [1, 1]} : vector<8x64xf32> to vector<8x8xf32>
    %232 = tpu.concatenate %231, %231, %231, %231, %231, %231, %231, %231 in 1 : vector<8x8xf32>, vector<8x8xf32>, vector<8x8xf32>, vector<8x8xf32>, vector<8x8xf32>, vector<8x8xf32>, vector<8x8xf32>, vector<8x8xf32> -> vector<8x64xf32>
    %233 = arith.mulf %199, %217 : vector<1x64xf32>
    %234 = vector.broadcast %233 : vector<1x64xf32> to vector<8x64xf32>
    %235 = arith.mulf %234, %232 : vector<8x64xf32>
    %236 = arith.addf %230, %235 : vector<8x64xf32>
    %237 = vector.extract_strided_slice %146 {offsets = [0, 24], sizes = [8, 8], strides = [1, 1]} : vector<8x64xf32> to vector<8x8xf32>
    %238 = tpu.concatenate %237, %237, %237, %237, %237, %237, %237, %237 in 1 : vector<8x8xf32>, vector<8x8xf32>, vector<8x8xf32>, vector<8x8xf32>, vector<8x8xf32>, vector<8x8xf32>, vector<8x8xf32>, vector<8x8xf32> -> vector<8x64xf32>
    %239 = arith.mulf %201, %217 : vector<1x64xf32>
    %240 = vector.broadcast %239 : vector<1x64xf32> to vector<8x64xf32>
    %241 = arith.mulf %240, %238 : vector<8x64xf32>
    %242 = arith.addf %236, %241 : vector<8x64xf32>
    %243 = vector.extract_strided_slice %146 {offsets = [0, 32], sizes = [8, 8], strides = [1, 1]} : vector<8x64xf32> to vector<8x8xf32>
    %244 = tpu.concatenate %243, %243, %243, %243, %243, %243, %243, %243 in 1 : vector<8x8xf32>, vector<8x8xf32>, vector<8x8xf32>, vector<8x8xf32>, vector<8x8xf32>, vector<8x8xf32>, vector<8x8xf32>, vector<8x8xf32> -> vector<8x64xf32>
    %245 = arith.mulf %203, %217 : vector<1x64xf32>
    %246 = vector.broadcast %245 : vector<1x64xf32> to vector<8x64xf32>
    %247 = arith.mulf %246, %244 : vector<8x64xf32>
    %248 = arith.addf %242, %247 : vector<8x64xf32>
    %249 = vector.extract_strided_slice %146 {offsets = [0, 40], sizes = [8, 8], strides = [1, 1]} : vector<8x64xf32> to vector<8x8xf32>
    %250 = tpu.concatenate %249, %249, %249, %249, %249, %249, %249, %249 in 1 : vector<8x8xf32>, vector<8x8xf32>, vector<8x8xf32>, vector<8x8xf32>, vector<8x8xf32>, vector<8x8xf32>, vector<8x8xf32>, vector<8x8xf32> -> vector<8x64xf32>
    %251 = arith.mulf %205, %217 : vector<1x64xf32>
    %252 = vector.broadcast %251 : vector<1x64xf32> to vector<8x64xf32>
    %253 = arith.mulf %252, %250 : vector<8x64xf32>
    %254 = arith.addf %248, %253 : vector<8x64xf32>
    %255 = vector.extract_strided_slice %146 {offsets = [0, 48], sizes = [8, 8], strides = [1, 1]} : vector<8x64xf32> to vector<8x8xf32>
    %256 = tpu.concatenate %255, %255, %255, %255, %255, %255, %255, %255 in 1 : vector<8x8xf32>, vector<8x8xf32>, vector<8x8xf32>, vector<8x8xf32>, vector<8x8xf32>, vector<8x8xf32>, vector<8x8xf32>, vector<8x8xf32> -> vector<8x64xf32>
    %257 = arith.mulf %207, %217 : vector<1x64xf32>
    %258 = vector.broadcast %257 : vector<1x64xf32> to vector<8x64xf32>
    %259 = arith.mulf %258, %256 : vector<8x64xf32>
    %260 = arith.addf %254, %259 : vector<8x64xf32>
    %261 = vector.extract_strided_slice %146 {offsets = [0, 56], sizes = [8, 8], strides = [1, 1]} : vector<8x64xf32> to vector<8x8xf32>
    %262 = tpu.concatenate %261, %261, %261, %261, %261, %261, %261, %261 in 1 : vector<8x8xf32>, vector<8x8xf32>, vector<8x8xf32>, vector<8x8xf32>, vector<8x8xf32>, vector<8x8xf32>, vector<8x8xf32>, vector<8x8xf32> -> vector<8x64xf32>
    %263 = arith.mulf %209, %217 : vector<1x64xf32>
    %264 = vector.broadcast %263 : vector<1x64xf32> to vector<8x64xf32>
    %265 = arith.mulf %264, %262 : vector<8x64xf32>
    %266 = arith.addf %260, %265 : vector<8x64xf32>
    %267 = vector.extract_strided_slice %18 {offsets = [16, 0], sizes = [8, 64], strides = [1, 1]} : vector<32x64xf32> to vector<8x64xf32>
    %268 = vector.extract_strided_slice %19 {offsets = [16, 0], sizes = [8, 64], strides = [1, 1]} : vector<32x64xf32> to vector<8x64xf32>
    %269 = vector.extract_strided_slice %20 {offsets = [16, 0], sizes = [8, 64], strides = [1, 1]} : vector<32x64xf32> to vector<8x64xf32>
    %270 = vector.extract_strided_slice %268 {offsets = [0, 0], sizes = [8, 8], strides = [1, 1]} : vector<8x64xf32> to vector<8x8xf32>
    %271 = tpu.concatenate %270, %270, %270, %270, %270, %270, %270, %270 in 1 : vector<8x8xf32>, vector<8x8xf32>, vector<8x8xf32>, vector<8x8xf32>, vector<8x8xf32>, vector<8x8xf32>, vector<8x8xf32>, vector<8x8xf32> -> vector<8x64xf32>
    %272 = arith.mulf %267, %271 : vector<8x64xf32>
    %cst_31 = arith.constant dense<0.000000e+00> : vector<64xf32>
    %273 = vector.multi_reduction <add>, %272, %cst_31 [0] : vector<8x64xf32> to vector<64xf32>
    %274 = vector.shape_cast %273 : vector<64xf32> to vector<1x64xf32>
    %275 = vector.extract_strided_slice %268 {offsets = [0, 8], sizes = [8, 8], strides = [1, 1]} : vector<8x64xf32> to vector<8x8xf32>
    %276 = tpu.concatenate %275, %275, %275, %275, %275, %275, %275, %275 in 1 : vector<8x8xf32>, vector<8x8xf32>, vector<8x8xf32>, vector<8x8xf32>, vector<8x8xf32>, vector<8x8xf32>, vector<8x8xf32>, vector<8x8xf32> -> vector<8x64xf32>
    %277 = arith.mulf %267, %276 : vector<8x64xf32>
    %cst_32 = arith.constant dense<0.000000e+00> : vector<64xf32>
    %278 = vector.multi_reduction <add>, %277, %cst_32 [0] : vector<8x64xf32> to vector<64xf32>
    %279 = vector.shape_cast %278 : vector<64xf32> to vector<1x64xf32>
    %280 = vector.extract_strided_slice %268 {offsets = [0, 16], sizes = [8, 8], strides = [1, 1]} : vector<8x64xf32> to vector<8x8xf32>
    %281 = tpu.concatenate %280, %280, %280, %280, %280, %280, %280, %280 in 1 : vector<8x8xf32>, vector<8x8xf32>, vector<8x8xf32>, vector<8x8xf32>, vector<8x8xf32>, vector<8x8xf32>, vector<8x8xf32>, vector<8x8xf32> -> vector<8x64xf32>
    %282 = arith.mulf %267, %281 : vector<8x64xf32>
    %cst_33 = arith.constant dense<0.000000e+00> : vector<64xf32>
    %283 = vector.multi_reduction <add>, %282, %cst_33 [0] : vector<8x64xf32> to vector<64xf32>
    %284 = vector.shape_cast %283 : vector<64xf32> to vector<1x64xf32>
    %285 = vector.extract_strided_slice %268 {offsets = [0, 24], sizes = [8, 8], strides = [1, 1]} : vector<8x64xf32> to vector<8x8xf32>
    %286 = tpu.concatenate %285, %285, %285, %285, %285, %285, %285, %285 in 1 : vector<8x8xf32>, vector<8x8xf32>, vector<8x8xf32>, vector<8x8xf32>, vector<8x8xf32>, vector<8x8xf32>, vector<8x8xf32>, vector<8x8xf32> -> vector<8x64xf32>
    %287 = arith.mulf %267, %286 : vector<8x64xf32>
    %cst_34 = arith.constant dense<0.000000e+00> : vector<64xf32>
    %288 = vector.multi_reduction <add>, %287, %cst_34 [0] : vector<8x64xf32> to vector<64xf32>
    %289 = vector.shape_cast %288 : vector<64xf32> to vector<1x64xf32>
    %290 = vector.extract_strided_slice %268 {offsets = [0, 32], sizes = [8, 8], strides = [1, 1]} : vector<8x64xf32> to vector<8x8xf32>
    %291 = tpu.concatenate %290, %290, %290, %290, %290, %290, %290, %290 in 1 : vector<8x8xf32>, vector<8x8xf32>, vector<8x8xf32>, vector<8x8xf32>, vector<8x8xf32>, vector<8x8xf32>, vector<8x8xf32>, vector<8x8xf32> -> vector<8x64xf32>
    %292 = arith.mulf %267, %291 : vector<8x64xf32>
    %cst_35 = arith.constant dense<0.000000e+00> : vector<64xf32>
    %293 = vector.multi_reduction <add>, %292, %cst_35 [0] : vector<8x64xf32> to vector<64xf32>
    %294 = vector.shape_cast %293 : vector<64xf32> to vector<1x64xf32>
    %295 = vector.extract_strided_slice %268 {offsets = [0, 40], sizes = [8, 8], strides = [1, 1]} : vector<8x64xf32> to vector<8x8xf32>
    %296 = tpu.concatenate %295, %295, %295, %295, %295, %295, %295, %295 in 1 : vector<8x8xf32>, vector<8x8xf32>, vector<8x8xf32>, vector<8x8xf32>, vector<8x8xf32>, vector<8x8xf32>, vector<8x8xf32>, vector<8x8xf32> -> vector<8x64xf32>
    %297 = arith.mulf %267, %296 : vector<8x64xf32>
    %cst_36 = arith.constant dense<0.000000e+00> : vector<64xf32>
    %298 = vector.multi_reduction <add>, %297, %cst_36 [0] : vector<8x64xf32> to vector<64xf32>
    %299 = vector.shape_cast %298 : vector<64xf32> to vector<1x64xf32>
    %300 = vector.extract_strided_slice %268 {offsets = [0, 48], sizes = [8, 8], strides = [1, 1]} : vector<8x64xf32> to vector<8x8xf32>
    %301 = tpu.concatenate %300, %300, %300, %300, %300, %300, %300, %300 in 1 : vector<8x8xf32>, vector<8x8xf32>, vector<8x8xf32>, vector<8x8xf32>, vector<8x8xf32>, vector<8x8xf32>, vector<8x8xf32>, vector<8x8xf32> -> vector<8x64xf32>
    %302 = arith.mulf %267, %301 : vector<8x64xf32>
    %cst_37 = arith.constant dense<0.000000e+00> : vector<64xf32>
    %303 = vector.multi_reduction <add>, %302, %cst_37 [0] : vector<8x64xf32> to vector<64xf32>
    %304 = vector.shape_cast %303 : vector<64xf32> to vector<1x64xf32>
    %305 = vector.extract_strided_slice %268 {offsets = [0, 56], sizes = [8, 8], strides = [1, 1]} : vector<8x64xf32> to vector<8x8xf32>
    %306 = tpu.concatenate %305, %305, %305, %305, %305, %305, %305, %305 in 1 : vector<8x8xf32>, vector<8x8xf32>, vector<8x8xf32>, vector<8x8xf32>, vector<8x8xf32>, vector<8x8xf32>, vector<8x8xf32>, vector<8x8xf32> -> vector<8x64xf32>
    %307 = arith.mulf %267, %306 : vector<8x64xf32>
    %cst_38 = arith.constant dense<0.000000e+00> : vector<64xf32>
    %308 = vector.multi_reduction <add>, %307, %cst_38 [0] : vector<8x64xf32> to vector<64xf32>
    %309 = vector.shape_cast %308 : vector<64xf32> to vector<1x64xf32>
    %310 = arith.maximumf %274, %279 : vector<1x64xf32>
    %311 = arith.maximumf %310, %284 : vector<1x64xf32>
    %312 = arith.maximumf %311, %289 : vector<1x64xf32>
    %313 = arith.maximumf %312, %294 : vector<1x64xf32>
    %314 = arith.maximumf %313, %299 : vector<1x64xf32>
    %315 = arith.maximumf %314, %304 : vector<1x64xf32>
    %316 = arith.maximumf %315, %309 : vector<1x64xf32>
    %317 = arith.subf %274, %316 : vector<1x64xf32>
    %318 = math.exp %317 : vector<1x64xf32>
    %319 = arith.subf %279, %316 : vector<1x64xf32>
    %320 = math.exp %319 : vector<1x64xf32>
    %321 = arith.subf %284, %316 : vector<1x64xf32>
    %322 = math.exp %321 : vector<1x64xf32>
    %323 = arith.subf %289, %316 : vector<1x64xf32>
    %324 = math.exp %323 : vector<1x64xf32>
    %325 = arith.subf %294, %316 : vector<1x64xf32>
    %326 = math.exp %325 : vector<1x64xf32>
    %327 = arith.subf %299, %316 : vector<1x64xf32>
    %328 = math.exp %327 : vector<1x64xf32>
    %329 = arith.subf %304, %316 : vector<1x64xf32>
    %330 = math.exp %329 : vector<1x64xf32>
    %331 = arith.subf %309, %316 : vector<1x64xf32>
    %332 = math.exp %331 : vector<1x64xf32>
    %333 = arith.addf %318, %320 : vector<1x64xf32>
    %334 = arith.addf %333, %322 : vector<1x64xf32>
    %335 = arith.addf %334, %324 : vector<1x64xf32>
    %336 = arith.addf %335, %326 : vector<1x64xf32>
    %337 = arith.addf %336, %328 : vector<1x64xf32>
    %338 = arith.addf %337, %330 : vector<1x64xf32>
    %339 = arith.addf %338, %332 : vector<1x64xf32>
    %340 = tpu.reciprocal %339 {approx = true} : vector<1x64xf32> -> vector<1x64xf32>
    %cst_39 = arith.constant 0.000000e+00 : f32
    %341 = vector.broadcast %cst_39 : f32 to vector<8x64xf32>
    %342 = vector.extract_strided_slice %269 {offsets = [0, 0], sizes = [8, 8], strides = [1, 1]} : vector<8x64xf32> to vector<8x8xf32>
    %343 = tpu.concatenate %342, %342, %342, %342, %342, %342, %342, %342 in 1 : vector<8x8xf32>, vector<8x8xf32>, vector<8x8xf32>, vector<8x8xf32>, vector<8x8xf32>, vector<8x8xf32>, vector<8x8xf32>, vector<8x8xf32> -> vector<8x64xf32>
    %344 = arith.mulf %318, %340 : vector<1x64xf32>
    %345 = vector.broadcast %344 : vector<1x64xf32> to vector<8x64xf32>
    %346 = arith.mulf %345, %343 : vector<8x64xf32>
    %347 = arith.addf %341, %346 : vector<8x64xf32>
    %348 = vector.extract_strided_slice %269 {offsets = [0, 8], sizes = [8, 8], strides = [1, 1]} : vector<8x64xf32> to vector<8x8xf32>
    %349 = tpu.concatenate %348, %348, %348, %348, %348, %348, %348, %348 in 1 : vector<8x8xf32>, vector<8x8xf32>, vector<8x8xf32>, vector<8x8xf32>, vector<8x8xf32>, vector<8x8xf32>, vector<8x8xf32>, vector<8x8xf32> -> vector<8x64xf32>
    %350 = arith.mulf %320, %340 : vector<1x64xf32>
    %351 = vector.broadcast %350 : vector<1x64xf32> to vector<8x64xf32>
    %352 = arith.mulf %351, %349 : vector<8x64xf32>
    %353 = arith.addf %347, %352 : vector<8x64xf32>
    %354 = vector.extract_strided_slice %269 {offsets = [0, 16], sizes = [8, 8], strides = [1, 1]} : vector<8x64xf32> to vector<8x8xf32>
    %355 = tpu.concatenate %354, %354, %354, %354, %354, %354, %354, %354 in 1 : vector<8x8xf32>, vector<8x8xf32>, vector<8x8xf32>, vector<8x8xf32>, vector<8x8xf32>, vector<8x8xf32>, vector<8x8xf32>, vector<8x8xf32> -> vector<8x64xf32>
    %356 = arith.mulf %322, %340 : vector<1x64xf32>
    %357 = vector.broadcast %356 : vector<1x64xf32> to vector<8x64xf32>
    %358 = arith.mulf %357, %355 : vector<8x64xf32>
    %359 = arith.addf %353, %358 : vector<8x64xf32>
    %360 = vector.extract_strided_slice %269 {offsets = [0, 24], sizes = [8, 8], strides = [1, 1]} : vector<8x64xf32> to vector<8x8xf32>
    %361 = tpu.concatenate %360, %360, %360, %360, %360, %360, %360, %360 in 1 : vector<8x8xf32>, vector<8x8xf32>, vector<8x8xf32>, vector<8x8xf32>, vector<8x8xf32>, vector<8x8xf32>, vector<8x8xf32>, vector<8x8xf32> -> vector<8x64xf32>
    %362 = arith.mulf %324, %340 : vector<1x64xf32>
    %363 = vector.broadcast %362 : vector<1x64xf32> to vector<8x64xf32>
    %364 = arith.mulf %363, %361 : vector<8x64xf32>
    %365 = arith.addf %359, %364 : vector<8x64xf32>
    %366 = vector.extract_strided_slice %269 {offsets = [0, 32], sizes = [8, 8], strides = [1, 1]} : vector<8x64xf32> to vector<8x8xf32>
    %367 = tpu.concatenate %366, %366, %366, %366, %366, %366, %366, %366 in 1 : vector<8x8xf32>, vector<8x8xf32>, vector<8x8xf32>, vector<8x8xf32>, vector<8x8xf32>, vector<8x8xf32>, vector<8x8xf32>, vector<8x8xf32> -> vector<8x64xf32>
    %368 = arith.mulf %326, %340 : vector<1x64xf32>
    %369 = vector.broadcast %368 : vector<1x64xf32> to vector<8x64xf32>
    %370 = arith.mulf %369, %367 : vector<8x64xf32>
    %371 = arith.addf %365, %370 : vector<8x64xf32>
    %372 = vector.extract_strided_slice %269 {offsets = [0, 40], sizes = [8, 8], strides = [1, 1]} : vector<8x64xf32> to vector<8x8xf32>
    %373 = tpu.concatenate %372, %372, %372, %372, %372, %372, %372, %372 in 1 : vector<8x8xf32>, vector<8x8xf32>, vector<8x8xf32>, vector<8x8xf32>, vector<8x8xf32>, vector<8x8xf32>, vector<8x8xf32>, vector<8x8xf32> -> vector<8x64xf32>
    %374 = arith.mulf %328, %340 : vector<1x64xf32>
    %375 = vector.broadcast %374 : vector<1x64xf32> to vector<8x64xf32>
    %376 = arith.mulf %375, %373 : vector<8x64xf32>
    %377 = arith.addf %371, %376 : vector<8x64xf32>
    %378 = vector.extract_strided_slice %269 {offsets = [0, 48], sizes = [8, 8], strides = [1, 1]} : vector<8x64xf32> to vector<8x8xf32>
    %379 = tpu.concatenate %378, %378, %378, %378, %378, %378, %378, %378 in 1 : vector<8x8xf32>, vector<8x8xf32>, vector<8x8xf32>, vector<8x8xf32>, vector<8x8xf32>, vector<8x8xf32>, vector<8x8xf32>, vector<8x8xf32> -> vector<8x64xf32>
    %380 = arith.mulf %330, %340 : vector<1x64xf32>
    %381 = vector.broadcast %380 : vector<1x64xf32> to vector<8x64xf32>
    %382 = arith.mulf %381, %379 : vector<8x64xf32>
    %383 = arith.addf %377, %382 : vector<8x64xf32>
    %384 = vector.extract_strided_slice %269 {offsets = [0, 56], sizes = [8, 8], strides = [1, 1]} : vector<8x64xf32> to vector<8x8xf32>
    %385 = tpu.concatenate %384, %384, %384, %384, %384, %384, %384, %384 in 1 : vector<8x8xf32>, vector<8x8xf32>, vector<8x8xf32>, vector<8x8xf32>, vector<8x8xf32>, vector<8x8xf32>, vector<8x8xf32>, vector<8x8xf32> -> vector<8x64xf32>
    %386 = arith.mulf %332, %340 : vector<1x64xf32>
    %387 = vector.broadcast %386 : vector<1x64xf32> to vector<8x64xf32>
    %388 = arith.mulf %387, %385 : vector<8x64xf32>
    %389 = arith.addf %383, %388 : vector<8x64xf32>
    %390 = vector.extract_strided_slice %18 {offsets = [24, 0], sizes = [8, 64], strides = [1, 1]} : vector<32x64xf32> to vector<8x64xf32>
    %391 = vector.extract_strided_slice %19 {offsets = [24, 0], sizes = [8, 64], strides = [1, 1]} : vector<32x64xf32> to vector<8x64xf32>
    %392 = vector.extract_strided_slice %20 {offsets = [24, 0], sizes = [8, 64], strides = [1, 1]} : vector<32x64xf32> to vector<8x64xf32>
    %393 = vector.extract_strided_slice %391 {offsets = [0, 0], sizes = [8, 8], strides = [1, 1]} : vector<8x64xf32> to vector<8x8xf32>
    %394 = tpu.concatenate %393, %393, %393, %393, %393, %393, %393, %393 in 1 : vector<8x8xf32>, vector<8x8xf32>, vector<8x8xf32>, vector<8x8xf32>, vector<8x8xf32>, vector<8x8xf32>, vector<8x8xf32>, vector<8x8xf32> -> vector<8x64xf32>
    %395 = arith.mulf %390, %394 : vector<8x64xf32>
    %cst_40 = arith.constant dense<0.000000e+00> : vector<64xf32>
    %396 = vector.multi_reduction <add>, %395, %cst_40 [0] : vector<8x64xf32> to vector<64xf32>
    %397 = vector.shape_cast %396 : vector<64xf32> to vector<1x64xf32>
    %398 = vector.extract_strided_slice %391 {offsets = [0, 8], sizes = [8, 8], strides = [1, 1]} : vector<8x64xf32> to vector<8x8xf32>
    %399 = tpu.concatenate %398, %398, %398, %398, %398, %398, %398, %398 in 1 : vector<8x8xf32>, vector<8x8xf32>, vector<8x8xf32>, vector<8x8xf32>, vector<8x8xf32>, vector<8x8xf32>, vector<8x8xf32>, vector<8x8xf32> -> vector<8x64xf32>
    %400 = arith.mulf %390, %399 : vector<8x64xf32>
    %cst_41 = arith.constant dense<0.000000e+00> : vector<64xf32>
    %401 = vector.multi_reduction <add>, %400, %cst_41 [0] : vector<8x64xf32> to vector<64xf32>
    %402 = vector.shape_cast %401 : vector<64xf32> to vector<1x64xf32>
    %403 = vector.extract_strided_slice %391 {offsets = [0, 16], sizes = [8, 8], strides = [1, 1]} : vector<8x64xf32> to vector<8x8xf32>
    %404 = tpu.concatenate %403, %403, %403, %403, %403, %403, %403, %403 in 1 : vector<8x8xf32>, vector<8x8xf32>, vector<8x8xf32>, vector<8x8xf32>, vector<8x8xf32>, vector<8x8xf32>, vector<8x8xf32>, vector<8x8xf32> -> vector<8x64xf32>
    %405 = arith.mulf %390, %404 : vector<8x64xf32>
    %cst_42 = arith.constant dense<0.000000e+00> : vector<64xf32>
    %406 = vector.multi_reduction <add>, %405, %cst_42 [0] : vector<8x64xf32> to vector<64xf32>
    %407 = vector.shape_cast %406 : vector<64xf32> to vector<1x64xf32>
    %408 = vector.extract_strided_slice %391 {offsets = [0, 24], sizes = [8, 8], strides = [1, 1]} : vector<8x64xf32> to vector<8x8xf32>
    %409 = tpu.concatenate %408, %408, %408, %408, %408, %408, %408, %408 in 1 : vector<8x8xf32>, vector<8x8xf32>, vector<8x8xf32>, vector<8x8xf32>, vector<8x8xf32>, vector<8x8xf32>, vector<8x8xf32>, vector<8x8xf32> -> vector<8x64xf32>
    %410 = arith.mulf %390, %409 : vector<8x64xf32>
    %cst_43 = arith.constant dense<0.000000e+00> : vector<64xf32>
    %411 = vector.multi_reduction <add>, %410, %cst_43 [0] : vector<8x64xf32> to vector<64xf32>
    %412 = vector.shape_cast %411 : vector<64xf32> to vector<1x64xf32>
    %413 = vector.extract_strided_slice %391 {offsets = [0, 32], sizes = [8, 8], strides = [1, 1]} : vector<8x64xf32> to vector<8x8xf32>
    %414 = tpu.concatenate %413, %413, %413, %413, %413, %413, %413, %413 in 1 : vector<8x8xf32>, vector<8x8xf32>, vector<8x8xf32>, vector<8x8xf32>, vector<8x8xf32>, vector<8x8xf32>, vector<8x8xf32>, vector<8x8xf32> -> vector<8x64xf32>
    %415 = arith.mulf %390, %414 : vector<8x64xf32>
    %cst_44 = arith.constant dense<0.000000e+00> : vector<64xf32>
    %416 = vector.multi_reduction <add>, %415, %cst_44 [0] : vector<8x64xf32> to vector<64xf32>
    %417 = vector.shape_cast %416 : vector<64xf32> to vector<1x64xf32>
    %418 = vector.extract_strided_slice %391 {offsets = [0, 40], sizes = [8, 8], strides = [1, 1]} : vector<8x64xf32> to vector<8x8xf32>
    %419 = tpu.concatenate %418, %418, %418, %418, %418, %418, %418, %418 in 1 : vector<8x8xf32>, vector<8x8xf32>, vector<8x8xf32>, vector<8x8xf32>, vector<8x8xf32>, vector<8x8xf32>, vector<8x8xf32>, vector<8x8xf32> -> vector<8x64xf32>
    %420 = arith.mulf %390, %419 : vector<8x64xf32>
    %cst_45 = arith.constant dense<0.000000e+00> : vector<64xf32>
    %421 = vector.multi_reduction <add>, %420, %cst_45 [0] : vector<8x64xf32> to vector<64xf32>
    %422 = vector.shape_cast %421 : vector<64xf32> to vector<1x64xf32>
    %423 = vector.extract_strided_slice %391 {offsets = [0, 48], sizes = [8, 8], strides = [1, 1]} : vector<8x64xf32> to vector<8x8xf32>
    %424 = tpu.concatenate %423, %423, %423, %423, %423, %423, %423, %423 in 1 : vector<8x8xf32>, vector<8x8xf32>, vector<8x8xf32>, vector<8x8xf32>, vector<8x8xf32>, vector<8x8xf32>, vector<8x8xf32>, vector<8x8xf32> -> vector<8x64xf32>
    %425 = arith.mulf %390, %424 : vector<8x64xf32>
    %cst_46 = arith.constant dense<0.000000e+00> : vector<64xf32>
    %426 = vector.multi_reduction <add>, %425, %cst_46 [0] : vector<8x64xf32> to vector<64xf32>
    %427 = vector.shape_cast %426 : vector<64xf32> to vector<1x64xf32>
    %428 = vector.extract_strided_slice %391 {offsets = [0, 56], sizes = [8, 8], strides = [1, 1]} : vector<8x64xf32> to vector<8x8xf32>
    %429 = tpu.concatenate %428, %428, %428, %428, %428, %428, %428, %428 in 1 : vector<8x8xf32>, vector<8x8xf32>, vector<8x8xf32>, vector<8x8xf32>, vector<8x8xf32>, vector<8x8xf32>, vector<8x8xf32>, vector<8x8xf32> -> vector<8x64xf32>
    %430 = arith.mulf %390, %429 : vector<8x64xf32>
    %cst_47 = arith.constant dense<0.000000e+00> : vector<64xf32>
    %431 = vector.multi_reduction <add>, %430, %cst_47 [0] : vector<8x64xf32> to vector<64xf32>
    %432 = vector.shape_cast %431 : vector<64xf32> to vector<1x64xf32>
    %433 = arith.maximumf %397, %402 : vector<1x64xf32>
    %434 = arith.maximumf %433, %407 : vector<1x64xf32>
    %435 = arith.maximumf %434, %412 : vector<1x64xf32>
    %436 = arith.maximumf %435, %417 : vector<1x64xf32>
    %437 = arith.maximumf %436, %422 : vector<1x64xf32>
    %438 = arith.maximumf %437, %427 : vector<1x64xf32>
    %439 = arith.maximumf %438, %432 : vector<1x64xf32>
    %440 = arith.subf %397, %439 : vector<1x64xf32>
    %441 = math.exp %440 : vector<1x64xf32>
    %442 = arith.subf %402, %439 : vector<1x64xf32>
    %443 = math.exp %442 : vector<1x64xf32>
    %444 = arith.subf %407, %439 : vector<1x64xf32>
    %445 = math.exp %444 : vector<1x64xf32>
    %446 = arith.subf %412, %439 : vector<1x64xf32>
    %447 = math.exp %446 : vector<1x64xf32>
    %448 = arith.subf %417, %439 : vector<1x64xf32>
    %449 = math.exp %448 : vector<1x64xf32>
    %450 = arith.subf %422, %439 : vector<1x64xf32>
    %451 = math.exp %450 : vector<1x64xf32>
    %452 = arith.subf %427, %439 : vector<1x64xf32>
    %453 = math.exp %452 : vector<1x64xf32>
    %454 = arith.subf %432, %439 : vector<1x64xf32>
    %455 = math.exp %454 : vector<1x64xf32>
    %456 = arith.addf %441, %443 : vector<1x64xf32>
    %457 = arith.addf %456, %445 : vector<1x64xf32>
    %458 = arith.addf %457, %447 : vector<1x64xf32>
    %459 = arith.addf %458, %449 : vector<1x64xf32>
    %460 = arith.addf %459, %451 : vector<1x64xf32>
    %461 = arith.addf %460, %453 : vector<1x64xf32>
    %462 = arith.addf %461, %455 : vector<1x64xf32>
    %463 = tpu.reciprocal %462 {approx = true} : vector<1x64xf32> -> vector<1x64xf32>
    %cst_48 = arith.constant 0.000000e+00 : f32
    %464 = vector.broadcast %cst_48 : f32 to vector<8x64xf32>
    %465 = vector.extract_strided_slice %392 {offsets = [0, 0], sizes = [8, 8], strides = [1, 1]} : vector<8x64xf32> to vector<8x8xf32>
    %466 = tpu.concatenate %465, %465, %465, %465, %465, %465, %465, %465 in 1 : vector<8x8xf32>, vector<8x8xf32>, vector<8x8xf32>, vector<8x8xf32>, vector<8x8xf32>, vector<8x8xf32>, vector<8x8xf32>, vector<8x8xf32> -> vector<8x64xf32>
    %467 = arith.mulf %441, %463 : vector<1x64xf32>
    %468 = vector.broadcast %467 : vector<1x64xf32> to vector<8x64xf32>
    %469 = arith.mulf %468, %466 : vector<8x64xf32>
    %470 = arith.addf %464, %469 : vector<8x64xf32>
    %471 = vector.extract_strided_slice %392 {offsets = [0, 8], sizes = [8, 8], strides = [1, 1]} : vector<8x64xf32> to vector<8x8xf32>
    %472 = tpu.concatenate %471, %471, %471, %471, %471, %471, %471, %471 in 1 : vector<8x8xf32>, vector<8x8xf32>, vector<8x8xf32>, vector<8x8xf32>, vector<8x8xf32>, vector<8x8xf32>, vector<8x8xf32>, vector<8x8xf32> -> vector<8x64xf32>
    %473 = arith.mulf %443, %463 : vector<1x64xf32>
    %474 = vector.broadcast %473 : vector<1x64xf32> to vector<8x64xf32>
    %475 = arith.mulf %474, %472 : vector<8x64xf32>
    %476 = arith.addf %470, %475 : vector<8x64xf32>
    %477 = vector.extract_strided_slice %392 {offsets = [0, 16], sizes = [8, 8], strides = [1, 1]} : vector<8x64xf32> to vector<8x8xf32>
    %478 = tpu.concatenate %477, %477, %477, %477, %477, %477, %477, %477 in 1 : vector<8x8xf32>, vector<8x8xf32>, vector<8x8xf32>, vector<8x8xf32>, vector<8x8xf32>, vector<8x8xf32>, vector<8x8xf32>, vector<8x8xf32> -> vector<8x64xf32>
    %479 = arith.mulf %445, %463 : vector<1x64xf32>
    %480 = vector.broadcast %479 : vector<1x64xf32> to vector<8x64xf32>
    %481 = arith.mulf %480, %478 : vector<8x64xf32>
    %482 = arith.addf %476, %481 : vector<8x64xf32>
    %483 = vector.extract_strided_slice %392 {offsets = [0, 24], sizes = [8, 8], strides = [1, 1]} : vector<8x64xf32> to vector<8x8xf32>
    %484 = tpu.concatenate %483, %483, %483, %483, %483, %483, %483, %483 in 1 : vector<8x8xf32>, vector<8x8xf32>, vector<8x8xf32>, vector<8x8xf32>, vector<8x8xf32>, vector<8x8xf32>, vector<8x8xf32>, vector<8x8xf32> -> vector<8x64xf32>
    %485 = arith.mulf %447, %463 : vector<1x64xf32>
    %486 = vector.broadcast %485 : vector<1x64xf32> to vector<8x64xf32>
    %487 = arith.mulf %486, %484 : vector<8x64xf32>
    %488 = arith.addf %482, %487 : vector<8x64xf32>
    %489 = vector.extract_strided_slice %392 {offsets = [0, 32], sizes = [8, 8], strides = [1, 1]} : vector<8x64xf32> to vector<8x8xf32>
    %490 = tpu.concatenate %489, %489, %489, %489, %489, %489, %489, %489 in 1 : vector<8x8xf32>, vector<8x8xf32>, vector<8x8xf32>, vector<8x8xf32>, vector<8x8xf32>, vector<8x8xf32>, vector<8x8xf32>, vector<8x8xf32> -> vector<8x64xf32>
    %491 = arith.mulf %449, %463 : vector<1x64xf32>
    %492 = vector.broadcast %491 : vector<1x64xf32> to vector<8x64xf32>
    %493 = arith.mulf %492, %490 : vector<8x64xf32>
    %494 = arith.addf %488, %493 : vector<8x64xf32>
    %495 = vector.extract_strided_slice %392 {offsets = [0, 40], sizes = [8, 8], strides = [1, 1]} : vector<8x64xf32> to vector<8x8xf32>
    %496 = tpu.concatenate %495, %495, %495, %495, %495, %495, %495, %495 in 1 : vector<8x8xf32>, vector<8x8xf32>, vector<8x8xf32>, vector<8x8xf32>, vector<8x8xf32>, vector<8x8xf32>, vector<8x8xf32>, vector<8x8xf32> -> vector<8x64xf32>
    %497 = arith.mulf %451, %463 : vector<1x64xf32>
    %498 = vector.broadcast %497 : vector<1x64xf32> to vector<8x64xf32>
    %499 = arith.mulf %498, %496 : vector<8x64xf32>
    %500 = arith.addf %494, %499 : vector<8x64xf32>
    %501 = vector.extract_strided_slice %392 {offsets = [0, 48], sizes = [8, 8], strides = [1, 1]} : vector<8x64xf32> to vector<8x8xf32>
    %502 = tpu.concatenate %501, %501, %501, %501, %501, %501, %501, %501 in 1 : vector<8x8xf32>, vector<8x8xf32>, vector<8x8xf32>, vector<8x8xf32>, vector<8x8xf32>, vector<8x8xf32>, vector<8x8xf32>, vector<8x8xf32> -> vector<8x64xf32>
    %503 = arith.mulf %453, %463 : vector<1x64xf32>
    %504 = vector.broadcast %503 : vector<1x64xf32> to vector<8x64xf32>
    %505 = arith.mulf %504, %502 : vector<8x64xf32>
    %506 = arith.addf %500, %505 : vector<8x64xf32>
    %507 = vector.extract_strided_slice %392 {offsets = [0, 56], sizes = [8, 8], strides = [1, 1]} : vector<8x64xf32> to vector<8x8xf32>
    %508 = tpu.concatenate %507, %507, %507, %507, %507, %507, %507, %507 in 1 : vector<8x8xf32>, vector<8x8xf32>, vector<8x8xf32>, vector<8x8xf32>, vector<8x8xf32>, vector<8x8xf32>, vector<8x8xf32>, vector<8x8xf32> -> vector<8x64xf32>
    %509 = arith.mulf %455, %463 : vector<1x64xf32>
    %510 = vector.broadcast %509 : vector<1x64xf32> to vector<8x64xf32>
    %511 = arith.mulf %510, %508 : vector<8x64xf32>
    %512 = arith.addf %506, %511 : vector<8x64xf32>
    %513 = tpu.concatenate %143, %266, %389, %512 in 0 : vector<8x64xf32>, vector<8x64xf32>, vector<8x64xf32>, vector<8x64xf32> -> vector<32x64xf32>
    %c0_49 = arith.constant 0 : index
    %c0_50 = arith.constant 0 : index
    %c0_51 = arith.constant 0 : index
    %514 = vector.load %arg6[%c0_49, %c0_50, %c0_51] : memref<2x32x32xbf16, #tpu.memory_space<vmem>>, vector<1x32x32xbf16>
    %515 = vector.shape_cast %514 : vector<1x32x32xbf16> to vector<32x32xbf16>
    %516 = arith.truncf %513 : vector<32x64xf32> to vector<32x64xbf16>
    %cst_52 = arith.constant dense<0.000000e+00> : vector<32x64xf32>
    %517 = tpu.matmul %515, %516, %cst_52 {dimension_numbers = #tpu.dot_dimension_numbers<[1], [0], [0], [1], [0, 0, 1, 1], [], []>} : vector<32x32xbf16>, vector<32x64xbf16>, vector<32x64xf32> -> vector<32x64xf32>
    %c0_53 = arith.constant 0 : index
    %c0_54 = arith.constant 0 : index
    %c0_55 = arith.constant 0 : index
    %518 = vector.load %arg7[%c0_53, %c0_54, %c0_55] : memref<2x32x1xf32, #tpu.memory_space<vmem>>, vector<1x32x1xf32>
    %519 = vector.shape_cast %518 : vector<1x32x1xf32> to vector<32x1xf32>
    %520 = vector.broadcast %519 : vector<32x1xf32> to vector<32x64xf32>
    %521 = arith.addf %517, %520 : vector<32x64xf32>
    %522 = arith.addf %7, %521 : vector<32x64xf32>
    %c0_56 = arith.constant 0 : index
    %c0_57 = arith.constant 0 : index
    %c0_58 = arith.constant 0 : index
    %523 = vector.load %arg12[%c0_56, %c0_57, %c0_58] : memref<2x32x1xf32, #tpu.memory_space<vmem>>, vector<1x32x1xf32>
    %524 = vector.shape_cast %523 : vector<1x32x1xf32> to vector<32x1xf32>
    %c0_59 = arith.constant 0 : index
    %c0_60 = arith.constant 0 : index
    %c0_61 = arith.constant 0 : index
    %525 = vector.load %arg13[%c0_59, %c0_60, %c0_61] : memref<2x32x1xf32, #tpu.memory_space<vmem>>, vector<1x32x1xf32>
    %526 = vector.shape_cast %525 : vector<1x32x1xf32> to vector<32x1xf32>
    %cst_62 = arith.constant dense<0.000000e+00> : vector<64xf32>
    %527 = vector.multi_reduction <add>, %522, %cst_62 [0] : vector<32x64xf32> to vector<64xf32>
    %528 = vector.shape_cast %527 : vector<64xf32> to vector<1x64xf32>
    %cst_63 = arith.constant 3.200000e+01 : f32
    %529 = vector.broadcast %cst_63 : f32 to vector<1x64xf32>
    %530 = arith.divf %528, %529 : vector<1x64xf32>
    %531 = vector.broadcast %530 : vector<1x64xf32> to vector<32x64xf32>
    %532 = arith.subf %522, %531 : vector<32x64xf32>
    %533 = arith.mulf %532, %532 : vector<32x64xf32>
    %cst_64 = arith.constant dense<0.000000e+00> : vector<64xf32>
    %534 = vector.multi_reduction <add>, %533, %cst_64 [0] : vector<32x64xf32> to vector<64xf32>
    %535 = vector.shape_cast %534 : vector<64xf32> to vector<1x64xf32>
    %cst_65 = arith.constant 3.200000e+01 : f32
    %536 = vector.broadcast %cst_65 : f32 to vector<1x64xf32>
    %537 = arith.divf %535, %536 : vector<1x64xf32>
    %538 = vector.broadcast %530 : vector<1x64xf32> to vector<32x64xf32>
    %539 = arith.subf %522, %538 : vector<32x64xf32>
    %cst_66 = arith.constant 9.99999974E-6 : f32
    %540 = vector.broadcast %cst_66 : f32 to vector<1x64xf32>
    %541 = arith.addf %537, %540 : vector<1x64xf32>
    %542 = math.rsqrt %541 : vector<1x64xf32>
    %543 = vector.broadcast %542 : vector<1x64xf32> to vector<32x64xf32>
    %544 = arith.mulf %539, %543 : vector<32x64xf32>
    %545 = vector.broadcast %524 : vector<32x1xf32> to vector<32x64xf32>
    %546 = arith.mulf %544, %545 : vector<32x64xf32>
    %547 = vector.broadcast %526 : vector<32x1xf32> to vector<32x64xf32>
    %548 = arith.addf %546, %547 : vector<32x64xf32>
    %c0_67 = arith.constant 0 : index
    %c0_68 = arith.constant 0 : index
    %c0_69 = arith.constant 0 : index
    %549 = vector.load %arg8[%c0_67, %c0_68, %c0_69] : memref<2x64x32xbf16, #tpu.memory_space<vmem>>, vector<1x64x32xbf16>
    %550 = vector.shape_cast %549 : vector<1x64x32xbf16> to vector<64x32xbf16>
    %551 = arith.truncf %548 : vector<32x64xf32> to vector<32x64xbf16>
    %cst_70 = arith.constant dense<0.000000e+00> : vector<64x64xf32>
    %552 = tpu.matmul %550, %551, %cst_70 {dimension_numbers = #tpu.dot_dimension_numbers<[1], [0], [0], [1], [0, 0, 1, 1], [], []>} : vector<64x32xbf16>, vector<32x64xbf16>, vector<64x64xf32> -> vector<64x64xf32>
    %c0_71 = arith.constant 0 : index
    %c0_72 = arith.constant 0 : index
    %c0_73 = arith.constant 0 : index
    %553 = vector.load %arg9[%c0_71, %c0_72, %c0_73] : memref<2x64x1xf32, #tpu.memory_space<vmem>>, vector<1x64x1xf32>
    %554 = vector.shape_cast %553 : vector<1x64x1xf32> to vector<64x1xf32>
    %555 = vector.broadcast %554 : vector<64x1xf32> to vector<64x64xf32>
    %556 = arith.addf %552, %555 : vector<64x64xf32>
    %cst_74 = arith.constant 0.000000e+00 : f32
    %557 = vector.broadcast %cst_74 : f32 to vector<64x64xf32>
    %558 = arith.maximumf %556, %557 : vector<64x64xf32>
    %c0_75 = arith.constant 0 : index
    %c0_76 = arith.constant 0 : index
    %c0_77 = arith.constant 0 : index
    %559 = vector.load %arg10[%c0_75, %c0_76, %c0_77] : memref<2x32x64xbf16, #tpu.memory_space<vmem>>, vector<1x32x64xbf16>
    %560 = vector.shape_cast %559 : vector<1x32x64xbf16> to vector<32x64xbf16>
    %561 = arith.truncf %558 : vector<64x64xf32> to vector<64x64xbf16>
    %cst_78 = arith.constant dense<0.000000e+00> : vector<32x64xf32>
    %562 = tpu.matmul %560, %561, %cst_78 {dimension_numbers = #tpu.dot_dimension_numbers<[1], [0], [0], [1], [0, 0, 1, 1], [], []>} : vector<32x64xbf16>, vector<64x64xbf16>, vector<32x64xf32> -> vector<32x64xf32>
    %c0_79 = arith.constant 0 : index
    %c0_80 = arith.constant 0 : index
    %c0_81 = arith.constant 0 : index
    %563 = vector.load %arg11[%c0_79, %c0_80, %c0_81] : memref<2x32x1xf32, #tpu.memory_space<vmem>>, vector<1x32x1xf32>
    %564 = vector.shape_cast %563 : vector<1x32x1xf32> to vector<32x1xf32>
    %565 = vector.broadcast %564 : vector<32x1xf32> to vector<32x64xf32>
    %566 = arith.addf %562, %565 : vector<32x64xf32>
    %567 = arith.addf %548, %566 : vector<32x64xf32>
    %c0_82 = arith.constant 0 : index
    %c0_83 = arith.constant 0 : index
    %c0_84 = arith.constant 0 : index
    %568 = vector.load %arg14[%c0_82, %c0_83, %c0_84] : memref<2x32x1xf32, #tpu.memory_space<vmem>>, vector<1x32x1xf32>
    %569 = vector.shape_cast %568 : vector<1x32x1xf32> to vector<32x1xf32>
    %c0_85 = arith.constant 0 : index
    %c0_86 = arith.constant 0 : index
    %c0_87 = arith.constant 0 : index
    %570 = vector.load %arg15[%c0_85, %c0_86, %c0_87] : memref<2x32x1xf32, #tpu.memory_space<vmem>>, vector<1x32x1xf32>
    %571 = vector.shape_cast %570 : vector<1x32x1xf32> to vector<32x1xf32>
    %cst_88 = arith.constant dense<0.000000e+00> : vector<64xf32>
    %572 = vector.multi_reduction <add>, %567, %cst_88 [0] : vector<32x64xf32> to vector<64xf32>
    %573 = vector.shape_cast %572 : vector<64xf32> to vector<1x64xf32>
    %cst_89 = arith.constant 3.200000e+01 : f32
    %574 = vector.broadcast %cst_89 : f32 to vector<1x64xf32>
    %575 = arith.divf %573, %574 : vector<1x64xf32>
    %576 = vector.broadcast %575 : vector<1x64xf32> to vector<32x64xf32>
    %577 = arith.subf %567, %576 : vector<32x64xf32>
    %578 = arith.mulf %577, %577 : vector<32x64xf32>
    %cst_90 = arith.constant dense<0.000000e+00> : vector<64xf32>
    %579 = vector.multi_reduction <add>, %578, %cst_90 [0] : vector<32x64xf32> to vector<64xf32>
    %580 = vector.shape_cast %579 : vector<64xf32> to vector<1x64xf32>
    %cst_91 = arith.constant 3.200000e+01 : f32
    %581 = vector.broadcast %cst_91 : f32 to vector<1x64xf32>
    %582 = arith.divf %580, %581 : vector<1x64xf32>
    %583 = vector.broadcast %575 : vector<1x64xf32> to vector<32x64xf32>
    %584 = arith.subf %567, %583 : vector<32x64xf32>
    %cst_92 = arith.constant 9.99999974E-6 : f32
    %585 = vector.broadcast %cst_92 : f32 to vector<1x64xf32>
    %586 = arith.addf %582, %585 : vector<1x64xf32>
    %587 = math.rsqrt %586 : vector<1x64xf32>
    %588 = vector.broadcast %587 : vector<1x64xf32> to vector<32x64xf32>
    %589 = arith.mulf %584, %588 : vector<32x64xf32>
    %590 = vector.broadcast %569 : vector<32x1xf32> to vector<32x64xf32>
    %591 = arith.mulf %589, %590 : vector<32x64xf32>
    %592 = vector.broadcast %571 : vector<32x1xf32> to vector<32x64xf32>
    %593 = arith.addf %591, %592 : vector<32x64xf32>
    %c1 = arith.constant 1 : index
    %c0_93 = arith.constant 0 : index
    %c0_94 = arith.constant 0 : index
    %594 = vector.load %arg4[%c1, %c0_93, %c0_94] : memref<2x96x32xbf16, #tpu.memory_space<vmem>>, vector<1x96x32xbf16>
    %595 = vector.shape_cast %594 : vector<1x96x32xbf16> to vector<96x32xbf16>
    %596 = arith.truncf %593 : vector<32x64xf32> to vector<32x64xbf16>
    %cst_95 = arith.constant dense<0.000000e+00> : vector<96x64xf32>
    %597 = tpu.matmul %595, %596, %cst_95 {dimension_numbers = #tpu.dot_dimension_numbers<[1], [0], [0], [1], [0, 0, 1, 1], [], []>} : vector<96x32xbf16>, vector<32x64xbf16>, vector<96x64xf32> -> vector<96x64xf32>
    %c1_96 = arith.constant 1 : index
    %c0_97 = arith.constant 0 : index
    %c0_98 = arith.constant 0 : index
    %598 = vector.load %arg5[%c1_96, %c0_97, %c0_98] : memref<2x96x1xf32, #tpu.memory_space<vmem>>, vector<1x96x1xf32>
    %599 = vector.shape_cast %598 : vector<1x96x1xf32> to vector<96x1xf32>
    %600 = vector.broadcast %599 : vector<96x1xf32> to vector<96x64xf32>
    %601 = arith.addf %597, %600 : vector<96x64xf32>
    %602 = vector.extract_strided_slice %601 {offsets = [0, 0], sizes = [32, 64], strides = [1, 1]} : vector<96x64xf32> to vector<32x64xf32>
    %cst_99 = arith.constant 0.353553385 : f32
    %603 = vector.broadcast %cst_99 : f32 to vector<32x64xf32>
    %604 = arith.mulf %602, %603 : vector<32x64xf32>
    %605 = vector.extract_strided_slice %601 {offsets = [32, 0], sizes = [32, 64], strides = [1, 1]} : vector<96x64xf32> to vector<32x64xf32>
    %606 = vector.extract_strided_slice %601 {offsets = [64, 0], sizes = [32, 64], strides = [1, 1]} : vector<96x64xf32> to vector<32x64xf32>
    %607 = vector.extract_strided_slice %604 {offsets = [0, 0], sizes = [8, 64], strides = [1, 1]} : vector<32x64xf32> to vector<8x64xf32>
    %608 = vector.extract_strided_slice %605 {offsets = [0, 0], sizes = [8, 64], strides = [1, 1]} : vector<32x64xf32> to vector<8x64xf32>
    %609 = vector.extract_strided_slice %606 {offsets = [0, 0], sizes = [8, 64], strides = [1, 1]} : vector<32x64xf32> to vector<8x64xf32>
    %610 = vector.extract_strided_slice %608 {offsets = [0, 0], sizes = [8, 8], strides = [1, 1]} : vector<8x64xf32> to vector<8x8xf32>
    %611 = tpu.concatenate %610, %610, %610, %610, %610, %610, %610, %610 in 1 : vector<8x8xf32>, vector<8x8xf32>, vector<8x8xf32>, vector<8x8xf32>, vector<8x8xf32>, vector<8x8xf32>, vector<8x8xf32>, vector<8x8xf32> -> vector<8x64xf32>
    %612 = arith.mulf %607, %611 : vector<8x64xf32>
    %cst_100 = arith.constant dense<0.000000e+00> : vector<64xf32>
    %613 = vector.multi_reduction <add>, %612, %cst_100 [0] : vector<8x64xf32> to vector<64xf32>
    %614 = vector.shape_cast %613 : vector<64xf32> to vector<1x64xf32>
    %615 = vector.extract_strided_slice %608 {offsets = [0, 8], sizes = [8, 8], strides = [1, 1]} : vector<8x64xf32> to vector<8x8xf32>
    %616 = tpu.concatenate %615, %615, %615, %615, %615, %615, %615, %615 in 1 : vector<8x8xf32>, vector<8x8xf32>, vector<8x8xf32>, vector<8x8xf32>, vector<8x8xf32>, vector<8x8xf32>, vector<8x8xf32>, vector<8x8xf32> -> vector<8x64xf32>
    %617 = arith.mulf %607, %616 : vector<8x64xf32>
    %cst_101 = arith.constant dense<0.000000e+00> : vector<64xf32>
    %618 = vector.multi_reduction <add>, %617, %cst_101 [0] : vector<8x64xf32> to vector<64xf32>
    %619 = vector.shape_cast %618 : vector<64xf32> to vector<1x64xf32>
    %620 = vector.extract_strided_slice %608 {offsets = [0, 16], sizes = [8, 8], strides = [1, 1]} : vector<8x64xf32> to vector<8x8xf32>
    %621 = tpu.concatenate %620, %620, %620, %620, %620, %620, %620, %620 in 1 : vector<8x8xf32>, vector<8x8xf32>, vector<8x8xf32>, vector<8x8xf32>, vector<8x8xf32>, vector<8x8xf32>, vector<8x8xf32>, vector<8x8xf32> -> vector<8x64xf32>
    %622 = arith.mulf %607, %621 : vector<8x64xf32>
    %cst_102 = arith.constant dense<0.000000e+00> : vector<64xf32>
    %623 = vector.multi_reduction <add>, %622, %cst_102 [0] : vector<8x64xf32> to vector<64xf32>
    %624 = vector.shape_cast %623 : vector<64xf32> to vector<1x64xf32>
    %625 = vector.extract_strided_slice %608 {offsets = [0, 24], sizes = [8, 8], strides = [1, 1]} : vector<8x64xf32> to vector<8x8xf32>
    %626 = tpu.concatenate %625, %625, %625, %625, %625, %625, %625, %625 in 1 : vector<8x8xf32>, vector<8x8xf32>, vector<8x8xf32>, vector<8x8xf32>, vector<8x8xf32>, vector<8x8xf32>, vector<8x8xf32>, vector<8x8xf32> -> vector<8x64xf32>
    %627 = arith.mulf %607, %626 : vector<8x64xf32>
    %cst_103 = arith.constant dense<0.000000e+00> : vector<64xf32>
    %628 = vector.multi_reduction <add>, %627, %cst_103 [0] : vector<8x64xf32> to vector<64xf32>
    %629 = vector.shape_cast %628 : vector<64xf32> to vector<1x64xf32>
    %630 = vector.extract_strided_slice %608 {offsets = [0, 32], sizes = [8, 8], strides = [1, 1]} : vector<8x64xf32> to vector<8x8xf32>
    %631 = tpu.concatenate %630, %630, %630, %630, %630, %630, %630, %630 in 1 : vector<8x8xf32>, vector<8x8xf32>, vector<8x8xf32>, vector<8x8xf32>, vector<8x8xf32>, vector<8x8xf32>, vector<8x8xf32>, vector<8x8xf32> -> vector<8x64xf32>
    %632 = arith.mulf %607, %631 : vector<8x64xf32>
    %cst_104 = arith.constant dense<0.000000e+00> : vector<64xf32>
    %633 = vector.multi_reduction <add>, %632, %cst_104 [0] : vector<8x64xf32> to vector<64xf32>
    %634 = vector.shape_cast %633 : vector<64xf32> to vector<1x64xf32>
    %635 = vector.extract_strided_slice %608 {offsets = [0, 40], sizes = [8, 8], strides = [1, 1]} : vector<8x64xf32> to vector<8x8xf32>
    %636 = tpu.concatenate %635, %635, %635, %635, %635, %635, %635, %635 in 1 : vector<8x8xf32>, vector<8x8xf32>, vector<8x8xf32>, vector<8x8xf32>, vector<8x8xf32>, vector<8x8xf32>, vector<8x8xf32>, vector<8x8xf32> -> vector<8x64xf32>
    %637 = arith.mulf %607, %636 : vector<8x64xf32>
    %cst_105 = arith.constant dense<0.000000e+00> : vector<64xf32>
    %638 = vector.multi_reduction <add>, %637, %cst_105 [0] : vector<8x64xf32> to vector<64xf32>
    %639 = vector.shape_cast %638 : vector<64xf32> to vector<1x64xf32>
    %640 = vector.extract_strided_slice %608 {offsets = [0, 48], sizes = [8, 8], strides = [1, 1]} : vector<8x64xf32> to vector<8x8xf32>
    %641 = tpu.concatenate %640, %640, %640, %640, %640, %640, %640, %640 in 1 : vector<8x8xf32>, vector<8x8xf32>, vector<8x8xf32>, vector<8x8xf32>, vector<8x8xf32>, vector<8x8xf32>, vector<8x8xf32>, vector<8x8xf32> -> vector<8x64xf32>
    %642 = arith.mulf %607, %641 : vector<8x64xf32>
    %cst_106 = arith.constant dense<0.000000e+00> : vector<64xf32>
    %643 = vector.multi_reduction <add>, %642, %cst_106 [0] : vector<8x64xf32> to vector<64xf32>
    %644 = vector.shape_cast %643 : vector<64xf32> to vector<1x64xf32>
    %645 = vector.extract_strided_slice %608 {offsets = [0, 56], sizes = [8, 8], strides = [1, 1]} : vector<8x64xf32> to vector<8x8xf32>
    %646 = tpu.concatenate %645, %645, %645, %645, %645, %645, %645, %645 in 1 : vector<8x8xf32>, vector<8x8xf32>, vector<8x8xf32>, vector<8x8xf32>, vector<8x8xf32>, vector<8x8xf32>, vector<8x8xf32>, vector<8x8xf32> -> vector<8x64xf32>
    %647 = arith.mulf %607, %646 : vector<8x64xf32>
    %cst_107 = arith.constant dense<0.000000e+00> : vector<64xf32>
    %648 = vector.multi_reduction <add>, %647, %cst_107 [0] : vector<8x64xf32> to vector<64xf32>
    %649 = vector.shape_cast %648 : vector<64xf32> to vector<1x64xf32>
    %650 = arith.maximumf %614, %619 : vector<1x64xf32>
    %651 = arith.maximumf %650, %624 : vector<1x64xf32>
    %652 = arith.maximumf %651, %629 : vector<1x64xf32>
    %653 = arith.maximumf %652, %634 : vector<1x64xf32>
    %654 = arith.maximumf %653, %639 : vector<1x64xf32>
    %655 = arith.maximumf %654, %644 : vector<1x64xf32>
    %656 = arith.maximumf %655, %649 : vector<1x64xf32>
    %657 = arith.subf %614, %656 : vector<1x64xf32>
    %658 = math.exp %657 : vector<1x64xf32>
    %659 = arith.subf %619, %656 : vector<1x64xf32>
    %660 = math.exp %659 : vector<1x64xf32>
    %661 = arith.subf %624, %656 : vector<1x64xf32>
    %662 = math.exp %661 : vector<1x64xf32>
    %663 = arith.subf %629, %656 : vector<1x64xf32>
    %664 = math.exp %663 : vector<1x64xf32>
    %665 = arith.subf %634, %656 : vector<1x64xf32>
    %666 = math.exp %665 : vector<1x64xf32>
    %667 = arith.subf %639, %656 : vector<1x64xf32>
    %668 = math.exp %667 : vector<1x64xf32>
    %669 = arith.subf %644, %656 : vector<1x64xf32>
    %670 = math.exp %669 : vector<1x64xf32>
    %671 = arith.subf %649, %656 : vector<1x64xf32>
    %672 = math.exp %671 : vector<1x64xf32>
    %673 = arith.addf %658, %660 : vector<1x64xf32>
    %674 = arith.addf %673, %662 : vector<1x64xf32>
    %675 = arith.addf %674, %664 : vector<1x64xf32>
    %676 = arith.addf %675, %666 : vector<1x64xf32>
    %677 = arith.addf %676, %668 : vector<1x64xf32>
    %678 = arith.addf %677, %670 : vector<1x64xf32>
    %679 = arith.addf %678, %672 : vector<1x64xf32>
    %680 = tpu.reciprocal %679 {approx = true} : vector<1x64xf32> -> vector<1x64xf32>
    %cst_108 = arith.constant 0.000000e+00 : f32
    %681 = vector.broadcast %cst_108 : f32 to vector<8x64xf32>
    %682 = vector.extract_strided_slice %609 {offsets = [0, 0], sizes = [8, 8], strides = [1, 1]} : vector<8x64xf32> to vector<8x8xf32>
    %683 = tpu.concatenate %682, %682, %682, %682, %682, %682, %682, %682 in 1 : vector<8x8xf32>, vector<8x8xf32>, vector<8x8xf32>, vector<8x8xf32>, vector<8x8xf32>, vector<8x8xf32>, vector<8x8xf32>, vector<8x8xf32> -> vector<8x64xf32>
    %684 = arith.mulf %658, %680 : vector<1x64xf32>
    %685 = vector.broadcast %684 : vector<1x64xf32> to vector<8x64xf32>
    %686 = arith.mulf %685, %683 : vector<8x64xf32>
    %687 = arith.addf %681, %686 : vector<8x64xf32>
    %688 = vector.extract_strided_slice %609 {offsets = [0, 8], sizes = [8, 8], strides = [1, 1]} : vector<8x64xf32> to vector<8x8xf32>
    %689 = tpu.concatenate %688, %688, %688, %688, %688, %688, %688, %688 in 1 : vector<8x8xf32>, vector<8x8xf32>, vector<8x8xf32>, vector<8x8xf32>, vector<8x8xf32>, vector<8x8xf32>, vector<8x8xf32>, vector<8x8xf32> -> vector<8x64xf32>
    %690 = arith.mulf %660, %680 : vector<1x64xf32>
    %691 = vector.broadcast %690 : vector<1x64xf32> to vector<8x64xf32>
    %692 = arith.mulf %691, %689 : vector<8x64xf32>
    %693 = arith.addf %687, %692 : vector<8x64xf32>
    %694 = vector.extract_strided_slice %609 {offsets = [0, 16], sizes = [8, 8], strides = [1, 1]} : vector<8x64xf32> to vector<8x8xf32>
    %695 = tpu.concatenate %694, %694, %694, %694, %694, %694, %694, %694 in 1 : vector<8x8xf32>, vector<8x8xf32>, vector<8x8xf32>, vector<8x8xf32>, vector<8x8xf32>, vector<8x8xf32>, vector<8x8xf32>, vector<8x8xf32> -> vector<8x64xf32>
    %696 = arith.mulf %662, %680 : vector<1x64xf32>
    %697 = vector.broadcast %696 : vector<1x64xf32> to vector<8x64xf32>
    %698 = arith.mulf %697, %695 : vector<8x64xf32>
    %699 = arith.addf %693, %698 : vector<8x64xf32>
    %700 = vector.extract_strided_slice %609 {offsets = [0, 24], sizes = [8, 8], strides = [1, 1]} : vector<8x64xf32> to vector<8x8xf32>
    %701 = tpu.concatenate %700, %700, %700, %700, %700, %700, %700, %700 in 1 : vector<8x8xf32>, vector<8x8xf32>, vector<8x8xf32>, vector<8x8xf32>, vector<8x8xf32>, vector<8x8xf32>, vector<8x8xf32>, vector<8x8xf32> -> vector<8x64xf32>
    %702 = arith.mulf %664, %680 : vector<1x64xf32>
    %703 = vector.broadcast %702 : vector<1x64xf32> to vector<8x64xf32>
    %704 = arith.mulf %703, %701 : vector<8x64xf32>
    %705 = arith.addf %699, %704 : vector<8x64xf32>
    %706 = vector.extract_strided_slice %609 {offsets = [0, 32], sizes = [8, 8], strides = [1, 1]} : vector<8x64xf32> to vector<8x8xf32>
    %707 = tpu.concatenate %706, %706, %706, %706, %706, %706, %706, %706 in 1 : vector<8x8xf32>, vector<8x8xf32>, vector<8x8xf32>, vector<8x8xf32>, vector<8x8xf32>, vector<8x8xf32>, vector<8x8xf32>, vector<8x8xf32> -> vector<8x64xf32>
    %708 = arith.mulf %666, %680 : vector<1x64xf32>
    %709 = vector.broadcast %708 : vector<1x64xf32> to vector<8x64xf32>
    %710 = arith.mulf %709, %707 : vector<8x64xf32>
    %711 = arith.addf %705, %710 : vector<8x64xf32>
    %712 = vector.extract_strided_slice %609 {offsets = [0, 40], sizes = [8, 8], strides = [1, 1]} : vector<8x64xf32> to vector<8x8xf32>
    %713 = tpu.concatenate %712, %712, %712, %712, %712, %712, %712, %712 in 1 : vector<8x8xf32>, vector<8x8xf32>, vector<8x8xf32>, vector<8x8xf32>, vector<8x8xf32>, vector<8x8xf32>, vector<8x8xf32>, vector<8x8xf32> -> vector<8x64xf32>
    %714 = arith.mulf %668, %680 : vector<1x64xf32>
    %715 = vector.broadcast %714 : vector<1x64xf32> to vector<8x64xf32>
    %716 = arith.mulf %715, %713 : vector<8x64xf32>
    %717 = arith.addf %711, %716 : vector<8x64xf32>
    %718 = vector.extract_strided_slice %609 {offsets = [0, 48], sizes = [8, 8], strides = [1, 1]} : vector<8x64xf32> to vector<8x8xf32>
    %719 = tpu.concatenate %718, %718, %718, %718, %718, %718, %718, %718 in 1 : vector<8x8xf32>, vector<8x8xf32>, vector<8x8xf32>, vector<8x8xf32>, vector<8x8xf32>, vector<8x8xf32>, vector<8x8xf32>, vector<8x8xf32> -> vector<8x64xf32>
    %720 = arith.mulf %670, %680 : vector<1x64xf32>
    %721 = vector.broadcast %720 : vector<1x64xf32> to vector<8x64xf32>
    %722 = arith.mulf %721, %719 : vector<8x64xf32>
    %723 = arith.addf %717, %722 : vector<8x64xf32>
    %724 = vector.extract_strided_slice %609 {offsets = [0, 56], sizes = [8, 8], strides = [1, 1]} : vector<8x64xf32> to vector<8x8xf32>
    %725 = tpu.concatenate %724, %724, %724, %724, %724, %724, %724, %724 in 1 : vector<8x8xf32>, vector<8x8xf32>, vector<8x8xf32>, vector<8x8xf32>, vector<8x8xf32>, vector<8x8xf32>, vector<8x8xf32>, vector<8x8xf32> -> vector<8x64xf32>
    %726 = arith.mulf %672, %680 : vector<1x64xf32>
    %727 = vector.broadcast %726 : vector<1x64xf32> to vector<8x64xf32>
    %728 = arith.mulf %727, %725 : vector<8x64xf32>
    %729 = arith.addf %723, %728 : vector<8x64xf32>
    %730 = vector.extract_strided_slice %604 {offsets = [8, 0], sizes = [8, 64], strides = [1, 1]} : vector<32x64xf32> to vector<8x64xf32>
    %731 = vector.extract_strided_slice %605 {offsets = [8, 0], sizes = [8, 64], strides = [1, 1]} : vector<32x64xf32> to vector<8x64xf32>
    %732 = vector.extract_strided_slice %606 {offsets = [8, 0], sizes = [8, 64], strides = [1, 1]} : vector<32x64xf32> to vector<8x64xf32>
    %733 = vector.extract_strided_slice %731 {offsets = [0, 0], sizes = [8, 8], strides = [1, 1]} : vector<8x64xf32> to vector<8x8xf32>
    %734 = tpu.concatenate %733, %733, %733, %733, %733, %733, %733, %733 in 1 : vector<8x8xf32>, vector<8x8xf32>, vector<8x8xf32>, vector<8x8xf32>, vector<8x8xf32>, vector<8x8xf32>, vector<8x8xf32>, vector<8x8xf32> -> vector<8x64xf32>
    %735 = arith.mulf %730, %734 : vector<8x64xf32>
    %cst_109 = arith.constant dense<0.000000e+00> : vector<64xf32>
    %736 = vector.multi_reduction <add>, %735, %cst_109 [0] : vector<8x64xf32> to vector<64xf32>
    %737 = vector.shape_cast %736 : vector<64xf32> to vector<1x64xf32>
    %738 = vector.extract_strided_slice %731 {offsets = [0, 8], sizes = [8, 8], strides = [1, 1]} : vector<8x64xf32> to vector<8x8xf32>
    %739 = tpu.concatenate %738, %738, %738, %738, %738, %738, %738, %738 in 1 : vector<8x8xf32>, vector<8x8xf32>, vector<8x8xf32>, vector<8x8xf32>, vector<8x8xf32>, vector<8x8xf32>, vector<8x8xf32>, vector<8x8xf32> -> vector<8x64xf32>
    %740 = arith.mulf %730, %739 : vector<8x64xf32>
    %cst_110 = arith.constant dense<0.000000e+00> : vector<64xf32>
    %741 = vector.multi_reduction <add>, %740, %cst_110 [0] : vector<8x64xf32> to vector<64xf32>
    %742 = vector.shape_cast %741 : vector<64xf32> to vector<1x64xf32>
    %743 = vector.extract_strided_slice %731 {offsets = [0, 16], sizes = [8, 8], strides = [1, 1]} : vector<8x64xf32> to vector<8x8xf32>
    %744 = tpu.concatenate %743, %743, %743, %743, %743, %743, %743, %743 in 1 : vector<8x8xf32>, vector<8x8xf32>, vector<8x8xf32>, vector<8x8xf32>, vector<8x8xf32>, vector<8x8xf32>, vector<8x8xf32>, vector<8x8xf32> -> vector<8x64xf32>
    %745 = arith.mulf %730, %744 : vector<8x64xf32>
    %cst_111 = arith.constant dense<0.000000e+00> : vector<64xf32>
    %746 = vector.multi_reduction <add>, %745, %cst_111 [0] : vector<8x64xf32> to vector<64xf32>
    %747 = vector.shape_cast %746 : vector<64xf32> to vector<1x64xf32>
    %748 = vector.extract_strided_slice %731 {offsets = [0, 24], sizes = [8, 8], strides = [1, 1]} : vector<8x64xf32> to vector<8x8xf32>
    %749 = tpu.concatenate %748, %748, %748, %748, %748, %748, %748, %748 in 1 : vector<8x8xf32>, vector<8x8xf32>, vector<8x8xf32>, vector<8x8xf32>, vector<8x8xf32>, vector<8x8xf32>, vector<8x8xf32>, vector<8x8xf32> -> vector<8x64xf32>
    %750 = arith.mulf %730, %749 : vector<8x64xf32>
    %cst_112 = arith.constant dense<0.000000e+00> : vector<64xf32>
    %751 = vector.multi_reduction <add>, %750, %cst_112 [0] : vector<8x64xf32> to vector<64xf32>
    %752 = vector.shape_cast %751 : vector<64xf32> to vector<1x64xf32>
    %753 = vector.extract_strided_slice %731 {offsets = [0, 32], sizes = [8, 8], strides = [1, 1]} : vector<8x64xf32> to vector<8x8xf32>
    %754 = tpu.concatenate %753, %753, %753, %753, %753, %753, %753, %753 in 1 : vector<8x8xf32>, vector<8x8xf32>, vector<8x8xf32>, vector<8x8xf32>, vector<8x8xf32>, vector<8x8xf32>, vector<8x8xf32>, vector<8x8xf32> -> vector<8x64xf32>
    %755 = arith.mulf %730, %754 : vector<8x64xf32>
    %cst_113 = arith.constant dense<0.000000e+00> : vector<64xf32>
    %756 = vector.multi_reduction <add>, %755, %cst_113 [0] : vector<8x64xf32> to vector<64xf32>
    %757 = vector.shape_cast %756 : vector<64xf32> to vector<1x64xf32>
    %758 = vector.extract_strided_slice %731 {offsets = [0, 40], sizes = [8, 8], strides = [1, 1]} : vector<8x64xf32> to vector<8x8xf32>
    %759 = tpu.concatenate %758, %758, %758, %758, %758, %758, %758, %758 in 1 : vector<8x8xf32>, vector<8x8xf32>, vector<8x8xf32>, vector<8x8xf32>, vector<8x8xf32>, vector<8x8xf32>, vector<8x8xf32>, vector<8x8xf32> -> vector<8x64xf32>
    %760 = arith.mulf %730, %759 : vector<8x64xf32>
    %cst_114 = arith.constant dense<0.000000e+00> : vector<64xf32>
    %761 = vector.multi_reduction <add>, %760, %cst_114 [0] : vector<8x64xf32> to vector<64xf32>
    %762 = vector.shape_cast %761 : vector<64xf32> to vector<1x64xf32>
    %763 = vector.extract_strided_slice %731 {offsets = [0, 48], sizes = [8, 8], strides = [1, 1]} : vector<8x64xf32> to vector<8x8xf32>
    %764 = tpu.concatenate %763, %763, %763, %763, %763, %763, %763, %763 in 1 : vector<8x8xf32>, vector<8x8xf32>, vector<8x8xf32>, vector<8x8xf32>, vector<8x8xf32>, vector<8x8xf32>, vector<8x8xf32>, vector<8x8xf32> -> vector<8x64xf32>
    %765 = arith.mulf %730, %764 : vector<8x64xf32>
    %cst_115 = arith.constant dense<0.000000e+00> : vector<64xf32>
    %766 = vector.multi_reduction <add>, %765, %cst_115 [0] : vector<8x64xf32> to vector<64xf32>
    %767 = vector.shape_cast %766 : vector<64xf32> to vector<1x64xf32>
    %768 = vector.extract_strided_slice %731 {offsets = [0, 56], sizes = [8, 8], strides = [1, 1]} : vector<8x64xf32> to vector<8x8xf32>
    %769 = tpu.concatenate %768, %768, %768, %768, %768, %768, %768, %768 in 1 : vector<8x8xf32>, vector<8x8xf32>, vector<8x8xf32>, vector<8x8xf32>, vector<8x8xf32>, vector<8x8xf32>, vector<8x8xf32>, vector<8x8xf32> -> vector<8x64xf32>
    %770 = arith.mulf %730, %769 : vector<8x64xf32>
    %cst_116 = arith.constant dense<0.000000e+00> : vector<64xf32>
    %771 = vector.multi_reduction <add>, %770, %cst_116 [0] : vector<8x64xf32> to vector<64xf32>
    %772 = vector.shape_cast %771 : vector<64xf32> to vector<1x64xf32>
    %773 = arith.maximumf %737, %742 : vector<1x64xf32>
    %774 = arith.maximumf %773, %747 : vector<1x64xf32>
    %775 = arith.maximumf %774, %752 : vector<1x64xf32>
    %776 = arith.maximumf %775, %757 : vector<1x64xf32>
    %777 = arith.maximumf %776, %762 : vector<1x64xf32>
    %778 = arith.maximumf %777, %767 : vector<1x64xf32>
    %779 = arith.maximumf %778, %772 : vector<1x64xf32>
    %780 = arith.subf %737, %779 : vector<1x64xf32>
    %781 = math.exp %780 : vector<1x64xf32>
    %782 = arith.subf %742, %779 : vector<1x64xf32>
    %783 = math.exp %782 : vector<1x64xf32>
    %784 = arith.subf %747, %779 : vector<1x64xf32>
    %785 = math.exp %784 : vector<1x64xf32>
    %786 = arith.subf %752, %779 : vector<1x64xf32>
    %787 = math.exp %786 : vector<1x64xf32>
    %788 = arith.subf %757, %779 : vector<1x64xf32>
    %789 = math.exp %788 : vector<1x64xf32>
    %790 = arith.subf %762, %779 : vector<1x64xf32>
    %791 = math.exp %790 : vector<1x64xf32>
    %792 = arith.subf %767, %779 : vector<1x64xf32>
    %793 = math.exp %792 : vector<1x64xf32>
    %794 = arith.subf %772, %779 : vector<1x64xf32>
    %795 = math.exp %794 : vector<1x64xf32>
    %796 = arith.addf %781, %783 : vector<1x64xf32>
    %797 = arith.addf %796, %785 : vector<1x64xf32>
    %798 = arith.addf %797, %787 : vector<1x64xf32>
    %799 = arith.addf %798, %789 : vector<1x64xf32>
    %800 = arith.addf %799, %791 : vector<1x64xf32>
    %801 = arith.addf %800, %793 : vector<1x64xf32>
    %802 = arith.addf %801, %795 : vector<1x64xf32>
    %803 = tpu.reciprocal %802 {approx = true} : vector<1x64xf32> -> vector<1x64xf32>
    %cst_117 = arith.constant 0.000000e+00 : f32
    %804 = vector.broadcast %cst_117 : f32 to vector<8x64xf32>
    %805 = vector.extract_strided_slice %732 {offsets = [0, 0], sizes = [8, 8], strides = [1, 1]} : vector<8x64xf32> to vector<8x8xf32>
    %806 = tpu.concatenate %805, %805, %805, %805, %805, %805, %805, %805 in 1 : vector<8x8xf32>, vector<8x8xf32>, vector<8x8xf32>, vector<8x8xf32>, vector<8x8xf32>, vector<8x8xf32>, vector<8x8xf32>, vector<8x8xf32> -> vector<8x64xf32>
    %807 = arith.mulf %781, %803 : vector<1x64xf32>
    %808 = vector.broadcast %807 : vector<1x64xf32> to vector<8x64xf32>
    %809 = arith.mulf %808, %806 : vector<8x64xf32>
    %810 = arith.addf %804, %809 : vector<8x64xf32>
    %811 = vector.extract_strided_slice %732 {offsets = [0, 8], sizes = [8, 8], strides = [1, 1]} : vector<8x64xf32> to vector<8x8xf32>
    %812 = tpu.concatenate %811, %811, %811, %811, %811, %811, %811, %811 in 1 : vector<8x8xf32>, vector<8x8xf32>, vector<8x8xf32>, vector<8x8xf32>, vector<8x8xf32>, vector<8x8xf32>, vector<8x8xf32>, vector<8x8xf32> -> vector<8x64xf32>
    %813 = arith.mulf %783, %803 : vector<1x64xf32>
    %814 = vector.broadcast %813 : vector<1x64xf32> to vector<8x64xf32>
    %815 = arith.mulf %814, %812 : vector<8x64xf32>
    %816 = arith.addf %810, %815 : vector<8x64xf32>
    %817 = vector.extract_strided_slice %732 {offsets = [0, 16], sizes = [8, 8], strides = [1, 1]} : vector<8x64xf32> to vector<8x8xf32>
    %818 = tpu.concatenate %817, %817, %817, %817, %817, %817, %817, %817 in 1 : vector<8x8xf32>, vector<8x8xf32>, vector<8x8xf32>, vector<8x8xf32>, vector<8x8xf32>, vector<8x8xf32>, vector<8x8xf32>, vector<8x8xf32> -> vector<8x64xf32>
    %819 = arith.mulf %785, %803 : vector<1x64xf32>
    %820 = vector.broadcast %819 : vector<1x64xf32> to vector<8x64xf32>
    %821 = arith.mulf %820, %818 : vector<8x64xf32>
    %822 = arith.addf %816, %821 : vector<8x64xf32>
    %823 = vector.extract_strided_slice %732 {offsets = [0, 24], sizes = [8, 8], strides = [1, 1]} : vector<8x64xf32> to vector<8x8xf32>
    %824 = tpu.concatenate %823, %823, %823, %823, %823, %823, %823, %823 in 1 : vector<8x8xf32>, vector<8x8xf32>, vector<8x8xf32>, vector<8x8xf32>, vector<8x8xf32>, vector<8x8xf32>, vector<8x8xf32>, vector<8x8xf32> -> vector<8x64xf32>
    %825 = arith.mulf %787, %803 : vector<1x64xf32>
    %826 = vector.broadcast %825 : vector<1x64xf32> to vector<8x64xf32>
    %827 = arith.mulf %826, %824 : vector<8x64xf32>
    %828 = arith.addf %822, %827 : vector<8x64xf32>
    %829 = vector.extract_strided_slice %732 {offsets = [0, 32], sizes = [8, 8], strides = [1, 1]} : vector<8x64xf32> to vector<8x8xf32>
    %830 = tpu.concatenate %829, %829, %829, %829, %829, %829, %829, %829 in 1 : vector<8x8xf32>, vector<8x8xf32>, vector<8x8xf32>, vector<8x8xf32>, vector<8x8xf32>, vector<8x8xf32>, vector<8x8xf32>, vector<8x8xf32> -> vector<8x64xf32>
    %831 = arith.mulf %789, %803 : vector<1x64xf32>
    %832 = vector.broadcast %831 : vector<1x64xf32> to vector<8x64xf32>
    %833 = arith.mulf %832, %830 : vector<8x64xf32>
    %834 = arith.addf %828, %833 : vector<8x64xf32>
    %835 = vector.extract_strided_slice %732 {offsets = [0, 40], sizes = [8, 8], strides = [1, 1]} : vector<8x64xf32> to vector<8x8xf32>
    %836 = tpu.concatenate %835, %835, %835, %835, %835, %835, %835, %835 in 1 : vector<8x8xf32>, vector<8x8xf32>, vector<8x8xf32>, vector<8x8xf32>, vector<8x8xf32>, vector<8x8xf32>, vector<8x8xf32>, vector<8x8xf32> -> vector<8x64xf32>
    %837 = arith.mulf %791, %803 : vector<1x64xf32>
    %838 = vector.broadcast %837 : vector<1x64xf32> to vector<8x64xf32>
    %839 = arith.mulf %838, %836 : vector<8x64xf32>
    %840 = arith.addf %834, %839 : vector<8x64xf32>
    %841 = vector.extract_strided_slice %732 {offsets = [0, 48], sizes = [8, 8], strides = [1, 1]} : vector<8x64xf32> to vector<8x8xf32>
    %842 = tpu.concatenate %841, %841, %841, %841, %841, %841, %841, %841 in 1 : vector<8x8xf32>, vector<8x8xf32>, vector<8x8xf32>, vector<8x8xf32>, vector<8x8xf32>, vector<8x8xf32>, vector<8x8xf32>, vector<8x8xf32> -> vector<8x64xf32>
    %843 = arith.mulf %793, %803 : vector<1x64xf32>
    %844 = vector.broadcast %843 : vector<1x64xf32> to vector<8x64xf32>
    %845 = arith.mulf %844, %842 : vector<8x64xf32>
    %846 = arith.addf %840, %845 : vector<8x64xf32>
    %847 = vector.extract_strided_slice %732 {offsets = [0, 56], sizes = [8, 8], strides = [1, 1]} : vector<8x64xf32> to vector<8x8xf32>
    %848 = tpu.concatenate %847, %847, %847, %847, %847, %847, %847, %847 in 1 : vector<8x8xf32>, vector<8x8xf32>, vector<8x8xf32>, vector<8x8xf32>, vector<8x8xf32>, vector<8x8xf32>, vector<8x8xf32>, vector<8x8xf32> -> vector<8x64xf32>
    %849 = arith.mulf %795, %803 : vector<1x64xf32>
    %850 = vector.broadcast %849 : vector<1x64xf32> to vector<8x64xf32>
    %851 = arith.mulf %850, %848 : vector<8x64xf32>
    %852 = arith.addf %846, %851 : vector<8x64xf32>
    %853 = vector.extract_strided_slice %604 {offsets = [16, 0], sizes = [8, 64], strides = [1, 1]} : vector<32x64xf32> to vector<8x64xf32>
    %854 = vector.extract_strided_slice %605 {offsets = [16, 0], sizes = [8, 64], strides = [1, 1]} : vector<32x64xf32> to vector<8x64xf32>
    %855 = vector.extract_strided_slice %606 {offsets = [16, 0], sizes = [8, 64], strides = [1, 1]} : vector<32x64xf32> to vector<8x64xf32>
    %856 = vector.extract_strided_slice %854 {offsets = [0, 0], sizes = [8, 8], strides = [1, 1]} : vector<8x64xf32> to vector<8x8xf32>
    %857 = tpu.concatenate %856, %856, %856, %856, %856, %856, %856, %856 in 1 : vector<8x8xf32>, vector<8x8xf32>, vector<8x8xf32>, vector<8x8xf32>, vector<8x8xf32>, vector<8x8xf32>, vector<8x8xf32>, vector<8x8xf32> -> vector<8x64xf32>
    %858 = arith.mulf %853, %857 : vector<8x64xf32>
    %cst_118 = arith.constant dense<0.000000e+00> : vector<64xf32>
    %859 = vector.multi_reduction <add>, %858, %cst_118 [0] : vector<8x64xf32> to vector<64xf32>
    %860 = vector.shape_cast %859 : vector<64xf32> to vector<1x64xf32>
    %861 = vector.extract_strided_slice %854 {offsets = [0, 8], sizes = [8, 8], strides = [1, 1]} : vector<8x64xf32> to vector<8x8xf32>
    %862 = tpu.concatenate %861, %861, %861, %861, %861, %861, %861, %861 in 1 : vector<8x8xf32>, vector<8x8xf32>, vector<8x8xf32>, vector<8x8xf32>, vector<8x8xf32>, vector<8x8xf32>, vector<8x8xf32>, vector<8x8xf32> -> vector<8x64xf32>
    %863 = arith.mulf %853, %862 : vector<8x64xf32>
    %cst_119 = arith.constant dense<0.000000e+00> : vector<64xf32>
    %864 = vector.multi_reduction <add>, %863, %cst_119 [0] : vector<8x64xf32> to vector<64xf32>
    %865 = vector.shape_cast %864 : vector<64xf32> to vector<1x64xf32>
    %866 = vector.extract_strided_slice %854 {offsets = [0, 16], sizes = [8, 8], strides = [1, 1]} : vector<8x64xf32> to vector<8x8xf32>
    %867 = tpu.concatenate %866, %866, %866, %866, %866, %866, %866, %866 in 1 : vector<8x8xf32>, vector<8x8xf32>, vector<8x8xf32>, vector<8x8xf32>, vector<8x8xf32>, vector<8x8xf32>, vector<8x8xf32>, vector<8x8xf32> -> vector<8x64xf32>
    %868 = arith.mulf %853, %867 : vector<8x64xf32>
    %cst_120 = arith.constant dense<0.000000e+00> : vector<64xf32>
    %869 = vector.multi_reduction <add>, %868, %cst_120 [0] : vector<8x64xf32> to vector<64xf32>
    %870 = vector.shape_cast %869 : vector<64xf32> to vector<1x64xf32>
    %871 = vector.extract_strided_slice %854 {offsets = [0, 24], sizes = [8, 8], strides = [1, 1]} : vector<8x64xf32> to vector<8x8xf32>
    %872 = tpu.concatenate %871, %871, %871, %871, %871, %871, %871, %871 in 1 : vector<8x8xf32>, vector<8x8xf32>, vector<8x8xf32>, vector<8x8xf32>, vector<8x8xf32>, vector<8x8xf32>, vector<8x8xf32>, vector<8x8xf32> -> vector<8x64xf32>
    %873 = arith.mulf %853, %872 : vector<8x64xf32>
    %cst_121 = arith.constant dense<0.000000e+00> : vector<64xf32>
    %874 = vector.multi_reduction <add>, %873, %cst_121 [0] : vector<8x64xf32> to vector<64xf32>
    %875 = vector.shape_cast %874 : vector<64xf32> to vector<1x64xf32>
    %876 = vector.extract_strided_slice %854 {offsets = [0, 32], sizes = [8, 8], strides = [1, 1]} : vector<8x64xf32> to vector<8x8xf32>
    %877 = tpu.concatenate %876, %876, %876, %876, %876, %876, %876, %876 in 1 : vector<8x8xf32>, vector<8x8xf32>, vector<8x8xf32>, vector<8x8xf32>, vector<8x8xf32>, vector<8x8xf32>, vector<8x8xf32>, vector<8x8xf32> -> vector<8x64xf32>
    %878 = arith.mulf %853, %877 : vector<8x64xf32>
    %cst_122 = arith.constant dense<0.000000e+00> : vector<64xf32>
    %879 = vector.multi_reduction <add>, %878, %cst_122 [0] : vector<8x64xf32> to vector<64xf32>
    %880 = vector.shape_cast %879 : vector<64xf32> to vector<1x64xf32>
    %881 = vector.extract_strided_slice %854 {offsets = [0, 40], sizes = [8, 8], strides = [1, 1]} : vector<8x64xf32> to vector<8x8xf32>
    %882 = tpu.concatenate %881, %881, %881, %881, %881, %881, %881, %881 in 1 : vector<8x8xf32>, vector<8x8xf32>, vector<8x8xf32>, vector<8x8xf32>, vector<8x8xf32>, vector<8x8xf32>, vector<8x8xf32>, vector<8x8xf32> -> vector<8x64xf32>
    %883 = arith.mulf %853, %882 : vector<8x64xf32>
    %cst_123 = arith.constant dense<0.000000e+00> : vector<64xf32>
    %884 = vector.multi_reduction <add>, %883, %cst_123 [0] : vector<8x64xf32> to vector<64xf32>
    %885 = vector.shape_cast %884 : vector<64xf32> to vector<1x64xf32>
    %886 = vector.extract_strided_slice %854 {offsets = [0, 48], sizes = [8, 8], strides = [1, 1]} : vector<8x64xf32> to vector<8x8xf32>
    %887 = tpu.concatenate %886, %886, %886, %886, %886, %886, %886, %886 in 1 : vector<8x8xf32>, vector<8x8xf32>, vector<8x8xf32>, vector<8x8xf32>, vector<8x8xf32>, vector<8x8xf32>, vector<8x8xf32>, vector<8x8xf32> -> vector<8x64xf32>
    %888 = arith.mulf %853, %887 : vector<8x64xf32>
    %cst_124 = arith.constant dense<0.000000e+00> : vector<64xf32>
    %889 = vector.multi_reduction <add>, %888, %cst_124 [0] : vector<8x64xf32> to vector<64xf32>
    %890 = vector.shape_cast %889 : vector<64xf32> to vector<1x64xf32>
    %891 = vector.extract_strided_slice %854 {offsets = [0, 56], sizes = [8, 8], strides = [1, 1]} : vector<8x64xf32> to vector<8x8xf32>
    %892 = tpu.concatenate %891, %891, %891, %891, %891, %891, %891, %891 in 1 : vector<8x8xf32>, vector<8x8xf32>, vector<8x8xf32>, vector<8x8xf32>, vector<8x8xf32>, vector<8x8xf32>, vector<8x8xf32>, vector<8x8xf32> -> vector<8x64xf32>
    %893 = arith.mulf %853, %892 : vector<8x64xf32>
    %cst_125 = arith.constant dense<0.000000e+00> : vector<64xf32>
    %894 = vector.multi_reduction <add>, %893, %cst_125 [0] : vector<8x64xf32> to vector<64xf32>
    %895 = vector.shape_cast %894 : vector<64xf32> to vector<1x64xf32>
    %896 = arith.maximumf %860, %865 : vector<1x64xf32>
    %897 = arith.maximumf %896, %870 : vector<1x64xf32>
    %898 = arith.maximumf %897, %875 : vector<1x64xf32>
    %899 = arith.maximumf %898, %880 : vector<1x64xf32>
    %900 = arith.maximumf %899, %885 : vector<1x64xf32>
    %901 = arith.maximumf %900, %890 : vector<1x64xf32>
    %902 = arith.maximumf %901, %895 : vector<1x64xf32>
    %903 = arith.subf %860, %902 : vector<1x64xf32>
    %904 = math.exp %903 : vector<1x64xf32>
    %905 = arith.subf %865, %902 : vector<1x64xf32>
    %906 = math.exp %905 : vector<1x64xf32>
    %907 = arith.subf %870, %902 : vector<1x64xf32>
    %908 = math.exp %907 : vector<1x64xf32>
    %909 = arith.subf %875, %902 : vector<1x64xf32>
    %910 = math.exp %909 : vector<1x64xf32>
    %911 = arith.subf %880, %902 : vector<1x64xf32>
    %912 = math.exp %911 : vector<1x64xf32>
    %913 = arith.subf %885, %902 : vector<1x64xf32>
    %914 = math.exp %913 : vector<1x64xf32>
    %915 = arith.subf %890, %902 : vector<1x64xf32>
    %916 = math.exp %915 : vector<1x64xf32>
    %917 = arith.subf %895, %902 : vector<1x64xf32>
    %918 = math.exp %917 : vector<1x64xf32>
    %919 = arith.addf %904, %906 : vector<1x64xf32>
    %920 = arith.addf %919, %908 : vector<1x64xf32>
    %921 = arith.addf %920, %910 : vector<1x64xf32>
    %922 = arith.addf %921, %912 : vector<1x64xf32>
    %923 = arith.addf %922, %914 : vector<1x64xf32>
    %924 = arith.addf %923, %916 : vector<1x64xf32>
    %925 = arith.addf %924, %918 : vector<1x64xf32>
    %926 = tpu.reciprocal %925 {approx = true} : vector<1x64xf32> -> vector<1x64xf32>
    %cst_126 = arith.constant 0.000000e+00 : f32
    %927 = vector.broadcast %cst_126 : f32 to vector<8x64xf32>
    %928 = vector.extract_strided_slice %855 {offsets = [0, 0], sizes = [8, 8], strides = [1, 1]} : vector<8x64xf32> to vector<8x8xf32>
    %929 = tpu.concatenate %928, %928, %928, %928, %928, %928, %928, %928 in 1 : vector<8x8xf32>, vector<8x8xf32>, vector<8x8xf32>, vector<8x8xf32>, vector<8x8xf32>, vector<8x8xf32>, vector<8x8xf32>, vector<8x8xf32> -> vector<8x64xf32>
    %930 = arith.mulf %904, %926 : vector<1x64xf32>
    %931 = vector.broadcast %930 : vector<1x64xf32> to vector<8x64xf32>
    %932 = arith.mulf %931, %929 : vector<8x64xf32>
    %933 = arith.addf %927, %932 : vector<8x64xf32>
    %934 = vector.extract_strided_slice %855 {offsets = [0, 8], sizes = [8, 8], strides = [1, 1]} : vector<8x64xf32> to vector<8x8xf32>
    %935 = tpu.concatenate %934, %934, %934, %934, %934, %934, %934, %934 in 1 : vector<8x8xf32>, vector<8x8xf32>, vector<8x8xf32>, vector<8x8xf32>, vector<8x8xf32>, vector<8x8xf32>, vector<8x8xf32>, vector<8x8xf32> -> vector<8x64xf32>
    %936 = arith.mulf %906, %926 : vector<1x64xf32>
    %937 = vector.broadcast %936 : vector<1x64xf32> to vector<8x64xf32>
    %938 = arith.mulf %937, %935 : vector<8x64xf32>
    %939 = arith.addf %933, %938 : vector<8x64xf32>
    %940 = vector.extract_strided_slice %855 {offsets = [0, 16], sizes = [8, 8], strides = [1, 1]} : vector<8x64xf32> to vector<8x8xf32>
    %941 = tpu.concatenate %940, %940, %940, %940, %940, %940, %940, %940 in 1 : vector<8x8xf32>, vector<8x8xf32>, vector<8x8xf32>, vector<8x8xf32>, vector<8x8xf32>, vector<8x8xf32>, vector<8x8xf32>, vector<8x8xf32> -> vector<8x64xf32>
    %942 = arith.mulf %908, %926 : vector<1x64xf32>
    %943 = vector.broadcast %942 : vector<1x64xf32> to vector<8x64xf32>
    %944 = arith.mulf %943, %941 : vector<8x64xf32>
    %945 = arith.addf %939, %944 : vector<8x64xf32>
    %946 = vector.extract_strided_slice %855 {offsets = [0, 24], sizes = [8, 8], strides = [1, 1]} : vector<8x64xf32> to vector<8x8xf32>
    %947 = tpu.concatenate %946, %946, %946, %946, %946, %946, %946, %946 in 1 : vector<8x8xf32>, vector<8x8xf32>, vector<8x8xf32>, vector<8x8xf32>, vector<8x8xf32>, vector<8x8xf32>, vector<8x8xf32>, vector<8x8xf32> -> vector<8x64xf32>
    %948 = arith.mulf %910, %926 : vector<1x64xf32>
    %949 = vector.broadcast %948 : vector<1x64xf32> to vector<8x64xf32>
    %950 = arith.mulf %949, %947 : vector<8x64xf32>
    %951 = arith.addf %945, %950 : vector<8x64xf32>
    %952 = vector.extract_strided_slice %855 {offsets = [0, 32], sizes = [8, 8], strides = [1, 1]} : vector<8x64xf32> to vector<8x8xf32>
    %953 = tpu.concatenate %952, %952, %952, %952, %952, %952, %952, %952 in 1 : vector<8x8xf32>, vector<8x8xf32>, vector<8x8xf32>, vector<8x8xf32>, vector<8x8xf32>, vector<8x8xf32>, vector<8x8xf32>, vector<8x8xf32> -> vector<8x64xf32>
    %954 = arith.mulf %912, %926 : vector<1x64xf32>
    %955 = vector.broadcast %954 : vector<1x64xf32> to vector<8x64xf32>
    %956 = arith.mulf %955, %953 : vector<8x64xf32>
    %957 = arith.addf %951, %956 : vector<8x64xf32>
    %958 = vector.extract_strided_slice %855 {offsets = [0, 40], sizes = [8, 8], strides = [1, 1]} : vector<8x64xf32> to vector<8x8xf32>
    %959 = tpu.concatenate %958, %958, %958, %958, %958, %958, %958, %958 in 1 : vector<8x8xf32>, vector<8x8xf32>, vector<8x8xf32>, vector<8x8xf32>, vector<8x8xf32>, vector<8x8xf32>, vector<8x8xf32>, vector<8x8xf32> -> vector<8x64xf32>
    %960 = arith.mulf %914, %926 : vector<1x64xf32>
    %961 = vector.broadcast %960 : vector<1x64xf32> to vector<8x64xf32>
    %962 = arith.mulf %961, %959 : vector<8x64xf32>
    %963 = arith.addf %957, %962 : vector<8x64xf32>
    %964 = vector.extract_strided_slice %855 {offsets = [0, 48], sizes = [8, 8], strides = [1, 1]} : vector<8x64xf32> to vector<8x8xf32>
    %965 = tpu.concatenate %964, %964, %964, %964, %964, %964, %964, %964 in 1 : vector<8x8xf32>, vector<8x8xf32>, vector<8x8xf32>, vector<8x8xf32>, vector<8x8xf32>, vector<8x8xf32>, vector<8x8xf32>, vector<8x8xf32> -> vector<8x64xf32>
    %966 = arith.mulf %916, %926 : vector<1x64xf32>
    %967 = vector.broadcast %966 : vector<1x64xf32> to vector<8x64xf32>
    %968 = arith.mulf %967, %965 : vector<8x64xf32>
    %969 = arith.addf %963, %968 : vector<8x64xf32>
    %970 = vector.extract_strided_slice %855 {offsets = [0, 56], sizes = [8, 8], strides = [1, 1]} : vector<8x64xf32> to vector<8x8xf32>
    %971 = tpu.concatenate %970, %970, %970, %970, %970, %970, %970, %970 in 1 : vector<8x8xf32>, vector<8x8xf32>, vector<8x8xf32>, vector<8x8xf32>, vector<8x8xf32>, vector<8x8xf32>, vector<8x8xf32>, vector<8x8xf32> -> vector<8x64xf32>
    %972 = arith.mulf %918, %926 : vector<1x64xf32>
    %973 = vector.broadcast %972 : vector<1x64xf32> to vector<8x64xf32>
    %974 = arith.mulf %973, %971 : vector<8x64xf32>
    %975 = arith.addf %969, %974 : vector<8x64xf32>
    %976 = vector.extract_strided_slice %604 {offsets = [24, 0], sizes = [8, 64], strides = [1, 1]} : vector<32x64xf32> to vector<8x64xf32>
    %977 = vector.extract_strided_slice %605 {offsets = [24, 0], sizes = [8, 64], strides = [1, 1]} : vector<32x64xf32> to vector<8x64xf32>
    %978 = vector.extract_strided_slice %606 {offsets = [24, 0], sizes = [8, 64], strides = [1, 1]} : vector<32x64xf32> to vector<8x64xf32>
    %979 = vector.extract_strided_slice %977 {offsets = [0, 0], sizes = [8, 8], strides = [1, 1]} : vector<8x64xf32> to vector<8x8xf32>
    %980 = tpu.concatenate %979, %979, %979, %979, %979, %979, %979, %979 in 1 : vector<8x8xf32>, vector<8x8xf32>, vector<8x8xf32>, vector<8x8xf32>, vector<8x8xf32>, vector<8x8xf32>, vector<8x8xf32>, vector<8x8xf32> -> vector<8x64xf32>
    %981 = arith.mulf %976, %980 : vector<8x64xf32>
    %cst_127 = arith.constant dense<0.000000e+00> : vector<64xf32>
    %982 = vector.multi_reduction <add>, %981, %cst_127 [0] : vector<8x64xf32> to vector<64xf32>
    %983 = vector.shape_cast %982 : vector<64xf32> to vector<1x64xf32>
    %984 = vector.extract_strided_slice %977 {offsets = [0, 8], sizes = [8, 8], strides = [1, 1]} : vector<8x64xf32> to vector<8x8xf32>
    %985 = tpu.concatenate %984, %984, %984, %984, %984, %984, %984, %984 in 1 : vector<8x8xf32>, vector<8x8xf32>, vector<8x8xf32>, vector<8x8xf32>, vector<8x8xf32>, vector<8x8xf32>, vector<8x8xf32>, vector<8x8xf32> -> vector<8x64xf32>
    %986 = arith.mulf %976, %985 : vector<8x64xf32>
    %cst_128 = arith.constant dense<0.000000e+00> : vector<64xf32>
    %987 = vector.multi_reduction <add>, %986, %cst_128 [0] : vector<8x64xf32> to vector<64xf32>
    %988 = vector.shape_cast %987 : vector<64xf32> to vector<1x64xf32>
    %989 = vector.extract_strided_slice %977 {offsets = [0, 16], sizes = [8, 8], strides = [1, 1]} : vector<8x64xf32> to vector<8x8xf32>
    %990 = tpu.concatenate %989, %989, %989, %989, %989, %989, %989, %989 in 1 : vector<8x8xf32>, vector<8x8xf32>, vector<8x8xf32>, vector<8x8xf32>, vector<8x8xf32>, vector<8x8xf32>, vector<8x8xf32>, vector<8x8xf32> -> vector<8x64xf32>
    %991 = arith.mulf %976, %990 : vector<8x64xf32>
    %cst_129 = arith.constant dense<0.000000e+00> : vector<64xf32>
    %992 = vector.multi_reduction <add>, %991, %cst_129 [0] : vector<8x64xf32> to vector<64xf32>
    %993 = vector.shape_cast %992 : vector<64xf32> to vector<1x64xf32>
    %994 = vector.extract_strided_slice %977 {offsets = [0, 24], sizes = [8, 8], strides = [1, 1]} : vector<8x64xf32> to vector<8x8xf32>
    %995 = tpu.concatenate %994, %994, %994, %994, %994, %994, %994, %994 in 1 : vector<8x8xf32>, vector<8x8xf32>, vector<8x8xf32>, vector<8x8xf32>, vector<8x8xf32>, vector<8x8xf32>, vector<8x8xf32>, vector<8x8xf32> -> vector<8x64xf32>
    %996 = arith.mulf %976, %995 : vector<8x64xf32>
    %cst_130 = arith.constant dense<0.000000e+00> : vector<64xf32>
    %997 = vector.multi_reduction <add>, %996, %cst_130 [0] : vector<8x64xf32> to vector<64xf32>
    %998 = vector.shape_cast %997 : vector<64xf32> to vector<1x64xf32>
    %999 = vector.extract_strided_slice %977 {offsets = [0, 32], sizes = [8, 8], strides = [1, 1]} : vector<8x64xf32> to vector<8x8xf32>
    %1000 = tpu.concatenate %999, %999, %999, %999, %999, %999, %999, %999 in 1 : vector<8x8xf32>, vector<8x8xf32>, vector<8x8xf32>, vector<8x8xf32>, vector<8x8xf32>, vector<8x8xf32>, vector<8x8xf32>, vector<8x8xf32> -> vector<8x64xf32>
    %1001 = arith.mulf %976, %1000 : vector<8x64xf32>
    %cst_131 = arith.constant dense<0.000000e+00> : vector<64xf32>
    %1002 = vector.multi_reduction <add>, %1001, %cst_131 [0] : vector<8x64xf32> to vector<64xf32>
    %1003 = vector.shape_cast %1002 : vector<64xf32> to vector<1x64xf32>
    %1004 = vector.extract_strided_slice %977 {offsets = [0, 40], sizes = [8, 8], strides = [1, 1]} : vector<8x64xf32> to vector<8x8xf32>
    %1005 = tpu.concatenate %1004, %1004, %1004, %1004, %1004, %1004, %1004, %1004 in 1 : vector<8x8xf32>, vector<8x8xf32>, vector<8x8xf32>, vector<8x8xf32>, vector<8x8xf32>, vector<8x8xf32>, vector<8x8xf32>, vector<8x8xf32> -> vector<8x64xf32>
    %1006 = arith.mulf %976, %1005 : vector<8x64xf32>
    %cst_132 = arith.constant dense<0.000000e+00> : vector<64xf32>
    %1007 = vector.multi_reduction <add>, %1006, %cst_132 [0] : vector<8x64xf32> to vector<64xf32>
    %1008 = vector.shape_cast %1007 : vector<64xf32> to vector<1x64xf32>
    %1009 = vector.extract_strided_slice %977 {offsets = [0, 48], sizes = [8, 8], strides = [1, 1]} : vector<8x64xf32> to vector<8x8xf32>
    %1010 = tpu.concatenate %1009, %1009, %1009, %1009, %1009, %1009, %1009, %1009 in 1 : vector<8x8xf32>, vector<8x8xf32>, vector<8x8xf32>, vector<8x8xf32>, vector<8x8xf32>, vector<8x8xf32>, vector<8x8xf32>, vector<8x8xf32> -> vector<8x64xf32>
    %1011 = arith.mulf %976, %1010 : vector<8x64xf32>
    %cst_133 = arith.constant dense<0.000000e+00> : vector<64xf32>
    %1012 = vector.multi_reduction <add>, %1011, %cst_133 [0] : vector<8x64xf32> to vector<64xf32>
    %1013 = vector.shape_cast %1012 : vector<64xf32> to vector<1x64xf32>
    %1014 = vector.extract_strided_slice %977 {offsets = [0, 56], sizes = [8, 8], strides = [1, 1]} : vector<8x64xf32> to vector<8x8xf32>
    %1015 = tpu.concatenate %1014, %1014, %1014, %1014, %1014, %1014, %1014, %1014 in 1 : vector<8x8xf32>, vector<8x8xf32>, vector<8x8xf32>, vector<8x8xf32>, vector<8x8xf32>, vector<8x8xf32>, vector<8x8xf32>, vector<8x8xf32> -> vector<8x64xf32>
    %1016 = arith.mulf %976, %1015 : vector<8x64xf32>
    %cst_134 = arith.constant dense<0.000000e+00> : vector<64xf32>
    %1017 = vector.multi_reduction <add>, %1016, %cst_134 [0] : vector<8x64xf32> to vector<64xf32>
    %1018 = vector.shape_cast %1017 : vector<64xf32> to vector<1x64xf32>
    %1019 = arith.maximumf %983, %988 : vector<1x64xf32>
    %1020 = arith.maximumf %1019, %993 : vector<1x64xf32>
    %1021 = arith.maximumf %1020, %998 : vector<1x64xf32>
    %1022 = arith.maximumf %1021, %1003 : vector<1x64xf32>
    %1023 = arith.maximumf %1022, %1008 : vector<1x64xf32>
    %1024 = arith.maximumf %1023, %1013 : vector<1x64xf32>
    %1025 = arith.maximumf %1024, %1018 : vector<1x64xf32>
    %1026 = arith.subf %983, %1025 : vector<1x64xf32>
    %1027 = math.exp %1026 : vector<1x64xf32>
    %1028 = arith.subf %988, %1025 : vector<1x64xf32>
    %1029 = math.exp %1028 : vector<1x64xf32>
    %1030 = arith.subf %993, %1025 : vector<1x64xf32>
    %1031 = math.exp %1030 : vector<1x64xf32>
    %1032 = arith.subf %998, %1025 : vector<1x64xf32>
    %1033 = math.exp %1032 : vector<1x64xf32>
    %1034 = arith.subf %1003, %1025 : vector<1x64xf32>
    %1035 = math.exp %1034 : vector<1x64xf32>
    %1036 = arith.subf %1008, %1025 : vector<1x64xf32>
    %1037 = math.exp %1036 : vector<1x64xf32>
    %1038 = arith.subf %1013, %1025 : vector<1x64xf32>
    %1039 = math.exp %1038 : vector<1x64xf32>
    %1040 = arith.subf %1018, %1025 : vector<1x64xf32>
    %1041 = math.exp %1040 : vector<1x64xf32>
    %1042 = arith.addf %1027, %1029 : vector<1x64xf32>
    %1043 = arith.addf %1042, %1031 : vector<1x64xf32>
    %1044 = arith.addf %1043, %1033 : vector<1x64xf32>
    %1045 = arith.addf %1044, %1035 : vector<1x64xf32>
    %1046 = arith.addf %1045, %1037 : vector<1x64xf32>
    %1047 = arith.addf %1046, %1039 : vector<1x64xf32>
    %1048 = arith.addf %1047, %1041 : vector<1x64xf32>
    %1049 = tpu.reciprocal %1048 {approx = true} : vector<1x64xf32> -> vector<1x64xf32>
    %cst_135 = arith.constant 0.000000e+00 : f32
    %1050 = vector.broadcast %cst_135 : f32 to vector<8x64xf32>
    %1051 = vector.extract_strided_slice %978 {offsets = [0, 0], sizes = [8, 8], strides = [1, 1]} : vector<8x64xf32> to vector<8x8xf32>
    %1052 = tpu.concatenate %1051, %1051, %1051, %1051, %1051, %1051, %1051, %1051 in 1 : vector<8x8xf32>, vector<8x8xf32>, vector<8x8xf32>, vector<8x8xf32>, vector<8x8xf32>, vector<8x8xf32>, vector<8x8xf32>, vector<8x8xf32> -> vector<8x64xf32>
    %1053 = arith.mulf %1027, %1049 : vector<1x64xf32>
    %1054 = vector.broadcast %1053 : vector<1x64xf32> to vector<8x64xf32>
    %1055 = arith.mulf %1054, %1052 : vector<8x64xf32>
    %1056 = arith.addf %1050, %1055 : vector<8x64xf32>
    %1057 = vector.extract_strided_slice %978 {offsets = [0, 8], sizes = [8, 8], strides = [1, 1]} : vector<8x64xf32> to vector<8x8xf32>
    %1058 = tpu.concatenate %1057, %1057, %1057, %1057, %1057, %1057, %1057, %1057 in 1 : vector<8x8xf32>, vector<8x8xf32>, vector<8x8xf32>, vector<8x8xf32>, vector<8x8xf32>, vector<8x8xf32>, vector<8x8xf32>, vector<8x8xf32> -> vector<8x64xf32>
    %1059 = arith.mulf %1029, %1049 : vector<1x64xf32>
    %1060 = vector.broadcast %1059 : vector<1x64xf32> to vector<8x64xf32>
    %1061 = arith.mulf %1060, %1058 : vector<8x64xf32>
    %1062 = arith.addf %1056, %1061 : vector<8x64xf32>
    %1063 = vector.extract_strided_slice %978 {offsets = [0, 16], sizes = [8, 8], strides = [1, 1]} : vector<8x64xf32> to vector<8x8xf32>
    %1064 = tpu.concatenate %1063, %1063, %1063, %1063, %1063, %1063, %1063, %1063 in 1 : vector<8x8xf32>, vector<8x8xf32>, vector<8x8xf32>, vector<8x8xf32>, vector<8x8xf32>, vector<8x8xf32>, vector<8x8xf32>, vector<8x8xf32> -> vector<8x64xf32>
    %1065 = arith.mulf %1031, %1049 : vector<1x64xf32>
    %1066 = vector.broadcast %1065 : vector<1x64xf32> to vector<8x64xf32>
    %1067 = arith.mulf %1066, %1064 : vector<8x64xf32>
    %1068 = arith.addf %1062, %1067 : vector<8x64xf32>
    %1069 = vector.extract_strided_slice %978 {offsets = [0, 24], sizes = [8, 8], strides = [1, 1]} : vector<8x64xf32> to vector<8x8xf32>
    %1070 = tpu.concatenate %1069, %1069, %1069, %1069, %1069, %1069, %1069, %1069 in 1 : vector<8x8xf32>, vector<8x8xf32>, vector<8x8xf32>, vector<8x8xf32>, vector<8x8xf32>, vector<8x8xf32>, vector<8x8xf32>, vector<8x8xf32> -> vector<8x64xf32>
    %1071 = arith.mulf %1033, %1049 : vector<1x64xf32>
    %1072 = vector.broadcast %1071 : vector<1x64xf32> to vector<8x64xf32>
    %1073 = arith.mulf %1072, %1070 : vector<8x64xf32>
    %1074 = arith.addf %1068, %1073 : vector<8x64xf32>
    %1075 = vector.extract_strided_slice %978 {offsets = [0, 32], sizes = [8, 8], strides = [1, 1]} : vector<8x64xf32> to vector<8x8xf32>
    %1076 = tpu.concatenate %1075, %1075, %1075, %1075, %1075, %1075, %1075, %1075 in 1 : vector<8x8xf32>, vector<8x8xf32>, vector<8x8xf32>, vector<8x8xf32>, vector<8x8xf32>, vector<8x8xf32>, vector<8x8xf32>, vector<8x8xf32> -> vector<8x64xf32>
    %1077 = arith.mulf %1035, %1049 : vector<1x64xf32>
    %1078 = vector.broadcast %1077 : vector<1x64xf32> to vector<8x64xf32>
    %1079 = arith.mulf %1078, %1076 : vector<8x64xf32>
    %1080 = arith.addf %1074, %1079 : vector<8x64xf32>
    %1081 = vector.extract_strided_slice %978 {offsets = [0, 40], sizes = [8, 8], strides = [1, 1]} : vector<8x64xf32> to vector<8x8xf32>
    %1082 = tpu.concatenate %1081, %1081, %1081, %1081, %1081, %1081, %1081, %1081 in 1 : vector<8x8xf32>, vector<8x8xf32>, vector<8x8xf32>, vector<8x8xf32>, vector<8x8xf32>, vector<8x8xf32>, vector<8x8xf32>, vector<8x8xf32> -> vector<8x64xf32>
    %1083 = arith.mulf %1037, %1049 : vector<1x64xf32>
    %1084 = vector.broadcast %1083 : vector<1x64xf32> to vector<8x64xf32>
    %1085 = arith.mulf %1084, %1082 : vector<8x64xf32>
    %1086 = arith.addf %1080, %1085 : vector<8x64xf32>
    %1087 = vector.extract_strided_slice %978 {offsets = [0, 48], sizes = [8, 8], strides = [1, 1]} : vector<8x64xf32> to vector<8x8xf32>
    %1088 = tpu.concatenate %1087, %1087, %1087, %1087, %1087, %1087, %1087, %1087 in 1 : vector<8x8xf32>, vector<8x8xf32>, vector<8x8xf32>, vector<8x8xf32>, vector<8x8xf32>, vector<8x8xf32>, vector<8x8xf32>, vector<8x8xf32> -> vector<8x64xf32>
    %1089 = arith.mulf %1039, %1049 : vector<1x64xf32>
    %1090 = vector.broadcast %1089 : vector<1x64xf32> to vector<8x64xf32>
    %1091 = arith.mulf %1090, %1088 : vector<8x64xf32>
    %1092 = arith.addf %1086, %1091 : vector<8x64xf32>
    %1093 = vector.extract_strided_slice %978 {offsets = [0, 56], sizes = [8, 8], strides = [1, 1]} : vector<8x64xf32> to vector<8x8xf32>
    %1094 = tpu.concatenate %1093, %1093, %1093, %1093, %1093, %1093, %1093, %1093 in 1 : vector<8x8xf32>, vector<8x8xf32>, vector<8x8xf32>, vector<8x8xf32>, vector<8x8xf32>, vector<8x8xf32>, vector<8x8xf32>, vector<8x8xf32> -> vector<8x64xf32>
    %1095 = arith.mulf %1041, %1049 : vector<1x64xf32>
    %1096 = vector.broadcast %1095 : vector<1x64xf32> to vector<8x64xf32>
    %1097 = arith.mulf %1096, %1094 : vector<8x64xf32>
    %1098 = arith.addf %1092, %1097 : vector<8x64xf32>
    %1099 = tpu.concatenate %729, %852, %975, %1098 in 0 : vector<8x64xf32>, vector<8x64xf32>, vector<8x64xf32>, vector<8x64xf32> -> vector<32x64xf32>
    %c1_136 = arith.constant 1 : index
    %c0_137 = arith.constant 0 : index
    %c0_138 = arith.constant 0 : index
    %1100 = vector.load %arg6[%c1_136, %c0_137, %c0_138] : memref<2x32x32xbf16, #tpu.memory_space<vmem>>, vector<1x32x32xbf16>
    %1101 = vector.shape_cast %1100 : vector<1x32x32xbf16> to vector<32x32xbf16>
    %1102 = arith.truncf %1099 : vector<32x64xf32> to vector<32x64xbf16>
    %cst_139 = arith.constant dense<0.000000e+00> : vector<32x64xf32>
    %1103 = tpu.matmul %1101, %1102, %cst_139 {dimension_numbers = #tpu.dot_dimension_numbers<[1], [0], [0], [1], [0, 0, 1, 1], [], []>} : vector<32x32xbf16>, vector<32x64xbf16>, vector<32x64xf32> -> vector<32x64xf32>
    %c1_140 = arith.constant 1 : index
    %c0_141 = arith.constant 0 : index
    %c0_142 = arith.constant 0 : index
    %1104 = vector.load %arg7[%c1_140, %c0_141, %c0_142] : memref<2x32x1xf32, #tpu.memory_space<vmem>>, vector<1x32x1xf32>
    %1105 = vector.shape_cast %1104 : vector<1x32x1xf32> to vector<32x1xf32>
    %1106 = vector.broadcast %1105 : vector<32x1xf32> to vector<32x64xf32>
    %1107 = arith.addf %1103, %1106 : vector<32x64xf32>
    %1108 = arith.addf %593, %1107 : vector<32x64xf32>
    %c1_143 = arith.constant 1 : index
    %c0_144 = arith.constant 0 : index
    %c0_145 = arith.constant 0 : index
    %1109 = vector.load %arg12[%c1_143, %c0_144, %c0_145] : memref<2x32x1xf32, #tpu.memory_space<vmem>>, vector<1x32x1xf32>
    %1110 = vector.shape_cast %1109 : vector<1x32x1xf32> to vector<32x1xf32>
    %c1_146 = arith.constant 1 : index
    %c0_147 = arith.constant 0 : index
    %c0_148 = arith.constant 0 : index
    %1111 = vector.load %arg13[%c1_146, %c0_147, %c0_148] : memref<2x32x1xf32, #tpu.memory_space<vmem>>, vector<1x32x1xf32>
    %1112 = vector.shape_cast %1111 : vector<1x32x1xf32> to vector<32x1xf32>
    %cst_149 = arith.constant dense<0.000000e+00> : vector<64xf32>
    %1113 = vector.multi_reduction <add>, %1108, %cst_149 [0] : vector<32x64xf32> to vector<64xf32>
    %1114 = vector.shape_cast %1113 : vector<64xf32> to vector<1x64xf32>
    %cst_150 = arith.constant 3.200000e+01 : f32
    %1115 = vector.broadcast %cst_150 : f32 to vector<1x64xf32>
    %1116 = arith.divf %1114, %1115 : vector<1x64xf32>
    %1117 = vector.broadcast %1116 : vector<1x64xf32> to vector<32x64xf32>
    %1118 = arith.subf %1108, %1117 : vector<32x64xf32>
    %1119 = arith.mulf %1118, %1118 : vector<32x64xf32>
    %cst_151 = arith.constant dense<0.000000e+00> : vector<64xf32>
    %1120 = vector.multi_reduction <add>, %1119, %cst_151 [0] : vector<32x64xf32> to vector<64xf32>
    %1121 = vector.shape_cast %1120 : vector<64xf32> to vector<1x64xf32>
    %cst_152 = arith.constant 3.200000e+01 : f32
    %1122 = vector.broadcast %cst_152 : f32 to vector<1x64xf32>
    %1123 = arith.divf %1121, %1122 : vector<1x64xf32>
    %1124 = vector.broadcast %1116 : vector<1x64xf32> to vector<32x64xf32>
    %1125 = arith.subf %1108, %1124 : vector<32x64xf32>
    %cst_153 = arith.constant 9.99999974E-6 : f32
    %1126 = vector.broadcast %cst_153 : f32 to vector<1x64xf32>
    %1127 = arith.addf %1123, %1126 : vector<1x64xf32>
    %1128 = math.rsqrt %1127 : vector<1x64xf32>
    %1129 = vector.broadcast %1128 : vector<1x64xf32> to vector<32x64xf32>
    %1130 = arith.mulf %1125, %1129 : vector<32x64xf32>
    %1131 = vector.broadcast %1110 : vector<32x1xf32> to vector<32x64xf32>
    %1132 = arith.mulf %1130, %1131 : vector<32x64xf32>
    %1133 = vector.broadcast %1112 : vector<32x1xf32> to vector<32x64xf32>
    %1134 = arith.addf %1132, %1133 : vector<32x64xf32>
    %c1_154 = arith.constant 1 : index
    %c0_155 = arith.constant 0 : index
    %c0_156 = arith.constant 0 : index
    %1135 = vector.load %arg8[%c1_154, %c0_155, %c0_156] : memref<2x64x32xbf16, #tpu.memory_space<vmem>>, vector<1x64x32xbf16>
    %1136 = vector.shape_cast %1135 : vector<1x64x32xbf16> to vector<64x32xbf16>
    %1137 = arith.truncf %1134 : vector<32x64xf32> to vector<32x64xbf16>
    %cst_157 = arith.constant dense<0.000000e+00> : vector<64x64xf32>
    %1138 = tpu.matmul %1136, %1137, %cst_157 {dimension_numbers = #tpu.dot_dimension_numbers<[1], [0], [0], [1], [0, 0, 1, 1], [], []>} : vector<64x32xbf16>, vector<32x64xbf16>, vector<64x64xf32> -> vector<64x64xf32>
    %c1_158 = arith.constant 1 : index
    %c0_159 = arith.constant 0 : index
    %c0_160 = arith.constant 0 : index
    %1139 = vector.load %arg9[%c1_158, %c0_159, %c0_160] : memref<2x64x1xf32, #tpu.memory_space<vmem>>, vector<1x64x1xf32>
    %1140 = vector.shape_cast %1139 : vector<1x64x1xf32> to vector<64x1xf32>
    %1141 = vector.broadcast %1140 : vector<64x1xf32> to vector<64x64xf32>
    %1142 = arith.addf %1138, %1141 : vector<64x64xf32>
    %cst_161 = arith.constant 0.000000e+00 : f32
    %1143 = vector.broadcast %cst_161 : f32 to vector<64x64xf32>
    %1144 = arith.maximumf %1142, %1143 : vector<64x64xf32>
    %c1_162 = arith.constant 1 : index
    %c0_163 = arith.constant 0 : index
    %c0_164 = arith.constant 0 : index
    %1145 = vector.load %arg10[%c1_162, %c0_163, %c0_164] : memref<2x32x64xbf16, #tpu.memory_space<vmem>>, vector<1x32x64xbf16>
    %1146 = vector.shape_cast %1145 : vector<1x32x64xbf16> to vector<32x64xbf16>
    %1147 = arith.truncf %1144 : vector<64x64xf32> to vector<64x64xbf16>
    %cst_165 = arith.constant dense<0.000000e+00> : vector<32x64xf32>
    %1148 = tpu.matmul %1146, %1147, %cst_165 {dimension_numbers = #tpu.dot_dimension_numbers<[1], [0], [0], [1], [0, 0, 1, 1], [], []>} : vector<32x64xbf16>, vector<64x64xbf16>, vector<32x64xf32> -> vector<32x64xf32>
    %c1_166 = arith.constant 1 : index
    %c0_167 = arith.constant 0 : index
    %c0_168 = arith.constant 0 : index
    %1149 = vector.load %arg11[%c1_166, %c0_167, %c0_168] : memref<2x32x1xf32, #tpu.memory_space<vmem>>, vector<1x32x1xf32>
    %1150 = vector.shape_cast %1149 : vector<1x32x1xf32> to vector<32x1xf32>
    %1151 = vector.broadcast %1150 : vector<32x1xf32> to vector<32x64xf32>
    %1152 = arith.addf %1148, %1151 : vector<32x64xf32>
    %1153 = arith.addf %1134, %1152 : vector<32x64xf32>
    %c1_169 = arith.constant 1 : index
    %c0_170 = arith.constant 0 : index
    %c0_171 = arith.constant 0 : index
    %1154 = vector.load %arg14[%c1_169, %c0_170, %c0_171] : memref<2x32x1xf32, #tpu.memory_space<vmem>>, vector<1x32x1xf32>
    %1155 = vector.shape_cast %1154 : vector<1x32x1xf32> to vector<32x1xf32>
    %c1_172 = arith.constant 1 : index
    %c0_173 = arith.constant 0 : index
    %c0_174 = arith.constant 0 : index
    %1156 = vector.load %arg15[%c1_172, %c0_173, %c0_174] : memref<2x32x1xf32, #tpu.memory_space<vmem>>, vector<1x32x1xf32>
    %1157 = vector.shape_cast %1156 : vector<1x32x1xf32> to vector<32x1xf32>
    %cst_175 = arith.constant dense<0.000000e+00> : vector<64xf32>
    %1158 = vector.multi_reduction <add>, %1153, %cst_175 [0] : vector<32x64xf32> to vector<64xf32>
    %1159 = vector.shape_cast %1158 : vector<64xf32> to vector<1x64xf32>
    %cst_176 = arith.constant 3.200000e+01 : f32
    %1160 = vector.broadcast %cst_176 : f32 to vector<1x64xf32>
    %1161 = arith.divf %1159, %1160 : vector<1x64xf32>
    %1162 = vector.broadcast %1161 : vector<1x64xf32> to vector<32x64xf32>
    %1163 = arith.subf %1153, %1162 : vector<32x64xf32>
    %1164 = arith.mulf %1163, %1163 : vector<32x64xf32>
    %cst_177 = arith.constant dense<0.000000e+00> : vector<64xf32>
    %1165 = vector.multi_reduction <add>, %1164, %cst_177 [0] : vector<32x64xf32> to vector<64xf32>
    %1166 = vector.shape_cast %1165 : vector<64xf32> to vector<1x64xf32>
    %cst_178 = arith.constant 3.200000e+01 : f32
    %1167 = vector.broadcast %cst_178 : f32 to vector<1x64xf32>
    %1168 = arith.divf %1166, %1167 : vector<1x64xf32>
    %1169 = vector.broadcast %1161 : vector<1x64xf32> to vector<32x64xf32>
    %1170 = arith.subf %1153, %1169 : vector<32x64xf32>
    %cst_179 = arith.constant 9.99999974E-6 : f32
    %1171 = vector.broadcast %cst_179 : f32 to vector<1x64xf32>
    %1172 = arith.addf %1168, %1171 : vector<1x64xf32>
    %1173 = math.rsqrt %1172 : vector<1x64xf32>
    %1174 = vector.broadcast %1173 : vector<1x64xf32> to vector<32x64xf32>
    %1175 = arith.mulf %1170, %1174 : vector<32x64xf32>
    %1176 = vector.broadcast %1155 : vector<32x1xf32> to vector<32x64xf32>
    %1177 = arith.mulf %1175, %1176 : vector<32x64xf32>
    %1178 = vector.broadcast %1157 : vector<32x1xf32> to vector<32x64xf32>
    %1179 = arith.addf %1177, %1178 : vector<32x64xf32>
    %1180 = vector.extract_strided_slice %1179 {offsets = [0, 0], sizes = [32, 8], strides = [1, 1]} : vector<32x64xf32> to vector<32x8xf32>
    %1181 = vector.extract_strided_slice %1179 {offsets = [0, 8], sizes = [32, 8], strides = [1, 1]} : vector<32x64xf32> to vector<32x8xf32>
    %1182 = arith.addf %1180, %1181 : vector<32x8xf32>
    %1183 = vector.extract_strided_slice %1179 {offsets = [0, 16], sizes = [32, 8], strides = [1, 1]} : vector<32x64xf32> to vector<32x8xf32>
    %1184 = arith.addf %1182, %1183 : vector<32x8xf32>
    %1185 = vector.extract_strided_slice %1179 {offsets = [0, 24], sizes = [32, 8], strides = [1, 1]} : vector<32x64xf32> to vector<32x8xf32>
    %1186 = arith.addf %1184, %1185 : vector<32x8xf32>
    %1187 = vector.extract_strided_slice %1179 {offsets = [0, 32], sizes = [32, 8], strides = [1, 1]} : vector<32x64xf32> to vector<32x8xf32>
    %1188 = arith.addf %1186, %1187 : vector<32x8xf32>
    %1189 = vector.extract_strided_slice %1179 {offsets = [0, 40], sizes = [32, 8], strides = [1, 1]} : vector<32x64xf32> to vector<32x8xf32>
    %1190 = arith.addf %1188, %1189 : vector<32x8xf32>
    %1191 = vector.extract_strided_slice %1179 {offsets = [0, 48], sizes = [32, 8], strides = [1, 1]} : vector<32x64xf32> to vector<32x8xf32>
    %1192 = arith.addf %1190, %1191 : vector<32x8xf32>
    %1193 = vector.extract_strided_slice %1179 {offsets = [0, 56], sizes = [32, 8], strides = [1, 1]} : vector<32x64xf32> to vector<32x8xf32>
    %1194 = arith.addf %1192, %1193 : vector<32x8xf32>
    %cst_180 = arith.constant 1.250000e-01 : f32
    %1195 = vector.broadcast %cst_180 : f32 to vector<32x8xf32>
    %1196 = arith.mulf %1194, %1195 : vector<32x8xf32>
    %c0_181 = arith.constant 0 : index
    %c0_182 = arith.constant 0 : index
    %1197 = vector.load %arg16[%c0_181, %c0_182] : memref<32x8xf32, #tpu.memory_space<vmem>>, vector<32x8xf32>
    tpu.vector_store %arg16[%c0_181, %c0_182], %1196 {strides = array<i32>} : memref<32x8xf32, #tpu.memory_space<vmem>>, vector<32x8xf32>,
    return
  }
  func.func @transform_0(%arg0: i32) -> (i32, i32, i32) {
    %c0_i32 = arith.constant 0 : i32
    %c0_i32_0 = arith.constant 0 : i32
    %c0_i32_1 = arith.constant 0 : i32
    return %arg0, %c0_i32, %c0_i32_0 : i32, i32, i32
  }
  func.func @transform_1(%arg0: i32) -> (i32, i32) {
    %c0_i32 = arith.constant 0 : i32
    %c0_i32_0 = arith.constant 0 : i32
    %c0_i32_1 = arith.constant 0 : i32
    return %c0_i32, %c0_i32_0 : i32, i32
  }
  func.func @transform_2(%arg0: i32) -> (i32, i32) {
    %c0_i32 = arith.constant 0 : i32
    %c0_i32_0 = arith.constant 0 : i32
    %c0_i32_1 = arith.constant 0 : i32
    return %c0_i32, %c0_i32_0 : i32, i32
  }
  func.func @transform_3(%arg0: i32) -> (i32, i32, i32) {
    %c0_i32 = arith.constant 0 : i32
    %c0_i32_0 = arith.constant 0 : i32
    %c0_i32_1 = arith.constant 0 : i32
    %c0_i32_2 = arith.constant 0 : i32
    return %c0_i32, %c0_i32_0, %c0_i32_1 : i32, i32, i32
  }
  func.func @transform_4(%arg0: i32) -> (i32, i32, i32) {
    %c0_i32 = arith.constant 0 : i32
    %c0_i32_0 = arith.constant 0 : i32
    %c0_i32_1 = arith.constant 0 : i32
    %c0_i32_2 = arith.constant 0 : i32
    return %c0_i32, %c0_i32_0, %c0_i32_1 : i32, i32, i32
  }
  func.func @transform_5(%arg0: i32) -> (i32, i32, i32) {
    %c0_i32 = arith.constant 0 : i32
    %c0_i32_0 = arith.constant 0 : i32
    %c0_i32_1 = arith.constant 0 : i32
    %c0_i32_2 = arith.constant 0 : i32
    return %c0_i32, %c0_i32_0, %c0_i32_1 : i32, i32, i32
  }
  func.func @transform_6(%arg0: i32) -> (i32, i32, i32) {
    %c0_i32 = arith.constant 0 : i32
    %c0_i32_0 = arith.constant 0 : i32
    %c0_i32_1 = arith.constant 0 : i32
    %c0_i32_2 = arith.constant 0 : i32
    return %c0_i32, %c0_i32_0, %c0_i32_1 : i32, i32, i32
  }
  func.func @transform_7(%arg0: i32) -> (i32, i32, i32) {
    %c0_i32 = arith.constant 0 : i32
    %c0_i32_0 = arith.constant 0 : i32
    %c0_i32_1 = arith.constant 0 : i32
    %c0_i32_2 = arith.constant 0 : i32
    return %c0_i32, %c0_i32_0, %c0_i32_1 : i32, i32, i32
  }
  func.func @transform_8(%arg0: i32) -> (i32, i32, i32) {
    %c0_i32 = arith.constant 0 : i32
    %c0_i32_0 = arith.constant 0 : i32
    %c0_i32_1 = arith.constant 0 : i32
    %c0_i32_2 = arith.constant 0 : i32
    return %c0_i32, %c0_i32_0, %c0_i32_1 : i32, i32, i32
  }
  func.func @transform_9(%arg0: i32) -> (i32, i32, i32) {
    %c0_i32 = arith.constant 0 : i32
    %c0_i32_0 = arith.constant 0 : i32
    %c0_i32_1 = arith.constant 0 : i32
    %c0_i32_2 = arith.constant 0 : i32
    return %c0_i32, %c0_i32_0, %c0_i32_1 : i32, i32, i32
  }
  func.func @transform_10(%arg0: i32) -> (i32, i32, i32) {
    %c0_i32 = arith.constant 0 : i32
    %c0_i32_0 = arith.constant 0 : i32
    %c0_i32_1 = arith.constant 0 : i32
    %c0_i32_2 = arith.constant 0 : i32
    return %c0_i32, %c0_i32_0, %c0_i32_1 : i32, i32, i32
  }
  func.func @transform_11(%arg0: i32) -> (i32, i32, i32) {
    %c0_i32 = arith.constant 0 : i32
    %c0_i32_0 = arith.constant 0 : i32
    %c0_i32_1 = arith.constant 0 : i32
    %c0_i32_2 = arith.constant 0 : i32
    return %c0_i32, %c0_i32_0, %c0_i32_1 : i32, i32, i32
  }
  func.func @transform_12(%arg0: i32) -> (i32, i32, i32) {
    %c0_i32 = arith.constant 0 : i32
    %c0_i32_0 = arith.constant 0 : i32
    %c0_i32_1 = arith.constant 0 : i32
    %c0_i32_2 = arith.constant 0 : i32
    return %c0_i32, %c0_i32_0, %c0_i32_1 : i32, i32, i32
  }
  func.func @transform_13(%arg0: i32) -> (i32, i32, i32) {
    %c0_i32 = arith.constant 0 : i32
    %c0_i32_0 = arith.constant 0 : i32
    %c0_i32_1 = arith.constant 0 : i32
    %c0_i32_2 = arith.constant 0 : i32
    return %c0_i32, %c0_i32_0, %c0_i32_1 : i32, i32, i32
  }
  func.func @transform_14(%arg0: i32) -> (i32, i32, i32) {
    %c0_i32 = arith.constant 0 : i32
    %c0_i32_0 = arith.constant 0 : i32
    %c0_i32_1 = arith.constant 0 : i32
    %c0_i32_2 = arith.constant 0 : i32
    return %c0_i32, %c0_i32_0, %c0_i32_1 : i32, i32, i32
  }
  func.func @transform_15(%arg0: i32) -> (i32, i32) {
    %c0_i32 = arith.constant 0 : i32
    %c0_i32_0 = arith.constant 0 : i32
    return %c0_i32, %arg0 : i32, i32
  }
}

</mosaic_0001>

<bundles_post_ra>
// kernel: tpu_custom_call.1
= control target key start
LH: loop header
LB: loop body
LE: loop exit
PB: predicated region body
PF: predicated region fallthrough
CT: control target
= control target key end

     0   :  { %v4869_v0 = vmov 0   ;;  %vm210_vm0 = vcmask 261120   ;;  %s4870_s22 = smov 120   ;;  %s4871_s23 = smov 8   ;;  %vm336_vm1 = vcmask 64512   ;;  %vm338_vm2 = vcmask 130048   ;;  %s9418_s1 = inlined_call_operand.vmem [shape: f32[32,1], index: 1, kind: input, shape index: {}]   ;;  %s9419_s4 = inlined_call_operand.vmem [shape: f32[2,96,1], index: 4, kind: input, shape index: {}]   ;;  %s9420_s3 = inlined_call_operand.vmem [shape: bf16[2,96,32], index: 3, kind: input, shape index: {}]   ;;  %s9421_s0 = inlined_call_operand.vmem [shape: f32[1,1,64], index: 0, kind: input, shape index: {}]   ;;  %s9422_s2 = inlined_call_operand.vmem [shape: f32[32,64], index: 2, kind: input, shape index: {}]   ;;  %s9423_s6 = inlined_call_operand.vmem [shape: f32[2,32,1], index: 6, kind: input, shape index: {}]   ;;  %s9424_s11 = inlined_call_operand.vmem [shape: f32[2,32,1], index: 11, kind: input, shape index: {}]   ;;  %s9425_s12 = inlined_call_operand.vmem [shape: f32[2,32,1], index: 12, kind: input, shape index: {}]   ;;  %s9426_s8 = inlined_call_operand.vmem [shape: f32[2,64,1], index: 8, kind: input, shape index: {}]   ;;  %s9427_s10 = inlined_call_operand.vmem [shape: f32[2,32,1], index: 10, kind: input, shape index: {}]   ;;  %s9428_s5 = inlined_call_operand.vmem [shape: bf16[2,32,32], index: 5, kind: input, shape index: {}]   ;;  %s9429_s13 = inlined_call_operand.vmem [shape: f32[2,32,1], index: 13, kind: input, shape index: {}]   ;;  %s9430_s14 = inlined_call_operand.vmem [shape: f32[2,32,1], index: 14, kind: input, shape index: {}]   ;;  %s9431_s7 = inlined_call_operand.vmem [shape: bf16[2,64,32], index: 7, kind: input, shape index: {}]   ;;  %s9432_s9 = inlined_call_operand.vmem [shape: bf16[2,32,64], index: 9, kind: input, shape index: {}]   ;;  %s9433_s15 = inlined_call_operand.vmem [shape: f32[32,8], index: 15, kind: output, shape index: {}]  }
   0x1   :  { %4688 = vset.pattern.permute.xlu1 %v4869_v0  ;;  %4687 = vset.pattern.permute.xlu0 %v4869_v0  ;;  %v54_v1 = vld [vmem:[%s9418_s1 + $0x10] sm:$0xff]  ;;  %v52_v2 = vld [vmem:[%s9418_s1] sm:$0xff]  ;;  %v55_v3 = vld [vmem:[%s9418_s1 + $0x18] sm:$0xff]  ;;  %s4872_s24 = smov 112   ;;  %s4873_s25 = smov 16   ;;  %vm340_vm3 = vcmask 195584  }
   0x2   :  { %68 = vperm.xlu1 %4688, %v54_v1   ;;  %58 = vperm.xlu0 %4687, %v52_v2   ;;  %v53_v4 = vld [vmem:[%s9418_s1 + $0x8] sm:$0xff]  ;;  %v112_v6 = vld [vmem:[%s9419_s4 + $0x20] sm:$0xff]  ;;  %v115_v7 = vld [vmem:[%s9419_s4 + $0x38] sm:$0xff]  ;;  %s4874_s26 = smov 104   ;;  %s4875_s27 = smov 24   ;;  %vm343_vm4 = vcmask 326656  }
   0x3   :  { %v113_v5 = vld [vmem:[%s9419_s4 + $0x28] sm:$0xff]  ;;  %v114_v8 = vld [vmem:[%s9419_s4 + $0x30] sm:$0xff]  ;;  %v108_v10 = vld [vmem:[%s9419_s4] sm:$0xff]  ;;  %s4876_s28 = smov 96   ;;  %s4877_s29 = smov 32   ;;  %vm345_vm5 = vcmask 392192  }
   0x4   :  { %v109_v9 = vld [vmem:[%s9419_s4 + $0x8] sm:$0xff]  ;;  %v111_v11 = vld [vmem:[%s9419_s4 + $0x18] sm:$0xff]  ;;  %v4689_v12 = vld [vmem:[%s9420_s3] sm:$0xff]   ;;  %s4880_s30 = smov 56   ;;  %s9504_s16 = smov 88   ;;  %vm347_vm6 = vcmask 457728  }
   0x5   :  { %v110_v13 = vld [vmem:[%s9419_s4 + $0x10] sm:$0xff]  ;;  %4580 = vmatprep.mubr.msk.bf16.mxu0 %vm210_vm0, %v4689_v12  ;;  %v117_v14 = vld [vmem:[%s9419_s4 + $0x48] sm:$0xff]  ;;  %v116_v15 = vld [vmem:[%s9419_s4 + $0x40] sm:$0xff]  ;;  %s9458_s17 = smov 80   ;;  %s9456_s18 = smov 72   ;;  %vm350_vm7 = vcmask 523264  }
   0x6   :  { %73 = vperm.xlu1 %4688, %v55_v3   ;;  %63 = vperm.xlu0 %4687, %v53_v4   ;;  %v119_v16 = vld [vmem:[%s9419_s4 + $0x58] sm:$0xff]  ;;  %v118_v17 = vld [vmem:[%s9419_s4 + $0x50] sm:$0xff]  ;;  %v4399_v19 = vld [vmem:[%s9421_s0] ss:$0 sm:$0xff]  ;;  %s4878_s0 = smov 40   ;;  %s9706_s21 = smov 80  }
   0x7   :  { %v88_v21 = vld [vmem:[%s9422_s2 + $0x10] sm:$0xff]  ;;  %v89_v24 = vld [vmem:[%s9422_s2 + $0x18] sm:$0xff]  ;;  %v86_v27 = vld [vmem:[%s9422_s2] sm:$0xff] }
   0x8   :  { %v87_v28 = vld [vmem:[%s9422_s2 + $0x8] sm:$0xff]  ;;  %v4691_v38 = vld [vmem:[%s9420_s3 + $0x10] sm:$0xff]   ;;  %v4692_v39 = vld [vmem:[%s9420_s3 + $0x18] sm:$0xff]   ;;  %s4879_s2 = smov 48  }
   0x9   :  { %v4690_v37 = vld [vmem:[%s9420_s3 + $0x8] sm:$0xff]   ;;  %v4693_v40 = vld [vmem:[%s9420_s3 + $0x20] sm:$0xff]  }
   0xa   :  { %147 = vperm.xlu1 %4688, %v113_v5   ;;  %142 = vperm.xlu0 %4687, %v112_v6   ;;  %v4694_v41 = vld [vmem:[%s9420_s3 + $0x28] sm:$0xff]  }
   0xe   :  { %157 = vperm.xlu1 %4688, %v115_v7   ;;  %152 = vperm.xlu0 %4687, %v114_v8  }
  0x12   :  { %127 = vperm.xlu1 %4688, %v109_v9   ;;  %122 = vperm.xlu0 %4687, %v108_v10  }
  0x16   :  { %137 = vperm.xlu1 %4688, %v111_v11   ;;  %132 = vperm.xlu0 %4687, %v110_v13  }
  0x1a   :  { %167 = vperm.xlu1 %4688, %v117_v14   ;;  %162 = vperm.xlu0 %4687, %v116_v15  }
  0x1e   :  { %177 = vperm.xlu1 %4688, %v119_v16   ;;  %172 = vperm.xlu0 %4687, %v118_v17  }
  0x81   :  { %v69_v18 = vpop.permute.xlu1 %68  ;;  %v59_v20 = vpop.permute.xlu0 %58 }
  0x82   :  { %v84_v22 = vmul.f32 %v4399_v19, %v69_v18  ;;  %v82_v23 = vmul.f32 %v4399_v19, %v59_v20 }
  0x84   :  { %v5031_v31 = vadd.f32 %v88_v21, %v84_v22  ;;  %v5035_v33 = vadd.f32 %v86_v27, %v82_v23 }
  0x85   :  { %v74_v25 = vpop.permute.xlu1 %73  ;;  %v64_v26 = vpop.permute.xlu0 %63 }
  0x86   :  { %v85_v29 = vmul.f32 %v4399_v19, %v74_v25  ;;  %v83_v30 = vmul.f32 %v4399_v19, %v64_v26  ;;  %9569 = vst [vmem:[#allocation2_spill] sm:$0xff] %v5031_v31  ;;  %9571 = vst [vmem:[#allocation4_spill] sm:$0xff] %v5035_v33 }
  0x88   :  { %v5033_v32 = vadd.f32 %v89_v24, %v85_v29  ;;  %v5037_v34 = vadd.f32 %v87_v28, %v83_v30 }
  0x89   :  { %v143_v44 = vpop.permute.xlu0 %142  ;;  %v148_v58 = vpop.permute.xlu1 %147 }
  0x8a   :  { %9570 = vst [vmem:[#allocation3_spill] sm:$0xff] %v5033_v32  ;;  %9572 = vst [vmem:[#allocation5_spill] sm:$0xff] %v5037_v34  ;;  %v106_v35 = vpack.c.bf16 %v5037_v34, %v5035_v33  ;;  %v107_v36 = vpack.c.bf16 %v5033_v32, %v5031_v31 }
  0x8c   :  { %4576 = vmatprep.subr.bf16.mxu0 %v106_v35 }
  0x8d   :  { %4577 = vmatpush3.bf16.msra.mxu0 %v106_v35  ;;  %v153_v47 = vpop.permute.xlu0 %152  ;;  %v158_v59 = vpop.permute.xlu1 %157 }
  0x8e   :  { %4578 = vmatprep.subr.bf16.mxu0 %v107_v36 }
  0x91   :  { %4579 = vmatpush3.bf16.msra.mxu0 %v107_v36  ;;  %v5179_v62 = vpop.permute.xlu0 %122  ;;  %v5181_v63 = vpop.permute.xlu1 %127 }
  0x94   :  { %4581 = vmatmul.mubr.msk.bf16.vlgmr.msra.gmra.mrb[0].mxu0 %vm210_vm0, %v4690_v37 }
  0x95   :  { %4584 = vmatprep.mubr.msk.bf16.mxu0 %vm210_vm0, %v4691_v38  ;;  %v133_v0 = vpop.permute.xlu0 %132  ;;  %v5191_v1 = vpop.permute.xlu1 %137 }
  0x99   :  { %v163_v2 = vpop.permute.xlu0 %162  ;;  %v5197_v3 = vpop.permute.xlu1 %167 }
  0x9c   :  { %4585 = vmatmul.mubr.msk.bf16.gmra.mrb[4].mxu0 %vm210_vm0, %v4692_v39 }
  0x9d   :  { %4588 = vmatprep.mubr.msk.bf16.mxu0 %vm210_vm0, %v4693_v40  ;;  %v173_v4 = vpop.permute.xlu0 %172  ;;  %v5207_v5 = vpop.permute.xlu1 %177 }
  0xa4   :  { %4589 = vmatmul.mubr.msk.bf16.gmra.mrb[8].mxu0 %vm210_vm0, %v4694_v41 }
 0x167   :  { %v5063_v42 = vpop.f32.mrb[0].mxu0 }
 0x168   :  { %v5065_v43 = vpop.f32.mrb[1].mxu0  ;;  %v272_v17 = vadd.f32 %v5063_v42, %v133_v0 }
 0x169   :  { %v5067_v45 = vpop.f32.mrb[2].mxu0 }
 0x16a   :  { %v5069_v46 = vpop.f32.mrb[3].mxu0  ;;  %v5270_v28 = vmul.f32 0.35355338, %v272_v17 }
 0x16f   :  { %v4586_v48 = vpop.f32.mrb[4].mxu0 }
 0x170   :  { %v5071_v49 = vadd.f32 %v4586_v48, %v153_v47  ;;  %v279_v50 = vpop.f32.mrb[5].mxu0 }
 0x171   :  { %v4587_v51 = vpop.f32.mrb[6].mxu0  ;;  %v5097_v57 = vadd.f32 %v279_v50, %v143_v44 }
 0x172   :  { %1008 = vrot.lane.b32.xlu1 %v5071_v49, %s4870_s22  ;;  %972 = vrot.lane.b32.xlu0 %v5071_v49, %s4871_s23  ;;  %v282_v52 = vpop.f32.mrb[7].mxu0  ;;  %v5115_v60 = vadd.f32 %v4587_v51, %v158_v59 }
 0x173   :  { %v5157_v61 = vadd.f32 %v282_v52, %v148_v58 }
 0x176   :  { %1026 = vrot.lane.b32.xlu1 %v5071_v49, %s4872_s24  ;;  %975 = vrot.lane.b32.xlu0 %v5071_v49, %s4873_s25 }
 0x177   :  { %v5081_v53 = vpop.f32.mrb[8].mxu0 }
 0x178   :  { %v5083_v54 = vpop.f32.mrb[9].mxu0  ;;  %v5210_v6 = vadd.f32 %v5081_v53, %v173_v4 }
 0x179   :  { %v5085_v55 = vpop.f32.mrb[10].mxu0  ;;  %v5254_v20 = vadd.f32 %v5083_v54, %v163_v2 }
 0x17a   :  { %1044 = vrot.lane.b32.xlu1 %v5071_v49, %s4874_s26  ;;  %978 = vrot.lane.b32.xlu0 %v5071_v49, %s4875_s27  ;;  %v5091_v56 = vpop.f32.mrb[11].mxu0  ;;  %9573 = vst [vmem:[#allocation6_spill] sm:$0xff] %v5210_v6 }
 0x17b   :  { %9574 = vst [vmem:[#allocation7_spill] sm:$0xff] %v5254_v20 }
 0x17e   :  { %1062 = vrot.lane.b32.xlu1 %v5071_v49, %s4876_s28  ;;  %981 = vrot.lane.b32.xlu0 %v5071_v49, %s4877_s29 }
 0x182   :  { %984 = vrot.lane.b32.xlu0 %v5071_v49, %s4878_s0  ;;  %358 = vrot.lane.b32.xlu1 %v5097_v57, %s4870_s22 }
 0x186   :  { %987 = vrot.lane.b32.xlu0 %v5071_v49, %s4879_s2  ;;  %376 = vrot.lane.b32.xlu1 %v5097_v57, %s4872_s24 }
 0x18a   :  { %990 = vrot.lane.b32.xlu0 %v5071_v49, %s4880_s30  ;;  %394 = vrot.lane.b32.xlu1 %v5097_v57, %s4874_s26 }
 0x18e   :  { %1080 = vrot.lane.b32.xlu0 %v5071_v49, %s9504_s16  ;;  %412 = vrot.lane.b32.xlu1 %v5097_v57, %s4876_s28 }
 0x192   :  { %1098 = vrot.lane.b32.xlu0 %v5071_v49, %s9458_s17  ;;  %1333 = vrot.lane.b32.xlu1 %v5115_v60, %s4870_s22 }
 0x196   :  { %1116 = vrot.lane.b32.xlu0 %v5071_v49, %s9456_s18  ;;  %1300 = vrot.lane.b32.xlu1 %v5115_v60, %s4873_s25 }
 0x19a   :  { %1351 = vrot.lane.b32.xlu1 %v5115_v60, %s4872_s24  ;;  %315 = vrot.lane.b32.xlu0 %v5097_v57, %s4871_s23 }
 0x19e   :  { %1306 = vrot.lane.b32.xlu1 %v5115_v60, %s4877_s29  ;;  %318 = vrot.lane.b32.xlu0 %v5097_v57, %s4873_s25 }
 0x1a2   :  { %1369 = vrot.lane.b32.xlu1 %v5115_v60, %s4874_s26  ;;  %321 = vrot.lane.b32.xlu0 %v5097_v57, %s4875_s27 }
 0x1a6   :  { %1312 = vrot.lane.b32.xlu1 %v5115_v60, %s4879_s2  ;;  %324 = vrot.lane.b32.xlu0 %v5097_v57, %s4877_s29 }
 0x1aa   :  { %1387 = vrot.lane.b32.xlu1 %v5115_v60, %s4876_s28  ;;  %327 = vrot.lane.b32.xlu0 %v5097_v57, %s4878_s0 }
 0x1ae   :  { %1405 = vrot.lane.b32.xlu1 %v5115_v60, %s9504_s16  ;;  %330 = vrot.lane.b32.xlu0 %v5097_v57, %s4879_s2 }
 0x1b2   :  { %1423 = vrot.lane.b32.xlu1 %v5115_v60, %s9458_s17  ;;  %333 = vrot.lane.b32.xlu0 %v5097_v57, %s4880_s30 }
 0x1b6   :  { %1441 = vrot.lane.b32.xlu1 %v5115_v60, %s9456_s18  ;;  %430 = vrot.lane.b32.xlu0 %v5097_v57, %s9504_s16 }
 0x1ba   :  { %683 = vrot.lane.b32.xlu1 %v5157_v61, %s4870_s22  ;;  %448 = vrot.lane.b32.xlu0 %v5097_v57, %s9458_s17 }
 0x1be   :  { %650 = vrot.lane.b32.xlu1 %v5157_v61, %s4873_s25  ;;  %466 = vrot.lane.b32.xlu0 %v5097_v57, %s9456_s18 }
 0x1c2   :  { %701 = vrot.lane.b32.xlu1 %v5157_v61, %s4872_s24  ;;  %1297 = vrot.lane.b32.xlu0 %v5115_v60, %s4871_s23 }
 0x1c6   :  { %656 = vrot.lane.b32.xlu1 %v5157_v61, %s4877_s29  ;;  %1303 = vrot.lane.b32.xlu0 %v5115_v60, %s4875_s27 }
 0x1ca   :  { %719 = vrot.lane.b32.xlu1 %v5157_v61, %s4874_s26  ;;  %1309 = vrot.lane.b32.xlu0 %v5115_v60, %s4878_s0 }
 0x1ce   :  { %662 = vrot.lane.b32.xlu1 %v5157_v61, %s4879_s2  ;;  %1315 = vrot.lane.b32.xlu0 %v5115_v60, %s4880_s30 }
 0x1d2   :  { %737 = vrot.lane.b32.xlu1 %v5157_v61, %s4876_s28  ;;  %647 = vrot.lane.b32.xlu0 %v5157_v61, %s4871_s23 }
 0x1d6   :  { %755 = vrot.lane.b32.xlu1 %v5157_v61, %s9504_s16  ;;  %653 = vrot.lane.b32.xlu0 %v5157_v61, %s4875_s27 }
 0x1da   :  { %773 = vrot.lane.b32.xlu1 %v5157_v61, %s9458_s17  ;;  %659 = vrot.lane.b32.xlu0 %v5157_v61, %s4878_s0 }
 0x1de   :  { %791 = vrot.lane.b32.xlu1 %v5157_v61, %s9456_s18  ;;  %665 = vrot.lane.b32.xlu0 %v5157_v61, %s4880_s30 }
 0x1e2   :  { %1205 = vrot.lane.b32.xlu1 %v5210_v6, %s4870_s22  ;;  %1174 = vrot.lane.b32.xlu0 %v5210_v6, %s4871_s23 }
 0x1e4   :  { %v5216_v7 = vpop.permute.xlu1 %1008  ;;  %v5218_v8 = vpop.permute.xlu0 %972 }
 0x1e5   :  { %v1011_v27 = vsel %vm336_vm1, %v5216_v7, %v5071_v49  ;;  %v993_v59 = vsel %vm336_vm1, %v5071_v49, %v5218_v8 }
 0x1e6   :  { %1218 = vrot.lane.b32.xlu1 %v5210_v6, %s4872_s24  ;;  %1177 = vrot.lane.b32.xlu0 %v5210_v6, %s4873_s25  ;;  %v1012_v44 = vsel %vm338_vm2, %v1011_v27, %v5218_v8 }
 0x1e8   :  { %v5224_v9 = vpop.permute.xlu1 %1026  ;;  %v5226_v10 = vpop.permute.xlu0 %975 }
 0x1e9   :  { %v1029_v11 = vsel %vm336_vm1, %v5224_v9, %v5216_v7  ;;  %v1013_v50 = vsel %vm340_vm3, %v1012_v44, %v5226_v10 }
 0x1ea   :  { %1231 = vrot.lane.b32.xlu1 %v5210_v6, %s4874_s26  ;;  %1180 = vrot.lane.b32.xlu0 %v5210_v6, %s4875_s27  ;;  %v1030_v12 = vsel %vm338_vm2, %v1029_v11, %v5071_v49 }
 0x1eb   :  { %v1031_v16 = vsel %vm340_vm3, %v1030_v12, %v5218_v8 }
 0x1ec   :  { %v5237_v13 = vpop.permute.xlu1 %1044  ;;  %v979_v14 = vpop.permute.xlu0 %978  ;;  %v1032_v24 = vsel %vm210_vm0, %v1031_v16, %v5226_v10 }
 0x1ed   :  { %v1047_v15 = vsel %vm336_vm1, %v5237_v13, %v5224_v9  ;;  %v1033_v37 = vsel %vm343_vm4, %v1032_v24, %v979_v14  ;;  %v1014_v53 = vsel %vm210_vm0, %v1013_v50, %v979_v14 }
 0x1ee   :  { %v1048_v18 = vsel %vm338_vm2, %v1047_v15, %v5216_v7  ;;  %1244 = vrot.lane.b32.xlu1 %v5210_v6, %s4876_s28  ;;  %1183 = vrot.lane.b32.xlu0 %v5210_v6, %s4877_s29  ;;  %v994_v15 = vsel %vm338_vm2, %v993_v59, %v5226_v10 }
 0x1ef   :  { %v1049_v19 = vsel %vm340_vm3, %v1048_v18, %v5071_v49  ;;  %v995_v18 = vsel %vm340_vm3, %v994_v15, %v979_v14 }
 0x1f0   :  { %v5256_v21 = vpop.permute.xlu1 %1062  ;;  %v1050_v22 = vsel %vm210_vm0, %v1049_v19, %v5218_v8  ;;  %v982_v23 = vpop.permute.xlu0 %981 }
 0x1f1   :  { %v1065_v25 = vsel %vm336_vm1, %v5256_v21, %v5237_v13  ;;  %v1051_v26 = vsel %vm343_vm4, %v1050_v22, %v5226_v10  ;;  %v1034_v40 = vsel %vm345_vm5, %v1033_v37, %v982_v23  ;;  %v1015_v58 = vsel %vm343_vm4, %v1014_v53, %v982_v23 }
 0x1f2   :  { %v1066_v29 = vsel %vm338_vm2, %v1065_v25, %v5224_v9  ;;  %v1052_v30 = vsel %vm345_vm5, %v1051_v26, %v979_v14  ;;  %555 = vrot.lane.b32.xlu1 %v5254_v20, %s4870_s22  ;;  %1186 = vrot.lane.b32.xlu0 %v5210_v6, %s4878_s0  ;;  %v996_v22 = vsel %vm210_vm0, %v995_v18, %v982_v23 }
 0x1f3   :  { %v1067_v35 = vsel %vm340_vm3, %v1066_v29, %v5216_v7  ;;  %v1053_v36 = vsel %vm347_vm6, %v1052_v30, %v982_v23 }
 0x1f4   :  { %v1068_v38 = vsel %vm210_vm0, %v1067_v35, %v5071_v49  ;;  %v1054_v39 = vmul.f32 %v1053_v36, %v5270_v28  ;;  %v985_v41 = vpop.permute.xlu0 %984  ;;  %v5287_v42 = vpop.permute.xlu1 %358 }
 0x1f5   :  { %v1069_v47 = vsel %vm343_vm4, %v1068_v38, %v5218_v8  ;;  %v1035_v48 = vsel %vm347_vm6, %v1034_v40, %v985_v41  ;;  %v1016_v0 = vsel %vm345_vm5, %v1015_v58, %v985_v41  ;;  %v997_v26 = vsel %vm343_vm4, %v996_v22, %v985_v41 }
 0x1f6   :  { %v1070_v51 = vsel %vm345_vm5, %v1069_v47, %v5226_v10  ;;  %v1036_v52 = vmul.f32 %v1035_v48, %v5270_v28  ;;  %568 = vrot.lane.b32.xlu1 %v5254_v20, %s4872_s24  ;;  %1189 = vrot.lane.b32.xlu0 %v5210_v6, %s4879_s2  ;;  %v1055_v54 = vsel %vm350_vm7, %v1054_v39, 0.0  ;;  %v5337_v38 = vadd.f32 %v5085_v55, %v5207_v5 }
 0x1f7   :  { %v1071_v11 = vsel %vm347_vm6, %v1070_v51, %v979_v14  ;;  %v1056_v17 = vrot.slane %v1055_v54, 4 }
 0x1f8   :  { %v988_v2 = vpop.permute.xlu0 %987  ;;  %v5310_v4 = vpop.permute.xlu1 %376  ;;  %v1037_v12 = vsel %vm350_vm7, %v1036_v52, 0.0  ;;  %v1072_v24 = vmul.f32 %v1071_v11, %v5270_v28  ;;  %9575 = vst [vmem:[#allocation8_spill] sm:$0xff] %v5337_v38 }
 0x1f9   :  { %v1017_v16 = vsel %vm347_vm6, %v1016_v0, %v988_v2  ;;  %v1038_v25 = vrot.slane %v1037_v12, 4  ;;  %v998_v14 = vsel %vm345_vm5, %v997_v26, %v988_v2  ;;  %v1057_v36 = vadd.f32 %v1056_v17, %v1055_v54 }
 0x1fa   :  { %v1018_v19 = vmul.f32 %v1017_v16, %v5270_v28  ;;  %581 = vrot.lane.b32.xlu1 %v5254_v20, %s4874_s26  ;;  %1192 = vrot.lane.b32.xlu0 %v5210_v6, %s4880_s30  ;;  %v1073_v40 = vsel %vm350_vm7, %v1072_v24, 0.0 }
 0x1fb   :  { %v1039_v39 = vadd.f32 %v1038_v25, %v1037_v12  ;;  %v1058_v48 = vrot.slane %v1057_v36, 2  ;;  %v1074_v5 = vrot.slane %v1073_v40, 4 }
 0x1fc   :  { %v1019_v27 = vsel %vm350_vm7, %v1018_v19, 0.0  ;;  %v991_v29 = vpop.permute.xlu0 %990  ;;  %v5327_v30 = vpop.permute.xlu1 %394 }
 0x1fd   :  { %v1020_v35 = vrot.slane %v1019_v27, 4  ;;  %v999_v37 = vsel %vm347_vm6, %v998_v14, %v991_v29  ;;  %v1040_v53 = vrot.slane %v1039_v39, 2  ;;  %v5356_v11 = vadd.f32 %v1058_v48, %v1057_v36 }
 0x1fe   :  { %594 = vrot.lane.b32.xlu1 %v5254_v20, %s4876_s28  ;;  %524 = vrot.lane.b32.xlu0 %v5254_v20, %s4871_s23  ;;  %v1000_v41 = vmul.f32 %v999_v37, %v5270_v28  ;;  %v1075_v17 = vadd.f32 %v1074_v5, %v1073_v40 }
 0x1ff   :  { %v1021_v23 = vadd.f32 %v1020_v35, %v1019_v27  ;;  %v1041_v22 = vadd.f32 %v1040_v53, %v1039_v39 }
 0x200   :  { %v1081_v44 = vpop.permute.xlu0 %1080  ;;  %v5341_v47 = vpop.permute.xlu1 %412  ;;  %v1001_v50 = vsel %vm350_vm7, %v1000_v41, 0.0 }
 0x201   :  { %v1083_v51 = vsel %vm336_vm1, %v1081_v44, %v5256_v21  ;;  %v1022_v55 = vrot.slane %v1021_v23, 2  ;;  %v1002_v52 = vrot.slane %v1001_v50, 4  ;;  %v415_v25 = vsel %vm336_vm1, %v5341_v47, %v5327_v30 }
 0x202   :  { %1530 = vrot.lane.b32.xlu1 %v5337_v38, %s4870_s22  ;;  %527 = vrot.lane.b32.xlu0 %v5254_v20, %s4873_s25  ;;  %v1084_v54 = vsel %vm338_vm2, %v1083_v51, %v5237_v13 }
 0x203   :  { %v1003_v0 = vadd.f32 %v1002_v52, %v1001_v50  ;;  %v1085_v2 = vsel %vm340_vm3, %v1084_v54, %v5224_v9  ;;  %v1023_v16 = vadd.f32 %v1022_v55, %v1021_v23  ;;  %v416_v55 = vsel %vm338_vm2, %v415_v25, %v5310_v4 }
 0x204   :  { %v1099_v58 = vpop.permute.xlu0 %1098  ;;  %v5352_v59 = vpop.permute.xlu1 %1333  ;;  %v1086_v12 = vsel %vm210_vm0, %v1085_v2, %v5216_v7  ;;  %v1042_v2 = vrot.slane %v1041_v22, 1 }
 0x205   :  { %v1101_v15 = vsel %vm336_vm1, %v1099_v58, %v1081_v44  ;;  %v1004_v18 = vrot.slane %v1003_v0, 2  ;;  %v1087_v19 = vsel %vm343_vm4, %v1086_v12, %v5071_v49  ;;  %v1024_v41 = vrot.slane %v1023_v16, 1 }
 0x206   :  { %1502 = vrot.lane.b32.xlu1 %v5337_v38, %s4873_s25  ;;  %530 = vrot.lane.b32.xlu0 %v5254_v20, %s4875_s27  ;;  %v1088_v24 = vsel %vm345_vm5, %v1087_v19, %v5218_v8  ;;  %v1102_v26 = vsel %vm338_vm2, %v1101_v15, %v5256_v21  ;;  %v1076_v12 = vrot.slane %v1075_v17, 2 }
 0x207   :  { %v1005_v14 = vadd.f32 %v1004_v18, %v1003_v0  ;;  %v1089_v35 = vsel %vm347_vm6, %v1088_v24, %v5226_v10  ;;  %v1103_v36 = vsel %vm340_vm3, %v1102_v26, %v5237_v13  ;;  %v5417_v18 = vadd.f32 %v1024_v41, %v1023_v16 }
 0x208   :  { %v1117_v27 = vpop.permute.xlu0 %1116  ;;  %v5374_v29 = vpop.permute.xlu1 %1300  ;;  %v1090_v23 = vmul.f32 %v1089_v35, %v5270_v28  ;;  %v1104_v39 = vsel %vm210_vm0, %v1103_v36, %v5224_v9  ;;  %v264_v24 = vadd.f32 %v5065_v43, %v5179_v62  ;;  %v1077_v43 = vadd.f32 %v1076_v12, %v1075_v17 }
 0x209   :  { %v1119_v37 = vsel %vm336_vm1, %v1117_v27, %v1099_v58  ;;  %v1006_v10 = vrot.slane %v1005_v14, 1  ;;  %v1105_v48 = vsel %vm343_vm4, %v1104_v39, %v5216_v7 }
 0x20a   :  { %v1120_v40 = vsel %vm338_vm2, %v1119_v37, %v1081_v44  ;;  %1543 = vrot.lane.b32.xlu1 %v5337_v38, %s4872_s24  ;;  %533 = vrot.lane.b32.xlu0 %v5254_v20, %s4877_s29  ;;  %v1091_v51 = vsel %vm350_vm7, %v1090_v23, 0.0  ;;  %v1106_v44 = vsel %vm345_vm5, %v1105_v48, %v5071_v49  ;;  %v5437_v37 = vadd.f32 %v1042_v2, %v1041_v22 }
 0x20b   :  { %v1121_v50 = vsel %vm340_vm3, %v1120_v40, %v5256_v21  ;;  %v5404_v54 = vadd.f32 %v1006_v10, %v1005_v14  ;;  %v1092_v58 = vrot.slane %v1091_v51, 4  ;;  %v1107_v21 = vsel %vm347_vm6, %v1106_v44, %v5218_v8 }
 0x20c   :  { %v1122_v5 = vsel %vm210_vm0, %v1121_v50, %v5237_v13  ;;  %v5400_v52 = vpop.permute.xlu1 %1351  ;;  %v5402_v53 = vpop.permute.xlu0 %315  ;;  %v1108_v15 = vmul.f32 %v1107_v21, %v5270_v28  ;;  %v397_v8 = vsel %vm336_vm1, %v5327_v30, %v5310_v4  ;;  %v1060_v14 = vrot.slane %v5356_v11, 1 }
 0x20d   :  { %v1123_v0 = vsel %vm343_vm4, %v1122_v5, %v5224_v9  ;;  %v1093_v9 = vadd.f32 %v1092_v58, %v1091_v51  ;;  %v1134_v35 = vmax.f32 %v5404_v54, %v5417_v18  ;;  %v398_v62 = vsel %vm338_vm2, %v397_v8, %v5287_v42 }
 0x20e   :  { %v1124_v13 = vsel %vm345_vm5, %v1123_v0, %v5216_v7  ;;  %1508 = vrot.lane.b32.xlu1 %v5337_v38, %s4877_s29  ;;  %536 = vrot.lane.b32.xlu0 %v5254_v20, %s4878_s0  ;;  %v417_v7 = vsel %vm340_vm3, %v416_v55, %v5287_v42  ;;  %v1109_v25 = vsel %vm350_vm7, %v1108_v15, 0.0  ;;  %v5457_v44 = vmul.f32 0.35355338, %v264_v24 }
 0x20f   :  { %v1125_v19 = vsel %vm347_vm6, %v1124_v13, %v5071_v49  ;;  %v1094_v49 = vrot.slane %v1093_v9, 2  ;;  %v1110_v36 = vrot.slane %v1109_v25, 4  ;;  %v418_v39 = vsel %vm210_vm0, %v417_v7, %v5097_v57 }
 0x210   :  { %v1126_v26 = vmul.f32 %v1125_v19, %v5270_v28  ;;  %v5430_v16 = vpop.permute.xlu1 %1306  ;;  %v5432_v27 = vpop.permute.xlu0 %318  ;;  %v419_v17 = vsel %vm343_vm4, %v418_v39, %v5402_v53  ;;  %v1135_v48 = vmax.f32 %v1134_v35, %v5437_v37  ;;  %v5460_v5 = vadd.f32 %v1060_v14, %v5356_v11 }
 0x211   :  { %v1095_v28 = vadd.f32 %v1094_v49, %v1093_v9  ;;  %v1111_v40 = vadd.f32 %v1110_v36, %v1109_v25  ;;  %v420_v55 = vsel %vm345_vm5, %v419_v17, %v5432_v27  ;;  %v399_v58 = vsel %vm340_vm3, %v398_v62, %v5097_v57 }
 0x212   :  { %v1127_v23 = vsel %vm350_vm7, %v1126_v26, 0.0  ;;  %1556 = vrot.lane.b32.xlu1 %v5337_v38, %s4874_s26  ;;  %539 = vrot.lane.b32.xlu0 %v5254_v20, %s4879_s2  ;;  %v1078_v0 = vrot.slane %v1077_v43, 1  ;;  %v400_v8 = vsel %vm210_vm0, %v399_v58, %v5402_v53  ;;  %v1136_v19 = vmax.f32 %v1135_v48, %v5460_v5 }
 0x213   :  { %v1128_v41 = vrot.slane %v1127_v23, 4  ;;  %v1112_v50 = vrot.slane %v1111_v40, 2  ;;  %v1096_v2 = vrot.slane %v1095_v28, 1  ;;  %v401_v25 = vsel %vm343_vm4, %v400_v8, %v5432_v27 }
 0x214   :  { %v5448_v22 = vpop.permute.xlu1 %1369  ;;  %v5452_v10 = vpop.permute.xlu0 %321  ;;  %v379_v26 = vsel %vm336_vm1, %v5310_v4, %v5287_v42  ;;  %v5489_v35 = vadd.f32 %v1078_v0, %v1077_v43  ;;  %v267_v39 = vadd.f32 %v5069_v46, %v5181_v63 }
 0x215   :  { %v1129_v51 = vadd.f32 %v1128_v41, %v1127_v23  ;;  %v421_v21 = vsel %vm347_vm6, %v420_v55, %v5452_v10  ;;  %v1113_v12 = vadd.f32 %v1112_v50, %v1111_v40  ;;  %v402_v14 = vsel %vm345_vm5, %v401_v25, %v5452_v10 }
 0x216   :  { %1514 = vrot.lane.b32.xlu1 %v5337_v38, %s4879_s2  ;;  %542 = vrot.lane.b32.xlu0 %v5254_v20, %s4880_s30  ;;  %v422_v13 = vmul.f32 %v421_v21, %v5457_v44  ;;  %v5491_v49 = vadd.f32 %v1096_v2, %v1095_v28  ;;  %v275_v23 = vadd.f32 %v5067_v45, %v5191_v1 }
 0x217   :  { %v1130_v15 = vrot.slane %v1129_v51, 2  ;;  %v1114_v24 = vrot.slane %v1113_v12, 1  ;;  %v5501_v40 = vadd.f32 %v5091_v56, %v5197_v3  ;;  %v1137_v17 = vmax.f32 %v1136_v19, %v5489_v35 }
 0x218   :  { %v5471_v11 = vpop.permute.xlu1 %1312  ;;  %v5475_v9 = vpop.permute.xlu0 %324  ;;  %v423_v41 = vsel %vm350_vm7, %v422_v13, 0.0  ;;  %v380_v45 = vsel %vm338_vm2, %v379_v26, %v5097_v57  ;;  %v1372_v63 = vsel %vm336_vm1, %v5448_v22, %v5400_v52  ;;  %v5522_v3 = vmul.f32 0.35355338, %v275_v23 }
 0x219   :  { %v1131_v7 = vadd.f32 %v1130_v15, %v1129_v51  ;;  %v403_v62 = vsel %vm347_vm6, %v402_v14, %v5475_v9  ;;  %9576 = vst [vmem:[#allocation9_spill] sm:$0xff] %v5501_v40  ;;  %v5507_v48 = vadd.f32 %v1114_v24, %v1113_v12  ;;  %v1138_v46 = vmax.f32 %v1137_v17, %v5491_v49 }
 0x21a   :  { %1569 = vrot.lane.b32.xlu1 %v5337_v38, %s4876_s28  ;;  %607 = vrot.lane.b32.xlu0 %v5254_v20, %s9504_s16  ;;  %v404_v50 = vmul.f32 %v403_v62, %v5457_v44  ;;  %v424_v1 = vrot.slane %v423_v41, 4  ;;  %v5524_v51 = vmul.f32 0.35355338, %v267_v39  ;;  %v381_v55 = vsel %vm340_vm3, %v380_v45, %v5402_v53 }
 0x21b   :  { %v1132_v36 = vrot.slane %v1131_v7, 1  ;;  %v1139_v0 = vmax.f32 %v1138_v46, %v5507_v48  ;;  %v1354_v2 = vsel %vm336_vm1, %v5400_v52, %v5352_v59  ;;  %v382_v12 = vsel %vm210_vm0, %v381_v55, %v5432_v27 }
 0x21c   :  { %v5504_v43 = vpop.permute.xlu1 %1387  ;;  %v328_v28 = vpop.permute.xlu0 %327  ;;  %v361_v15 = vsel %vm336_vm1, %v5287_v42, %v5097_v57  ;;  %v1373_v13 = vsel %vm338_vm2, %v1372_v63, %v5352_v59  ;;  %v405_v8 = vsel %vm350_vm7, %v404_v50, 0.0  ;;  %v337_v19 = vsel %vm336_vm1, %v5097_v57, %v5402_v53 }
 0x21d   :  { %v5517_v56 = vadd.f32 %v1132_v36, %v1131_v7  ;;  %v362_v24 = vsel %vm338_vm2, %v361_v15, %v5402_v53  ;;  %v425_v25 = vadd.f32 %v424_v1, %v423_v41  ;;  %v1390_v26 = vsel %vm336_vm1, %v5504_v43, %v5448_v22 }
 0x21e   :  { %880 = vrot.lane.b32.xlu1 %v5501_v40, %s4870_s22  ;;  %620 = vrot.lane.b32.xlu0 %v5254_v20, %s9458_s17  ;;  %v383_v14 = vsel %vm343_vm4, %v382_v12, %v5452_v10  ;;  %v339_v62 = vsel %vm338_vm2, %v337_v19, %v5432_v27  ;;  %v363_v23 = vsel %vm340_vm3, %v362_v24, %v5432_v27  ;;  %v406_v50 = vrot.slane %v405_v8, 4 }
 0x21f   :  { %v5550_v7 = vmax.f32 %v1139_v0, %v5517_v56  ;;  %v384_v36 = vsel %vm345_vm5, %v383_v14, %v5475_v9  ;;  %v5570_v17 = vsel %vm336_vm1, %v5352_v59, %v5115_v60  ;;  %v364_v46 = vsel %vm210_vm0, %v363_v23, %v5452_v10 }
 0x220   :  { %v5528_v58 = vpop.permute.xlu1 %1405  ;;  %v331_v21 = vpop.permute.xlu0 %330  ;;  %v385_v45 = vsel %vm347_vm6, %v384_v36, %v328_v28  ;;  %v5577_v63 = vsel %vm338_vm2, %v1354_v2, %v5115_v60  ;;  %v5581_v1 = vsel %vm340_vm3, %v1373_v13, %v5115_v60  ;;  %v1391_v55 = vsel %vm338_vm2, %v1390_v26, %v5400_v52 }
 0x221   :  { %v341_v0 = vsel %vm340_vm3, %v339_v62, %v5452_v10  ;;  %v365_v12 = vsel %vm343_vm4, %v364_v46, %v5475_v9  ;;  %v1141_v2 = vsub.f32 %v5404_v54, %v5550_v7  ;;  %v426_v15 = vrot.slane %v425_v25, 2 }
 0x222   :  { %852 = vrot.lane.b32.xlu1 %v5501_v40, %s4873_s25  ;;  %633 = vrot.lane.b32.xlu0 %v5254_v20, %s9456_s18  ;;  %v342_v13 = vsel %vm210_vm0, %v341_v0, %v5475_v9  ;;  %v366_v19 = vsel %vm345_vm5, %v365_v12, %v328_v28  ;;  %v1144_v10 = vsub.f32 %v5417_v18, %v5550_v7 }
 0x223   :  { %v386_v24 = vmul.f32 %v385_v45, %v5457_v44  ;;  %v344_v26 = vsel %vm343_vm4, %v342_v13, %v328_v28  ;;  %v367_v14 = vsel %vm347_vm6, %v366_v19, %v331_v21  ;;  %v1147_v62 = vsub.f32 %v5437_v37, %v5550_v7 }
 0x224   :  { %v5565_v39 = vpop.permute.xlu1 %1423  ;;  %v334_v41 = vpop.permute.xlu0 %333  ;;  %v5605_v9 = vadd.f32 %v406_v50, %v405_v8  ;;  %v1392_v23 = vsel %vm340_vm3, %v1391_v55, %v5352_v59  ;;  %v346_v46 = vsel %vm345_vm5, %v344_v26, %v331_v21  ;;  %v1153_v18 = vsub.f32 %v5489_v35, %v5550_v7 }
 0x225   :  { %v1156_v28 = vsub.f32 %v5491_v49, %v5550_v7  ;;  %v368_v45 = vmul.f32 %v367_v14, %v5457_v44  ;;  %v348_v0 = vsel %vm347_vm6, %v346_v46, %v334_v41  ;;  %v1142_v37 = vmul.f32 1.442695, %v1141_v2 }
 0x226   :  { %893 = vrot.lane.b32.xlu1 %v5501_v40, %s4872_s24  ;;  %1499 = vrot.lane.b32.xlu0 %v5337_v38, %s4871_s23  ;;  %v1159_v8 = vsub.f32 %v5507_v48, %v5550_v7  ;;  %v1162_v21 = vsub.f32 %v5517_v56, %v5550_v7  ;;  %v5622_v50 = vadd.f32 %v426_v15, %v425_v25  ;;  %v5626_v35 = vmul.f32 1.442695, %v1144_v10 }
 0x227   :  { %v387_v49 = vsel %vm350_vm7, %v386_v24, 0.0  ;;  %v369_v41 = vsel %vm350_vm7, %v368_v45, 0.0  ;;  %v349_v55 = vmul.f32 %v348_v0, %v5457_v44  ;;  %v5633_v48 = vmul.f32 1.442695, %v1147_v62 }
 0x228   :  { %v1442_v36 = vpop.permute.xlu1 %1441  ;;  %v431_v54 = vpop.permute.xlu0 %430  ;;  %v5637_v56 = vsel %vm210_vm0, %v1392_v23, %v5115_v60  ;;  %v370_v25 = vrot.slane %v369_v41, 4  ;;  %v5641_v13 = vmul.f32 1.442695, %v1153_v18  ;;  %v5650_v26 = vmul.f32 1.442695, %v1156_v28 }
 0x229   :  { %v1444_v15 = vsel %vm336_vm1, %v1442_v36, %v5565_v39  ;;  %v351_v19 = vsel %vm350_vm7, %v349_v55, 0.0  ;;  %v433_v24 = vsel %vm336_vm1, %v431_v54, %v5341_v47  ;;  %v5652_v14 = vmul.f32 1.442695, %v1159_v8 }
 0x22a   :  { %858 = vrot.lane.b32.xlu1 %v5501_v40, %s4877_s29  ;;  %1505 = vrot.lane.b32.xlu0 %v5337_v38, %s4875_s27  ;;  %v1445_v10 = vsel %vm338_vm2, %v1444_v15, %v5528_v58  ;;  %v388_v62 = vrot.slane %v387_v49, 4  ;;  %v352_v23 = vrot.slane %v351_v19, 4  ;;  %v371_v36 = vadd.f32 %v370_v25, %v369_v41 }
 0x22b   :  { %v1446_v46 = vsel %vm340_vm3, %v1445_v10, %v5504_v43  ;;  %v434_v18 = vsel %vm338_vm2, %v433_v24, %v5327_v30  ;;  %v1408_v8 = vsel %vm336_vm1, %v5528_v58, %v5504_v43  ;;  %v1426_v55 = vsel %vm336_vm1, %v5565_v39, %v5528_v58 }
 0x22c   :  { %v5631_v12 = vpop.permute.xlu1 %683  ;;  %v449_v2 = vpop.permute.xlu0 %448  ;;  %v353_v41 = vadd.f32 %v352_v23, %v351_v19  ;;  %v1447_v25 = vsel %vm210_vm0, %v1446_v46, %v5448_v22  ;;  %v435_v10 = vsel %vm340_vm3, %v434_v18, %v5310_v4  ;;  %v389_v34 = vadd.f32 %v388_v62, %v387_v49 }
 0x22d   :  { %v451_v45 = vsel %vm336_vm1, %v449_v2, %v431_v54  ;;  %v1448_v15 = vsel %vm343_vm4, %v1447_v25, %v5400_v52  ;;  %v436_v19 = vsel %vm210_vm0, %v435_v10, %v5287_v42  ;;  %v372_v23 = vrot.slane %v371_v36, 2 }
 0x22e   :  { %906 = vrot.lane.b32.xlu1 %v5501_v40, %s4874_s26  ;;  %1511 = vrot.lane.b32.xlu0 %v5337_v38, %s4878_s0  ;;  %v452_v24 = vsel %vm338_vm2, %v451_v45, %v5341_v47  ;;  %v354_v58 = vrot.slane %v353_v41, 2  ;;  %v1449_v39 = vsel %vm345_vm5, %v1448_v15, %v5352_v59  ;;  %v437_v46 = vsel %vm343_vm4, %v436_v19, %v5097_v57 }
 0x22f   :  { %4717 = vpow2.f32 %v1142_v37  ;;  %v1427_v45 = vsel %vm338_vm2, %v1426_v55, %v5504_v43  ;;  %v438_v25 = vsel %vm345_vm5, %v437_v46, %v5402_v53  ;;  %v5709_v43 = vmul.f32 1.442695, %v1162_v21 }
 0x230   :  { %v5661_v0 = vpop.permute.xlu1 %650  ;;  %v467_v28 = vpop.permute.xlu0 %466  ;;  %v355_v15 = vadd.f32 %v354_v58, %v353_v41  ;;  %v439_v10 = vsel %vm347_vm6, %v438_v25, %v5432_v27  ;;  %v390_v37 = vrot.slane %v389_v34, 2  ;;  %v1409_v55 = vsel %vm338_vm2, %v1408_v8, %v5448_v22 }
 0x231   :  { %v469_v32 = vsel %vm336_vm1, %v467_v28, %v449_v2  ;;  %v453_v2 = vsel %vm340_vm3, %v452_v24, %v5327_v30  ;;  %v1450_v28 = vsel %vm347_vm6, %v1449_v39, %v5115_v60  ;;  %v440_v41 = vmul.f32 %v439_v10, %v5457_v44 }
 0x232   :  { %864 = vrot.lane.b32.xlu1 %v5501_v40, %s4879_s2  ;;  %1517 = vrot.lane.b32.xlu0 %v5337_v38, %s4880_s30  ;;  %v470_v18 = vsel %vm338_vm2, %v469_v32, %v431_v54  ;;  %v454_v32 = vsel %vm210_vm0, %v453_v2, %v5310_v4  ;;  %v373_v27 = vadd.f32 %v372_v23, %v371_v36  ;;  %v356_v23 = vrot.slane %v355_v15, 1 }
 0x233   :  { %v471_v54 = vsel %vm340_vm3, %v470_v18, %v5341_v47  ;;  %v1428_v24 = vsel %vm340_vm3, %v1427_v45, %v5448_v22  ;;  %v455_v47 = vsel %vm343_vm4, %v454_v32, %v5287_v42  ;;  %v1451_v8 = vmul.f32 %v1450_v28, %v5522_v3 }
 0x234   :  { %v5691_v49 = vpop.permute.xlu1 %701  ;;  %v5693_v62 = vpop.permute.xlu0 %1297  ;;  %v472_v21 = vsel %vm210_vm0, %v471_v54, %v5327_v30  ;;  %v441_v19 = vsel %vm350_vm7, %v440_v41, 0.0  ;;  %v456_v36 = vsel %vm345_vm5, %v455_v47, %v5097_v57  ;;  %v408_v18 = vrot.slane %v5605_v9, 2 }
 0x235   :  { %v473_v22 = vsel %vm343_vm4, %v472_v21, %v5310_v4  ;;  %v442_v46 = vrot.slane %v441_v19, 4  ;;  %v457_v2 = vsel %vm347_vm6, %v456_v36, %v5402_v53  ;;  %v1410_v45 = vsel %vm340_vm3, %v1409_v55, %v5400_v52 }
 0x236   :  { %1582 = vrot.lane.b32.xlu1 %v5337_v38, %s9504_s16  ;;  %849 = vrot.lane.b32.xlu0 %v5501_v40, %s4871_s23  ;;  %v474_v30 = vsel %vm345_vm5, %v473_v22, %v5287_v42  ;;  %v458_v28 = vmul.f32 %v457_v2, %v5457_v44  ;;  %v391_v53 = vadd.f32 %v390_v37, %v389_v34  ;;  %v374_v25 = vrot.slane %v373_v27, 1 }
 0x237   :  { %v475_v4 = vsel %vm347_vm6, %v474_v30, %v5097_v57  ;;  %v1429_v42 = vsel %vm210_vm0, %v1428_v24, %v5400_v52  ;;  %4719 = vpow2.f32 %v5626_v35  ;;  %v1452_v55 = vsel %vm350_vm7, %v1451_v8, 0.0 }
 0x238   :  { %v5722_v58 = vpop.permute.xlu1 %656  ;;  %v5724_v39 = vpop.permute.xlu0 %1303  ;;  %v476_v10 = vmul.f32 %v475_v4, %v5457_v44  ;;  %v443_v41 = vadd.f32 %v442_v46, %v441_v19  ;;  %v459_v57 = vsel %vm350_vm7, %v458_v28, 0.0  ;;  %v1411_v34 = vsel %vm210_vm0, %v1410_v45, %v5352_v59 }
 0x239   :  { %v5758_v37 = vadd.f32 %v356_v23, %v355_v15  ;;  %v460_v47 = vrot.slane %v459_v57, 4  ;;  %v5763_v44 = vpop.eup %4717  ;;  %v409_v35 = vadd.f32 %v408_v18, %v5605_v9  ;;  %v1430_v24 = vsel %vm343_vm4, %v1429_v42, %v5352_v59 }
 0x23a   :  { %1595 = vrot.lane.b32.xlu1 %v5337_v38, %s9458_s17  ;;  %855 = vrot.lane.b32.xlu0 %v5501_v40, %s4875_s27  ;;  %v477_v52 = vsel %vm350_vm7, %v476_v10, 0.0  ;;  %9577 = vst [vmem:[#allocation10_spill] sm:$0xff] %v5763_v44  ;;  %v1375_v8 = vsel %vm210_vm0, %v5581_v1, %v5693_v62  ;;  %v392_v15 = vrot.slane %v391_v53, 1  ;;  %v5773_v19 = vadd.f32 %v374_v25, %v373_v27 }
 0x23b   :  { %v478_v21 = vrot.slane %v477_v52, 4  ;;  %v1453_v36 = vrot.slane %v1452_v55, 4  ;;  %v461_v22 = vadd.f32 %v460_v47, %v459_v57  ;;  %4721 = vpow2.f32 %v5633_v48 }
 0x23c   :  { %v5749_v32 = vpop.permute.xlu1 %719  ;;  %v5751_v54 = vpop.permute.xlu0 %1309  ;;  %v1412_v59 = vsel %vm343_vm4, %v1411_v34, %v5115_v60  ;;  %v444_v9 = vrot.slane %v443_v41, 2  ;;  %v1431_v1 = vsel %vm345_vm5, %v1430_v24, %v5115_v60  ;;  %v484_v27 = vmax.f32 %v5758_v37, %v5773_v19 }
 0x23d   :  { %v479_v2 = vadd.f32 %v478_v21, %v477_v52  ;;  %v1413_v30 = vsel %vm345_vm5, %v1412_v59, %v5693_v62  ;;  %v1376_v18 = vsel %vm343_vm4, %v1375_v8, %v5374_v29  ;;  %v462_v48 = vrot.slane %v461_v22, 2 }
 0x23e   :  { %919 = vrot.lane.b32.xlu1 %v5501_v40, %s4876_s28  ;;  %861 = vrot.lane.b32.xlu0 %v5501_v40, %s4878_s0  ;;  %v1432_v45 = vsel %vm347_vm6, %v1431_v1, %v5693_v62  ;;  %v1394_v28 = vsel %vm343_vm4, %v5637_v56, %v5693_v62  ;;  %v1377_v4 = vsel %vm345_vm5, %v1376_v18, %v5724_v39  ;;  %v410_v25 = vrot.slane %v409_v35, 1 }
 0x23f   :  { %v5801_v42 = vadd.f32 %v392_v15, %v391_v53  ;;  %v1454_v10 = vadd.f32 %v1453_v36, %v1452_v55  ;;  %v1395_v57 = vsel %vm345_vm5, %v1394_v28, %v5374_v29  ;;  %v445_v52 = vadd.f32 %v444_v9, %v443_v41 }
 0x240   :  { %v5775_v23 = vpop.permute.xlu1 %662  ;;  %v5777_v46 = vpop.permute.xlu0 %1315  ;;  %v480_v24 = vrot.slane %v479_v2, 2  ;;  %v1414_v56 = vsel %vm347_vm6, %v1413_v30, %v5374_v29  ;;  %v1396_v21 = vsel %vm347_vm6, %v1395_v57, %v5724_v39  ;;  %4723 = vpow2.f32 %v5641_v13 }
 0x241   :  { %v485_v53 = vmax.f32 %v484_v27, %v5801_v42  ;;  %v1433_v55 = vmul.f32 %v1432_v45, %v5522_v3  ;;  %v1378_v8 = vsel %vm347_vm6, %v1377_v4, %v5430_v16  ;;  %v5820_v41 = vpop.eup %4719  ;;  %4725 = vpow2.f32 %v5650_v26 }
 0x242   :  { %932 = vrot.lane.b32.xlu1 %v5501_v40, %s9504_s16  ;;  %867 = vrot.lane.b32.xlu0 %v5501_v40, %s4880_s30  ;;  %9578 = vst [vmem:[#allocation11_spill] sm:$0xff] %v5820_v41  ;;  %v428_v15 = vrot.slane %v5622_v50, 1  ;;  %v463_v36 = vadd.f32 %v462_v48, %v461_v22  ;;  %v1397_v59 = vmul.f32 %v1396_v21, %v5522_v3  ;;  %v1455_v9 = vrot.slane %v1454_v10, 2 }
 0x243   :  { %v5827_v13 = vadd.f32 %v410_v25, %v409_v35  ;;  %v1415_v1 = vmul.f32 %v1414_v56, %v5522_v3  ;;  %v1337_v27 = vsel %vm338_vm2, %v5570_v17, %v5693_v62  ;;  %v446_v18 = vrot.slane %v445_v52, 1 }
 0x244   :  { %v5805_v34 = vpop.permute.xlu1 %737  ;;  %v5807_v47 = vpop.permute.xlu0 %647  ;;  %v481_v22 = vadd.f32 %v480_v24, %v479_v2  ;;  %v1379_v48 = vmul.f32 %v1378_v8, %v5522_v3  ;;  %v1398_v45 = vsel %vm350_vm7, %v1397_v59, 0.0  ;;  %4727 = vpow2.f32 %v5652_v14 }
 0x245   :  { %9579 = vst [vmem:[#allocation12_spill] sm:$0xff] %v5827_v13  ;;  %v486_v35 = vmax.f32 %v485_v53, %v5827_v13  ;;  %v1434_v28 = vsel %vm350_vm7, %v1433_v55, 0.0  ;;  %v1338_v4 = vsel %vm340_vm3, %v1337_v27, %v5374_v29  ;;  %v5846_v17 = vpop.eup %4721  ;;  %v464_v25 = vrot.slane %v463_v36, 1 }
 0x246   :  { %945 = vrot.lane.b32.xlu1 %v5501_v40, %s9458_s17  ;;  %1257 = vrot.lane.b32.xlu0 %v5210_v6, %s9504_s16  ;;  %9580 = vst [vmem:[#allocation13_spill] sm:$0xff] %v5846_v17  ;;  %v1318_v2 = vsel %vm336_vm1, %v5115_v60, %v5693_v62  ;;  %v1339_v14 = vsel %vm210_vm0, %v1338_v4, %v5724_v39  ;;  %v1416_v21 = vsel %vm350_vm7, %v1415_v1, 0.0  ;;  %v1399_v53 = vrot.slane %v1398_v45, 4 }
 0x247   :  { %v1356_v57 = vsel %vm340_vm3, %v5577_v63, %v5693_v62  ;;  %v5859_v24 = vadd.f32 %v428_v15, %v5622_v50  ;;  %v5861_v56 = vadd.f32 %v1455_v9, %v1454_v10  ;;  %v5868_v8 = vadd.f32 %v446_v18, %v445_v52 }
 0x248   :  { %v5833_v30 = vpop.permute.xlu1 %755  ;;  %v5835_v26 = vpop.permute.xlu0 %653  ;;  %v482_v59 = vrot.slane %v481_v22, 1  ;;  %v1380_v63 = vsel %vm350_vm7, %v1379_v48, 0.0  ;;  %v1357_v62 = vsel %vm210_vm0, %v1356_v57, %v5374_v29  ;;  %v1435_v27 = vrot.slane %v1434_v28, 4 }
 0x249   :  { %v1319_v50 = vsel %vm338_vm2, %v1318_v2, %v5374_v29  ;;  %v1340_v10 = vsel %vm343_vm4, %v1339_v14, %v5430_v16  ;;  %v1358_v15 = vsel %vm343_vm4, %v1357_v62, %v5724_v39  ;;  %v487_v52 = vmax.f32 %v486_v35, %v5859_v24  ;;  %v1628_v29 = vld [vmem:[%s9423_s6 + $0x8] sm:$0xff]  ;;  %v1627_v14 = vld [vmem:[%s9423_s6] sm:$0xff] }
 0x24a   :  { %958 = vrot.lane.b32.xlu1 %v5501_v40, %s9456_s18  ;;  %1270 = vrot.lane.b32.xlu0 %v5210_v6, %s9458_s17  ;;  %v5882_v9 = vadd.f32 %v464_v25, %v463_v36  ;;  %v1320_v1 = vsel %vm340_vm3, %v1319_v50, %v5724_v39  ;;  %v1341_v18 = vsel %vm345_vm5, %v1340_v10, %v5751_v54  ;;  %v5893_v48 = vpop.eup %4723  ;;  %v1457_v4 = vrot.slane %v5861_v56, 1  ;;  %s9707_s17 = smov 72  }
 0x24b   :  { %9581 = vst [vmem:[#allocation14_spill] sm:$0xff] %v5893_v48  ;;  %v1417_v35 = vrot.slane %v1416_v21, 4  ;;  %v1381_v36 = vrot.slane %v1380_v63, 4  ;;  %v1400_v25 = vadd.f32 %v1399_v53, %v1398_v45  ;;  %v5903_v57 = vpop.eup %4725  ;;  %v488_v62 = vmax.f32 %v487_v52, %v5868_v8 }
 0x24c   :  { %v5864_v55 = vpop.permute.xlu1 %773  ;;  %v5866_v60 = vpop.permute.xlu0 %659  ;;  %9582 = vst [vmem:[#allocation15_spill] sm:$0xff] %v5903_v57  ;;  %v5906_v50 = vadd.f32 %v482_v59, %v481_v22  ;;  %v722_v10 = vsel %vm336_vm1, %v5749_v32, %v5691_v49  ;;  %v1359_v45 = vsel %vm345_vm5, %v1358_v15, %v5430_v16  ;;  %v5913_v53 = vadd.f32 %v1435_v27, %v1434_v28 }
 0x24d   :  { %v1321_v31 = vsel %vm210_vm0, %v1320_v1, %v5430_v16  ;;  %v1342_v33 = vsel %vm347_vm6, %v1341_v18, %v5471_v11  ;;  %v1360_v52 = vsel %vm347_vm6, %v1359_v45, %v5751_v54  ;;  %v489_v22 = vmax.f32 %v488_v62, %v5882_v9  ;;  %v1630_v16 = vld [vmem:[%s9423_s6 + $0x18] sm:$0xff] }
 0x24e   :  { %1608 = vrot.lane.b32.xlu1 %v5337_v38, %s9456_s18  ;;  %1283 = vrot.lane.b32.xlu0 %v5210_v6, %s9456_s18  ;;  %v1322_v59 = vsel %vm343_vm4, %v1321_v31, %v5751_v54  ;;  %v1343_v40 = vmul.f32 %v1342_v33, %v5522_v3  ;;  %v1361_v28 = vmul.f32 %v1360_v52, %v5522_v3  ;;  %v5929_v27 = vpop.eup %4727  ;;  %v1401_v1 = vrot.slane %v1400_v25, 2 }
 0x24f   :  { %9583 = vst [vmem:[#allocation16_spill] sm:$0xff] %v5929_v27  ;;  %v1382_v15 = vadd.f32 %v1381_v36, %v1380_v63  ;;  %v723_v18 = vsel %vm338_vm2, %v722_v10, %v5631_v12  ;;  %v5936_v31 = vsel %vm336_vm1, %v5631_v12, %v5157_v61  ;;  %v5951_v63 = vsel %vm336_vm1, %v5691_v49, %v5631_v12 }
 0x250   :  { %v5896_v2 = vpop.permute.xlu1 %791  ;;  %v5898_v39 = vpop.permute.xlu0 %665  ;;  %v1344_v36 = vsel %vm350_vm7, %v1343_v40, 0.0  ;;  %v1362_v62 = vsel %vm350_vm7, %v1361_v28, 0.0  ;;  %v1323_v52 = vsel %vm345_vm5, %v1322_v59, %v5471_v11  ;;  %v1418_v38 = vadd.f32 %v1417_v35, %v1416_v21  ;;  %v1721_v28 = vld [vmem:[%s9424_s11 + $0x8] sm:$0xff]  ;;  %v1720_v59 = vld [vmem:[%s9424_s11] sm:$0xff] }
 0x251   :  { %v1345_v10 = vrot.slane %v1344_v36, 4  ;;  %v1363_v45 = vrot.slane %v1362_v62, 4  ;;  %v5958_v20 = vadd.f32 %v1457_v4, %v5861_v56  ;;  %v724_v27 = vsel %vm340_vm3, %v723_v18, %v5157_v61 }
 0x252   :  { %1638 = vperm.xlu1 %4688, %v1628_v29   ;;  %1633 = vperm.xlu0 %4687, %v1627_v14   ;;  %v1629_v29 = vld [vmem:[%s9423_s6 + $0x10] sm:$0xff]  ;;  %v5946_v14 = vmax.f32 %v489_v22, %v5906_v50  ;;  %v1437_v22 = vrot.slane %v5913_v53, 2  ;;  %v1324_v40 = vsel %vm347_vm6, %v1323_v52, %v5777_v46  ;;  %v1383_v57 = vrot.slane %v1382_v15, 2 }
 0x253   :  { %v5968_v11 = vadd.f32 %v1401_v1, %v1400_v25  ;;  %v1346_v21 = vadd.f32 %v1345_v10, %v1344_v36  ;;  %v1364_v35 = vadd.f32 %v1363_v45, %v1362_v62  ;;  %v1325_v18 = vmul.f32 %v1324_v40, %v5522_v3  ;;  %v1725_v40 = vld [vmem:[%s9425_s12 + $0x8] sm:$0xff] }
 0x254   :  { %v5938_v33 = vpop.permute.xlu1 %1205  ;;  %v5940_v54 = vpop.permute.xlu0 %1174  ;;  %v740_v25 = vsel %vm336_vm1, %v5805_v34, %v5749_v32  ;;  %v758_v62 = vsel %vm336_vm1, %v5833_v30, %v5805_v34  ;;  %v725_v48 = vsel %vm210_vm0, %v724_v27, %v5807_v47  ;;  %v776_v27 = vsel %vm336_vm1, %v5864_v55, %v5833_v30 }
 0x255   :  { %9584 = vst [vmem:[#allocation17_spill] sm:$0xff] %v5938_v33  ;;  %9585 = vst [vmem:[#allocation18_spill] sm:$0xff] %v5940_v54  ;;  %v1347_v1 = vrot.slane %v1346_v21, 2  ;;  %v741_v36 = vsel %vm338_vm2, %v740_v25, %v5691_v49  ;;  %v1365_v10 = vrot.slane %v1364_v35, 2  ;;  %v1326_v45 = vsel %vm350_vm7, %v1325_v18, 0.0 }
 0x256   :  { %1648 = vperm.xlu1 %4688, %v1630_v16   ;;  %1643 = vperm.xlu0 %4687, %v1629_v29   ;;  %v1419_v29 = vrot.slane %v1418_v38, 2  ;;  %v742_v3 = vsel %vm340_vm3, %v741_v36, %v5631_v12  ;;  %v759_v52 = vsel %vm338_vm2, %v758_v62, %v5749_v32  ;;  %v1403_v25 = vrot.slane %v5968_v11, 1  ;;  %v1724_v36 = vld [vmem:[%s9425_s12] sm:$0xff] }
 0x257   :  { %v1348_v16 = vadd.f32 %v1347_v1, %v1346_v21  ;;  %v1327_v46 = vrot.slane %v1326_v45, 4  ;;  %v760_v62 = vsel %vm340_vm3, %v759_v52, %v5691_v49  ;;  %v687_v44 = vsel %vm338_vm2, %v5936_v31, %v5807_v47 }
 0x258   :  { %v5970_v56 = vpop.permute.xlu1 %1218  ;;  %v5972_v4 = vpop.permute.xlu0 %1177  ;;  %v6014_v1 = vadd.f32 %v1419_v29, %v1418_v38  ;;  %v1723_v38 = vld [vmem:[%s9424_s11 + $0x18] sm:$0xff] }
 0x259   :  { %9586 = vst [vmem:[#allocation19_spill] sm:$0xff] %v5970_v56  ;;  %9587 = vst [vmem:[#allocation20_spill] sm:$0xff] %v5972_v4  ;;  %v1328_v17 = vadd.f32 %v1327_v46, %v1326_v45  ;;  %v1366_v4 = vadd.f32 %v1365_v10, %v1364_v35  ;;  %v726_v46 = vsel %vm343_vm4, %v725_v48, %v5661_v0  ;;  %v1722_v45 = vld [vmem:[%s9424_s11 + $0x10] sm:$0xff] }
 0x25a   :  { %1778 = vperm.xlu1 %4688, %v1721_v28   ;;  %1773 = vperm.xlu0 %4687, %v1720_v59   ;;  %v743_v28 = vsel %vm210_vm0, %v742_v3, %v5157_v61  ;;  %v1384_v59 = vadd.f32 %v1383_v57, %v1382_v15  ;;  %v1438_v3 = vadd.f32 %v1437_v22, %v5913_v53  ;;  %v1349_v53 = vrot.slane %v1348_v16, 1 }
 0x25b   :  { %v744_v21 = vsel %vm343_vm4, %v743_v28, %v5807_v47  ;;  %v1329_v22 = vrot.slane %v1328_v17, 2  ;;  %v777_v48 = vsel %vm338_vm2, %v776_v27, %v5805_v34 }
 0x25c   :  { %v6001_v13 = vpop.permute.xlu1 %1231  ;;  %v6003_v18 = vpop.permute.xlu0 %1180  ;;  %v745_v15 = vsel %vm345_vm5, %v744_v21, %v5661_v0 }
 0x25d   :  { %9588 = vst [vmem:[#allocation21_spill] sm:$0xff] %v6001_v13  ;;  %9589 = vst [vmem:[#allocation22_spill] sm:$0xff] %v6003_v18  ;;  %v761_v18 = vsel %vm210_vm0, %v760_v62, %v5631_v12  ;;  %v746_v28 = vsel %vm347_vm6, %v745_v15, %v5835_v26  ;;  %v1727_v15 = vld [vmem:[%s9425_s12 + $0x18] sm:$0xff] }
 0x25e   :  { %1802 = vperm.xlu1 %4688, %v1725_v40   ;;  %v762_v57 = vsel %vm343_vm4, %v761_v18, %v5157_v61  ;;  %1797 = vperm.xlu0 %4687, %v1724_v36   ;;  %v727_v40 = vsel %vm345_vm5, %v726_v46, %v5835_v26  ;;  %v1385_v18 = vrot.slane %v1384_v59, 1  ;;  %v1330_v36 = vadd.f32 %v1329_v22, %v1328_v17 }
 0x25f   :  { %v763_v35 = vsel %vm345_vm5, %v762_v57, %v5807_v47  ;;  %v728_v21 = vsel %vm347_vm6, %v727_v40, %v5722_v58  ;;  %v1439_v57 = vrot.slane %v1438_v3, 1  ;;  %v778_v46 = vsel %vm340_vm3, %v777_v48, %v5749_v32 }
 0x260   :  { %v6033_v29 = vpop.permute.xlu1 %1244  ;;  %v6035_v10 = vpop.permute.xlu0 %1183  ;;  %v764_v52 = vsel %vm347_vm6, %v763_v35, %v5661_v0  ;;  %v729_v35 = vmul.f32 %v728_v21, %v5524_v51  ;;  %v1367_v17 = vrot.slane %v1366_v4, 1  ;;  %v1331_v27 = vrot.slane %v1330_v36, 1 }
 0x261   :  { %9590 = vst [vmem:[#allocation23_spill] sm:$0xff] %v6033_v29  ;;  %9591 = vst [vmem:[#allocation24_spill] sm:$0xff] %v6035_v10  ;;  %v765_v62 = vmul.f32 %v764_v52, %v5524_v51  ;;  %v747_v10 = vmul.f32 %v746_v28, %v5524_v51  ;;  %v779_v22 = vsel %vm210_vm0, %v778_v46, %v5691_v49  ;;  %v1421_v21 = vrot.slane %v6014_v1, 1 }
 0x262   :  { %1788 = vperm.xlu1 %4688, %v1723_v38   ;;  %1783 = vperm.xlu0 %4687, %v1722_v45   ;;  %v668_v38 = vsel %vm336_vm1, %v5157_v61, %v5807_v47  ;;  %v1726_v45 = vld [vmem:[%s9425_s12 + $0x10] sm:$0xff]  ;;  %v6070_v28 = vadd.f32 %v1349_v53, %v1348_v16  ;;  %v6073_v48 = vadd.f32 %v1403_v25, %v5968_v11 }
 0x263   :  { %v780_v46 = vsel %vm343_vm4, %v779_v22, %v5631_v12  ;;  %v6078_v41 = vadd.f32 %v1331_v27, %v1330_v36  ;;  %v6085_v16 = vadd.f32 %v1385_v18, %v1384_v59  ;;  %v6087_v11 = vadd.f32 %v1439_v57, %v1438_v3  ;;  %v1830_v36 = vld [vmem:[%s9426_s8 + $0x8] sm:$0xff]  ;;  %v1829_v57 = vld [vmem:[%s9426_s8] sm:$0xff] }
 0x264   :  { %v6063_v52 = vpop.permute.xlu1 %555  ;;  %v6065_v40 = vpop.permute.xlu0 %1186  ;;  %v748_v25 = vsel %vm350_vm7, %v747_v10, 0.0  ;;  %v669_v53 = vsel %vm338_vm2, %v668_v38, %v5661_v0  ;;  %v781_v59 = vsel %vm345_vm5, %v780_v46, %v5157_v61 }
 0x265   :  { %9592 = vst [vmem:[#allocation25_spill] sm:$0xff] %v6063_v52  ;;  %9593 = vst [vmem:[#allocation26_spill] sm:$0xff] %v6065_v40  ;;  %v766_v52 = vsel %vm350_vm7, %v765_v62, 0.0  ;;  %v730_v40 = vsel %vm350_vm7, %v729_v35, 0.0  ;;  %v6095_v62 = vadd.f32 %v1367_v17, %v1366_v4  ;;  %v1459_v31 = vmax.f32 %v6078_v41, %v6070_v28 }
 0x266   :  { %1812 = vperm.xlu1 %4688, %v1727_v15   ;;  %1807 = vperm.xlu0 %4687, %v1726_v45   ;;  %v670_v3 = vsel %vm340_vm3, %v669_v53, %v5835_v26  ;;  %v6111_v4 = vadd.f32 %v1421_v21, %v6014_v1  ;;  %v767_v35 = vrot.slane %v766_v52, 4  ;;  %v731_v15 = vrot.slane %v730_v40, 4  ;;  %v1832_v53 = vld [vmem:[%s9426_s8 + $0x18] sm:$0xff] }
 0x267   :  { %v688_v17 = vsel %vm340_vm3, %v687_v44, %v5661_v0  ;;  %v1460_v27 = vmax.f32 %v1459_v31, %v6095_v62  ;;  %v749_v22 = vrot.slane %v748_v25, 4  ;;  %v705_v45 = vsel %vm338_vm2, %v5951_v63, %v5157_v61 }
 0x268   :  { %v6103_v10 = vpop.permute.xlu1 %568  ;;  %v6105_v18 = vpop.permute.xlu0 %1189  ;;  %v689_v38 = vsel %vm210_vm0, %v688_v17, %v5835_v26  ;;  %v782_v1 = vsel %vm347_vm6, %v781_v59, %v5807_v47  ;;  %v671_v21 = vsel %vm210_vm0, %v670_v3, %v5722_v58  ;;  %v706_v46 = vsel %vm340_vm3, %v705_v45, %v5807_v47  ;;  %v1831_v47 = vld [vmem:[%s9426_s8 + $0x10] sm:$0xff] }
 0x269   :  { %v690_v44 = vsel %vm343_vm4, %v689_v38, %v5722_v58  ;;  %v1461_v63 = vmax.f32 %v1460_v27, %v6085_v16  ;;  %v672_v31 = vsel %vm343_vm4, %v671_v21, %v5866_v60  ;;  %v6148_v27 = vadd.f32 %v731_v15, %v730_v40 }
 0x26a   :  { %1844 = vperm.xlu1 %4688, %v1830_v36   ;;  %1839 = vperm.xlu0 %4687, %v1829_v57   ;;  %v707_v36 = vsel %vm210_vm0, %v706_v46, %v5661_v0  ;;  %v691_v59 = vsel %vm345_vm5, %v690_v44, %v5866_v60  ;;  %v6146_v57 = vadd.f32 %v767_v35, %v766_v52 }
 0x26b   :  { %v708_v0 = vsel %vm343_vm4, %v707_v36, %v5835_v26  ;;  %v692_v38 = vsel %vm347_vm6, %v691_v59, %v5775_v23  ;;  %v1462_v45 = vmax.f32 %v1461_v63, %v6073_v48  ;;  %v794_v52 = vsel %vm336_vm1, %v5896_v2, %v5864_v55 }
 0x26c   :  { %v6139_v3 = vpop.permute.xlu1 %581  ;;  %v6141_v17 = vpop.permute.xlu0 %1192  ;;  %v709_v21 = vsel %vm345_vm5, %v708_v0, %v5722_v58  ;;  %v693_v44 = vmul.f32 %v692_v38, %v5524_v51  ;;  %v783_v40 = vmul.f32 %v782_v1, %v5524_v51  ;;  %v795_v35 = vsel %vm338_vm2, %v794_v52, %v5833_v30  ;;  %v1834_v58 = vld [vmem:[%s9426_s8 + $0x28] sm:$0xff] }
 0x26d   :  { %v710_v26 = vsel %vm347_vm6, %v709_v21, %v5866_v60  ;;  %v673_v15 = vsel %vm345_vm5, %v672_v31, %v5775_v23  ;;  %v1463_v46 = vmax.f32 %v1462_v45, %v6111_v4  ;;  %v796_v60 = vsel %vm340_vm3, %v795_v35, %v5805_v34  ;;  %v1833_v23 = vld [vmem:[%s9426_s8 + $0x20] sm:$0xff] }
 0x26e   :  { %1854 = vperm.xlu1 %4688, %v1832_v53   ;;  %1849 = vperm.xlu0 %4687, %v1831_v47   ;;  %v694_v55 = vsel %vm350_vm7, %v693_v44, 0.0  ;;  %v711_v2 = vmul.f32 %v710_v26, %v5524_v51  ;;  %v6183_v53 = vadd.f32 %v749_v22, %v748_v25  ;;  %v797_v36 = vsel %vm210_vm0, %v796_v60, %v5749_v32 }
 0x26f   :  { %v695_v63 = vrot.slane %v694_v55, 4  ;;  %v674_v31 = vsel %vm347_vm6, %v673_v15, %v5898_v39  ;;  %v1464_v59 = vmax.f32 %v1463_v46, %v6087_v11  ;;  %v798_v47 = vsel %vm343_vm4, %v797_v36, %v5691_v49  ;;  %v1836_v39 = vld [vmem:[%s9426_s8 + $0x38] sm:$0xff] }
 0x270   :  { %v6176_v1 = vpop.permute.xlu1 %594  ;;  %v6178_v30 = vpop.permute.xlu0 %524  ;;  %v712_v34 = vsel %vm350_vm7, %v711_v2, 0.0  ;;  %v675_v0 = vmul.f32 %v674_v31, %v5524_v51  ;;  %v733_v25 = vrot.slane %v6148_v27, 2  ;;  %v799_v32 = vsel %vm345_vm5, %v798_v47, %v5631_v12  ;;  %v1835_v12 = vld [vmem:[%s9426_s8 + $0x30] sm:$0xff] }
 0x271   :  { %9594 = vst [vmem:[#allocation27_spill] sm:$0xff] %v6178_v30  ;;  %v696_v22 = vadd.f32 %v695_v63, %v694_v55  ;;  %v713_v38 = vrot.slane %v712_v34, 4  ;;  %v6201_v45 = vmax.f32 %v1464_v59, %v5958_v20  ;;  %v784_v49 = vsel %vm350_vm7, %v783_v40, 0.0 }
 0x272   :  { %1864 = vperm.xlu1 %4688, %v1834_v58   ;;  %1859 = vperm.xlu0 %4687, %v1833_v23   ;;  %v800_v21 = vsel %vm347_vm6, %v799_v32, %v5157_v61  ;;  %v676_v44 = vsel %vm350_vm7, %v675_v0, 0.0  ;;  %v1990_v0 = vld [vmem:[%s9427_s10] sm:$0xff] }
 0x273   :  { %v697_v35 = vrot.slane %v696_v22, 2  ;;  %v714_v15 = vadd.f32 %v713_v38, %v712_v34  ;;  %v801_v58 = vmul.f32 %v800_v21, %v5524_v51  ;;  %v677_v46 = vrot.slane %v676_v44, 4  ;;  %v9607_v51 = vld [vmem:[#allocation10_spill] sm:$0xff] }
 0x274   :  { %v6207_v52 = vpop.permute.xlu1 %1530  ;;  %v6209_v26 = vpop.permute.xlu0 %527  ;;  %v1466_v40 = vsub.f32 %v6078_v41, %v6201_v45  ;;  %v1469_v61 = vsub.f32 %v6070_v28, %v6201_v45  ;;  %v1475_v55 = vsub.f32 %v6085_v16, %v6201_v45  ;;  %v1478_v2 = vsub.f32 %v6073_v48, %v6201_v45  ;;  %v1991_v28 = vld [vmem:[%s9427_s10 + $0x8] sm:$0xff] }
 0x275   :  { %9595 = vst [vmem:[#allocation28_spill] sm:$0xff] %v6209_v26  ;;  %v1481_v60 = vsub.f32 %v6111_v4, %v6201_v45  ;;  %v785_v41 = vrot.slane %v784_v49, 4  ;;  %v698_v31 = vadd.f32 %v697_v35, %v696_v22  ;;  %v678_v59 = vadd.f32 %v677_v46, %v676_v44  ;;  %v2090_v4 = vld [vmem:[%s9430_s14 + $0x18] sm:$0xff] }
 0x276   :  { %1874 = vperm.xlu1 %4688, %v1836_v39   ;;  %1869 = vperm.xlu0 %4687, %v1835_v12   ;;  %v1467_v63 = vmul.f32 1.442695, %v1466_v40  ;;  %v1470_v36 = vmul.f32 1.442695, %v1469_v61  ;;  %v9597_v38 = vsub.f32 %v5758_v37, %v5946_v14  ;;  %v9598_v39 = vsub.f32 %v5773_v19, %v5946_v14  ;;  %v1993_v37 = vld [vmem:[%s9427_s10 + $0x18] sm:$0xff] }
 0x277   :  { %v497_v22 = vsub.f32 %v5801_v42, %v5946_v14  ;;  %v503_v44 = vsub.f32 %v5859_v24, %v5946_v14  ;;  %v769_v12 = vrot.slane %v6146_v57, 2  ;;  %v715_v35 = vrot.slane %v714_v15, 2  ;;  %v1992_v42 = vld [vmem:[%s9427_s10 + $0x10] sm:$0xff]  ;;  %v4695_v24 = vld [vmem:[%s9428_s5] sm:$0xff]  }
 0x278   :  { %v6232_v34 = vpop.permute.xlu1 %1502  ;;  %v6234_v47 = vpop.permute.xlu0 %530  ;;  %v492_v32 = vmul.f32 1.442695, %v9597_v38  ;;  %v495_v21 = vmul.f32 1.442695, %v9598_v39  ;;  %4729 = vpow2.f32 %v1467_v63  ;;  %v802_v46 = vsel %vm350_vm7, %v801_v58, 0.0  ;;  %4596 = vmatprep.mubr.msk.bf16.mxu1 %vm210_vm0, %v4695_v24 }
 0x279   :  { %9596 = vst [vmem:[#allocation29_spill] sm:$0xff] %v6232_v34  ;;  %4731 = vpow2.f32 %v1470_v36  ;;  %v751_v19 = vrot.slane %v6183_v53, 2  ;;  %v786_v40 = vadd.f32 %v785_v41, %v784_v49  ;;  %v679_v61 = vrot.slane %v678_v59, 2 }
 0x27a   :  { %2001 = vperm.xlu1 %4688, %v1991_v28   ;;  %1996 = vperm.xlu0 %4687, %v1990_v0   ;;  %v716_v58 = vadd.f32 %v715_v35, %v714_v15  ;;  %v803_v28 = vrot.slane %v802_v46, 4  ;;  %v699_v63 = vrot.slane %v698_v31, 1  ;;  %v734_v38 = vadd.f32 %v733_v25, %v6148_v27 }
 0x27b   :  { %4733 = vpow2.f32 %v5709_v43  ;;  %v506_v49 = vsub.f32 %v5868_v8, %v5946_v14  ;;  %v680_v41 = vadd.f32 %v679_v61, %v678_v59  ;;  %v498_v0 = vmul.f32 1.442695, %v497_v22  ;;  %v2084_v8 = vld [vmem:[%s9429_s13 + $0x8] sm:$0xff] }
 0x27c   :  { %v6262_v39 = vpop.permute.xlu1 %1543  ;;  %v6264_v36 = vpop.permute.xlu0 %533  ;;  %v504_v23 = vmul.f32 1.442695, %v503_v44  ;;  %v509_v15 = vsub.f32 %v5882_v9, %v5946_v14  ;;  %v512_v27 = vsub.f32 %v5906_v50, %v5946_v14  ;;  %4735 = vpow2.f32 %v492_v32  ;;  %v2083_v50 = vld [vmem:[%s9429_s13] sm:$0xff] }
 0x27d   :  { %v752_v25 = vadd.f32 %v751_v19, %v6183_v53  ;;  %v717_v35 = vrot.slane %v716_v58, 1  ;;  %v681_v43 = vrot.slane %v680_v41, 1  ;;  %4737 = vpow2.f32 %v495_v21 }
 0x27e   :  { %2011 = vperm.xlu1 %4688, %v1993_v37   ;;  %2006 = vperm.xlu0 %4687, %v1992_v42   ;;  %v787_v59 = vrot.slane %v786_v40, 2  ;;  %v735_v22 = vrot.slane %v734_v38, 1  ;;  %v770_v44 = vadd.f32 %v769_v12, %v6146_v57  ;;  %v804_v53 = vadd.f32 %v803_v28, %v802_v46  ;;  %v2088_v28 = vld [vmem:[%s9430_s14 + $0x8] sm:$0xff] }
 0x27f   :  { %v6286_v32 = vadd.f32 %v681_v43, %v680_v41  ;;  %v6288_v37 = vadd.f32 %v699_v63, %v698_v31  ;;  %v1234_v21 = vsel %vm336_vm1, %v6001_v13, %v5970_v56  ;;  %4739 = vpow2.f32 %v498_v0  ;;  %v2087_v0 = vld [vmem:[%s9430_s14] sm:$0xff] }
 0x280   :  { %v6279_v9 = vpop.permute.xlu1 %1508  ;;  %v6281_v61 = vpop.permute.xlu0 %536  ;;  %v507_v19 = vmul.f32 1.442695, %v506_v49  ;;  %v510_v57 = vmul.f32 1.442695, %v509_v15  ;;  %v1150_v12 = vsub.f32 %v5460_v5, %v5550_v7  ;;  %v753_v42 = vrot.slane %v752_v25, 1 }
 0x281   :  { %9599 = vst [vmem:[#allocation30_spill] sm:$0xff] %v6279_v9  ;;  %v6295_v24 = vadd.f32 %v717_v35, %v716_v58  ;;  %v809_v46 = vmax.f32 %v6286_v32, %v6288_v37  ;;  %v1235_v31 = vsel %vm338_vm2, %v1234_v21, %v5938_v33  ;;  %4741 = vpow2.f32 %v504_v23 }
 0x282   :  { %2140 = vperm.xlu1 %4688, %v2084_v8   ;;  %2135 = vperm.xlu0 %4687, %v2083_v50   ;;  %v6304_v63 = vpop.eup %4729  ;;  %v788_v49 = vadd.f32 %v787_v59, %v786_v40  ;;  %v6306_v5 = vadd.f32 %v735_v22, %v734_v38  ;;  %v1151_v7 = vmul.f32 1.442695, %v1150_v12  ;;  %v805_v35 = vrot.slane %v804_v53, 2 }
 0x283   :  { %9600 = vst [vmem:[#allocation31_spill] sm:$0xff] %v6295_v24  ;;  %9601 = vst [vmem:[#allocation32_spill] sm:$0xff] %v6304_v63  ;;  %v6315_v15 = vpop.eup %4731  ;;  %v771_v43 = vrot.slane %v770_v44, 1  ;;  %v810_v8 = vmax.f32 %v809_v46, %v6295_v24  ;;  %v1247_v23 = vsel %vm336_vm1, %v6033_v29, %v6001_v13  ;;  %4743 = vpow2.f32 %v507_v19  ;;  %v9614_v13 = vld [vmem:[#allocation22_spill] sm:$0xff] }
 0x284   :  { %v6308_v58 = vpop.permute.xlu1 %1556  ;;  %v6310_v41 = vpop.permute.xlu0 %539  ;;  %9603 = vst [vmem:[#allocation34_spill] sm:$0xff] %v6315_v15  ;;  %v513_v40 = vmul.f32 1.442695, %v512_v27  ;;  %v6323_v38 = vadd.f32 %v6315_v15, %v6304_v63  ;;  %v1236_v59 = vsel %vm340_vm3, %v1235_v31, %v5210_v6  ;;  %v6329_v50 = vadd.f32 %v753_v42, %v752_v25  ;;  %v2086_v27 = vld [vmem:[%s9429_s13 + $0x18] sm:$0xff]  ;;  %v9608_v15 = vld [vmem:[#allocation11_spill] sm:$0xff] }
 0x285   :  { %9602 = vst [vmem:[#allocation33_spill] sm:$0xff] %v6308_v58  ;;  %v6327_v22 = vpop.eup %4733  ;;  %v811_v21 = vmax.f32 %v810_v8, %v6306_v5  ;;  %v1221_v12 = vsel %vm336_vm1, %v5970_v56, %v5938_v33  ;;  %4745 = vpow2.f32 %v1151_v7  ;;  %v1476_v19 = vmul.f32 1.442695, %v1475_v55  ;;  %v2085_v7 = vld [vmem:[%s9429_s13 + $0x10] sm:$0xff] }
 0x286   :  { %9604 = vst [vmem:[#allocation35_spill] sm:$0xff] %v6323_v38  ;;  %2164 = vperm.xlu1 %4688, %v2088_v28   ;;  %9605 = vst [vmem:[#allocation36_spill] sm:$0xff] %v6327_v22  ;;  %2159 = vperm.xlu0 %4687, %v2087_v0   ;;  %v1479_v25 = vmul.f32 1.442695, %v1478_v2  ;;  %v789_v42 = vrot.slane %v788_v49, 1  ;;  %v1248_v46 = vsel %vm338_vm2, %v1247_v23, %v5970_v56  ;;  %v6353_v0 = vpop.eup %4735  ;;  %4747 = vpow2.f32 %v510_v57 }
 0x287   :  { %v806_v16 = vadd.f32 %v805_v35, %v804_v53  ;;  %v6355_v55 = vadd.f32 %v771_v43, %v770_v44  ;;  %v812_v48 = vmax.f32 %v811_v21, %v6329_v50  ;;  %v1237_v2 = vsel %vm210_vm0, %v1236_v59, %v5940_v54  ;;  %v6360_v8 = vpop.eup %4737  ;;  %v9611_v21 = vld [vmem:[#allocation20_spill] sm:$0xff] }
 0x288   :  { %v6346_v31 = vpop.permute.xlu1 %1514  ;;  %v6348_v28 = vpop.permute.xlu0 %542  ;;  %v1482_v23 = vmul.f32 1.442695, %v1481_v60  ;;  %v1165_v63 = vadd.f32 %v9608_v15, %v9607_v51  ;;  %v1222_v53 = vsel %vm338_vm2, %v1221_v12, %v5210_v6  ;;  %4749 = vpow2.f32 %v513_v40 }
 0x289   :  { %9606 = vst [vmem:[#allocation37_spill] sm:$0xff] %v6346_v31  ;;  %v9609_v44 = vsub.f32 %v6087_v11, %v6201_v45  ;;  %v813_v43 = vmax.f32 %v812_v48, %v6355_v55  ;;  %v1249_v57 = vsel %vm340_vm3, %v1248_v46, %v5938_v33  ;;  %v6378_v60 = vpop.eup %4739  ;;  %4751 = vpow2.f32 %v1476_v19  ;;  %v2089_v46 = vld [vmem:[%s9430_s14 + $0x10] sm:$0xff] }
 0x28a   :  { %2150 = vperm.xlu1 %4688, %v2086_v27   ;;  %2145 = vperm.xlu0 %4687, %v2085_v7   ;;  %v9610_v40 = vsub.f32 %v5958_v20, %v6201_v45  ;;  %v1238_v11 = vsel %vm343_vm4, %v1237_v2, %v9611_v21  ;;  %4753 = vpow2.f32 %v1479_v25  ;;  %v807_v7 = vrot.slane %v806_v16, 1 }
 0x28b   :  { %v1485_v35 = vmul.f32 1.442695, %v9609_v44  ;;  %v6392_v48 = vadd.f32 %v789_v42, %v788_v49  ;;  %v1223_v19 = vsel %vm340_vm3, %v1222_v53, %v5940_v54  ;;  %v6396_v20 = vpop.eup %4741  ;;  %4755 = vpow2.f32 %v1482_v23  ;;  %v9613_v44 = vld [vmem:[#allocation13_spill] sm:$0xff]  ;;  %v4445_v49 = vld [vmem:[%s9419_s4 + $0x88] sm:$0xff] }
 0x28c   :  { %v1488_v59 = vmul.f32 1.442695, %v9610_v40  ;;  %v6385_v12 = vpop.permute.xlu1 %1569  ;;  %v6387_v27 = vpop.permute.xlu0 %607  ;;  %9612 = vst [vmem:[#allocation10_spill] sm:$0xff] %v6396_v20  ;;  %v1250_v2 = vsel %vm210_vm0, %v1249_v57, %v5210_v6  ;;  %v1166_v40 = vadd.f32 %v9613_v44, %v1165_v63  ;;  %v1239_v25 = vsel %vm345_vm5, %v1238_v11, %v9614_v13  ;;  %v9627_v44 = vld [vmem:[#allocation26_spill] sm:$0xff] }
 0x28d   :  { %4757 = vpow2.f32 %v1485_v35  ;;  %v814_v56 = vmax.f32 %v813_v43, %v6392_v48  ;;  %v6407_v42 = vpop.eup %4743  ;;  %v1224_v23 = vsel %vm210_vm0, %v1223_v19, %v9611_v21  ;;  %v4444_v35 = vld [vmem:[%s9419_s4 + $0x80] sm:$0xff]  ;;  %v6420_v57 = vadd.f32 %v807_v7, %v806_v16  ;;  %v9617_v19 = vld [vmem:[#allocation24_spill] sm:$0xff] }
 0x28e   :  { %2174 = vperm.xlu1 %4688, %v2090_v4   ;;  %2169 = vperm.xlu0 %4687, %v2089_v46   ;;  %9615 = vst [vmem:[#allocation11_spill] sm:$0xff] %v6407_v42  ;;  %4759 = vpow2.f32 %v1488_v59  ;;  %v1251_v4 = vsel %vm343_vm4, %v1250_v2, %v5940_v54  ;;  %v1208_v59 = vsel %vm336_vm1, %v5938_v33, %v5210_v6 }
 0x28f   :  { %v6418_v43 = vpop.eup %4745  ;;  %v597_v11 = vsel %vm336_vm1, %v6176_v1, %v6139_v3  ;;  %v6433_v29 = vsel %vm347_vm6, %v1239_v25, %v9617_v19  ;;  %v1195_v16 = vsel %vm336_vm1, %v5210_v6, %v5940_v54  ;;  %v584_v7 = vsel %vm336_vm1, %v6139_v3, %v6103_v10  ;;  %v4447_v6 = vld [vmem:[%s9419_s4 + $0x98] sm:$0xff] }
 0x290   :  { %v6411_v53 = vpop.permute.xlu1 %880  ;;  %v6413_v63 = vpop.permute.xlu0 %620  ;;  %9616 = vst [vmem:[#allocation22_spill] sm:$0xff] %v6418_v43  ;;  %v1167_v46 = vadd.f32 %v6418_v43, %v1166_v40  ;;  %9618 = vst [vmem:[#allocation24_spill] sm:$0xff] %v6433_v29  ;;  %v6442_v2 = vmax.f32 %v814_v56, %v6420_v57  ;;  %v1225_v33 = vsel %vm343_vm4, %v1224_v23, %v9614_v13  ;;  %v9619_v40 = vld [vmem:[#allocation25_spill] sm:$0xff]  ;;  %v9621_v56 = vld [vmem:[#allocation14_spill] sm:$0xff] }
 0x291   :  { %v6449_v25 = vsel %vm336_vm1, %v6103_v10, %v9619_v40  ;;  %v1196_v31 = vsel %vm338_vm2, %v1195_v16, %v9611_v21  ;;  %v1226_v23 = vsel %vm345_vm5, %v1225_v33, %v9617_v19  ;;  %v1209_v9 = vsel %vm338_vm2, %v1208_v59, %v5940_v54  ;;  %v9624_v54 = vld [vmem:[#allocation12_spill] sm:$0xff]  ;;  %v9626_v43 = vld [vmem:[#allocation15_spill] sm:$0xff] }
 0x292   :  { %2236 = vperm.xlu1 %4688, %v4445_v49   ;;  %2231 = vperm.xlu0 %4687, %v4444_v35   ;;  %v6456_v49 = vpop.eup %4747  ;;  %v1168_v24 = vadd.f32 %v9621_v56, %v1167_v46  ;;  %v598_v29 = vsel %vm338_vm2, %v597_v11, %v6103_v10  ;;  %v4446_v35 = vld [vmem:[%s9419_s4 + $0x90] sm:$0xff]  ;;  %v1197_v46 = vsel %vm340_vm3, %v1196_v31, %v9614_v13 }
 0x293   :  { %9620 = vst [vmem:[#allocation38_spill] sm:$0xff] %v6456_v49  ;;  %v6470_v16 = vpop.eup %4749  ;;  %v1210_v33 = vsel %vm340_vm3, %v1209_v9, %v9611_v21  ;;  %v585_v59 = vsel %vm338_vm2, %v584_v7, %v9619_v40  ;;  %v500_v11 = vsub.f32 %v9624_v54, %v5946_v14  ;;  %v1198_v31 = vsel %vm210_vm0, %v1197_v46, %v9617_v19  ;;  %v4441_v46 = vld [vmem:[%s9419_s4 + $0x68] sm:$0xff] }
 0x294   :  { %v6465_v38 = vpop.permute.xlu1 %852  ;;  %9623 = vst [vmem:[#allocation40_spill] sm:$0xff] %v6470_v16  ;;  %v6480_v56 = vpop.permute.xlu0 %633  ;;  %v1169_v49 = vadd.f32 %v9626_v43, %v1168_v24  ;;  %v6487_v16 = vsel %vm347_vm6, %v1226_v23, %v9627_v44  ;;  %v1211_v9 = vsel %vm210_vm0, %v1210_v33, %v9614_v13  ;;  %v816_v54 = vsub.f32 %v6286_v32, %v6442_v2  ;;  %v9630_v32 = vld [vmem:[#allocation16_spill] sm:$0xff] }
 0x295   :  { %9622 = vst [vmem:[#allocation39_spill] sm:$0xff] %v6465_v38  ;;  %v6482_v38 = vpop.eup %4751  ;;  %v1199_v14 = vsel %vm343_vm4, %v1198_v31, %v9627_v44  ;;  %v1252_v24 = vsel %vm345_vm5, %v1251_v4, %v9611_v21  ;;  %v599_v23 = vsel %vm340_vm3, %v598_v29, %v9619_v40  ;;  %v819_v33 = vsub.f32 %v6288_v37, %v6442_v2  ;;  %v4440_v29 = vld [vmem:[%s9419_s4 + $0x60] sm:$0xff] }
 0x296   :  { %9625 = vst [vmem:[#allocation12_spill] sm:$0xff] %v6482_v38  ;;  %2246 = vperm.xlu1 %4688, %v4447_v6   ;;  %v6493_v7 = vpop.eup %4753  ;;  %2241 = vperm.xlu0 %4687, %v4446_v35   ;;  %v1170_v43 = vadd.f32 %v9630_v32, %v1169_v49  ;;  %v1212_v31 = vsel %vm343_vm4, %v1211_v9, %v9617_v19  ;;  %v501_v49 = vmul.f32 1.442695, %v500_v11 }
 0x297   :  { %9628 = vst [vmem:[#allocation26_spill] sm:$0xff] %v6493_v7  ;;  %v6506_v6 = vpop.eup %4755  ;;  %v9631_v7 = vld [vmem:[#allocation7_spill] sm:$0xff]  ;;  %v1213_v37 = vsel %vm345_vm5, %v1212_v31, %v9627_v44  ;;  %v1200_v19 = vsel %vm345_vm5, %v1199_v14, %v6105_v18  ;;  %v828_v32 = vsub.f32 %v6329_v50, %v6442_v2  ;;  %v817_v44 = vmul.f32 1.442695, %v816_v54 }
 0x298   :  { %9629 = vst [vmem:[#allocation41_spill] sm:$0xff] %v6506_v6  ;;  %v586_v4 = vsel %vm340_vm3, %v585_v59, %v9631_v7  ;;  %v6515_v21 = vpop.permute.xlu1 %893  ;;  %v6520_v35 = vpop.eup %4757  ;;  %v825_v6 = vsub.f32 %v6306_v5, %v6442_v2  ;;  %v1171_v38 = vadd.f32 %v6327_v22, %v1170_v43  ;;  %v600_v5 = vsel %vm210_vm0, %v599_v23, %v9631_v7 }
 0x299   :  { %9632 = vst [vmem:[#allocation42_spill] sm:$0xff] %v6520_v35  ;;  %v6528_v9 = vpop.permute.xlu0 %1499  ;;  %v6530_v59 = vpop.eup %4759  ;;  %v6537_v35 = vsel %vm347_vm6, %v1252_v24, %v9614_v13  ;;  %v831_v11 = vsub.f32 %v6355_v55, %v6442_v2  ;;  %v6545_v14 = vsel %vm347_vm6, %v1213_v37, %v6105_v18  ;;  %v6549_v50 = vsel %vm347_vm6, %v1200_v19, %v6141_v17  ;;  %v4443_v13 = vld [vmem:[%s9419_s4 + $0x78] sm:$0xff]  ;;  %v4442_v17 = vld [vmem:[%s9419_s4 + $0x70] sm:$0xff] }
 0x29a   :  { %9633 = vst [vmem:[#allocation43_spill] sm:$0xff] %v6528_v9  ;;  %2216 = vperm.xlu1 %4688, %v4441_v46   ;;  %2211 = vperm.xlu0 %4687, %v4440_v29   ;;  %v820_v43 = vmul.f32 1.442695, %v819_v33  ;;  %v834_v54 = vsub.f32 %v6392_v48, %v6442_v2  ;;  %v837_v55 = vsub.f32 %v6420_v57, %v6442_v2  ;;  %v826_v23 = vmul.f32 1.442695, %v825_v6 }
 0x29b   :  { %v587_v18 = vsel %vm210_vm0, %v586_v4, %v6178_v30  ;;  %v601_v46 = vsel %vm343_vm4, %v600_v5, %v6178_v30  ;;  %4761 = vpow2.f32 %v501_v49  ;;  %v515_v48 = vadd.f32 %v6360_v8, %v6353_v0 }
 0x29c   :  { %v6560_v24 = vpop.permute.xlu1 %858  ;;  %v829_v57 = vmul.f32 1.442695, %v828_v32  ;;  %4763 = vrcp.f32 %v1171_v38  ;;  %v6574_v31 = vsel %vm336_vm1, %v6262_v39, %v6207_v52  ;;  %v588_v4 = vsel %vm343_vm4, %v587_v18, %v6209_v26  ;;  %v4449_v38 = vld [vmem:[%s9419_s4 + $0xa8] sm:$0xff] }
 0x29d   :  { %v6569_v33 = vpop.permute.xlu0 %1505  ;;  %4765 = vpow2.f32 %v817_v44  ;;  %v832_v6 = vmul.f32 1.442695, %v831_v11  ;;  %v572_v29 = vsel %vm338_vm2, %v6449_v25, %v9631_v7  ;;  %v1559_v32 = vsel %vm336_vm1, %v6308_v58, %v6262_v39  ;;  %v4448_v25 = vld [vmem:[%s9419_s4 + $0xa0] sm:$0xff] }
 0x29e   :  { %2226 = vperm.xlu1 %4688, %v4443_v13   ;;  %2221 = vperm.xlu0 %4687, %v4442_v17   ;;  %4767 = vpow2.f32 %v820_v43  ;;  %v835_v37 = vmul.f32 1.442695, %v834_v54  ;;  %v838_v19 = vmul.f32 1.442695, %v837_v55  ;;  %v602_v49 = vsel %vm345_vm5, %v601_v46, %v6209_v26 }
 0x29f   :  { %4769 = vpow2.f32 %v826_v23  ;;  %v6596_v44 = vsel %vm347_vm6, %v602_v49, %v6234_v47  ;;  %v589_v11 = vsel %vm345_vm5, %v588_v4, %v6234_v47  ;;  %v516_v13 = vadd.f32 %v6378_v60, %v515_v48  ;;  %v4451_v48 = vld [vmem:[%s9419_s4 + $0xb8] sm:$0xff] }
 0x2a0   :  { %v6589_v5 = vpop.permute.xlu1 %906  ;;  %9634 = vst [vmem:[#allocation44_spill] sm:$0xff] %v6596_v44  ;;  %4771 = vpow2.f32 %v829_v57  ;;  %v573_v54 = vsel %vm340_vm3, %v572_v29, %v6178_v30  ;;  %v1560_v55 = vsel %vm338_vm2, %v1559_v32, %v6207_v52  ;;  %v1572_v18 = vsel %vm336_vm1, %v6385_v12, %v6308_v58  ;;  %v4450_v32 = vld [vmem:[%s9419_s4 + $0xb0] sm:$0xff] }
 0x2a1   :  { %v6601_v43 = vpop.permute.xlu0 %1511  ;;  %4773 = vpow2.f32 %v832_v6  ;;  %v6612_v17 = vsel %vm347_vm6, %v589_v11, %v6264_v36  ;;  %v574_v23 = vsel %vm210_vm0, %v573_v54, %v6209_v26  ;;  %v610_v46 = vsel %vm336_vm1, %v6387_v27, %v6176_v1 }
 0x2a2   :  { %2256 = vperm.xlu1 %4688, %v4449_v38   ;;  %2251 = vperm.xlu0 %4687, %v4448_v25   ;;  %4775 = vpow2.f32 %v835_v37  ;;  %v575_v57 = vsel %vm343_vm4, %v574_v23, %v6234_v47  ;;  %v545_v4 = vsel %vm336_vm1, %v9631_v7, %v6178_v30  ;;  %v623_v6 = vsel %vm336_vm1, %v6413_v63, %v6387_v27  ;;  %v9635_v37 = vld [vmem:[#allocation8_spill] sm:$0xff] }
 0x2a3   :  { %4777 = vpow2.f32 %v838_v19  ;;  %v576_v38 = vsel %vm345_vm5, %v575_v57, %v6264_v36  ;;  %v1561_v49 = vsel %vm340_vm3, %v1560_v55, %v9635_v37  ;;  %v1573_v25 = vsel %vm338_vm2, %v1572_v18, %v6262_v39 }
 0x2a4   :  { %v6630_v29 = vpop.permute.xlu1 %864  ;;  %v546_v54 = vsel %vm338_vm2, %v545_v4, %v6209_v26  ;;  %v558_v23 = vsel %vm336_vm1, %v9619_v40, %v9631_v7  ;;  %v611_v19 = vsel %vm338_vm2, %v610_v46, %v6139_v3  ;;  %v1472_v57 = vsub.f32 %v6095_v62, %v6201_v45 }
 0x2a5   :  { %v6641_v11 = vpop.permute.xlu0 %1517  ;;  %v6652_v55 = vpop.eup %4761  ;;  %v547_v18 = vsel %vm340_vm3, %v546_v54, %v6234_v47  ;;  %v559_v44 = vsel %vm338_vm2, %v558_v23, %v6178_v30  ;;  %v624_v4 = vsel %vm338_vm2, %v623_v6, %v6176_v1  ;;  %v636_v22 = vsel %vm336_vm1, %v6480_v56, %v6413_v63 }
 0x2a6   :  { %2266 = vperm.xlu1 %4688, %v4451_v48   ;;  %2261 = vperm.xlu0 %4687, %v4450_v32   ;;  %v6663_v46 = vpop.eup %4763  ;;  %v517_v62 = vadd.f32 %v6652_v55, %v516_v13  ;;  %v560_v45 = vsel %vm340_vm3, %v559_v44, %v6209_v26  ;;  %v1574_v48 = vsel %vm340_vm3, %v1573_v25, %v6207_v52  ;;  %v1473_v54 = vmul.f32 1.442695, %v1472_v57 }
 0x2a7   :  { %9636 = vst [vmem:[#allocation8_spill] sm:$0xff] %v6663_v46  ;;  %v6672_v30 = vpop.eup %4765  ;;  %v6676_v6 = vsel %vm347_vm6, %v576_v38, %v6281_v61  ;;  %v548_v63 = vsel %vm210_vm0, %v547_v18, %v6264_v36  ;;  %v561_v56 = vsel %vm210_vm0, %v560_v45, %v6234_v47  ;;  %v612_v44 = vsel %vm340_vm3, %v611_v19, %v6103_v10 }
 0x2a8   :  { %v6670_v23 = vpop.permute.xlu1 %1582  ;;  %9637 = vst [vmem:[#allocation45_spill] sm:$0xff] %v6672_v30  ;;  %v6686_v32 = vpop.eup %4767  ;;  %v518_v25 = vadd.f32 %v6396_v20, %v517_v62  ;;  %v625_v57 = vsel %vm340_vm3, %v624_v4, %v6139_v3  ;;  %v637_v38 = vsel %vm338_vm2, %v636_v22, %v6387_v27  ;;  %4779 = vpow2.f32 %v1473_v54 }
 0x2a9   :  { %v6684_v13 = vpop.permute.xlu0 %849  ;;  %9638 = vst [vmem:[#allocation46_spill] sm:$0xff] %v6686_v32  ;;  %v6693_v18 = vpop.eup %4769  ;;  %v1202_v47 = vmul.f32 %v6663_v46, %v9607_v51  ;;  %v549_v19 = vsel %vm343_vm4, %v548_v63, %v6281_v61  ;;  %v562_v45 = vsel %vm343_vm4, %v561_v56, %v6264_v36  ;;  %v1575_v62 = vsel %vm210_vm0, %v1574_v48, %v9635_v37 }
 0x2aa   :  { %v6703_v26 = vpop.eup %4771  ;;  %v550_v22 = vsel %vm345_vm5, %v549_v19, %v6310_v41  ;;  %v613_v27 = vsel %vm210_vm0, %v612_v44, %v9619_v40  ;;  %v1562_v51 = vsel %vm210_vm0, %v1561_v49, %v6528_v9  ;;  %v1576_v4 = vsel %vm343_vm4, %v1575_v62, %v6528_v9 }
 0x2ab   :  { %v6715_v36 = vpop.eup %4773  ;;  %v1215_v48 = vmul.f32 %v6663_v46, %v9608_v15  ;;  %v1203_v63 = vmul.f32 %v1202_v47, %v6549_v50  ;;  %v626_v56 = vsel %vm210_vm0, %v625_v57, %v6103_v10  ;;  %v638_v44 = vsel %vm340_vm3, %v637_v38, %v6176_v1 }
 0x2ac   :  { %v6713_v54 = vpop.permute.xlu1 %1595  ;;  %v6726_v49 = vpop.eup %4775  ;;  %v6730_v62 = vadd.f32 %v6686_v32, %v6672_v30  ;;  %v519_v20 = vadd.f32 %v6407_v42, %v518_v25  ;;  %v563_v15 = vsel %vm345_vm5, %v562_v45, %v6281_v61  ;;  %v6737_v50 = vsel %vm347_vm6, %v550_v22, %v6348_v28  ;;  %v9642_v22 = vld [vmem:[#allocation13_spill] sm:$0xff]  ;;  %v9650_v32 = vld [vmem:[#allocation24_spill] sm:$0xff] }
 0x2ad   :  { %v6724_v19 = vpop.permute.xlu0 %855  ;;  %v6739_v57 = vpop.eup %4777  ;;  %v1216_v1 = vmul.f32 %v1215_v48, %v6545_v14  ;;  %v6744_v38 = vsel %vm347_vm6, %v563_v15, %v6310_v41  ;;  %v6748_v47 = vsel %vm343_vm4, %v613_v27, %v9631_v7  ;;  %v6753_v61 = vsel %vm336_vm1, %v6515_v21, %v6411_v53 }
 0x2ae   :  { %9639 = vst [vmem:[#allocation47_spill] sm:$0xff] %v6724_v19  ;;  %9640 = vst [vmem:[#allocation48_spill] sm:$0xff] %v6748_v47  ;;  %v6757_v28 = vsel %vm343_vm4, %v626_v56, %v9619_v40  ;;  %v639_v14 = vsel %vm210_vm0, %v638_v44, %v6139_v3  ;;  %v1563_v41 = vsel %vm343_vm4, %v1562_v51, %v6232_v34  ;;  %v9643_v51 = vld [vmem:[#allocation38_spill] sm:$0xff] }
 0x2af   :  { %9641 = vst [vmem:[#allocation49_spill] sm:$0xff] %v6757_v28  ;;  %v1577_v25 = vsel %vm345_vm5, %v1576_v4, %v6232_v34  ;;  %v1228_v27 = vmul.f32 %v6663_v46, %v9642_v22  ;;  %v1217_v48 = vadd.f32 %v1216_v1, %v1203_v63  ;;  %v6771_v15 = vsel %vm345_vm5, %v1563_v41, %v6569_v33  ;;  %v9647_v28 = vld [vmem:[#allocation14_spill] sm:$0xff] }
 0x2b0   :  { %v6765_v45 = vpop.permute.xlu1 %919  ;;  %v1520_v3 = vsel %vm336_vm1, %v9635_v37, %v6528_v9  ;;  %v520_v44 = vadd.f32 %v9643_v51, %v519_v20  ;;  %v6781_v4 = vsel %vm347_vm6, %v1577_v25, %v6569_v33  ;;  %v909_v63 = vsel %vm336_vm1, %v6589_v5, %v6515_v21  ;;  %v9646_v51 = vld [vmem:[#allocation22_spill] sm:$0xff] }
 0x2b1   :  { %v6776_v56 = vpop.permute.xlu0 %861  ;;  %9644 = vst [vmem:[#allocation13_spill] sm:$0xff] %v6781_v4  ;;  %v1533_v1 = vsel %vm336_vm1, %v6207_v52, %v9635_v37  ;;  %v1229_v41 = vmul.f32 %v1228_v27, %v6487_v16  ;;  %v6792_v22 = vsel %vm343_vm4, %v639_v14, %v6103_v10  ;;  %v1547_v25 = vsel %vm338_vm2, %v6574_v31, %v9635_v37 }
 0x2b2   :  { %9645 = vst [vmem:[#allocation50_spill] sm:$0xff] %v6792_v22  ;;  %v1534_v20 = vsel %vm338_vm2, %v1533_v1, %v6528_v9  ;;  %v6799_v40 = vpop.eup %4779  ;;  %v1241_v42 = vmul.f32 %v6663_v46, %v9646_v51  ;;  %v1254_v7 = vmul.f32 %v6663_v46, %v9647_v28  ;;  %v1521_v16 = vsel %vm338_vm2, %v1520_v3, %v6232_v34  ;;  %v9648_v1 = vld [vmem:[#allocation35_spill] sm:$0xff]  ;;  %v9651_v3 = vld [vmem:[#allocation40_spill] sm:$0xff] }
 0x2b3   :  { %v1548_v10 = vsel %vm340_vm3, %v1547_v25, %v6528_v9  ;;  %v1230_v14 = vadd.f32 %v1229_v41, %v1217_v48  ;;  %v910_v27 = vsel %vm338_vm2, %v909_v63, %v6411_v53  ;;  %v1491_v31 = vadd.f32 %v6799_v40, %v9648_v1  ;;  %v9652_v63 = vld [vmem:[#allocation12_spill] sm:$0xff]  ;;  %v9656_v9 = vld [vmem:[#allocation26_spill] sm:$0xff] }
 0x2b4   :  { %v1522_v22 = vsel %vm340_vm3, %v1521_v16, %v6569_v33  ;;  %v1242_v28 = vmul.f32 %v1241_v42, %v9650_v32  ;;  %v1255_v30 = vmul.f32 %v1254_v7, %v6537_v35  ;;  %v521_v47 = vadd.f32 %v9651_v3, %v520_v44  ;;  %v6822_v41 = vpop.permute.xlu1 %932  ;;  %v9653_v7 = vld [vmem:[#allocation30_spill] sm:$0xff]  ;;  %v9655_v3 = vld [vmem:[#allocation9_spill] sm:$0xff] }
 0x2b5   :  { %v6815_v51 = vpop.permute.xlu0 %867  ;;  %v1535_v48 = vsel %vm340_vm3, %v1534_v20, %v6232_v34  ;;  %v1492_v25 = vadd.f32 %v9652_v63, %v1491_v31  ;;  %v1549_v1 = vsel %vm210_vm0, %v1548_v10, %v6232_v34  ;;  %v1585_v16 = vsel %vm336_vm1, %v6670_v23, %v6385_v12  ;;  %v9654_v20 = vld [vmem:[#allocation31_spill] sm:$0xff] }
 0x2b6   :  { %9649 = vst [vmem:[#allocation22_spill] sm:$0xff] %v6815_v51  ;;  %v1598_v42 = vsel %vm336_vm1, %v6713_v54, %v6670_v23  ;;  %v1523_v35 = vsel %vm210_vm0, %v1522_v22, %v9653_v7  ;;  %v1536_v32 = vsel %vm210_vm0, %v1535_v48, %v6569_v33  ;;  %v1550_v44 = vsel %vm343_vm4, %v1549_v1, %v6569_v33  ;;  %v9658_v1 = vld [vmem:[#allocation37_spill] sm:$0xff] }
 0x2b7   :  { %v822_v10 = vsub.f32 %v9654_v20, %v6442_v2  ;;  %v1243_v31 = vadd.f32 %v1242_v28, %v1230_v14  ;;  %v911_v34 = vsel %vm340_vm3, %v910_v27, %v9655_v3  ;;  %v1493_v46 = vadd.f32 %v9656_v9, %v1492_v25  ;;  %v9657_v2 = vld [vmem:[#allocation41_spill] sm:$0xff] }
 0x2b8   :  { %v1524_v4 = vsel %vm343_vm4, %v1523_v35, %v6601_v43  ;;  %4781 = vrcp.f32 %v521_v47  ;;  %v1586_v22 = vsel %vm338_vm2, %v1585_v16, %v6308_v58  ;;  %v1599_v33 = vsel %vm338_vm2, %v1598_v42, %v6385_v12  ;;  %v6867_v42 = vpop.permute.xlu1 %945 }
 0x2b9   :  { %v6846_v51 = vpop.permute.xlu0 %1257  ;;  %v823_v48 = vmul.f32 1.442695, %v822_v10  ;;  %v1494_v14 = vadd.f32 %v9657_v2, %v1493_v46  ;;  %v1537_v27 = vsel %vm343_vm4, %v1536_v32, %v9653_v7  ;;  %v1551_v28 = vsel %vm345_vm5, %v1550_v44, %v9653_v7  ;;  %v9659_v10 = vld [vmem:[#allocation42_spill] sm:$0xff] }
 0x2ba   :  { %v922_v25 = vsel %vm336_vm1, %v6765_v45, %v6589_v5  ;;  %v1538_v47 = vsel %vm345_vm5, %v1537_v27, %v6601_v43  ;;  %v1525_v16 = vsel %vm345_vm5, %v1524_v4, %v9658_v1  ;;  %v870_v46 = vsel %vm336_vm1, %v9655_v3, %v6684_v13 }
 0x2bb   :  { %4783 = vpow2.f32 %v823_v48  ;;  %v1587_v35 = vsel %vm340_vm3, %v1586_v22, %v6262_v39  ;;  %v1600_v32 = vsel %vm340_vm3, %v1599_v33, %v6308_v58  ;;  %v883_v44 = vsel %vm336_vm1, %v6411_v53, %v9655_v3 }
 0x2bc   :  { %v897_v4 = vsel %vm338_vm2, %v6753_v61, %v9655_v3  ;;  %v1495_v27 = vadd.f32 %v9659_v10, %v1494_v14  ;;  %v923_v48 = vsel %vm338_vm2, %v922_v25, %v6515_v21  ;;  %v884_v22 = vsel %vm338_vm2, %v883_v44, %v6684_v13  ;;  %v9660_v14 = vld [vmem:[#allocation39_spill] sm:$0xff] }
 0x2bd   :  { %v1271_v20 = vpop.permute.xlu0 %1270  ;;  %v898_v33 = vsel %vm340_vm3, %v897_v4, %v6684_v13  ;;  %v6886_v2 = vadd.f32 %v1255_v30, %v1243_v31  ;;  %v6890_v58 = vsel %vm347_vm6, %v1551_v28, %v6601_v43  ;;  %v6895_v61 = vsel %vm347_vm6, %v6771_v15, %v9653_v7 }
 0x2be   :  { %v871_v25 = vsel %vm338_vm2, %v870_v46, %v9660_v14  ;;  %v1496_v10 = vadd.f32 %v6530_v59, %v1495_v27  ;;  %v1588_v44 = vsel %vm210_vm0, %v1587_v35, %v6207_v52  ;;  %v912_v30 = vsel %vm210_vm0, %v911_v34, %v6684_v13 }
 0x2bf   :  { %v872_v43 = vsel %vm340_vm3, %v871_v25, %v6724_v19  ;;  %v1601_v31 = vsel %vm210_vm0, %v1600_v32, %v6262_v39  ;;  %v924_v15 = vsel %vm340_vm3, %v923_v48, %v6411_v53  ;;  %v885_v7 = vsel %vm340_vm3, %v884_v22, %v9660_v14  ;;  %v959_v32 = vpop.permute.xlu1 %958 }
 0x2c0   :  { %v899_v28 = vsel %vm210_vm0, %v898_v33, %v9660_v14  ;;  %4785 = vrcp.f32 %v1496_v10  ;;  %v886_v46 = vsel %vm210_vm0, %v885_v7, %v6724_v19  ;;  %v935_v35 = vsel %vm336_vm1, %v6822_v41, %v6765_v45 }
 0x2c1   :  { %v900_v34 = vsel %vm343_vm4, %v899_v28, %v6724_v19  ;;  %v1539_v4 = vsel %vm347_vm6, %v1538_v47, %v9658_v1  ;;  %v1526_v27 = vsel %vm347_vm6, %v1525_v16, %v6641_v11  ;;  %v913_v10 = vsel %vm343_vm4, %v912_v30, %v9660_v14  ;;  %v1284_v22 = vpop.permute.xlu0 %1283  ;;  %v9661_v28 = vld [vmem:[#allocation23_spill] sm:$0xff] }
 0x2c2   :  { %v873_v48 = vsel %vm210_vm0, %v872_v43, %v6560_v24  ;;  %v6929_v33 = vpop.eup %4781  ;;  %v6933_v25 = vsel %vm343_vm4, %v1588_v44, %v9635_v37  ;;  %v6937_v7 = vsel %vm343_vm4, %v1601_v31, %v6207_v52  ;;  %v914_v11 = vsel %vm345_vm5, %v913_v10, %v6724_v19 }
 0x2c3   :  { %v874_v47 = vsel %vm343_vm4, %v873_v48, %v6776_v56  ;;  %v6945_v1 = vsel %vm210_vm0, %v924_v15, %v9655_v3  ;;  %v887_v16 = vsel %vm343_vm4, %v886_v46, %v6560_v24  ;;  %v901_v44 = vsel %vm345_vm5, %v900_v34, %v6560_v24 }
 0x2c4   :  { %v936_v30 = vsel %vm338_vm2, %v935_v35, %v6589_v5  ;;  %v888_v31 = vsel %vm345_vm5, %v887_v16, %v6776_v56  ;;  %v1260_v10 = vsel %vm336_vm1, %v6846_v51, %v9661_v28  ;;  %v1273_v15 = vsel %vm336_vm1, %v1271_v20, %v6846_v51 }
 0x2c5   :  { %v6953_v43 = vpop.eup %4783  ;;  %v1286_v46 = vsel %vm336_vm1, %v1284_v22, %v1271_v20  ;;  %v591_v34 = vmul.f32 %v6929_v33, %v6652_v55  ;;  %v6969_v48 = vsel %vm347_vm6, %v901_v44, %v6776_v56  ;;  %v875_v16 = vsel %vm345_vm5, %v874_v47, %v6630_v29  ;;  %v9662_v56 = vld [vmem:[#allocation21_spill] sm:$0xff] }
 0x2c6   :  { %v841_v35 = vadd.f32 %v6953_v43, %v6730_v62  ;;  %v578_v19 = vmul.f32 %v6929_v33, %v6378_v60  ;;  %v565_v14 = vmul.f32 %v6929_v33, %v6360_v8  ;;  %v552_v20 = vmul.f32 %v6929_v33, %v6353_v0  ;;  %v1609_v62 = vpop.permute.xlu1 %1608 }
 0x2c7   :  { %v937_v55 = vsel %vm340_vm3, %v936_v30, %v6515_v21  ;;  %v1261_v44 = vsel %vm338_vm2, %v1260_v10, %v9662_v56  ;;  %v1274_v47 = vsel %vm338_vm2, %v1273_v15, %v9661_v28  ;;  %v1287_v60 = vsel %vm338_vm2, %v1286_v46, %v6846_v51 }
 0x2c8   :  { %v842_v22 = vadd.f32 %v6693_v18, %v841_v35  ;;  %v6989_v8 = vmul.f32 %v591_v34, %v6612_v17  ;;  %v579_v0 = vmul.f32 %v578_v19, %v6676_v6  ;;  %v6994_v30 = vsel %vm347_vm6, %v888_v31, %v6630_v29  ;;  %v9663_v29 = vld [vmem:[#allocation19_spill] sm:$0xff]  ;;  %v9665_v34 = vld [vmem:[#allocation34_spill] sm:$0xff] }
 0x2c9   :  { %v6998_v35 = vsel %vm347_vm6, %v914_v11, %v6560_v24  ;;  %v566_v10 = vmul.f32 %v565_v14, %v6744_v38  ;;  %v948_v51 = vsel %vm336_vm1, %v6867_v42, %v6822_v41  ;;  %v1611_v17 = vsel %vm336_vm1, %v1609_v62, %v6713_v54  ;;  %v9664_v11 = vld [vmem:[#allocation32_spill] sm:$0xff] }
 0x2ca   :  { %v843_v15 = vadd.f32 %v6703_v26, %v842_v22  ;;  %v4786_v6 = vpop.eup %4785  ;;  %v553_v19 = vmul.f32 %v552_v20, %v6737_v50  ;;  %v1262_v31 = vsel %vm340_vm3, %v1261_v44, %v9663_v29  ;;  %v1275_v24 = vsel %vm340_vm3, %v1274_v47, %v9662_v56 }
 0x2cb   :  { %v1288_v38 = vsel %vm340_vm3, %v1287_v60, %v9661_v28  ;;  %v1553_v14 = vmul.f32 %v4786_v6, %v6799_v40  ;;  %v1527_v46 = vmul.f32 %v4786_v6, %v9664_v11  ;;  %v1540_v22 = vmul.f32 %v4786_v6, %v9665_v34  ;;  %v9666_v60 = vld [vmem:[#allocation17_spill] sm:$0xff] }
 0x2cc   :  { %v1566_v54 = vmul.f32 %v4786_v6, %v9652_v63  ;;  %v1579_v62 = vmul.f32 %v4786_v6, %v9656_v9  ;;  %v844_v50 = vadd.f32 %v6715_v36, %v843_v15  ;;  %v949_v20 = vsel %vm338_vm2, %v948_v51, %v6765_v45 }
 0x2cd   :  { %v1612_v44 = vsel %vm338_vm2, %v1611_v17, %v6670_v23  ;;  %v1541_v47 = vmul.f32 %v1540_v22, %v1539_v4  ;;  %v1528_v28 = vmul.f32 %v1527_v46, %v1526_v27  ;;  %v1263_v40 = vsel %vm210_vm0, %v1262_v31, %v9666_v60  ;;  %v9670_v22 = vld [vmem:[#allocation13_spill] sm:$0xff] }
 0x2ce   :  { %v1276_v11 = vsel %vm210_vm0, %v1275_v24, %v9663_v29  ;;  %v567_v34 = vadd.f32 %v566_v10, %v553_v19  ;;  %v845_v63 = vadd.f32 %v6726_v49, %v844_v50  ;;  %v961_v9 = vsel %vm336_vm1, %v959_v32, %v6867_v42  ;;  %v9667_v19 = vld [vmem:[#allocation6_spill] sm:$0xff] }
 0x2cf   :  { %v1289_v15 = vsel %vm210_vm0, %v1288_v38, %v9662_v56  ;;  %v1554_v51 = vmul.f32 %v1553_v14, %v6890_v58  ;;  %v1542_v23 = vadd.f32 %v1541_v47, %v1528_v28  ;;  %v938_v4 = vsel %vm210_vm0, %v937_v55, %v6411_v53  ;;  %v9668_v24 = vld [vmem:[#allocation22_spill] sm:$0xff]  ;;  %v9669_v14 = vld [vmem:[#allocation33_spill] sm:$0xff] }
 0x2d0   :  { %v1613_v27 = vsel %vm340_vm3, %v1612_v44, %v6385_v12  ;;  %v846_v17 = vadd.f32 %v6739_v57, %v845_v63  ;;  %v950_v10 = vsel %vm340_vm3, %v949_v20, %v6589_v5  ;;  %v1264_v42 = vsel %vm343_vm4, %v1263_v40, %v9667_v19  ;;  %v9671_v44 = vld [vmem:[#allocation18_spill] sm:$0xff]  ;;  %v9673_v40 = vld [vmem:[#allocation15_spill] sm:$0xff] }
 0x2d1   :  { %v1277_v32 = vsel %vm343_vm4, %v1276_v11, %v9666_v60  ;;  %v1567_v58 = vmul.f32 %v1566_v54, %v6895_v61  ;;  %v1555_v56 = vadd.f32 %v1554_v51, %v1542_v23  ;;  %v962_v55 = vsel %vm338_vm2, %v961_v9, %v6822_v41  ;;  %v9672_v54 = vld [vmem:[#allocation20_spill] sm:$0xff]  ;;  %v9677_v23 = vld [vmem:[#allocation41_spill] sm:$0xff] }
 0x2d2   :  { %v1290_v12 = vsel %vm343_vm4, %v1289_v15, %v9663_v29  ;;  %v580_v31 = vadd.f32 %v579_v0, %v567_v34  ;;  %4787 = vrcp.f32 %v846_v17  ;;  %v876_v38 = vsel %vm347_vm6, %v875_v16, %v9668_v24  ;;  %v9674_v11 = vld [vmem:[#allocation8_spill] sm:$0xff] }
 0x2d3   :  { %v1614_v46 = vsel %vm210_vm0, %v1613_v27, %v9669_v14  ;;  %v1580_v50 = vmul.f32 %v1579_v62, %v9670_v22  ;;  %v1568_v20 = vadd.f32 %v1567_v58, %v1555_v56  ;;  %v1265_v61 = vsel %vm345_vm5, %v1264_v42, %v9671_v44  ;;  %v9675_v9 = vld [vmem:[#allocation16_spill] sm:$0xff]  ;;  %v9679_v56 = vld [vmem:[#allocation42_spill] sm:$0xff] }
 0x2d4   :  { %v1278_v41 = vsel %vm345_vm5, %v1277_v32, %v9667_v19  ;;  %v951_v29 = vsel %vm210_vm0, %v950_v10, %v6515_v21  ;;  %v963_v0 = vsel %vm340_vm3, %v962_v55, %v6765_v45  ;;  %v1266_v16 = vsel %vm347_vm6, %v1265_v61, %v9672_v54  ;;  %v9676_v45 = vld [vmem:[#allocation43_spill] sm:$0xff]  ;;  %v9678_v10 = vld [vmem:[#allocation29_spill] sm:$0xff]  ;;  %v9680_v14 = vld [vmem:[#allocation36_spill] sm:$0xff] }
 0x2d5   :  { %v1291_v47 = vsel %vm345_vm5, %v1290_v12, %v9666_v60  ;;  %v1581_v62 = vadd.f32 %v1580_v50, %v1568_v20  ;;  %v1615_v28 = vsel %vm343_vm4, %v1614_v46, %v6262_v39  ;;  %v1267_v34 = vmul.f32 %v9674_v11, %v9673_v40  ;;  %v9683_v54 = vld [vmem:[#allocation10_spill] sm:$0xff] }
 0x2d6   :  { %v1279_v63 = vsel %vm347_vm6, %v1278_v41, %v9671_v44  ;;  %v1280_v15 = vmul.f32 %v9674_v11, %v9675_v9  ;;  %v1590_v51 = vsel %vm345_vm5, %v6933_v25, %v9676_v45  ;;  %v1592_v27 = vmul.f32 %v4786_v6, %v9677_v23  ;;  %v9681_v44 = vld [vmem:[#allocation27_spill] sm:$0xff] }
 0x2d7   :  { %v1603_v60 = vsel %vm345_vm5, %v6937_v7, %v9635_v37  ;;  %v1268_v39 = vmul.f32 %v1267_v34, %v1266_v16  ;;  %v1292_v17 = vsel %vm347_vm6, %v1291_v47, %v9667_v19  ;;  %v1591_v42 = vsel %vm347_vm6, %v1590_v51, %v9678_v10  ;;  %v9684_v47 = vld [vmem:[#allocation45_spill] sm:$0xff]  ;;  %v9692_v10 = vld [vmem:[#allocation38_spill] sm:$0xff] }
 0x2d8   :  { %v1604_v32 = vsel %vm347_vm6, %v1603_v60, %v9676_v45  ;;  %v1593_v58 = vmul.f32 %v1592_v27, %v1591_v42  ;;  %v1605_v55 = vmul.f32 %v4786_v6, %v9679_v56  ;;  %v1616_v25 = vsel %vm345_vm5, %v1615_v28, %v6207_v52  ;;  %v9685_v28 = vld [vmem:[#allocation46_spill] sm:$0xff] }
 0x2d9   :  { %v1618_v12 = vmul.f32 %v4786_v6, %v6530_v59  ;;  %v939_v7 = vsel %vm343_vm4, %v938_v4, %v9655_v3  ;;  %v964_v19 = vsel %vm210_vm0, %v963_v0, %v6589_v5  ;;  %v1281_v24 = vmul.f32 %v1280_v15, %v1279_v63  ;;  %v9682_v59 = vld [vmem:[#allocation48_spill] sm:$0xff]  ;;  %v9688_v15 = vld [vmem:[#allocation7_spill] sm:$0xff] }
 0x2da   :  { %v1293_v46 = vmul.f32 %v9674_v11, %v9680_v14  ;;  %v952_v22 = vsel %vm343_vm4, %v951_v29, %v6411_v53  ;;  %v1594_v50 = vadd.f32 %v1593_v58, %v1581_v62  ;;  %v1606_v20 = vmul.f32 %v1605_v55, %v1604_v32 }
 0x2db   :  { %v1617_v52 = vsel %vm347_vm6, %v1616_v25, %v9635_v37  ;;  %v615_v6 = vsel %vm345_vm5, %v9682_v59, %v9681_v44  ;;  %v926_v5 = vsel %vm343_vm4, %v6945_v1, %v6684_v13  ;;  %v1269_v4 = vadd.f32 %v1268_v39, %v6886_v2  ;;  %v9686_v1 = vld [vmem:[#allocation44_spill] sm:$0xff]  ;;  %v9691_v39 = vld [vmem:[#allocation11_spill] sm:$0xff]  ;;  %v9693_v25 = vld [vmem:[#allocation25_spill] sm:$0xff] }
 0x2dc   :  { %v1294_v61 = vmul.f32 %v1293_v46, %v1292_v17  ;;  %v4788_v41 = vpop.eup %4787  ;;  %v593_v0 = vadd.f32 %v6989_v8, %v580_v31  ;;  %v965_v29 = vsel %vm343_vm4, %v964_v19, %v6515_v21  ;;  %v604_v37 = vmul.f32 %v6929_v33, %v9683_v54  ;;  %v9687_v2 = vld [vmem:[#allocation28_spill] sm:$0xff]  ;;  %v9689_v8 = vld [vmem:[#allocation49_spill] sm:$0xff]  ;;  %v9690_v21 = vld [vmem:[#allocation39_spill] sm:$0xff] }
 0x2dd   :  { %v1607_v16 = vadd.f32 %v1606_v20, %v1594_v50  ;;  %v877_v62 = vmul.f32 %v4788_v41, %v9684_v47  ;;  %v890_v40 = vmul.f32 %v4788_v41, %v9685_v28  ;;  %v1282_v11 = vadd.f32 %v1281_v24, %v1269_v4  ;;  %v9695_v24 = vld [vmem:[#allocation47_spill] sm:$0xff] }
 0x2de   :  { %v1619_v34 = vmul.f32 %v1618_v12, %v1617_v52  ;;  %v605_v63 = vmul.f32 %v604_v37, %v9686_v1  ;;  %v616_v9 = vsel %vm347_vm6, %v615_v6, %v9687_v2  ;;  %v628_v31 = vsel %vm345_vm5, %v9689_v8, %v9688_v15  ;;  %v9694_v12 = vld [vmem:[#allocation50_spill] sm:$0xff] }
 0x2df   :  { %v927_v45 = vsel %vm345_vm5, %v926_v5, %v9690_v21  ;;  %v903_v51 = vmul.f32 %v4788_v41, %v6953_v43  ;;  %v878_v23 = vmul.f32 %v877_v62, %v876_v38  ;;  %v891_v27 = vmul.f32 %v890_v40, %v6994_v30 }
 0x2e0   :  { %v1295_v60 = vadd.f32 %v1294_v61, %v1282_v11  ;;  %v617_v17 = vmul.f32 %v6929_v33, %v9691_v39  ;;  %v630_v42 = vmul.f32 %v6929_v33, %v9692_v10  ;;  %v940_v32 = vsel %vm345_vm5, %v939_v7, %v6684_v13 }
 0x2e1   :  { %v953_v58 = vsel %vm345_vm5, %v952_v22, %v9655_v3  ;;  %v904_v56 = vmul.f32 %v903_v51, %v6969_v48  ;;  %v892_v55 = vadd.f32 %v891_v27, %v878_v23  ;;  %v916_v43 = vmul.f32 %v4788_v41, %v6693_v18 }
 0x2e2   :  { %v1620_v38 = vadd.f32 %v1619_v34, %v1607_v16  ;;  %v629_v30 = vsel %vm347_vm6, %v628_v31, %v9681_v44  ;;  %v641_v19 = vsel %vm345_vm5, %v9694_v12, %v9693_v25  ;;  %v928_v14 = vsel %vm347_vm6, %v927_v45, %v9695_v24  ;;  %v9697_v45 = vld [vmem:[#allocation4_spill] sm:$0xff] }
 0x2e3   :  { %v966_v7 = vsel %vm345_vm5, %v965_v29, %v6411_v53  ;;  %v905_v46 = vadd.f32 %v904_v56, %v892_v55  ;;  %v917_v48 = vmul.f32 %v916_v43, %v6998_v35  ;;  %v929_v22 = vmul.f32 %v4788_v41, %v6703_v26  ;;  %v9696_v26 = vld [vmem:[#allocation40_spill] sm:$0xff] }
 0x2e4   :  { %v1626_v18 = vpack.c.bf16 %v1620_v38, %v1295_v60  ;;  %v606_v50 = vadd.f32 %v605_v63, %v593_v0  ;;  %v618_v20 = vmul.f32 %v617_v17, %v616_v9  ;;  %v941_v52 = vsel %vm347_vm6, %v940_v32, %v9690_v21  ;;  %v9698_v60 = vld [vmem:[#allocation2_spill] sm:$0xff]  ;;  %v9699_v17 = vld [vmem:[#allocation5_spill] sm:$0xff]  ;;  %v9700_v32 = vld [vmem:[#allocation3_spill] sm:$0xff] }
 0x2e5   :  { %v954_v44 = vsel %vm347_vm6, %v953_v58, %v6684_v13  ;;  %v918_v59 = vadd.f32 %v917_v48, %v905_v46  ;;  %v930_v6 = vmul.f32 %v929_v22, %v928_v14  ;;  %v942_v5 = vmul.f32 %v4788_v41, %v6715_v36 }
 0x2e6   :  { %v955_v53 = vmul.f32 %v4788_v41, %v6726_v49  ;;  %v631_v4 = vmul.f32 %v630_v42, %v629_v30  ;;  %v642_v35 = vsel %vm347_vm6, %v641_v19, %v9688_v15  ;;  %v643_v61 = vmul.f32 %v6929_v33, %v9696_v26  ;;  %v1634_v33 = vpop.permute.xlu0 %1633 }
 0x2e7   :  { %v967_v0 = vsel %vm347_vm6, %v966_v7, %v9655_v3  ;;  %v931_v29 = vadd.f32 %v930_v6, %v918_v59  ;;  %v943_v54 = vmul.f32 %v942_v5, %v941_v52  ;;  %v968_v13 = vmul.f32 %v4788_v41, %v6739_v57  ;;  %v4696_v3 = vld [vmem:[%s9428_s5 + $0x8] sm:$0xff]   ;;  %v4697_v57 = vld [vmem:[%s9431_s7] sm:$0xff]   ;;  %v1639_v41 = vpop.permute.xlu1 %1638 }
 0x2e8   :  { %v956_v37 = vmul.f32 %v955_v53, %v954_v44  ;;  %v619_v16 = vadd.f32 %v618_v20, %v606_v50  ;;  %v644_v47 = vmul.f32 %v643_v61, %v642_v35 }
 0x2e9   :  { %v944_v36 = vadd.f32 %v943_v54, %v931_v29  ;;  %v969_v62 = vmul.f32 %v968_v13, %v967_v0 }
 0x2ea   :  { %v632_v49 = vadd.f32 %v631_v4, %v619_v16  ;;  %v1644_v63 = vpop.permute.xlu0 %1643 }
 0x2eb   :  { %v957_v28 = vadd.f32 %v956_v37, %v944_v36  ;;  %v1649_v31 = vpop.permute.xlu1 %1648 }
 0x2ec   :  { %v645_v40 = vadd.f32 %v644_v47, %v632_v49 }
 0x2ed   :  { %v970_v11 = vadd.f32 %v969_v62, %v957_v28 }
 0x2ee   :  { %v1774_v62 = vpop.permute.xlu0 %1773 }
 0x2ef   :  { %v1625_v34 = vpack.c.bf16 %v970_v11, %v645_v40  ;;  %v1779_v36 = vpop.permute.xlu1 %1778 }
 0x2f1   :  { %4592 = vmatprep.subr.bf16.mxu1 %v1625_v34 }
 0x2f2   :  { %4593 = vmatpush3.bf16.msra.mxu1 %v1625_v34  ;;  %v1798_v11 = vpop.permute.xlu0 %1797 }
 0x2f3   :  { %4594 = vmatprep.subr.bf16.mxu1 %v1626_v18  ;;  %v1803_v40 = vpop.permute.xlu1 %1802 }
 0x2f6   :  { %4595 = vmatpush3.bf16.msra.mxu1 %v1626_v18 }
 0x2f7   :  { %v1789_v34 = vpop.permute.xlu1 %1788 }
 0x2f9   :  { %4597 = vmatmul.mubr.msk.bf16.vlgmr.msra.gmra.mrb[0].mxu1 %vm210_vm0, %v4696_v3  ;;  %v1784_v3 = vpop.permute.xlu0 %1783 }
 0x2fa   :  { %4604 = vmatprep.mubr.msk.bf16.mxu1 %vm210_vm0, %v4697_v57 }
 0x3cc   :  { %v4598_v1 = vpop.f32.mrb[0].mxu1 }
 0x3cd   :  { %v1701_v2 = vpop.f32.mrb[1].mxu1  ;;  %v1710_v9 = vadd.f32 %v4598_v1, %v1644_v63 }
 0x3ce   :  { %v1702_v15 = vadd.f32 %v1701_v2, %v1634_v33  ;;  %v4599_v8 = vpop.f32.mrb[2].mxu1 }
 0x3cf   :  { %v1704_v21 = vpop.f32.mrb[3].mxu1  ;;  %v1713_v23 = vadd.f32 %v4599_v8, %v1649_v31  ;;  %v1718_v39 = vadd.f32 %v1710_v9, %v9698_v60  ;;  %v1813_v31 = vpop.permute.xlu1 %1812 }
 0x3d0   :  { %v1716_v51 = vadd.f32 %v1702_v15, %v9697_v45  ;;  %v1705_v27 = vadd.f32 %v1704_v21, %v1639_v41  ;;  %v1808_v21 = vpop.permute.xlu0 %1807 }
 0x3d1   :  { %v1719_v58 = vadd.f32 %v1713_v23, %v9700_v32  ;;  %v1731_v43 = vsel %vm350_vm7, %v1718_v39, 0.0  ;;  %v4701_v32 = vld [vmem:[%s9432_s9] sm:$0xff]  }
 0x3d2   :  { %v1717_v10 = vadd.f32 %v1705_v27, %v9699_v17  ;;  %v1728_v42 = vsel %vm350_vm7, %v1716_v51, 0.0  ;;  %v4698_v17 = vld [vmem:[%s9431_s7 + $0x8] sm:$0xff]   ;;  %4620 = vmatprep.mubr.msk.bf16.mxu0 %vm350_vm7, %v4701_v32 }
 0x3d3   :  { %v1733_v30 = vsel %vm350_vm7, %v1719_v58, 0.0 }
 0x3d4   :  { %v1729_v56 = vsel %vm350_vm7, %v1717_v10, 0.0 }
 0x3d5   :  { %v1730_v55 = vadd.f32 %v1729_v56, %v1728_v42  ;;  %v4700_v42 = vld [vmem:[%s9431_s7 + $0x18] sm:$0xff]   ;;  %v1845_v56 = vpop.permute.xlu1 %1844 }
 0x3d7   :  { %v1732_v38 = vadd.f32 %v1731_v43, %v1730_v55 }
 0x3d9   :  { %v1734_v25 = vadd.f32 %v1733_v30, %v1732_v38  ;;  %v1855_v43 = vpop.permute.xlu1 %1854 }
 0x3db   :  { %v1735_v12 = vrot.slane %v1734_v25, 4 }
 0x3dd   :  { %v1736_v19 = vadd.f32 %v1735_v12, %v1734_v25 }
 0x3df   :  { %v1737_v24 = vrot.slane %v1736_v19, 2 }
 0x3e1   :  { %v1738_v14 = vadd.f32 %v1737_v24, %v1736_v19 }
 0x3e3   :  { %v1739_v7 = vrot.slane %v1738_v14, 1 }
 0x3e5   :  { %v1740_v46 = vadd.f32 %v1739_v7, %v1738_v14 }
 0x3e7   :  { %v1742_v48 = vmul.f32 0.03125, %v1740_v46  ;;  %v1865_v46 = vpop.permute.xlu1 %1864 }
 0x3e9   :  { %v1743_v22 = vsub.f32 %v1716_v51, %v1742_v48  ;;  %v1744_v18 = vsub.f32 %v1717_v10, %v1742_v48  ;;  %v1745_v50 = vsub.f32 %v1718_v39, %v1742_v48  ;;  %v1746_v20 = vsub.f32 %v1719_v58, %v1742_v48  ;;  %v4699_v10 = vld [vmem:[%s9431_s7 + $0x10] sm:$0xff]   ;;  %v1840_v58 = vpop.permute.xlu0 %1839 }
 0x3eb   :  { %v1747_v52 = vmul.f32 %v1743_v22, %v1743_v22  ;;  %v1748_v44 = vmul.f32 %v1744_v18, %v1744_v18  ;;  %v1749_v59 = vmul.f32 %v1745_v50, %v1745_v50  ;;  %v1750_v6 = vmul.f32 %v1746_v20, %v1746_v20 }
 0x3ed   :  { %v1751_v5 = vsel %vm350_vm7, %v1747_v52, 0.0  ;;  %v1752_v53 = vsel %vm350_vm7, %v1748_v44, 0.0  ;;  %v1754_v35 = vsel %vm350_vm7, %v1749_v59, 0.0  ;;  %v1756_v61 = vsel %vm350_vm7, %v1750_v6, 0.0  ;;  %v1850_v55 = vpop.permute.xlu0 %1849 }
 0x3ee   :  { %v1753_v4 = vadd.f32 %v1752_v53, %v1751_v5 }
 0x3f0   :  { %v1755_v26 = vadd.f32 %v1754_v35, %v1753_v4  ;;  %v1875_v4 = vpop.permute.xlu1 %1874 }
 0x3f1   :  { %v1860_v12 = vpop.permute.xlu0 %1859 }
 0x3f2   :  { %v1757_v0 = vadd.f32 %v1756_v61, %v1755_v26 }
 0x3f4   :  { %v1758_v29 = vrot.slane %v1757_v0, 4 }
 0x3f5   :  { %v1870_v44 = vpop.permute.xlu0 %1869 }
 0x3f6   :  { %v1759_v54 = vadd.f32 %v1758_v29, %v1757_v0 }
 0x3f8   :  { %v1760_v37 = vrot.slane %v1759_v54, 2 }
 0x3fa   :  { %v1761_v13 = vadd.f32 %v1760_v37, %v1759_v54 }
 0x3fc   :  { %v1762_v16 = vrot.slane %v1761_v13, 1 }
 0x3fe   :  { %v1763_v47 = vadd.f32 %v1762_v16, %v1761_v13 }
 0x400   :  { %v1764_v49 = vmul.f32 0.03125, %v1763_v47 }
 0x402   :  { %v1765_v28 = vadd.f32 1e-05, %v1764_v49  ;;  %v4703_v49 = vld [vmem:[%s9420_s3 + $0x30] sm:$0xff]  }
 0x404   :  { %4789 = vrsqrt.f32 %v1765_v28  ;;  %v1997_v28 = vpop.permute.xlu0 %1996 }
 0x40e   :  { %v4790_v57 = vpop.eup %4789 }
 0x40f   :  { %v1768_v33 = vmul.f32 %v4790_v57, %v1744_v18  ;;  %v1767_v41 = vmul.f32 %v4790_v57, %v1743_v22  ;;  %v1769_v1 = vmul.f32 %v4790_v57, %v1745_v50  ;;  %v1770_v63 = vmul.f32 %v4790_v57, %v1746_v20 }
 0x411   :  { %v1791_v2 = vmul.f32 %v1774_v62, %v1767_v41  ;;  %v1792_v9 = vmul.f32 %v1779_v36, %v1768_v33  ;;  %v1793_v15 = vmul.f32 %v1784_v3, %v1769_v1  ;;  %v1794_v8 = vmul.f32 %v1789_v34, %v1770_v63  ;;  %v4702_v62 = vld [vmem:[%s9432_s9 + $0x8] sm:$0xff]   ;;  %v2007_v34 = vpop.permute.xlu0 %2006 }
 0x413   :  { %v7180_v45 = vadd.f32 %v1798_v11, %v1791_v2  ;;  %v7182_v51 = vadd.f32 %v1803_v40, %v1792_v9  ;;  %v7184_v23 = vadd.f32 %v1808_v21, %v1793_v15  ;;  %v7186_v27 = vadd.f32 %v1813_v31, %v1794_v8  ;;  %v2002_v40 = vpop.permute.xlu1 %2001 }
 0x415   :  { %v1827_v60 = vpack.c.bf16 %v7182_v51, %v7180_v45  ;;  %v1828_v39 = vpack.c.bf16 %v7186_v27, %v7184_v23 }
 0x417   :  { %4600 = vmatprep.subr.bf16.mxu1 %v1827_v60  ;;  %v2012_v1 = vpop.permute.xlu1 %2011 }
 0x418   :  { %4601 = vmatpush3.bf16.msra.mxu1 %v1827_v60 }
 0x419   :  { %4602 = vmatprep.subr.bf16.mxu1 %v1828_v39 }
 0x41c   :  { %4603 = vmatpush3.bf16.msra.mxu1 %v1828_v39 }
 0x41f   :  { %4605 = vmatmul.mubr.msk.bf16.vlgmr.msra.gmra.mrb[4].mxu1 %vm210_vm0, %v4698_v17 }
 0x420   :  { %4608 = vmatprep.mubr.msk.bf16.mxu1 %vm210_vm0, %v4699_v10 }
 0x427   :  { %4609 = vmatmul.mubr.msk.bf16.gmra.mrb[8].mxu1 %vm210_vm0, %v4700_v42 }
 0x428   :  { %4628 = vmatprep.mubr.msk.bf16.mxu1 %vm210_vm0, %v4703_v49 }
 0x4f2   :  { %v4606_v38 = vpop.f32.mrb[4].mxu1 }
 0x4f3   :  { %v1952_v30 = vadd.f32 %v4606_v38, %v1850_v55  ;;  %v1943_v25 = vpop.f32.mrb[5].mxu1 }
 0x4f4   :  { %v1944_v19 = vadd.f32 %v1943_v25, %v1840_v58  ;;  %v4607_v24 = vpop.f32.mrb[6].mxu1 }
 0x4f5   :  { %v1955_v14 = vadd.f32 %v4607_v24, %v1855_v43  ;;  %v1946_v7 = vpop.f32.mrb[7].mxu1  ;;  %v1976_v22 = vmax.f32 %v1952_v30, 0.0 }
 0x4f6   :  { %v1947_v48 = vadd.f32 %v1946_v7, %v1845_v56  ;;  %v1974_v50 = vmax.f32 %v1944_v19, 0.0 }
 0x4f7   :  { %v1977_v18 = vmax.f32 %v1955_v14, 0.0 }
 0x4f8   :  { %v1975_v20 = vmax.f32 %v1947_v48, 0.0 }
 0x4f9   :  { %v1987_v52 = vpack.c.bf16 %v1977_v18, %v1976_v22 }
 0x4fa   :  { %v1986_v59 = vpack.c.bf16 %v1975_v20, %v1974_v50  ;;  %v4610_v6 = vpop.f32.mrb[8].mxu1 }
 0x4fb   :  { %v1968_v5 = vadd.f32 %v4610_v6, %v1870_v44  ;;  %v1959_v53 = vpop.f32.mrb[9].mxu1 }
 0x4fc   :  { %v1960_v35 = vadd.f32 %v1959_v53, %v1860_v12  ;;  %v4611_v26 = vpop.f32.mrb[10].mxu1  ;;  %4612 = vmatprep.subr.bf16.mxu0 %v1986_v59 }
 0x4fd   :  { %v1971_v61 = vadd.f32 %v4611_v26, %v1875_v4  ;;  %v1962_v0 = vpop.f32.mrb[11].mxu1  ;;  %4613 = vmatpush3.bf16.msra.mxu0 %v1986_v59  ;;  %v1980_v54 = vmax.f32 %v1968_v5, 0.0  ;;  %v2136_v26 = vpop.permute.xlu0 %2135 }
 0x4fe   :  { %v1963_v29 = vadd.f32 %v1962_v0, %v1865_v46  ;;  %4614 = vmatprep.subr.bf16.mxu0 %v1987_v52  ;;  %v1978_v13 = vmax.f32 %v1960_v35, 0.0  ;;  %v2141_v35 = vpop.permute.xlu1 %2140 }
 0x4ff   :  { %v1981_v37 = vmax.f32 %v1971_v61, 0.0 }
 0x500   :  { %v1979_v16 = vmax.f32 %v1963_v29, 0.0 }
 0x501   :  { %v1989_v47 = vpack.c.bf16 %v1981_v37, %v1980_v54  ;;  %4615 = vmatpush3.bf16.msra.mxu0 %v1987_v52  ;;  %v2160_v54 = vpop.permute.xlu0 %2159 }
 0x502   :  { %v1988_v36 = vpack.c.bf16 %v1979_v16, %v1978_v13  ;;  %v2165_v29 = vpop.permute.xlu1 %2164 }
 0x504   :  { %4616 = vmatprep.subr.bf16.mxu0 %v1988_v36 }
 0x505   :  { %4617 = vmatpush3.bf16.msra.mxu0 %v1988_v36  ;;  %v2146_v13 = vpop.permute.xlu0 %2145 }
 0x506   :  { %4618 = vmatprep.subr.bf16.mxu0 %v1989_v47  ;;  %v2151_v37 = vpop.permute.xlu1 %2150 }
 0x509   :  { %4619 = vmatpush3.bf16.msra.mxu0 %v1989_v47 }
 0x50c   :  { %4621 = vmatmul.mubr.msk.bf16.vlgmr.msra.gmra.mrb[12].mxu0 %vm350_vm7, %v4702_v62 }
 0x5df   :  { %v4622_v11 = vpop.f32.mrb[12].mxu0 }
 0x5e0   :  { %v2064_v3 = vpop.f32.mrb[13].mxu0  ;;  %v2073_v57 = vadd.f32 %v4622_v11, %v2007_v34 }
 0x5e1   :  { %v2065_v33 = vadd.f32 %v2064_v3, %v1997_v28  ;;  %v4623_v41 = vpop.f32.mrb[14].mxu0  ;;  %v2175_v3 = vpop.permute.xlu1 %2174 }
 0x5e2   :  { %v2067_v63 = vpop.f32.mrb[15].mxu0  ;;  %v2076_v9 = vadd.f32 %v4623_v41, %v2012_v1  ;;  %v2081_v8 = vadd.f32 %v2073_v57, %v7184_v23  ;;  %v2170_v57 = vpop.permute.xlu0 %2169 }
 0x5e3   :  { %v2079_v2 = vadd.f32 %v2065_v33, %v7180_v45  ;;  %v2068_v15 = vadd.f32 %v2067_v63, %v2002_v40 }
 0x5e4   :  { %v2082_v60 = vadd.f32 %v2076_v9, %v7186_v27  ;;  %v2094_v10 = vsel %vm350_vm7, %v2081_v8, 0.0 }
 0x5e5   :  { %v2080_v31 = vadd.f32 %v2068_v15, %v7182_v51  ;;  %v2091_v21 = vsel %vm350_vm7, %v2079_v2, 0.0  ;;  %v4704_v15 = vld [vmem:[%s9420_s3 + $0x38] sm:$0xff]  }
 0x5e6   :  { %v2096_v32 = vsel %vm350_vm7, %v2082_v60, 0.0 }
 0x5e7   :  { %v2092_v39 = vsel %vm350_vm7, %v2080_v31, 0.0 }
 0x5e8   :  { %v2093_v17 = vadd.f32 %v2092_v39, %v2091_v21  ;;  %v4707_v21 = vld [vmem:[%s9420_s3 + $0x50] sm:$0xff]  }
 0x5ea   :  { %v2095_v42 = vadd.f32 %v2094_v10, %v2093_v17  ;;  %v2232_v10 = vpop.permute.xlu0 %2231 }
 0x5ec   :  { %v2097_v58 = vadd.f32 %v2096_v32, %v2095_v42 }
 0x5ee   :  { %v2098_v45 = vrot.slane %v2097_v58, 4 }
 0x5f0   :  { %v2099_v56 = vadd.f32 %v2098_v45, %v2097_v58  ;;  %v2242_v58 = vpop.permute.xlu0 %2241 }
 0x5f2   :  { %v2100_v55 = vrot.slane %v2099_v56, 2 }
 0x5f4   :  { %v2101_v43 = vadd.f32 %v2100_v55, %v2099_v56 }
 0x5f6   :  { %v2102_v23 = vrot.slane %v2101_v43, 1 }
 0x5f8   :  { %v2103_v38 = vadd.f32 %v2102_v23, %v2101_v43 }
 0x5fa   :  { %v2104_v51 = vmul.f32 0.03125, %v2103_v38 }
 0x5fc   :  { %v2105_v30 = vsub.f32 %v2079_v2, %v2104_v51  ;;  %v2106_v25 = vsub.f32 %v2080_v31, %v2104_v51  ;;  %v2107_v12 = vsub.f32 %v2081_v8, %v2104_v51  ;;  %v2108_v27 = vsub.f32 %v2082_v60, %v2104_v51  ;;  %v4705_v8 = vld [vmem:[%s9420_s3 + $0x40] sm:$0xff]   ;;  %v4706_v31 = vld [vmem:[%s9420_s3 + $0x48] sm:$0xff]   ;;  %v4708_v60 = vld [vmem:[%s9420_s3 + $0x58] sm:$0xff]   ;;  %s9705_s3 = smov 88  }
 0x5fe   :  { %v2109_v19 = vmul.f32 %v2105_v30, %v2105_v30  ;;  %v2110_v24 = vmul.f32 %v2106_v25, %v2106_v25  ;;  %v2111_v14 = vmul.f32 %v2107_v12, %v2107_v12  ;;  %v2112_v7 = vmul.f32 %v2108_v27, %v2108_v27 }
 0x600   :  { %v2113_v46 = vsel %vm350_vm7, %v2109_v19, 0.0  ;;  %v2114_v48 = vsel %vm350_vm7, %v2110_v24, 0.0  ;;  %v2116_v18 = vsel %vm350_vm7, %v2111_v14, 0.0  ;;  %v2118_v20 = vsel %vm350_vm7, %v2112_v7, 0.0  ;;  %v7376_v7 = vpop.permute.xlu0 %2211 }
 0x601   :  { %v2115_v22 = vadd.f32 %v2114_v48, %v2113_v46 }
 0x603   :  { %v2117_v50 = vadd.f32 %v2116_v18, %v2115_v22 }
 0x604   :  { %v2222_v48 = vpop.permute.xlu0 %2221 }
 0x605   :  { %v2119_v52 = vadd.f32 %v2118_v20, %v2117_v50 }
 0x607   :  { %v2120_v44 = vrot.slane %v2119_v52, 4 }
 0x608   :  { %v2252_v18 = vpop.permute.xlu0 %2251 }
 0x609   :  { %v2121_v59 = vadd.f32 %v2120_v44, %v2119_v52 }
 0x60b   :  { %v2122_v6 = vrot.slane %v2121_v59, 2 }
 0x60c   :  { %v2262_v20 = vpop.permute.xlu0 %2261 }
 0x60d   :  { %v2123_v5 = vadd.f32 %v2122_v6, %v2121_v59 }
 0x60f   :  { %v2124_v53 = vrot.slane %v2123_v5, 1 }
 0x611   :  { %v2125_v4 = vadd.f32 %v2124_v53, %v2123_v5 }
 0x613   :  { %v2126_v61 = vmul.f32 0.03125, %v2125_v4 }
 0x615   :  { %v2127_v0 = vadd.f32 1e-05, %v2126_v61 }
 0x617   :  { %4791 = vrsqrt.f32 %v2127_v0 }
 0x621   :  { %v4792_v16 = vpop.eup %4791 }
 0x622   :  { %v2130_v47 = vmul.f32 %v4792_v16, %v2106_v25  ;;  %v2129_v36 = vmul.f32 %v4792_v16, %v2105_v30  ;;  %v2131_v62 = vmul.f32 %v4792_v16, %v2107_v12  ;;  %v2132_v49 = vmul.f32 %v4792_v16, %v2108_v27  ;;  %v2237_v27 = vpop.permute.xlu1 %2236 }
 0x624   :  { %v2153_v28 = vmul.f32 %v2136_v26, %v2129_v36  ;;  %v2154_v40 = vmul.f32 %v2141_v35, %v2130_v47  ;;  %v2155_v11 = vmul.f32 %v2146_v13, %v2131_v62  ;;  %v2156_v34 = vmul.f32 %v2151_v37, %v2132_v49 }
 0x626   :  { %v7228_v33 = vadd.f32 %v2160_v54, %v2153_v28  ;;  %v7230_v41 = vadd.f32 %v2165_v29, %v2154_v40  ;;  %v7232_v1 = vadd.f32 %v2170_v57, %v2155_v11  ;;  %v7234_v63 = vadd.f32 %v2175_v3, %v2156_v34  ;;  %v2247_v19 = vpop.permute.xlu1 %2246 }
 0x628   :  { %9701 = vst [vmem:[#allocation14_spill] sm:$0xff] %v7228_v33  ;;  %9702 = vst [vmem:[#allocation35_spill] sm:$0xff] %v7230_v41  ;;  %v2194_v2 = vpack.c.bf16 %v7230_v41, %v7228_v33  ;;  %v2195_v9 = vpack.c.bf16 %v7234_v63, %v7232_v1 }
 0x629   :  { %9703 = vst [vmem:[#allocation24_spill] sm:$0xff] %v7232_v1  ;;  %9704 = vst [vmem:[#allocation12_spill] sm:$0xff] %v7234_v63 }
 0x62a   :  { %4624 = vmatprep.subr.bf16.mxu1 %v2194_v2  ;;  %v7378_v46 = vpop.permute.xlu1 %2216 }
 0x62b   :  { %4625 = vmatpush3.bf16.msra.mxu1 %v2194_v2 }
 0x62c   :  { %4626 = vmatprep.subr.bf16.mxu1 %v2195_v9 }
 0x62e   :  { %v7388_v22 = vpop.permute.xlu1 %2226 }
 0x62f   :  { %4627 = vmatpush3.bf16.msra.mxu1 %v2195_v9 }
 0x632   :  { %4629 = vmatmul.mubr.msk.bf16.vlgmr.msra.gmra.mrb[12].mxu1 %vm210_vm0, %v4704_v15  ;;  %v7394_v50 = vpop.permute.xlu1 %2256 }
 0x633   :  { %4632 = vmatprep.mubr.msk.bf16.mxu1 %vm210_vm0, %v4705_v8 }
 0x636   :  { %v7404_v52 = vpop.permute.xlu1 %2266 }
 0x63a   :  { %4633 = vmatmul.mubr.msk.bf16.gmra.mrb[16].mxu1 %vm210_vm0, %v4706_v31 }
 0x63b   :  { %4636 = vmatprep.mubr.msk.bf16.mxu1 %vm210_vm0, %v4707_v21 }
 0x642   :  { %4637 = vmatmul.mubr.msk.bf16.gmra.mrb[20].mxu1 %vm210_vm0, %v4708_v60 }
 0x705   :  { %v7260_v39 = vpop.f32.mrb[12].mxu1 }
 0x706   :  { %v7262_v17 = vpop.f32.mrb[13].mxu1  ;;  %v2360_v54 = vadd.f32 %v7260_v39, %v2222_v48 }
 0x707   :  { %v7264_v42 = vpop.f32.mrb[14].mxu1 }
 0x708   :  { %v7266_v32 = vpop.f32.mrb[15].mxu1  ;;  %v7467_v34 = vmul.f32 0.35355338, %v2360_v54 }
 0x70d   :  { %v4634_v45 = vpop.f32.mrb[16].mxu1 }
 0x70e   :  { %v7268_v56 = vadd.f32 %v4634_v45, %v2242_v58  ;;  %v2367_v55 = vpop.f32.mrb[17].mxu1 }
 0x70f   :  { %v4635_v43 = vpop.f32.mrb[18].mxu1  ;;  %v7294_v12 = vadd.f32 %v2367_v55, %v2232_v10 }
 0x710   :  { %3089 = vrot.lane.b32.xlu1 %v7268_v56, %s4870_s22  ;;  %3053 = vrot.lane.b32.xlu0 %v7268_v56, %s4871_s23  ;;  %v2370_v23 = vpop.f32.mrb[19].mxu1  ;;  %v7312_v24 = vadd.f32 %v4635_v43, %v2247_v19 }
 0x711   :  { %v7354_v14 = vadd.f32 %v2370_v23, %v2237_v27 }
 0x714   :  { %3107 = vrot.lane.b32.xlu1 %v7268_v56, %s4872_s24  ;;  %3056 = vrot.lane.b32.xlu0 %v7268_v56, %s4873_s25 }
 0x715   :  { %v7278_v38 = vpop.f32.mrb[20].mxu1 }
 0x716   :  { %v7280_v51 = vpop.f32.mrb[21].mxu1  ;;  %v7407_v44 = vadd.f32 %v7278_v38, %v2262_v20 }
 0x717   :  { %v7282_v30 = vpop.f32.mrb[22].mxu1  ;;  %v7451_v16 = vadd.f32 %v7280_v51, %v2252_v18 }
 0x718   :  { %3125 = vrot.lane.b32.xlu1 %v7268_v56, %s4874_s26  ;;  %3059 = vrot.lane.b32.xlu0 %v7268_v56, %s4875_s27  ;;  %v7288_v25 = vpop.f32.mrb[23].mxu1  ;;  %9708 = vst [vmem:[#allocation30_spill] sm:$0xff] %v7407_v44 }
 0x719   :  { %9709 = vst [vmem:[#allocation31_spill] sm:$0xff] %v7451_v16 }
 0x71c   :  { %3143 = vrot.lane.b32.xlu1 %v7268_v56, %s4876_s28  ;;  %3062 = vrot.lane.b32.xlu0 %v7268_v56, %s4877_s29 }
 0x720   :  { %3065 = vrot.lane.b32.xlu0 %v7268_v56, %s4878_s0  ;;  %2439 = vrot.lane.b32.xlu1 %v7294_v12, %s4870_s22 }
 0x724   :  { %3068 = vrot.lane.b32.xlu0 %v7268_v56, %s4879_s2  ;;  %2457 = vrot.lane.b32.xlu1 %v7294_v12, %s4872_s24 }
 0x728   :  { %3071 = vrot.lane.b32.xlu0 %v7268_v56, %s4880_s30  ;;  %2475 = vrot.lane.b32.xlu1 %v7294_v12, %s4874_s26 }
 0x72c   :  { %3161 = vrot.lane.b32.xlu0 %v7268_v56, %s9705_s3  ;;  %2493 = vrot.lane.b32.xlu1 %v7294_v12, %s4876_s28 }
 0x730   :  { %3179 = vrot.lane.b32.xlu0 %v7268_v56, %s9706_s21  ;;  %3414 = vrot.lane.b32.xlu1 %v7312_v24, %s4870_s22 }
 0x734   :  { %3197 = vrot.lane.b32.xlu0 %v7268_v56, %s9707_s17  ;;  %3381 = vrot.lane.b32.xlu1 %v7312_v24, %s4873_s25 }
 0x738   :  { %3432 = vrot.lane.b32.xlu1 %v7312_v24, %s4872_s24  ;;  %2403 = vrot.lane.b32.xlu0 %v7294_v12, %s4871_s23 }
 0x73c   :  { %3387 = vrot.lane.b32.xlu1 %v7312_v24, %s4877_s29  ;;  %2406 = vrot.lane.b32.xlu0 %v7294_v12, %s4873_s25 }
 0x740   :  { %3450 = vrot.lane.b32.xlu1 %v7312_v24, %s4874_s26  ;;  %2409 = vrot.lane.b32.xlu0 %v7294_v12, %s4875_s27 }
 0x744   :  { %3393 = vrot.lane.b32.xlu1 %v7312_v24, %s4879_s2  ;;  %2412 = vrot.lane.b32.xlu0 %v7294_v12, %s4877_s29 }
 0x748   :  { %3468 = vrot.lane.b32.xlu1 %v7312_v24, %s4876_s28  ;;  %2415 = vrot.lane.b32.xlu0 %v7294_v12, %s4878_s0 }
 0x74c   :  { %3486 = vrot.lane.b32.xlu1 %v7312_v24, %s9705_s3  ;;  %2418 = vrot.lane.b32.xlu0 %v7294_v12, %s4879_s2 }
 0x750   :  { %3504 = vrot.lane.b32.xlu1 %v7312_v24, %s9706_s21  ;;  %2421 = vrot.lane.b32.xlu0 %v7294_v12, %s4880_s30 }
 0x754   :  { %3522 = vrot.lane.b32.xlu1 %v7312_v24, %s9707_s17  ;;  %2511 = vrot.lane.b32.xlu0 %v7294_v12, %s9705_s3 }
 0x758   :  { %2764 = vrot.lane.b32.xlu1 %v7354_v14, %s4870_s22  ;;  %2529 = vrot.lane.b32.xlu0 %v7294_v12, %s9706_s21 }
 0x75c   :  { %2731 = vrot.lane.b32.xlu1 %v7354_v14, %s4873_s25  ;;  %2547 = vrot.lane.b32.xlu0 %v7294_v12, %s9707_s17 }
 0x760   :  { %2782 = vrot.lane.b32.xlu1 %v7354_v14, %s4872_s24  ;;  %3378 = vrot.lane.b32.xlu0 %v7312_v24, %s4871_s23 }
 0x764   :  { %2737 = vrot.lane.b32.xlu1 %v7354_v14, %s4877_s29  ;;  %3384 = vrot.lane.b32.xlu0 %v7312_v24, %s4875_s27 }
 0x768   :  { %2800 = vrot.lane.b32.xlu1 %v7354_v14, %s4874_s26  ;;  %3390 = vrot.lane.b32.xlu0 %v7312_v24, %s4878_s0 }
 0x76c   :  { %2743 = vrot.lane.b32.xlu1 %v7354_v14, %s4879_s2  ;;  %3396 = vrot.lane.b32.xlu0 %v7312_v24, %s4880_s30 }
 0x770   :  { %2818 = vrot.lane.b32.xlu1 %v7354_v14, %s4876_s28  ;;  %2728 = vrot.lane.b32.xlu0 %v7354_v14, %s4871_s23 }
 0x774   :  { %2836 = vrot.lane.b32.xlu1 %v7354_v14, %s9705_s3  ;;  %2734 = vrot.lane.b32.xlu0 %v7354_v14, %s4875_s27 }
 0x778   :  { %2854 = vrot.lane.b32.xlu1 %v7354_v14, %s9706_s21  ;;  %2740 = vrot.lane.b32.xlu0 %v7354_v14, %s4878_s0 }
 0x77c   :  { %2872 = vrot.lane.b32.xlu1 %v7354_v14, %s9707_s17  ;;  %2746 = vrot.lane.b32.xlu0 %v7354_v14, %s4880_s30 }
 0x780   :  { %3286 = vrot.lane.b32.xlu1 %v7407_v44, %s4870_s22  ;;  %3255 = vrot.lane.b32.xlu0 %v7407_v44, %s4871_s23 }
 0x782   :  { %v7413_v59 = vpop.permute.xlu1 %3089  ;;  %v7415_v6 = vpop.permute.xlu0 %3053 }
 0x783   :  { %v3092_v11 = vsel %vm336_vm1, %v7413_v59, %v7268_v56  ;;  %v3074_v19 = vsel %vm336_vm1, %v7268_v56, %v7415_v6 }
 0x784   :  { %3299 = vrot.lane.b32.xlu1 %v7407_v44, %s4872_s24  ;;  %3258 = vrot.lane.b32.xlu0 %v7407_v44, %s4873_s25  ;;  %v3093_v10 = vsel %vm338_vm2, %v3092_v11, %v7415_v6 }
 0x786   :  { %v7421_v5 = vpop.permute.xlu1 %3107  ;;  %v7423_v53 = vpop.permute.xlu0 %3056 }
 0x787   :  { %v3110_v4 = vsel %vm336_vm1, %v7421_v5, %v7413_v59  ;;  %v3094_v55 = vsel %vm340_vm3, %v3093_v10, %v7423_v53 }
 0x788   :  { %3312 = vrot.lane.b32.xlu1 %v7407_v44, %s4874_s26  ;;  %3261 = vrot.lane.b32.xlu0 %v7407_v44, %s4875_s27  ;;  %v3111_v35 = vsel %vm338_vm2, %v3110_v4, %v7268_v56  ;;  %v3075_v4 = vsel %vm338_vm2, %v3074_v19, %v7423_v53 }
 0x789   :  { %v3112_v29 = vsel %vm340_vm3, %v3111_v35, %v7415_v6 }
 0x78a   :  { %v7434_v26 = vpop.permute.xlu1 %3125  ;;  %v3060_v61 = vpop.permute.xlu0 %3059  ;;  %v3113_v49 = vsel %vm210_vm0, %v3112_v29, %v7423_v53 }
 0x78b   :  { %v3128_v0 = vsel %vm336_vm1, %v7434_v26, %v7421_v5  ;;  %v3114_v15 = vsel %vm343_vm4, %v3113_v49, %v3060_v61  ;;  %v3095_v43 = vsel %vm210_vm0, %v3094_v55, %v3060_v61  ;;  %v3076_v29 = vsel %vm340_vm3, %v3075_v4, %v3060_v61 }
 0x78c   :  { %v3129_v37 = vsel %vm338_vm2, %v3128_v0, %v7413_v59  ;;  %3325 = vrot.lane.b32.xlu1 %v7407_v44, %s4876_s28  ;;  %3264 = vrot.lane.b32.xlu0 %v7407_v44, %s4877_s29 }
 0x78d   :  { %v3130_v13 = vsel %vm340_vm3, %v3129_v37, %v7268_v56 }
 0x78e   :  { %v7453_v47 = vpop.permute.xlu1 %3143  ;;  %v3131_v36 = vsel %vm210_vm0, %v3130_v13, %v7415_v6  ;;  %v3063_v62 = vpop.permute.xlu0 %3062 }
 0x78f   :  { %v3146_v28 = vsel %vm336_vm1, %v7453_v47, %v7434_v26  ;;  %v3132_v40 = vsel %vm343_vm4, %v3131_v36, %v7423_v53  ;;  %v3115_v21 = vsel %vm345_vm5, %v3114_v15, %v3063_v62  ;;  %v3096_v38 = vsel %vm343_vm4, %v3095_v43, %v3063_v62 }
 0x790   :  { %v3147_v3 = vsel %vm338_vm2, %v3146_v28, %v7421_v5  ;;  %v3133_v57 = vsel %vm345_vm5, %v3132_v40, %v3060_v61  ;;  %2636 = vrot.lane.b32.xlu1 %v7451_v16, %s4870_s22  ;;  %3267 = vrot.lane.b32.xlu0 %v7407_v44, %s4878_s0  ;;  %v3077_v13 = vsel %vm210_vm0, %v3076_v29, %v3063_v62 }
 0x791   :  { %v3148_v2 = vsel %vm340_vm3, %v3147_v3, %v7413_v59  ;;  %v3134_v9 = vsel %vm347_vm6, %v3133_v57, %v3063_v62  ;;  %v7534_v15 = vadd.f32 %v7282_v30, %v7404_v52 }
 0x792   :  { %v3149_v8 = vsel %vm210_vm0, %v3148_v2, %v7268_v56  ;;  %v3135_v31 = vmul.f32 %v3134_v9, %v7467_v34  ;;  %v3066_v60 = vpop.permute.xlu0 %3065  ;;  %v7484_v39 = vpop.permute.xlu1 %2439 }
 0x793   :  { %v3150_v58 = vsel %vm343_vm4, %v3149_v8, %v7415_v6  ;;  %v3116_v45 = vsel %vm347_vm6, %v3115_v21, %v3066_v60  ;;  %v3097_v48 = vsel %vm345_vm5, %v3096_v38, %v3066_v60  ;;  %v3078_v49 = vsel %vm343_vm4, %v3077_v13, %v3066_v60  ;;  %9710 = vst [vmem:[#allocation9_spill] sm:$0xff] %v7534_v15 }
 0x794   :  { %2649 = vrot.lane.b32.xlu1 %v7451_v16, %s4872_s24  ;;  %3270 = vrot.lane.b32.xlu0 %v7407_v44, %s4879_s2  ;;  %v3151_v23 = vsel %vm345_vm5, %v3150_v58, %v7423_v53  ;;  %v3136_v51 = vsel %vm350_vm7, %v3135_v31, 0.0  ;;  %v3117_v27 = vmul.f32 %v3116_v45, %v7467_v34 }
 0x795   :  { %v3152_v0 = vsel %vm347_vm6, %v3151_v23, %v3060_v61  ;;  %v3137_v37 = vrot.slane %v3136_v51, 4 }
 0x796   :  { %v3069_v18 = vpop.permute.xlu0 %3068  ;;  %v7507_v20 = vpop.permute.xlu1 %2457  ;;  %v3118_v36 = vsel %vm350_vm7, %v3117_v27, 0.0  ;;  %v3153_v61 = vmul.f32 %v3152_v0, %v7467_v34 }
 0x797   :  { %v3098_v35 = vsel %vm347_vm6, %v3097_v48, %v3069_v18  ;;  %v3079_v3 = vsel %vm345_vm5, %v3078_v49, %v3069_v18  ;;  %v3138_v62 = vadd.f32 %v3137_v37, %v3136_v51  ;;  %v3119_v9 = vrot.slane %v3118_v36, 4 }
 0x798   :  { %v3099_v54 = vmul.f32 %v3098_v35, %v7467_v34  ;;  %2662 = vrot.lane.b32.xlu1 %v7451_v16, %s4874_s26  ;;  %3273 = vrot.lane.b32.xlu0 %v7407_v44, %s4880_s30  ;;  %v3154_v10 = vsel %vm350_vm7, %v3153_v61, 0.0 }
 0x799   :  { %v3139_v30 = vrot.slane %v3138_v62, 2  ;;  %v3120_v52 = vadd.f32 %v3119_v9, %v3118_v36  ;;  %v3155_v23 = vrot.slane %v3154_v10, 4 }
 0x79a   :  { %v3100_v28 = vsel %vm350_vm7, %v3099_v54, 0.0  ;;  %v3072_v40 = vpop.permute.xlu0 %3071  ;;  %v7523_v11 = vpop.permute.xlu1 %2475 }
 0x79b   :  { %v3101_v57 = vrot.slane %v3100_v28, 4  ;;  %v3080_v2 = vsel %vm347_vm6, %v3079_v3, %v3072_v40  ;;  %v7560_v35 = vadd.f32 %v3139_v30, %v3138_v62  ;;  %v3121_v0 = vrot.slane %v3120_v52, 2 }
 0x79c   :  { %2675 = vrot.lane.b32.xlu1 %v7451_v16, %s4876_s28  ;;  %2605 = vrot.lane.b32.xlu0 %v7451_v16, %s4871_s23  ;;  %v3081_v31 = vmul.f32 %v3080_v2, %v7467_v34  ;;  %v3156_v13 = vadd.f32 %v3155_v23, %v3154_v10 }
 0x79d   :  { %v3102_v8 = vadd.f32 %v3101_v57, %v3100_v28 }
 0x79e   :  { %v3162_v21 = vpop.permute.xlu0 %3161  ;;  %v7537_v60 = vpop.permute.xlu1 %2493  ;;  %v3082_v58 = vsel %vm350_vm7, %v3081_v31, 0.0 }
 0x79f   :  { %v3164_v45 = vsel %vm336_vm1, %v3162_v21, %v7453_v47  ;;  %v3083_v55 = vrot.slane %v3082_v58, 4  ;;  %v3103_v43 = vrot.slane %v3102_v8, 2 }
 0x7a0   :  { %3611 = vrot.lane.b32.xlu1 %v7534_v15, %s4870_s22  ;;  %2608 = vrot.lane.b32.xlu0 %v7451_v16, %s4873_s25  ;;  %v3165_v38 = vsel %vm338_vm2, %v3164_v45, %v7434_v26  ;;  %v3122_v45 = vadd.f32 %v3121_v0, %v3120_v52 }
 0x7a1   :  { %v3084_v19 = vadd.f32 %v3083_v55, %v3082_v58  ;;  %v3166_v48 = vsel %vm340_vm3, %v3165_v38, %v7421_v5  ;;  %v3104_v37 = vadd.f32 %v3103_v43, %v3102_v8 }
 0x7a2   :  { %v3180_v51 = vpop.permute.xlu0 %3179  ;;  %v7549_v27 = vpop.permute.xlu1 %3414  ;;  %v3167_v18 = vsel %vm210_vm0, %v3166_v48, %v7413_v59  ;;  %v3123_v0 = vrot.slane %v3122_v45, 1 }
 0x7a3   :  { %v3182_v4 = vsel %vm336_vm1, %v3180_v51, %v3162_v21  ;;  %v3085_v29 = vrot.slane %v3084_v19, 2  ;;  %v3168_v54 = vsel %vm343_vm4, %v3167_v18, %v7268_v56  ;;  %v3105_v38 = vrot.slane %v3104_v37, 1 }
 0x7a4   :  { %3583 = vrot.lane.b32.xlu1 %v7534_v15, %s4873_s25  ;;  %2611 = vrot.lane.b32.xlu0 %v7451_v16, %s4875_s27  ;;  %v3169_v36 = vsel %vm345_vm5, %v3168_v54, %v7415_v6  ;;  %v3183_v49 = vsel %vm338_vm2, %v3182_v4, %v7453_v47 }
 0x7a5   :  { %v3086_v61 = vadd.f32 %v3085_v29, %v3084_v19  ;;  %v3170_v3 = vsel %vm347_vm6, %v3169_v36, %v7423_v53  ;;  %v3184_v57 = vsel %vm340_vm3, %v3183_v49, %v7434_v26  ;;  %v2496_v53 = vsel %vm336_vm1, %v7537_v60, %v7523_v11 }
 0x7a6   :  { %v3198_v28 = vpop.permute.xlu0 %3197  ;;  %v7568_v40 = vpop.permute.xlu1 %3381  ;;  %v3171_v62 = vmul.f32 %v3170_v3, %v7467_v34  ;;  %v3185_v9 = vsel %vm210_vm0, %v3184_v57, %v7421_v5  ;;  %v2497_v52 = vsel %vm338_vm2, %v2496_v53, %v7507_v20  ;;  %v3157_v29 = vrot.slane %v3156_v13, 2 }
 0x7a7   :  { %v3200_v2 = vsel %vm336_vm1, %v3198_v28, %v3180_v51  ;;  %v3087_v31 = vrot.slane %v3086_v61, 1  ;;  %v3186_v10 = vsel %vm343_vm4, %v3185_v9, %v7413_v59  ;;  %v7625_v28 = vadd.f32 %v3105_v38, %v3104_v37 }
 0x7a8   :  { %v3201_v8 = vsel %vm338_vm2, %v3200_v2, %v3162_v21  ;;  %3624 = vrot.lane.b32.xlu1 %v7534_v15, %s4872_s24  ;;  %2614 = vrot.lane.b32.xlu0 %v7451_v16, %s4877_s29  ;;  %v3172_v21 = vsel %vm350_vm7, %v3171_v62, 0.0  ;;  %v3187_v30 = vsel %vm345_vm5, %v3186_v10, %v7268_v56  ;;  %v2498_v3 = vsel %vm340_vm3, %v2497_v52, %v7484_v39 }
 0x7a9   :  { %v3202_v58 = vsel %vm340_vm3, %v3201_v8, %v7453_v47  ;;  %v3173_v51 = vrot.slane %v3172_v21, 4  ;;  %v3188_v19 = vsel %vm347_vm6, %v3187_v30, %v7415_v6  ;;  %v7612_v18 = vadd.f32 %v3087_v31, %v3086_v61 }
 0x7aa   :  { %v3203_v55 = vsel %vm210_vm0, %v3202_v58, %v7434_v26  ;;  %v7595_v43 = vpop.permute.xlu1 %3432  ;;  %v7597_v23 = vpop.permute.xlu0 %2403  ;;  %v3189_v48 = vmul.f32 %v3188_v19, %v7467_v34  ;;  %v2478_v6 = vsel %vm336_vm1, %v7523_v11, %v7507_v20  ;;  %v7639_v8 = vadd.f32 %v3123_v0, %v3122_v45 }
 0x7ab   :  { %v3204_v47 = vsel %vm343_vm4, %v3203_v55, %v7421_v5  ;;  %v3174_v5 = vadd.f32 %v3173_v51, %v3172_v21  ;;  %v3215_v37 = vmax.f32 %v7612_v18, %v7625_v28  ;;  %v3158_v31 = vadd.f32 %v3157_v29, %v3156_v13 }
 0x7ac   :  { %v3205_v26 = vsel %vm345_vm5, %v3204_v47, %v7413_v59  ;;  %3589 = vrot.lane.b32.xlu1 %v7534_v15, %s4877_s29  ;;  %2617 = vrot.lane.b32.xlu0 %v7451_v16, %s4878_s0  ;;  %v3190_v59 = vsel %vm350_vm7, %v3189_v48, 0.0 }
 0x7ad   :  { %v3206_v4 = vsel %vm347_vm6, %v3205_v26, %v7268_v56  ;;  %v3175_v61 = vrot.slane %v3174_v5, 2  ;;  %v3191_v57 = vrot.slane %v3190_v59, 4  ;;  %v2352_v56 = vadd.f32 %v7262_v17, %v7376_v7 }
 0x7ae   :  { %v3207_v54 = vmul.f32 %v3206_v4, %v7467_v34  ;;  %v7621_v36 = vpop.permute.xlu1 %3387  ;;  %v7623_v49 = vpop.permute.xlu0 %2406  ;;  %v3141_v34 = vrot.slane %v7560_v35, 1  ;;  %v2479_v17 = vsel %vm338_vm2, %v2478_v6, %v7484_v39  ;;  %v2499_v7 = vsel %vm210_vm0, %v2498_v3, %v7294_v12 }
 0x7af   :  { %v3192_v62 = vadd.f32 %v3191_v57, %v3190_v59  ;;  %v3176_v58 = vadd.f32 %v3175_v61, %v3174_v5  ;;  %v2500_v55 = vsel %vm343_vm4, %v2499_v7, %v7597_v23  ;;  %v3216_v13 = vmax.f32 %v3215_v37, %v7639_v8 }
 0x7b0   :  { %v3208_v2 = vsel %vm350_vm7, %v3207_v54, 0.0  ;;  %3637 = vrot.lane.b32.xlu1 %v7534_v15, %s4874_s26  ;;  %2620 = vrot.lane.b32.xlu0 %v7451_v16, %s4879_s2  ;;  %v2501_v45 = vsel %vm345_vm5, %v2500_v55, %v7623_v49  ;;  %v7660_v47 = vmul.f32 0.35355338, %v2352_v56  ;;  %v7663_v52 = vadd.f32 %v3141_v34, %v7560_v35 }
 0x7b1   :  { %v3209_v9 = vrot.slane %v3208_v2, 4  ;;  %v3193_v21 = vrot.slane %v3192_v62, 2  ;;  %v2480_v48 = vsel %vm340_vm3, %v2479_v17, %v7294_v12  ;;  %v3159_v5 = vrot.slane %v3158_v31, 1 }
 0x7b2   :  { %v7645_v53 = vpop.permute.xlu1 %3450  ;;  %v7647_v10 = vpop.permute.xlu0 %2409  ;;  %v3177_v4 = vrot.slane %v3176_v58, 1  ;;  %v2481_v29 = vsel %vm210_vm0, %v2480_v48, %v7597_v23  ;;  %v3217_v35 = vmax.f32 %v3216_v13, %v7663_v52  ;;  %v2363_v57 = vadd.f32 %v7264_v42, %v7388_v22 }
 0x7b3   :  { %v3210_v30 = vadd.f32 %v3209_v9, %v3208_v2  ;;  %v3194_v38 = vadd.f32 %v3193_v21, %v3192_v62  ;;  %v2502_v19 = vsel %vm347_vm6, %v2501_v45, %v7647_v10  ;;  %v2482_v54 = vsel %vm343_vm4, %v2481_v29, %v7623_v49 }
 0x7b4   :  { %3595 = vrot.lane.b32.xlu1 %v7534_v15, %s4879_s2  ;;  %2623 = vrot.lane.b32.xlu0 %v7451_v16, %s4880_s30  ;;  %v2503_v59 = vmul.f32 %v2502_v19, %v7660_v47  ;;  %v2483_v3 = vsel %vm345_vm5, %v2482_v54, %v7647_v10  ;;  %v7687_v56 = vadd.f32 %v7288_v25, %v7394_v50  ;;  %v7713_v21 = vmul.f32 0.35355338, %v2363_v57 }
 0x7b5   :  { %v3211_v51 = vrot.slane %v3210_v30, 2  ;;  %v3195_v61 = vrot.slane %v3194_v38, 1  ;;  %v2460_v2 = vsel %vm336_vm1, %v7507_v20, %v7484_v39  ;;  %v7696_v9 = vadd.f32 %v3159_v5, %v3158_v31 }
 0x7b6   :  { %v7667_v26 = vpop.permute.xlu1 %3393  ;;  %v7669_v6 = vpop.permute.xlu0 %2412  ;;  %9711 = vst [vmem:[#allocation26_spill] sm:$0xff] %v7687_v56  ;;  %v7698_v17 = vadd.f32 %v3177_v4, %v3176_v58  ;;  %v2355_v42 = vadd.f32 %v7266_v32, %v7378_v46  ;;  %v2504_v25 = vsel %vm350_vm7, %v2503_v59, 0.0  ;;  %v2461_v58 = vsel %vm338_vm2, %v2460_v2, %v7294_v12 }
 0x7b7   :  { %v3212_v0 = vadd.f32 %v3211_v51, %v3210_v30  ;;  %v2484_v34 = vsel %vm347_vm6, %v2483_v3, %v7669_v6  ;;  %v3218_v22 = vmax.f32 %v3217_v35, %v7696_v9  ;;  %v7708_v50 = vadd.f32 %v3195_v61, %v3194_v38 }
 0x7b8   :  { %3650 = vrot.lane.b32.xlu1 %v7534_v15, %s4876_s28  ;;  %2688 = vrot.lane.b32.xlu0 %v7451_v16, %s9705_s3  ;;  %v2485_v31 = vmul.f32 %v2484_v34, %v7660_v47  ;;  %v2462_v32 = vsel %vm340_vm3, %v2461_v58, %v7597_v23  ;;  %v3453_v13 = vsel %vm336_vm1, %v7645_v53, %v7595_v43  ;;  %v2505_v38 = vrot.slane %v2504_v25, 4 }
 0x7b9   :  { %v3213_v7 = vrot.slane %v3212_v0, 1  ;;  %v3219_v55 = vmax.f32 %v3218_v22, %v7698_v17  ;;  %v7725_v51 = vmul.f32 0.35355338, %v2355_v42  ;;  %v2463_v19 = vsel %vm210_vm0, %v2462_v32, %v7623_v49 }
 0x7ba   :  { %v7694_v37 = vpop.permute.xlu1 %3468  ;;  %v2416_v62 = vpop.permute.xlu0 %2415  ;;  %v2442_v48 = vsel %vm336_vm1, %v7484_v39, %v7294_v12  ;;  %v7737_v5 = vsel %vm336_vm1, %v7549_v27, %v7312_v24  ;;  %v2424_v29 = vsel %vm336_vm1, %v7294_v12, %v7597_v23  ;;  %v3454_v54 = vsel %vm338_vm2, %v3453_v13, %v7549_v27 }
 0x7bb   :  { %v7720_v45 = vadd.f32 %v3213_v7, %v3212_v0  ;;  %v3220_v4 = vmax.f32 %v3219_v55, %v7708_v50  ;;  %v2486_v0 = vsel %vm350_vm7, %v2485_v31, 0.0  ;;  %v2443_v59 = vsel %vm338_vm2, %v2442_v48, %v7597_v23 }
 0x7bc   :  { %2961 = vrot.lane.b32.xlu1 %v7687_v56, %s4870_s22  ;;  %2701 = vrot.lane.b32.xlu0 %v7451_v16, %s9706_s21  ;;  %v2464_v35 = vsel %vm343_vm4, %v2463_v19, %v7647_v10  ;;  %v2425_v61 = vsel %vm338_vm2, %v2424_v29, %v7623_v49  ;;  %v2444_v3 = vsel %vm340_vm3, %v2443_v59, %v7623_v49  ;;  %v2487_v31 = vrot.slane %v2486_v0, 4 }
 0x7bd   :  { %v7759_v34 = vmax.f32 %v3220_v4, %v7720_v45  ;;  %v2506_v7 = vadd.f32 %v2505_v38, %v2504_v25  ;;  %v3471_v42 = vsel %vm336_vm1, %v7694_v37, %v7645_v53  ;;  %v2445_v22 = vsel %vm210_vm0, %v2444_v3, %v7647_v10 }
 0x7be   :  { %v7717_v46 = vpop.permute.xlu1 %3486  ;;  %v2419_v30 = vpop.permute.xlu0 %2418  ;;  %v2465_v58 = vsel %vm345_vm5, %v2464_v35, %v7669_v6  ;;  %v2426_v32 = vsel %vm340_vm3, %v2425_v61, %v7647_v10  ;;  %v2446_v55 = vsel %vm343_vm4, %v2445_v22, %v7669_v6  ;;  %v7777_v25 = vsel %vm336_vm1, %v7595_v43, %v7549_v27 }
 0x7bf   :  { %v2466_v13 = vsel %vm347_vm6, %v2465_v58, %v2416_v62  ;;  %v2427_v38 = vsel %vm210_vm0, %v2426_v32, %v7669_v6  ;;  %v2447_v19 = vsel %vm345_vm5, %v2446_v55, %v2416_v62  ;;  %v7787_v10 = vsel %vm340_vm3, %v3454_v54, %v7312_v24 }
 0x7c0   :  { %2933 = vrot.lane.b32.xlu1 %v7687_v56, %s4873_s25  ;;  %2714 = vrot.lane.b32.xlu0 %v7451_v16, %s9707_s17  ;;  %v3472_v48 = vsel %vm338_vm2, %v3471_v42, %v7595_v43  ;;  %v2428_v4 = vsel %vm343_vm4, %v2427_v38, %v2416_v62  ;;  %v2448_v29 = vsel %vm347_vm6, %v2447_v19, %v2419_v30  ;;  %v2507_v3 = vrot.slane %v2506_v7, 2 }
 0x7c1   :  { %v3222_v6 = vsub.f32 %v7612_v18, %v7759_v34  ;;  %v3225_v61 = vsub.f32 %v7625_v28, %v7759_v34  ;;  %v2429_v22 = vsel %vm345_vm5, %v2428_v4, %v2419_v30  ;;  %v7798_v54 = vadd.f32 %v2487_v31, %v2486_v0 }
 0x7c2   :  { %v7756_v57 = vpop.permute.xlu1 %3504  ;;  %v2422_v2 = vpop.permute.xlu0 %2421  ;;  %v2467_v58 = vmul.f32 %v2466_v13, %v7660_v47  ;;  %v2449_v42 = vmul.f32 %v2448_v29, %v7660_v47  ;;  %v3228_v18 = vsub.f32 %v7639_v8, %v7759_v34  ;;  %v3234_v28 = vsub.f32 %v7696_v9, %v7759_v34 }
 0x7c3   :  { %v2430_v62 = vsel %vm347_vm6, %v2429_v22, %v2422_v2  ;;  %v3473_v0 = vsel %vm340_vm3, %v3472_v48, %v7549_v27  ;;  %v3223_v13 = vmul.f32 1.442695, %v3222_v6  ;;  %v7823_v38 = vmul.f32 1.442695, %v3225_v61 }
 0x7c4   :  { %2974 = vrot.lane.b32.xlu1 %v7687_v56, %s4872_s24  ;;  %3580 = vrot.lane.b32.xlu0 %v7534_v15, %s4871_s23  ;;  %v2450_v8 = vsel %vm350_vm7, %v2449_v42, 0.0  ;;  %v2431_v32 = vmul.f32 %v2430_v62, %v7660_v47  ;;  %v7825_v19 = vadd.f32 %v2507_v3, %v2506_v7  ;;  %v2468_v4 = vsel %vm350_vm7, %v2467_v58, 0.0 }
 0x7c5   :  { %v7837_v6 = vmul.f32 1.442695, %v3228_v18  ;;  %v7841_v7 = vsel %vm210_vm0, %v3473_v0, %v7312_v24  ;;  %v3489_v3 = vsel %vm336_vm1, %v7717_v46, %v7694_v37  ;;  %v3507_v31 = vsel %vm336_vm1, %v7756_v57, %v7717_v46 }
 0x7c6   :  { %v3523_v59 = vpop.permute.xlu1 %3522  ;;  %v2512_v35 = vpop.permute.xlu0 %2511  ;;  %v2432_v29 = vsel %vm350_vm7, %v2431_v32, 0.0  ;;  %v7869_v1 = vmul.f32 1.442695, %v3234_v28  ;;  %4793 = vpow2.f32 %v3223_v13 }
 0x7c7   :  { %v3525_v48 = vsel %vm336_vm1, %v3523_v59, %v7756_v57  ;;  %v2514_v42 = vsel %vm336_vm1, %v2512_v35, %v7537_v60  ;;  %v2451_v59 = vrot.slane %v2450_v8, 4  ;;  %v2433_v61 = vrot.slane %v2432_v29, 4 }
 0x7c8   :  { %2939 = vrot.lane.b32.xlu1 %v7687_v56, %s4877_s29  ;;  %3586 = vrot.lane.b32.xlu0 %v7534_v15, %s4875_s27  ;;  %v3526_v22 = vsel %vm338_vm2, %v3525_v48, %v7717_v46  ;;  %v2515_v62 = vsel %vm338_vm2, %v2514_v42, %v7523_v11  ;;  %v2469_v48 = vrot.slane %v2468_v4, 4  ;;  %4795 = vpow2.f32 %v7823_v38 }
 0x7c9   :  { %v3527_v58 = vsel %vm340_vm3, %v3526_v22, %v7694_v37  ;;  %v2434_v2 = vadd.f32 %v2433_v61, %v2432_v29  ;;  %v2516_v42 = vsel %vm340_vm3, %v2515_v62, %v7507_v20  ;;  %v2452_v46 = vadd.f32 %v2451_v59, %v2450_v8 }
 0x7ca   :  { %v7821_v9 = vpop.permute.xlu1 %2764  ;;  %v2530_v55 = vpop.permute.xlu0 %2529  ;;  %v3528_v30 = vsel %vm210_vm0, %v3527_v58, %v7645_v53  ;;  %v3490_v29 = vsel %vm338_vm2, %v3489_v3, %v7645_v53  ;;  %v2470_v58 = vadd.f32 %v2469_v48, %v2468_v4  ;;  %v3508_v62 = vsel %vm338_vm2, %v3507_v31, %v7694_v37 }
 0x7cb   :  { %v2532_v18 = vsel %vm336_vm1, %v2530_v55, %v2512_v35  ;;  %v3529_v22 = vsel %vm343_vm4, %v3528_v30, %v7595_v43  ;;  %v2517_v30 = vsel %vm210_vm0, %v2516_v42, %v7484_v39  ;;  %v2489_v37 = vrot.slane %v7798_v54, 2 }
 0x7cc   :  { %2987 = vrot.lane.b32.xlu1 %v7687_v56, %s4874_s26  ;;  %3592 = vrot.lane.b32.xlu0 %v7534_v15, %s4878_s0  ;;  %v2533_v63 = vsel %vm338_vm2, %v2532_v18, %v7537_v60  ;;  %v3530_v57 = vsel %vm345_vm5, %v3529_v22, %v7549_v27  ;;  %v2453_v31 = vrot.slane %v2452_v46, 2  ;;  %4797 = vpow2.f32 %v7837_v6 }
 0x7cd   :  { %v2534_v28 = vsel %vm340_vm3, %v2533_v63, %v7523_v11  ;;  %v3531_v18 = vsel %vm347_vm6, %v3530_v57, %v7312_v24  ;;  %v3509_v57 = vsel %vm340_vm3, %v3508_v62, %v7645_v53  ;;  %4799 = vpow2.f32 %v7869_v1 }
 0x7ce   :  { %v7853_v32 = vpop.permute.xlu1 %2731  ;;  %v2548_v0 = vpop.permute.xlu0 %2547  ;;  %v3532_v48 = vmul.f32 %v3531_v18, %v7713_v21  ;;  %v2454_v53 = vadd.f32 %v2453_v31, %v2452_v46 }
 0x7cf   :  { %v2550_v41 = vsel %vm336_vm1, %v2548_v0, %v2530_v55  ;;  %v2518_v55 = vsel %vm343_vm4, %v2517_v30, %v7294_v12  ;;  %v2435_v0 = vrot.slane %v2434_v2, 2 }
 0x7d0   :  { %2945 = vrot.lane.b32.xlu1 %v7687_v56, %s4879_s2  ;;  %3598 = vrot.lane.b32.xlu0 %v7534_v15, %s4880_s30  ;;  %v2551_v8 = vsel %vm338_vm2, %v2550_v41, %v2512_v35  ;;  %v2519_v3 = vsel %vm345_vm5, %v2518_v55, %v7597_v23  ;;  %v2535_v41 = vsel %vm210_vm0, %v2534_v28, %v7507_v20  ;;  %v2471_v28 = vrot.slane %v2470_v58, 2 }
 0x7d1   :  { %v2520_v63 = vsel %vm347_vm6, %v2519_v3, %v7623_v49  ;;  %v2552_v35 = vsel %vm340_vm3, %v2551_v8, %v7537_v60  ;;  %v3491_v49 = vsel %vm340_vm3, %v3490_v29, %v7595_v43  ;;  %v2536_v60 = vsel %vm343_vm4, %v2535_v41, %v7484_v39 }
 0x7d2   :  { %v7884_v59 = vpop.permute.xlu1 %2782  ;;  %v7886_v61 = vpop.permute.xlu0 %3378  ;;  %v2521_v4 = vmul.f32 %v2520_v63, %v7660_v47  ;;  %v2553_v22 = vsel %vm210_vm0, %v2552_v35, %v7523_v11  ;;  %v2537_v29 = vsel %vm345_vm5, %v2536_v60, %v7294_v12  ;;  %v2436_v8 = vadd.f32 %v2435_v0, %v2434_v2 }
 0x7d3   :  { %v2554_v55 = vsel %vm343_vm4, %v2553_v22, %v7507_v20  ;;  %v2538_v11 = vsel %vm347_vm6, %v2537_v29, %v7597_v23  ;;  %v3492_v20 = vsel %vm210_vm0, %v3491_v49, %v7549_v27  ;;  %v3533_v23 = vsel %vm350_vm7, %v3532_v48, 0.0  ;;  %v7971_v22 = vpop.eup %4793 }
 0x7d4   :  { %3663 = vrot.lane.b32.xlu1 %v7534_v15, %s9705_s3  ;;  %2930 = vrot.lane.b32.xlu0 %v7687_v56, %s4871_s23  ;;  %v2522_v30 = vsel %vm350_vm7, %v2521_v4, 0.0  ;;  %v2555_v18 = vsel %vm345_vm5, %v2554_v55, %v7484_v39  ;;  %v2539_v62 = vmul.f32 %v2538_v11, %v7660_v47  ;;  %v3510_v39 = vsel %vm210_vm0, %v3509_v57, %v7595_v43 }
 0x7d5   :  { %v2556_v3 = vsel %vm347_vm6, %v2555_v18, %v7294_v12  ;;  %v2523_v2 = vrot.slane %v2522_v30, 4  ;;  %v9712_v12 = vsub.f32 %v7698_v17, %v7759_v34  ;;  %v9713_v63 = vsub.f32 %v7708_v50, %v7759_v34 }
 0x7d6   :  { %v7913_v13 = vpop.permute.xlu1 %2737  ;;  %v7915_v42 = vpop.permute.xlu0 %3384  ;;  %v2490_v35 = vadd.f32 %v2489_v37, %v7798_v54  ;;  %v2472_v43 = vadd.f32 %v2471_v28, %v2470_v58  ;;  %v2437_v31 = vrot.slane %v2436_v8, 1  ;;  %v2540_v4 = vsel %vm350_vm7, %v2539_v62, 0.0 }
 0x7d7   :  { %v3238_v46 = vmul.f32 1.442695, %v9712_v12  ;;  %v3241_v41 = vmul.f32 1.442695, %v9713_v63  ;;  %v2557_v49 = vmul.f32 %v2556_v3, %v7660_v47  ;;  %v3493_v6 = vsel %vm343_vm4, %v3492_v20, %v7312_v24 }
 0x7d8   :  { %3676 = vrot.lane.b32.xlu1 %v7534_v15, %s9706_s21  ;;  %2936 = vrot.lane.b32.xlu0 %v7687_v56, %s4875_s27  ;;  %v2455_v17 = vrot.slane %v2454_v53, 1  ;;  %v3511_v48 = vsel %vm343_vm4, %v3510_v39, %v7549_v27  ;;  %v3534_v50 = vrot.slane %v3533_v23, 4  ;;  %v2509_v54 = vrot.slane %v7825_v19, 1 }
 0x7d9   :  { %v2524_v58 = vadd.f32 %v2523_v2, %v2522_v30  ;;  %v3494_v47 = vsel %vm345_vm5, %v3493_v6, %v7886_v61  ;;  %4801 = vpow2.f32 %v3238_v46  ;;  %v2491_v27 = vrot.slane %v2490_v35, 1  ;;  %v8002_v2 = vpop.eup %4795 }
 0x7da   :  { %v7941_v0 = vpop.permute.xlu1 %2800  ;;  %v7943_v38 = vpop.permute.xlu0 %3390  ;;  %v2541_v57 = vrot.slane %v2540_v4, 4  ;;  %v3456_v29 = vsel %vm210_vm0, %v7787_v10, %v7886_v61  ;;  %v2473_v1 = vrot.slane %v2472_v43, 1  ;;  %v3512_v30 = vsel %vm345_vm5, %v3511_v48, %v7312_v24  ;;  %9714 = vst [vmem:[#allocation37_spill] sm:$0xff] %v8002_v2 }
 0x7db   :  { %v7978_v55 = vadd.f32 %v2437_v31, %v2436_v8  ;;  %v2558_v28 = vsel %vm350_vm7, %v2557_v49, 0.0  ;;  %v7983_v11 = vadd.f32 %v2455_v17, %v2454_v53  ;;  %v3535_v18 = vadd.f32 %v3534_v50, %v3533_v23  ;;  %v8020_v17 = vpop.eup %4797 }
 0x7dc   :  { %3000 = vrot.lane.b32.xlu1 %v7687_v56, %s4876_s28  ;;  %2942 = vrot.lane.b32.xlu0 %v7687_v56, %s4878_s0  ;;  %v3495_v62 = vsel %vm347_vm6, %v3494_v47, %v7568_v40  ;;  %v3475_v10 = vsel %vm343_vm4, %v7841_v7, %v7886_v61  ;;  %v2525_v8 = vrot.slane %v2524_v58, 2  ;;  %v3513_v3 = vsel %vm347_vm6, %v3512_v30, %v7886_v61 }
 0x7dd   :  { %v3457_v20 = vsel %vm343_vm4, %v3456_v29, %v7568_v40  ;;  %v3476_v53 = vsel %vm345_vm5, %v3475_v10, %v7568_v40  ;;  %v2542_v7 = vadd.f32 %v2541_v57, %v2540_v4  ;;  %v2559_v12 = vrot.slane %v2558_v28, 4  ;;  %9716 = vst [vmem:[#allocation23_spill] sm:$0xff] %v8020_v17 }
 0x7de   :  { %v7967_v37 = vpop.permute.xlu1 %2743  ;;  %v7969_v60 = vpop.permute.xlu0 %3396  ;;  %v3458_v46 = vsel %vm345_vm5, %v3457_v20, %v7915_v42  ;;  %v3477_v63 = vsel %vm347_vm6, %v3476_v53, %v7915_v42  ;;  %4803 = vpow2.f32 %v3241_v41  ;;  %v9715_v31 = vsub.f32 %v7720_v45, %v7759_v34 }
 0x7df   :  { %v2565_v6 = vmax.f32 %v7978_v55, %v7983_v11  ;;  %v3436_v4 = vsel %vm338_vm2, %v7777_v25, %v7312_v24  ;;  %v8022_v48 = vadd.f32 %v2473_v1, %v2472_v43  ;;  %v3536_v41 = vrot.slane %v3535_v18, 2 }
 0x7e0   :  { %3013 = vrot.lane.b32.xlu1 %v7687_v56, %s9705_s3  ;;  %2948 = vrot.lane.b32.xlu0 %v7687_v56, %s4880_s30  ;;  %v8011_v49 = vmul.f32 1.442695, %v9715_v31  ;;  %v3496_v50 = vmul.f32 %v3495_v62, %v7713_v21  ;;  %v3478_v45 = vmul.f32 %v3477_v63, %v7713_v21  ;;  %v2526_v47 = vadd.f32 %v2525_v8, %v2524_v58  ;;  %v8043_v8 = vpop.eup %4799 }
 0x7e1   :  { %v3514_v57 = vmul.f32 %v3513_v3, %v7713_v21  ;;  %v3459_v25 = vsel %vm347_vm6, %v3458_v46, %v7621_v36  ;;  %v3418_v29 = vsel %vm338_vm2, %v7737_v5, %v7886_v61  ;;  %v8038_v30 = vadd.f32 %v2491_v27, %v2490_v35  ;;  %9718 = vst [vmem:[#allocation19_spill] sm:$0xff] %v8043_v8 }
 0x7e2   :  { %v7998_v39 = vpop.permute.xlu1 %2818  ;;  %v8000_v23 = vpop.permute.xlu0 %2728  ;;  %v8041_v62 = vadd.f32 %v2509_v54, %v7825_v19  ;;  %v2543_v10 = vrot.slane %v2542_v7, 2  ;;  %v2560_v58 = vadd.f32 %v2559_v12, %v2558_v28  ;;  %v2566_v3 = vmax.f32 %v2565_v6, %v8022_v48 }
 0x7e3   :  { %v8049_v20 = vsel %vm336_vm1, %v7884_v59, %v7821_v9  ;;  %v3419_v5 = vsel %vm340_vm3, %v3418_v29, %v7568_v40  ;;  %v8058_v19 = vsel %vm336_vm1, %v7821_v9, %v7354_v14  ;;  %v8060_v35 = vpop.eup %4801  ;;  %v3460_v54 = vmul.f32 %v3459_v25, %v7713_v21 }
 0x7e4   :  { %3026 = vrot.lane.b32.xlu1 %v7687_v56, %s9706_s21  ;;  %3338 = vrot.lane.b32.xlu0 %v7407_v44, %s9705_s3  ;;  %9717 = vst [vmem:[#allocation21_spill] sm:$0xff] %v8041_v62  ;;  %9719 = vst [vmem:[#allocation32_spill] sm:$0xff] %v8060_v35  ;;  %v3399_v27 = vsel %vm336_vm1, %v7312_v24, %v7886_v61  ;;  %v3420_v28 = vsel %vm210_vm0, %v3419_v5, %v7915_v42  ;;  %v2527_v46 = vrot.slane %v2526_v47, 1 }
 0x7e5   :  { %v3437_v53 = vsel %vm340_vm3, %v3436_v4, %v7886_v61  ;;  %v3537_v12 = vadd.f32 %v3536_v41, %v3535_v18  ;;  %v3497_v63 = vsel %vm350_vm7, %v3496_v50, 0.0  ;;  %v3515_v31 = vsel %vm350_vm7, %v3514_v57, 0.0 }
 0x7e6   :  { %v8034_v43 = vpop.permute.xlu1 %2836  ;;  %v8036_v1 = vpop.permute.xlu0 %2734  ;;  %v2544_v24 = vadd.f32 %v2543_v10, %v2542_v7  ;;  %v2561_v29 = vrot.slane %v2560_v58, 2  ;;  %v3479_v5 = vsel %vm350_vm7, %v3478_v45, 0.0  ;;  %v3438_v61 = vsel %vm210_vm0, %v3437_v53, %v7568_v40 }
 0x7e7   :  { %v2567_v4 = vmax.f32 %v2566_v3, %v8038_v30  ;;  %v3400_v18 = vsel %vm338_vm2, %v3399_v27, %v7568_v40  ;;  %v3421_v41 = vsel %vm343_vm4, %v3420_v28, %v7621_v36  ;;  %v3439_v50 = vsel %vm343_vm4, %v3438_v61, %v7915_v42  ;;  %v4469_v40 = vld [vmem:[%s9423_s6 + $0x28] sm:$0xff] }
 0x7e8   :  { %3039 = vrot.lane.b32.xlu1 %v7687_v56, %s9707_s17  ;;  %3351 = vrot.lane.b32.xlu0 %v7407_v44, %s9706_s21  ;;  %v3516_v7 = vrot.slane %v3515_v31, 4  ;;  %v3461_v45 = vsel %vm350_vm7, %v3460_v54, 0.0  ;;  %v3401_v57 = vsel %vm340_vm3, %v3400_v18, %v7915_v42  ;;  %v3422_v10 = vsel %vm345_vm5, %v3421_v41, %v7943_v38  ;;  %v8100_v3 = vpop.eup %4803  ;;  %v4468_v18 = vld [vmem:[%s9423_s6 + $0x20] sm:$0xff] }
 0x7e9   :  { %9720 = vst [vmem:[#allocation34_spill] sm:$0xff] %v8100_v3  ;;  %v3538_v27 = vrot.slane %v3537_v12, 1  ;;  %v3498_v28 = vrot.slane %v3497_v63, 4  ;;  %v3480_v53 = vrot.slane %v3479_v5, 4  ;;  %v2803_v54 = vsel %vm336_vm1, %v7941_v0, %v7884_v59 }
 0x7ea   :  { %v8074_v6 = vpop.permute.xlu1 %2854  ;;  %v8076_v25 = vpop.permute.xlu0 %2740  ;;  %v8112_v41 = vadd.f32 %v2527_v46, %v2526_v47  ;;  %v2545_v33 = vrot.slane %v2544_v24, 1  ;;  %v2562_v56 = vadd.f32 %v2561_v29, %v2560_v58  ;;  %v3462_v3 = vrot.slane %v3461_v45, 4 }
 0x7eb   :  { %v3402_v16 = vsel %vm210_vm0, %v3401_v57, %v7621_v36  ;;  %v3423_v35 = vsel %vm347_vm6, %v3422_v10, %v7667_v26  ;;  %v3517_v17 = vadd.f32 %v3516_v7, %v3515_v31  ;;  %v2568_v29 = vmax.f32 %v2567_v4, %v8041_v62 }
 0x7ec   :  { %3689 = vrot.lane.b32.xlu1 %v7534_v15, %s9707_s17  ;;  %3364 = vrot.lane.b32.xlu0 %v7407_v44, %s9707_s17  ;;  %v3440_v15 = vsel %vm345_vm5, %v3439_v50, %v7621_v36  ;;  %v3403_v47 = vsel %vm343_vm4, %v3402_v16, %v7943_v38  ;;  %v3424_v58 = vmul.f32 %v3423_v35, %v7713_v21  ;;  %v4471_v36 = vld [vmem:[%s9423_s6 + $0x38] sm:$0xff]  ;;  %v2563_v35 = vrot.slane %v2562_v56, 1 }
 0x7ed   :  { %v3441_v8 = vsel %vm347_vm6, %v3440_v15, %v7943_v38  ;;  %v8130_v50 = vadd.f32 %v3538_v27, %v3537_v12  ;;  %v3481_v57 = vadd.f32 %v3480_v53, %v3479_v5  ;;  %v2804_v15 = vsel %vm338_vm2, %v2803_v54, %v7821_v9  ;;  %v4470_v38 = vld [vmem:[%s9423_s6 + $0x30] sm:$0xff] }
 0x7ee   :  { %v8105_v42 = vpop.permute.xlu1 %2872  ;;  %v8107_v61 = vpop.permute.xlu0 %2746  ;;  %v3442_v46 = vmul.f32 %v3441_v8, %v7713_v21  ;;  %v8141_v8 = vadd.f32 %v2545_v33, %v2544_v24  ;;  %v3425_v7 = vsel %vm350_vm7, %v3424_v58, 0.0  ;;  %v3463_v4 = vadd.f32 %v3462_v3, %v3461_v45  ;;  %v4477_v24 = vld [vmem:[%s9424_s11 + $0x28] sm:$0xff] }
 0x7ef   :  { %v3426_v5 = vrot.slane %v3425_v7, 4  ;;  %v2569_v27 = vmax.f32 %v2568_v29, %v8112_v41  ;;  %v3518_v53 = vrot.slane %v3517_v17, 2  ;;  %v3499_v54 = vadd.f32 %v3498_v28, %v3497_v63  ;;  %v4476_v63 = vld [vmem:[%s9424_s11 + $0x20] sm:$0xff] }
 0x7f0   :  { %3721 = vperm.xlu1 %4688, %v4469_v40   ;;  %3716 = vperm.xlu0 %4687, %v4468_v18   ;;  %v3443_v12 = vsel %vm350_vm7, %v3442_v46, 0.0  ;;  %v3404_v40 = vsel %vm345_vm5, %v3403_v47, %v7667_v26  ;;  %v3482_v18 = vrot.slane %v3481_v57, 2  ;;  %v2805_v45 = vsel %vm340_vm3, %v2804_v15, %v7354_v14 }
 0x7f1   :  { %v3444_v10 = vrot.slane %v3443_v12, 4  ;;  %v3405_v33 = vsel %vm347_vm6, %v3404_v40, %v7969_v60  ;;  %v3427_v3 = vadd.f32 %v3426_v5, %v3425_v7  ;;  %v8163_v60 = vmax.f32 %v2569_v27, %v8141_v8  ;;  %v4481_v5 = vld [vmem:[%s9425_s12 + $0x28] sm:$0xff] }
 0x7f2   :  { %v8134_v31 = vpop.permute.xlu1 %3286  ;;  %v8136_v16 = vpop.permute.xlu0 %3255  ;;  %v8165_v28 = vadd.f32 %v2563_v35, %v2562_v56  ;;  %v3406_v46 = vmul.f32 %v3405_v33, %v7713_v21  ;;  %v3464_v29 = vrot.slane %v3463_v4, 2  ;;  %v2839_v7 = vsel %vm336_vm1, %v8034_v43, %v7998_v39 }
 0x7f3   :  { %9721 = vst [vmem:[#allocation17_spill] sm:$0xff] %v8134_v31  ;;  %9722 = vst [vmem:[#allocation6_spill] sm:$0xff] %v8136_v16  ;;  %v3445_v58 = vadd.f32 %v3444_v10, %v3443_v12  ;;  %v3428_v15 = vrot.slane %v3427_v3, 2  ;;  %v3500_v12 = vrot.slane %v3499_v54, 2  ;;  %v2840_v35 = vsel %vm338_vm2, %v2839_v7, %v7941_v0 }
 0x7f4   :  { %3731 = vperm.xlu1 %4688, %v4471_v36   ;;  %3726 = vperm.xlu0 %4687, %v4470_v38   ;;  %v2821_v36 = vsel %vm336_vm1, %v7998_v39, %v7941_v0  ;;  %v3407_v56 = vsel %vm350_vm7, %v3406_v46, 0.0  ;;  %v3483_v10 = vadd.f32 %v3482_v18, %v3481_v57  ;;  %v2806_v57 = vsel %vm210_vm0, %v2805_v45, %v8000_v23 }
 0x7f5   :  { %v2822_v38 = vsel %vm338_vm2, %v2821_v36, %v7884_v59  ;;  %v3446_v40 = vrot.slane %v3445_v58, 2  ;;  %v3408_v27 = vrot.slane %v3407_v56, 4  ;;  %v4480_v36 = vld [vmem:[%s9425_s12 + $0x20] sm:$0xff]  ;;  %v3465_v7 = vadd.f32 %v3464_v29, %v3463_v4 }
 0x7f6   :  { %v8155_v26 = vpop.permute.xlu1 %3299  ;;  %v8157_v47 = vpop.permute.xlu0 %3258  ;;  %v2823_v21 = vsel %vm340_vm3, %v2822_v38, %v7821_v9  ;;  %v3429_v38 = vadd.f32 %v3428_v15, %v3427_v3  ;;  %v2857_v45 = vsel %vm336_vm1, %v8074_v6, %v8034_v43  ;;  %v2807_v29 = vsel %vm343_vm4, %v2806_v57, %v7853_v32 }
 0x7f7   :  { %9723 = vst [vmem:[#allocation22_spill] sm:$0xff] %v8155_v26  ;;  %9724 = vst [vmem:[#allocation33_spill] sm:$0xff] %v8157_v47  ;;  %v2824_v33 = vsel %vm210_vm0, %v2823_v21, %v7354_v14  ;;  %v3519_v21 = vadd.f32 %v3518_v53, %v3517_v17  ;;  %v3409_v62 = vadd.f32 %v3408_v27, %v3407_v56  ;;  %v4479_v17 = vld [vmem:[%s9424_s11 + $0x38] sm:$0xff]  ;;  %v3466_v57 = vrot.slane %v3465_v7, 1 }
 0x7f8   :  { %3862 = vperm.xlu1 %4688, %v4477_v24   ;;  %3857 = vperm.xlu0 %4687, %v4476_v63   ;;  %v2841_v63 = vsel %vm340_vm3, %v2840_v35, %v7884_v59  ;;  %v2825_v18 = vsel %vm343_vm4, %v2824_v33, %v8000_v23  ;;  %v3501_v47 = vadd.f32 %v3500_v12, %v3499_v54  ;;  %v4478_v35 = vld [vmem:[%s9424_s11 + $0x30] sm:$0xff]  ;;  %v3484_v33 = vrot.slane %v3483_v10, 1 }
 0x7f9   :  { %v2826_v15 = vsel %vm345_vm5, %v2825_v18, %v7853_v32  ;;  %v3447_v4 = vadd.f32 %v3446_v40, %v3445_v58  ;;  %v3410_v53 = vrot.slane %v3409_v62, 2  ;;  %v2808_v58 = vsel %vm345_vm5, %v2807_v29, %v8036_v1 }
 0x7fa   :  { %v8186_v24 = vpop.permute.xlu1 %3312  ;;  %v8188_v46 = vpop.permute.xlu0 %3261  ;;  %v2858_v40 = vsel %vm338_vm2, %v2857_v45, %v7998_v39  ;;  %v3520_v18 = vrot.slane %v3519_v21, 1  ;;  %v4483_v45 = vld [vmem:[%s9425_s12 + $0x38] sm:$0xff] }
 0x7fb   :  { %9725 = vst [vmem:[#allocation13_spill] sm:$0xff] %v8186_v24  ;;  %9726 = vst [vmem:[#allocation18_spill] sm:$0xff] %v8188_v46  ;;  %v2842_v46 = vsel %vm210_vm0, %v2841_v63, %v7821_v9  ;;  %v2827_v63 = vsel %vm347_vm6, %v2826_v15, %v8036_v1  ;;  %v2749_v15 = vsel %vm336_vm1, %v7354_v14, %v8000_v23 }
 0x7fc   :  { %3886 = vperm.xlu1 %4688, %v4481_v5   ;;  %v2843_v3 = vsel %vm343_vm4, %v2842_v46, %v7354_v14  ;;  %3881 = vperm.xlu0 %4687, %v4480_v36   ;;  %v3430_v5 = vrot.slane %v3429_v38, 1  ;;  %v3411_v46 = vadd.f32 %v3410_v53, %v3409_v62  ;;  %v3448_v62 = vrot.slane %v3447_v4, 1 }
 0x7fd   :  { %v2844_v54 = vsel %vm345_vm5, %v2843_v3, %v8000_v23  ;;  %v2809_v3 = vsel %vm347_vm6, %v2808_v58, %v7913_v13 }
 0x7fe   :  { %v8215_v12 = vpop.permute.xlu1 %3325  ;;  %v8217_v56 = vpop.permute.xlu0 %3264  ;;  %v2845_v27 = vsel %vm347_vm6, %v2844_v54, %v7853_v32  ;;  %v2859_v54 = vsel %vm340_vm3, %v2858_v40, %v7941_v0  ;;  %v3412_v53 = vrot.slane %v3411_v46, 1  ;;  %v8250_v58 = vadd.f32 %v3430_v5, %v3429_v38 }
 0x7ff   :  { %9727 = vst [vmem:[#allocation20_spill] sm:$0xff] %v8215_v12  ;;  %9728 = vst [vmem:[#allocation15_spill] sm:$0xff] %v8217_v56  ;;  %v2846_v36 = vmul.f32 %v2845_v27, %v7725_v51  ;;  %v2860_v29 = vsel %vm210_vm0, %v2859_v54, %v7884_v59  ;;  %v3502_v40 = vrot.slane %v3501_v47, 1  ;;  %v2828_v56 = vmul.f32 %v2827_v63, %v7725_v51 }
 0x800   :  { %3872 = vperm.xlu1 %4688, %v4479_v17   ;;  %3867 = vperm.xlu0 %4687, %v4478_v35   ;;  %v4482_v35 = vld [vmem:[%s9425_s12 + $0x30] sm:$0xff]  ;;  %v2861_v54 = vsel %vm343_vm4, %v2860_v29, %v7821_v9  ;;  %v8255_v16 = vadd.f32 %v3412_v53, %v3411_v46  ;;  %v8264_v38 = vadd.f32 %v3466_v57, %v3465_v7  ;;  %v4492_v57 = vld [vmem:[%s9426_s8 + $0x40] sm:$0xff] }
 0x801   :  { %v8258_v2 = vsel %vm350_vm7, %v2846_v36, 0.0  ;;  %v8266_v5 = vadd.f32 %v3484_v33, %v3483_v10  ;;  %v8268_v63 = vadd.f32 %v3520_v18, %v3519_v21  ;;  %v2750_v46 = vsel %vm338_vm2, %v2749_v15, %v7853_v32  ;;  %v4493_v36 = vld [vmem:[%s9426_s8 + $0x48] sm:$0xff] }
 0x802   :  { %v8243_v17 = vpop.permute.xlu1 %2636  ;;  %v8245_v27 = vpop.permute.xlu0 %3267  ;;  %v2862_v7 = vsel %vm345_vm5, %v2861_v54, %v7354_v14  ;;  %v2751_v10 = vsel %vm340_vm3, %v2750_v46, %v8036_v1  ;;  %v8290_v18 = vadd.f32 %v3502_v40, %v3501_v47  ;;  %v4495_v40 = vld [vmem:[%s9426_s8 + $0x58] sm:$0xff] }
 0x803   :  { %9729 = vst [vmem:[#allocation8_spill] sm:$0xff] %v8243_v17  ;;  %9730 = vst [vmem:[#allocation16_spill] sm:$0xff] %v8245_v27  ;;  %v2810_v17 = vmul.f32 %v2809_v3, %v7725_v51  ;;  %v2768_v27 = vsel %vm338_vm2, %v8058_v19, %v8000_v23  ;;  %v8275_v3 = vadd.f32 %v3448_v62, %v3447_v4  ;;  %v2848_v4 = vrot.slane %v8258_v2, 4 }
 0x804   :  { %3896 = vperm.xlu1 %4688, %v4483_v45   ;;  %3891 = vperm.xlu0 %4687, %v4482_v35   ;;  %v3540_v19 = vmax.f32 %v8255_v16, %v8250_v58  ;;  %v2829_v45 = vsel %vm350_vm7, %v2828_v56, 0.0  ;;  %v2769_v62 = vsel %vm340_vm3, %v2768_v27, %v7853_v32  ;;  %v2786_v35 = vsel %vm338_vm2, %v8049_v20, %v7354_v14 }
 0x805   :  { %v2811_v29 = vsel %vm350_vm7, %v2810_v17, 0.0  ;;  %v2770_v15 = vsel %vm210_vm0, %v2769_v62, %v8036_v1  ;;  %v2863_v47 = vsel %vm347_vm6, %v2862_v7, %v8000_v23  ;;  %v2752_v56 = vsel %vm210_vm0, %v2751_v10, %v7913_v13 }
 0x806   :  { %v8283_v21 = vpop.permute.xlu1 %2649  ;;  %v8285_v33 = vpop.permute.xlu0 %3270  ;;  %v3541_v53 = vmax.f32 %v3540_v19, %v8275_v3  ;;  %v2771_v27 = vsel %vm343_vm4, %v2770_v15, %v7913_v13  ;;  %v2787_v17 = vsel %vm340_vm3, %v2786_v35, %v8000_v23  ;;  %v2753_v46 = vsel %vm343_vm4, %v2752_v56, %v8076_v25  ;;  %v4494_v23 = vld [vmem:[%s9426_s8 + $0x50] sm:$0xff] }
 0x807   :  { %v2788_v54 = vsel %vm210_vm0, %v2787_v17, %v7853_v32  ;;  %v2812_v10 = vrot.slane %v2811_v29, 4  ;;  %v2875_v56 = vsel %vm336_vm1, %v8105_v42, %v8074_v6 }
 0x808   :  { %3930 = vperm.xlu1 %4688, %v4493_v36   ;;  %3925 = vperm.xlu0 %4687, %v4492_v57   ;;  %v3542_v20 = vmax.f32 %v3541_v53, %v8264_v38  ;;  %v2772_v36 = vsel %vm345_vm5, %v2771_v27, %v8076_v25  ;;  %v2830_v57 = vrot.slane %v2829_v45, 4  ;;  %v2789_v62 = vsel %vm343_vm4, %v2788_v54, %v8036_v1 }
 0x809   :  { %v2773_v32 = vsel %vm347_vm6, %v2772_v36, %v7967_v37  ;;  %v2790_v15 = vsel %vm345_vm5, %v2789_v62, %v7913_v13  ;;  %v2864_v27 = vmul.f32 %v2863_v47, %v7725_v51  ;;  %v2876_v17 = vsel %vm338_vm2, %v2875_v56, %v8034_v43  ;;  %v4497_v13 = vld [vmem:[%s9426_s8 + $0x68] sm:$0xff] }
 0x80a   :  { %v8321_v19 = vpop.permute.xlu1 %2662  ;;  %v8323_v7 = vpop.permute.xlu0 %3273  ;;  %v3543_v53 = vmax.f32 %v3542_v20, %v8266_v5  ;;  %v2774_v35 = vmul.f32 %v2773_v32, %v7725_v51  ;;  %v2791_v1 = vsel %vm347_vm6, %v2790_v15, %v8076_v25  ;;  %v2754_v20 = vsel %vm345_vm5, %v2753_v46, %v7967_v37  ;;  %v4496_v37 = vld [vmem:[%s9426_s8 + $0x60] sm:$0xff] }
 0x80b   :  { %v2792_v42 = vmul.f32 %v2791_v1, %v7725_v51  ;;  %v2877_v25 = vsel %vm340_vm3, %v2876_v17, %v7998_v39  ;;  %v2813_v15 = vadd.f32 %v2812_v10, %v2811_v29  ;;  %v2865_v56 = vsel %vm350_vm7, %v2864_v27, 0.0 }
 0x80c   :  { %3940 = vperm.xlu1 %4688, %v4495_v40   ;;  %3935 = vperm.xlu0 %4687, %v4494_v23   ;;  %v3544_v54 = vmax.f32 %v3543_v53, %v8290_v18  ;;  %v2775_v6 = vsel %vm350_vm7, %v2774_v35, 0.0  ;;  %v8361_v40 = vadd.f32 %v2830_v57, %v2829_v45  ;;  %v2878_v36 = vsel %vm210_vm0, %v2877_v25, %v7941_v0  ;;  %v4499_v0 = vld [vmem:[%s9426_s8 + $0x78] sm:$0xff] }
 0x80d   :  { %v2776_v46 = vrot.slane %v2775_v6, 4  ;;  %v2755_v23 = vsel %vm347_vm6, %v2754_v20, %v8107_v61  ;;  %v2793_v39 = vsel %vm350_vm7, %v2792_v42, 0.0  ;;  %v2879_v32 = vsel %vm343_vm4, %v2878_v36, %v7884_v59 }
 0x80e   :  { %v8354_v47 = vpop.permute.xlu1 %2675  ;;  %v8356_v43 = vpop.permute.xlu0 %2605  ;;  %v3545_v62 = vmax.f32 %v3544_v54, %v8268_v63  ;;  %v2756_v53 = vmul.f32 %v2755_v23, %v7725_v51  ;;  %v2794_v57 = vrot.slane %v2793_v39, 4  ;;  %v2880_v35 = vsel %vm345_vm5, %v2879_v32, %v7821_v9  ;;  %v4498_v9 = vld [vmem:[%s9426_s8 + $0x70] sm:$0xff] }
 0x80f   :  { %v2777_v45 = vadd.f32 %v2776_v46, %v2775_v6  ;;  %v2881_v59 = vsel %vm347_vm6, %v2880_v35, %v7354_v14  ;;  %v2814_v36 = vrot.slane %v2813_v15, 2  ;;  %v2866_v23 = vrot.slane %v2865_v56, 4 }
 0x810   :  { %3950 = vperm.xlu1 %4688, %v4497_v13   ;;  %3945 = vperm.xlu0 %4687, %v4496_v37   ;;  %v8378_v61 = vmax.f32 %v3545_v62, %v8130_v50  ;;  %v2757_v29 = vsel %vm350_vm7, %v2756_v53, 0.0  ;;  %v2795_v20 = vadd.f32 %v2794_v57, %v2793_v39  ;;  %v2882_v13 = vmul.f32 %v2881_v59, %v7725_v51 }
 0x811   :  { %v2778_v17 = vrot.slane %v2777_v45, 2  ;;  %v2758_v54 = vrot.slane %v2757_v29, 4  ;;  %v8420_v32 = vmax.f32 %v8163_v60, %v8165_v28  ;;  %v2832_v59 = vrot.slane %v8361_v40, 2  ;;  %v4515_v60 = vld [vmem:[%s9427_s10 + $0x38] sm:$0xff] }
 0x812   :  { %v8384_v10 = vpop.permute.xlu1 %3611  ;;  %v8386_v1 = vpop.permute.xlu0 %2608  ;;  %v3547_v27 = vsub.f32 %v8255_v16, %v8378_v61  ;;  %v3550_v14 = vsub.f32 %v8250_v58, %v8378_v61  ;;  %v3553_v6 = vsub.f32 %v8275_v3, %v8378_v61  ;;  %v3556_v42 = vsub.f32 %v8264_v38, %v8378_v61  ;;  %v4513_v58 = vld [vmem:[%s9427_s10 + $0x28] sm:$0xff]  ;;  %v4512_v38 = vld [vmem:[%s9427_s10 + $0x20] sm:$0xff] }
 0x813   :  { %v2779_v57 = vadd.f32 %v2778_v17, %v2777_v45  ;;  %v2759_v35 = vadd.f32 %v2758_v54, %v2757_v29  ;;  %v2867_v45 = vadd.f32 %v2866_v23, %v2865_v56  ;;  %v2815_v17 = vadd.f32 %v2814_v36, %v2813_v15  ;;  %v4514_v54 = vld [vmem:[%s9427_s10 + $0x30] sm:$0xff] }
 0x814   :  { %3960 = vperm.xlu1 %4688, %v4499_v0   ;;  %3955 = vperm.xlu0 %4687, %v4498_v9   ;;  %v3548_v3 = vmul.f32 1.442695, %v3547_v27  ;;  %v3551_v46 = vmul.f32 1.442695, %v3550_v14  ;;  %v3554_v53 = vmul.f32 1.442695, %v3553_v6  ;;  %v2849_v0 = vadd.f32 %v2848_v4, %v8258_v2 }
 0x815   :  { %v2796_v9 = vrot.slane %v2795_v20, 2  ;;  %v3557_v27 = vmul.f32 1.442695, %v3556_v42  ;;  %v2883_v14 = vsel %vm350_vm7, %v2882_v13, 0.0  ;;  %v2760_v25 = vrot.slane %v2759_v35, 2 }
 0x816   :  { %v8414_v62 = vpop.permute.xlu1 %3583  ;;  %v8416_v39 = vpop.permute.xlu0 %2611  ;;  %4805 = vpow2.f32 %v3548_v3  ;;  %v2884_v13 = vrot.slane %v2883_v14, 4  ;;  %v2780_v42 = vrot.slane %v2779_v57, 1  ;;  %v2575_v15 = vsub.f32 %v7983_v11, %v8420_v32 }
 0x817   :  { %9731 = vst [vmem:[#allocation43_spill] sm:$0xff] %v8414_v62  ;;  %4807 = vpow2.f32 %v3551_v46  ;;  %v2797_v29 = vadd.f32 %v2796_v9, %v2795_v20  ;;  %v2761_v6 = vadd.f32 %v2760_v25, %v2759_v35  ;;  %v2578_v56 = vsub.f32 %v8022_v48, %v8420_v32  ;;  %v4521_v46 = vld [vmem:[%s9429_s13 + $0x28] sm:$0xff] }
 0x818   :  { %4089 = vperm.xlu1 %4688, %v4513_v58   ;;  %4084 = vperm.xlu0 %4687, %v4512_v38   ;;  %4809 = vpow2.f32 %v8011_v49  ;;  %v4709_v58 = vld [vmem:[%s9428_s5 + $0x10] sm:$0xff]   ;;  %v2572_v49 = vsub.f32 %v7978_v55, %v8420_v32  ;;  %v2850_v20 = vrot.slane %v2849_v0, 2  ;;  %v2833_v38 = vadd.f32 %v2832_v59, %v8361_v40 }
 0x819   :  { %4811 = vpow2.f32 %v3554_v53  ;;  %v2798_v25 = vrot.slane %v2797_v29, 1  ;;  %v2762_v3 = vrot.slane %v2761_v6, 1  ;;  %4644 = vmatprep.mubr.msk.bf16.mxu0 %vm210_vm0, %v4709_v58  ;;  %v2581_v55 = vsub.f32 %v8038_v30, %v8420_v32  ;;  %v4520_v53 = vld [vmem:[%s9429_s13 + $0x20] sm:$0xff] }
 0x81a   :  { %v8431_v2 = vpop.permute.xlu1 %3624  ;;  %v8433_v4 = vpop.permute.xlu0 %2614  ;;  %4813 = vpow2.f32 %v3557_v27  ;;  %v2587_v11 = vsub.f32 %v8112_v41, %v8420_v32  ;;  %v2868_v36 = vrot.slane %v2867_v45, 2  ;;  %v2885_v35 = vadd.f32 %v2884_v13, %v2883_v14 }
 0x81b   :  { %v8465_v59 = vadd.f32 %v2762_v3, %v2761_v6  ;;  %v8467_v9 = vadd.f32 %v2780_v42, %v2779_v57  ;;  %v2816_v30 = vrot.slane %v2815_v17, 1  ;;  %v2573_v27 = vmul.f32 1.442695, %v2572_v49  ;;  %v4523_v57 = vld [vmem:[%s9429_s13 + $0x38] sm:$0xff]  ;;  %v4522_v42 = vld [vmem:[%s9429_s13 + $0x30] sm:$0xff] }
 0x81c   :  { %4099 = vperm.xlu1 %4688, %v4515_v60   ;;  %4094 = vperm.xlu0 %4687, %v4514_v54   ;;  %v2593_v41 = vsub.f32 %v8165_v28, %v8420_v32  ;;  %v2851_v60 = vadd.f32 %v2850_v20, %v2849_v0  ;;  %v3231_v54 = vsub.f32 %v7663_v52, %v7759_v34  ;;  %v2576_v58 = vmul.f32 1.442695, %v2575_v15 }
 0x81d   :  { %v2834_v16 = vrot.slane %v2833_v38, 1  ;;  %v8473_v37 = vadd.f32 %v2798_v25, %v2797_v29  ;;  %v2890_v14 = vmax.f32 %v8465_v59, %v8467_v9  ;;  %v2579_v28 = vmul.f32 1.442695, %v2578_v56 }
 0x81e   :  { %v8458_v40 = vpop.permute.xlu1 %3589  ;;  %v8460_v23 = vpop.permute.xlu0 %2617  ;;  %v2869_v0 = vadd.f32 %v2868_v36, %v2867_v45  ;;  %v3315_v52 = vsel %vm336_vm1, %v8186_v24, %v8155_v26  ;;  %v3232_v34 = vmul.f32 1.442695, %v3231_v54  ;;  %v2582_v15 = vmul.f32 1.442695, %v2581_v55 }
 0x81f   :  { %9732 = vst [vmem:[#allocation41_spill] sm:$0xff] %v8458_v40  ;;  %9733 = vst [vmem:[#allocation29_spill] sm:$0xff] %v8473_v37  ;;  %v2886_v20 = vrot.slane %v2885_v35, 2  ;;  %v8494_v25 = vadd.f32 %v2816_v30, %v2815_v17  ;;  %v2891_v45 = vmax.f32 %v2890_v14, %v8473_v37  ;;  %4815 = vpow2.f32 %v2573_v27  ;;  %v4525_v27 = vld [vmem:[%s9430_s14 + $0x28] sm:$0xff]  ;;  %v9758_v40 = vld [vmem:[#allocation16_spill] sm:$0xff] }
 0x820   :  { %4230 = vperm.xlu1 %4688, %v4521_v46   ;;  %4225 = vperm.xlu0 %4687, %v4520_v53   ;;  %v8480_v13 = vpop.eup %4805  ;;  %v2852_v46 = vrot.slane %v2851_v60, 1  ;;  %v3328_v36 = vsel %vm336_vm1, %v8215_v12, %v8186_v24  ;;  %v8506_v55 = vadd.f32 %v2834_v16, %v2833_v38  ;;  %v3316_v30 = vsel %vm338_vm2, %v3315_v52, %v8134_v31  ;;  %v4524_v38 = vld [vmem:[%s9430_s14 + $0x20] sm:$0xff]  ;;  %v9740_v24 = vld [vmem:[#allocation37_spill] sm:$0xff] }
 0x821   :  { %9734 = vst [vmem:[#allocation42_spill] sm:$0xff] %v8480_v13  ;;  %v8492_v49 = vpop.eup %4807  ;;  %v2892_v17 = vmax.f32 %v2891_v45, %v8494_v25  ;;  %4817 = vpow2.f32 %v3232_v34  ;;  %v2588_v54 = vmul.f32 1.442695, %v2587_v11  ;;  %v2887_v34 = vadd.f32 %v2886_v20, %v2885_v35 }
 0x822   :  { %v8485_v6 = vpop.permute.xlu1 %3637  ;;  %v8487_v29 = vpop.permute.xlu0 %2620  ;;  %9735 = vst [vmem:[#allocation36_spill] sm:$0xff] %v8492_v49  ;;  %v3571_v3 = vadd.f32 %v8492_v49, %v8480_v13  ;;  %4819 = vpow2.f32 %v2576_v58  ;;  %v3302_v11 = vsel %vm336_vm1, %v8155_v26, %v8134_v31  ;;  %v3329_v58 = vsel %vm338_vm2, %v3328_v36, %v8155_v26  ;;  %v4527_v36 = vld [vmem:[%s9430_s14 + $0x38] sm:$0xff] }
 0x823   :  { %v8497_v56 = vpop.eup %4809  ;;  %v3317_v48 = vsel %vm340_vm3, %v3316_v30, %v7407_v44  ;;  %v3246_v35 = vadd.f32 %v9740_v24, %v7971_v22  ;;  %4821 = vpow2.f32 %v2579_v28  ;;  %v9741_v20 = vsub.f32 %v8141_v8, %v8420_v32  ;;  %v4526_v8 = vld [vmem:[%s9430_s14 + $0x30] sm:$0xff] }
 0x824   :  { %9736 = vst [vmem:[#allocation27_spill] sm:$0xff] %v8497_v56  ;;  %4240 = vperm.xlu1 %4688, %v4523_v57   ;;  %v8504_v53 = vpop.eup %4811  ;;  %4235 = vperm.xlu0 %4687, %v4522_v42   ;;  %v2870_v57 = vrot.slane %v2869_v0, 1  ;;  %v2893_v42 = vmax.f32 %v2892_v17, %v8506_v55  ;;  %4823 = vpow2.f32 %v2582_v15  ;;  %v3303_v30 = vsel %vm338_vm2, %v3302_v11, %v7407_v44  ;;  %v9743_v15 = vld [vmem:[#allocation6_spill] sm:$0xff] }
 0x825   :  { %9737 = vst [vmem:[#allocation48_spill] sm:$0xff] %v8504_v53  ;;  %v3572_v14 = vadd.f32 %v8504_v53, %v3571_v3  ;;  %v8522_v52 = vpop.eup %4813  ;;  %v8533_v3 = vadd.f32 %v2852_v46, %v2851_v60  ;;  %v2591_v17 = vmul.f32 1.442695, %v9741_v20  ;;  %v2594_v60 = vmul.f32 1.442695, %v2593_v41 }
 0x826   :  { %v8515_v51 = vpop.permute.xlu1 %3595  ;;  %v8517_v16 = vpop.permute.xlu0 %2623  ;;  %9739 = vst [vmem:[#allocation45_spill] sm:$0xff] %v8522_v52  ;;  %4825 = vpow2.f32 %v2588_v54  ;;  %v9742_v28 = vsub.f32 %v8290_v18, %v8378_v61  ;;  %v3330_v41 = vsel %vm340_vm3, %v3329_v58, %v8134_v31  ;;  %v9744_v11 = vsub.f32 %v8268_v63, %v8378_v61 }
 0x827   :  { %9738 = vst [vmem:[#allocation10_spill] sm:$0xff] %v8515_v51  ;;  %v8531_v45 = vadd.f32 %v8522_v52, %v3572_v14  ;;  %v2894_v46 = vmax.f32 %v2893_v42, %v8533_v3  ;;  %v3318_v42 = vsel %vm210_vm0, %v3317_v48, %v9743_v15  ;;  %v2888_v26 = vrot.slane %v2887_v34, 1  ;;  %v9745_v52 = vld [vmem:[#allocation23_spill] sm:$0xff] }
 0x828   :  { %4254 = vperm.xlu1 %4688, %v4525_v27   ;;  %4249 = vperm.xlu0 %4687, %v4524_v38   ;;  %v3563_v38 = vmul.f32 1.442695, %v9742_v28  ;;  %v3566_v20 = vmul.f32 1.442695, %v9744_v11  ;;  %v8565_v12 = vadd.f32 %v2870_v57, %v2869_v0  ;;  %v3247_v49 = vadd.f32 %v9745_v52, %v3246_v35  ;;  %v9747_v57 = vld [vmem:[#allocation33_spill] sm:$0xff]  ;;  %v9765_v52 = vld [vmem:[#allocation34_spill] sm:$0xff] }
 0x829   :  { %4827 = vpow2.f32 %v2591_v17  ;;  %v9746_v18 = vsub.f32 %v8130_v50, %v8378_v61  ;;  %v3304_v58 = vsel %vm340_vm3, %v3303_v30, %v9743_v15  ;;  %v8573_v48 = vpop.eup %4815  ;;  %v3331_v0 = vsel %vm210_vm0, %v3330_v41, %v7407_v44 }
 0x82a   :  { %v8548_v14 = vpop.permute.xlu1 %3650  ;;  %v8550_v27 = vpop.permute.xlu0 %2688  ;;  %4829 = vpow2.f32 %v2594_v60  ;;  %v2895_v63 = vmax.f32 %v2894_v46, %v8565_v12  ;;  %v3319_v35 = vsel %vm343_vm4, %v3318_v42, %v9747_v57  ;;  %v9749_v30 = vsub.f32 %v8266_v5, %v8378_v61  ;;  %v9750_v61 = vld [vmem:[#allocation18_spill] sm:$0xff] }
 0x82b   :  { %v3569_v54 = vmul.f32 1.442695, %v9746_v18  ;;  %v8584_v50 = vpop.eup %4817  ;;  %4831 = vpow2.f32 %v3563_v38  ;;  %v2665_v60 = vsel %vm336_vm1, %v8321_v19, %v8283_v21  ;;  %v8596_v28 = vadd.f32 %v2888_v26, %v2887_v34  ;;  %v9751_v26 = vld [vmem:[#allocation19_spill] sm:$0xff] }
 0x82c   :  { %4264 = vperm.xlu1 %4688, %v4527_v36   ;;  %4259 = vperm.xlu0 %4687, %v4526_v8   ;;  %9748 = vst [vmem:[#allocation46_spill] sm:$0xff] %v8584_v50  ;;  %v8589_v8 = vmul.f32 1.442695, %v9749_v30  ;;  %v8594_v46 = vpop.eup %4819  ;;  %4833 = vpow2.f32 %v3566_v20  ;;  %v3248_v41 = vadd.f32 %v8584_v50, %v3247_v49  ;;  %v3305_v42 = vsel %vm210_vm0, %v3304_v58, %v9747_v57  ;;  %v9752_v49 = vld [vmem:[#allocation8_spill] sm:$0xff] }
 0x82d   :  { %4835 = vpow2.f32 %v3569_v54  ;;  %v3332_v5 = vsel %vm343_vm4, %v3331_v0, %v9743_v15  ;;  %v3320_v38 = vsel %vm345_vm5, %v3319_v35, %v9750_v61  ;;  %v2678_v11 = vsel %vm336_vm1, %v8354_v47, %v8321_v19  ;;  %v8621_v0 = vpop.eup %4821 }
 0x82e   :  { %v8580_v17 = vpop.permute.xlu1 %2961  ;;  %v8582_v36 = vpop.permute.xlu0 %2701  ;;  %v8609_v20 = vmax.f32 %v2895_v63, %v8596_v28  ;;  %v3249_v34 = vadd.f32 %v9751_v26, %v3248_v41  ;;  %v8615_v18 = vsel %vm336_vm1, %v8283_v21, %v9752_v49  ;;  %v2666_v54 = vsel %vm338_vm2, %v2665_v60, %v9752_v49  ;;  %v9754_v41 = vld [vmem:[#allocation21_spill] sm:$0xff] }
 0x82f   :  { %v3306_v35 = vsel %vm343_vm4, %v3305_v42, %v9750_v61  ;;  %v3276_v63 = vsel %vm336_vm1, %v7407_v44, %v9743_v15  ;;  %v3289_v30 = vsel %vm336_vm1, %v8134_v31, %v7407_v44  ;;  %v2584_v13 = vsub.f32 %v9754_v41, %v8420_v32  ;;  %v8635_v60 = vpop.eup %4823  ;;  %v9757_v32 = vld [vmem:[#allocation32_spill] sm:$0xff] }
 0x830   :  { %v3277_v37 = vsel %vm338_vm2, %v3276_v63, %v9747_v57  ;;  %v2679_v44 = vsel %vm338_vm2, %v2678_v11, %v8283_v21  ;;  %v8647_v31 = vpop.eup %4825  ;;  %v3250_v41 = vadd.f32 %v9757_v32, %v3249_v34  ;;  %v2897_v63 = vsub.f32 %v8465_v59, %v8609_v20 }
 0x831   :  { %v3290_v26 = vsel %vm338_vm2, %v3289_v30, %v9743_v15  ;;  %v2585_v59 = vmul.f32 1.442695, %v2584_v13  ;;  %v3333_v50 = vsel %vm345_vm5, %v3332_v5, %v9747_v57 }
 0x832   :  { %v8619_v58 = vpop.permute.xlu1 %2933  ;;  %v8633_v53 = vpop.permute.xlu0 %2714 }
 0x833   :  { %9753 = vst [vmem:[#allocation44_spill] sm:$0xff] %v8619_v58  ;;  %v9755_v58 = vld [vmem:[#allocation15_spill] sm:$0xff]  ;;  %v8668_v32 = vpop.eup %4827  ;;  %4837 = vpow2.f32 %v2585_v59 }
 0x834   :  { %v8639_v51 = vsel %vm347_vm6, %v3320_v38, %v9755_v58  ;;  %v3307_v42 = vsel %vm345_vm5, %v3306_v35, %v9755_v58  ;;  %v3278_v38 = vsel %vm340_vm3, %v3277_v37, %v9750_v61  ;;  %9761 = vst [vmem:[#allocation49_spill] sm:$0xff] %v8668_v32  ;;  %v2900_v37 = vsub.f32 %v8467_v9, %v8609_v20  ;;  %v8678_v30 = vpop.eup %4829 }
 0x835   :  { %9756 = vst [vmem:[#allocation28_spill] sm:$0xff] %v8639_v51  ;;  %v8652_v62 = vsel %vm347_vm6, %v3307_v42, %v9758_v40  ;;  %v9760_v51 = vld [vmem:[#allocation31_spill] sm:$0xff]  ;;  %v3279_v11 = vsel %vm210_vm0, %v3278_v38, %v9755_v58  ;;  %9763 = vst [vmem:[#allocation11_spill] sm:$0xff] %v8678_v30  ;;  %v3291_v9 = vsel %vm340_vm3, %v3290_v26, %v9747_v57  ;;  %v8688_v13 = vpop.eup %4831  ;;  %v2898_v26 = vmul.f32 1.442695, %v2897_v63 }
 0x836   :  { %9759 = vst [vmem:[#allocation7_spill] sm:$0xff] %v8652_v62  ;;  %v2667_v35 = vsel %vm340_vm3, %v2666_v54, %v9760_v51  ;;  %v8666_v42 = vpop.permute.xlu1 %2974  ;;  %v2680_v54 = vsel %vm340_vm3, %v2679_v44, %v9752_v49  ;;  %v8676_v62 = vpop.permute.xlu0 %3580  ;;  %v3280_v15 = vsel %vm343_vm4, %v3279_v11, %v9758_v40  ;;  %9764 = vst [vmem:[#allocation38_spill] sm:$0xff] %v8688_v13  ;;  %v2901_v5 = vmul.f32 1.442695, %v2900_v37 }
 0x837   :  { %v2668_v34 = vsel %vm210_vm0, %v2667_v35, %v8356_v43  ;;  %9762 = vst [vmem:[#allocation39_spill] sm:$0xff] %v8676_v62  ;;  %v2906_v35 = vsub.f32 %v8494_v25, %v8609_v20  ;;  %v3292_v62 = vsel %vm210_vm0, %v3291_v9, %v9750_v61  ;;  %v8699_v11 = vpop.eup %4833  ;;  %v2681_v13 = vsel %vm210_vm0, %v2680_v54, %v9760_v51 }
 0x838   :  { %v2669_v38 = vsel %vm343_vm4, %v2668_v34, %v8386_v1  ;;  %v3251_v34 = vadd.f32 %v9765_v52, %v3250_v41  ;;  %9767 = vst [vmem:[#allocation50_spill] sm:$0xff] %v8699_v11  ;;  %v2596_v41 = vadd.f32 %v8594_v46, %v8573_v48  ;;  %v8709_v52 = vpop.eup %4835  ;;  %v3281_v63 = vsel %vm345_vm5, %v3280_v15, %v8285_v33 }
 0x839   :  { %v2670_v44 = vsel %vm345_vm5, %v2669_v38, %v8416_v39  ;;  %v2909_v38 = vsub.f32 %v8506_v55, %v8609_v20  ;;  %9769 = vst [vmem:[#allocation40_spill] sm:$0xff] %v8709_v52  ;;  %v2907_v55 = vmul.f32 1.442695, %v2906_v35  ;;  %v2915_v54 = vsub.f32 %v8565_v12, %v8609_v20 }
 0x83a   :  { %v8697_v25 = vsel %vm347_vm6, %v2670_v44, %v8433_v4  ;;  %v8707_v9 = vpop.permute.xlu1 %2939  ;;  %v2912_v44 = vsub.f32 %v8533_v3, %v8609_v20  ;;  %v8715_v57 = vpop.permute.xlu0 %3586  ;;  %v3252_v37 = vadd.f32 %v8497_v56, %v3251_v34  ;;  %v8726_v3 = vsel %vm347_vm6, %v3333_v50, %v9750_v61 }
 0x83b   :  { %9766 = vst [vmem:[#allocation25_spill] sm:$0xff] %v8697_v25  ;;  %9768 = vst [vmem:[#allocation47_spill] sm:$0xff] %v8707_v9  ;;  %v2918_v25 = vsub.f32 %v8596_v28, %v8609_v20  ;;  %v3293_v9 = vsel %vm343_vm4, %v3292_v62, %v9755_v58  ;;  %v8730_v15 = vsel %vm347_vm6, %v3281_v63, %v8323_v7  ;;  %4839 = vpow2.f32 %v2898_v26 }
 0x83c   :  { %v2682_v59 = vsel %vm343_vm4, %v2681_v13, %v8356_v43  ;;  %v2910_v12 = vmul.f32 1.442695, %v2909_v38  ;;  %v3294_v28 = vsel %vm345_vm5, %v3293_v9, %v9758_v40  ;;  %v2597_v62 = vadd.f32 %v8621_v0, %v2596_v41 }
 0x83d   :  { %4841 = vpow2.f32 %v2901_v5  ;;  %v2913_v35 = vmul.f32 1.442695, %v2912_v44  ;;  %v8741_v50 = vsel %vm347_vm6, %v3294_v28, %v8285_v33  ;;  %v3627_v7 = vsel %vm336_vm1, %v8431_v2, %v8384_v10 }
 0x83e   :  { %v8737_v58 = vpop.permute.xlu1 %2987  ;;  %v8746_v61 = vpop.permute.xlu0 %3592  ;;  %4843 = vpow2.f32 %v2907_v55  ;;  %v2916_v13 = vmul.f32 1.442695, %v2915_v54  ;;  %v2919_v34 = vmul.f32 1.442695, %v2918_v25  ;;  %v2683_v40 = vsel %vm345_vm5, %v2682_v59, %v8386_v1  ;;  %v9770_v25 = vld [vmem:[#allocation9_spill] sm:$0xff] }
 0x83f   :  { %4845 = vrcp.f32 %v3252_v37  ;;  %v8752_v26 = vsel %vm347_vm6, %v2683_v40, %v8416_v39  ;;  %v2626_v33 = vsel %vm336_vm1, %v9760_v51, %v8356_v43  ;;  %v2691_v38 = vsel %vm336_vm1, %v8550_v27, %v8354_v47 }
 0x840   :  { %4847 = vpow2.f32 %v2910_v12  ;;  %v2598_v41 = vadd.f32 %v8635_v60, %v2597_v62  ;;  %v8763_v9 = vsel %vm338_vm2, %v3627_v7, %v9770_v25  ;;  %v2627_v5 = vsel %vm338_vm2, %v2626_v33, %v8386_v1  ;;  %v8787_v62 = vpop.eup %4837 }
 0x841   :  { %4849 = vpow2.f32 %v2913_v35  ;;  %v2628_v63 = vsel %vm340_vm3, %v2627_v5, %v8416_v39  ;;  %v2639_v55 = vsel %vm336_vm1, %v9752_v49, %v9760_v51  ;;  %v2704_v54 = vsel %vm336_vm1, %v8582_v36, %v8550_v27 }
 0x842   :  { %v8767_v44 = vpop.permute.xlu1 %2945  ;;  %v8777_v37 = vpop.permute.xlu0 %3598  ;;  %v2640_v59 = vsel %vm338_vm2, %v2639_v55, %v8356_v43  ;;  %v2692_v12 = vsel %vm338_vm2, %v2691_v38, %v8321_v19  ;;  %v2717_v28 = vsel %vm336_vm1, %v8633_v53, %v8582_v36  ;;  %4851 = vpow2.f32 %v8589_v8 }
 0x843   :  { %9771 = vst [vmem:[#allocation4_spill] sm:$0xff] %v8767_v44  ;;  %4853 = vpow2.f32 %v2916_v13  ;;  %v2629_v35 = vsel %vm210_vm0, %v2628_v63, %v8433_v4  ;;  %v2641_v7 = vsel %vm340_vm3, %v2640_v59, %v8386_v1  ;;  %v2653_v40 = vsel %vm338_vm2, %v8615_v18, %v9760_v51 }
 0x844   :  { %v2599_v33 = vadd.f32 %v8787_v62, %v2598_v41  ;;  %v2642_v53 = vsel %vm210_vm0, %v2641_v7, %v8416_v39  ;;  %v3653_v36 = vsel %vm336_vm1, %v8548_v14, %v8485_v6  ;;  %v2705_v8 = vsel %vm338_vm2, %v2704_v54, %v8354_v47 }
 0x845   :  { %v2654_v38 = vsel %vm340_vm3, %v2653_v40, %v8356_v43  ;;  %v3640_v18 = vsel %vm336_vm1, %v8485_v6, %v8431_v2  ;;  %v2693_v41 = vsel %vm340_vm3, %v2692_v12, %v8283_v21  ;;  %v2718_v5 = vsel %vm338_vm2, %v2717_v28, %v8550_v27  ;;  %v8817_v55 = vpop.eup %4839 }
 0x846   :  { %v8804_v13 = vpop.permute.xlu1 %3663  ;;  %v8815_v63 = vpop.permute.xlu0 %2930  ;;  %9772 = vst [vmem:[#allocation2_spill] sm:$0xff] %v8817_v55  ;;  %v2600_v54 = vadd.f32 %v8647_v31, %v2599_v33  ;;  %v2643_v59 = vsel %vm343_vm4, %v2642_v53, %v8433_v4  ;;  %v2655_v7 = vsel %vm210_vm0, %v2654_v38, %v8386_v1  ;;  %v2630_v40 = vsel %vm343_vm4, %v2629_v35, %v8460_v23 }
 0x847   :  { %v8826_v44 = vpop.eup %4841  ;;  %v2656_v27 = vsel %vm343_vm4, %v2655_v7, %v8416_v39  ;;  %v2631_v12 = vsel %vm345_vm5, %v2630_v40, %v8487_v29  ;;  %v3654_v28 = vsel %vm338_vm2, %v3653_v36, %v8431_v2  ;;  %v2706_v33 = vsel %vm340_vm3, %v2705_v8, %v8321_v19 }
 0x848   :  { %9773 = vst [vmem:[#allocation5_spill] sm:$0xff] %v8826_v44  ;;  %v8836_v53 = vpop.eup %4843  ;;  %v2601_v38 = vadd.f32 %v8668_v32, %v2600_v54  ;;  %v3641_v35 = vsel %vm338_vm2, %v3640_v18, %v8384_v10  ;;  %v2694_v56 = vsel %vm210_vm0, %v2693_v41, %v9752_v49  ;;  %v2719_v39 = vsel %vm340_vm3, %v2718_v5, %v8354_v47 }
 0x849   :  { %v8847_v40 = vpop.eup %4845  ;;  %4855 = vpow2.f32 %v2919_v34  ;;  %v2657_v36 = vsel %vm345_vm5, %v2656_v27, %v8433_v4  ;;  %v2644_v8 = vsel %vm345_vm5, %v2643_v59, %v8460_v23  ;;  %v8855_v18 = vsel %vm347_vm6, %v2631_v12, %v8517_v16 }
 0x84a   :  { %v8845_v7 = vpop.permute.xlu1 %3676  ;;  %9774 = vst [vmem:[#allocation3_spill] sm:$0xff] %v8847_v40  ;;  %v8857_v54 = vpop.permute.xlu0 %2936  ;;  %v2602_v47 = vadd.f32 %v8678_v30, %v2601_v38  ;;  %v3655_v5 = vsel %vm340_vm3, %v3654_v28, %v8384_v10  ;;  %v2707_v34 = vsel %vm210_vm0, %v2706_v33, %v8283_v21  ;;  %v2977_v4 = vsel %vm336_vm1, %v8666_v42, %v8580_v17 }
 0x84b   :  { %v8859_v41 = vpop.eup %4847  ;;  %v3642_v16 = vsel %vm340_vm3, %v3641_v35, %v9770_v25  ;;  %v8875_v27 = vsel %vm347_vm6, %v2644_v8, %v8487_v29  ;;  %v2695_v12 = vsel %vm343_vm4, %v2694_v56, %v9760_v51  ;;  %v2720_v28 = vsel %vm210_vm0, %v2719_v39, %v8321_v19  ;;  %v9777_v39 = vld [vmem:[#allocation26_spill] sm:$0xff] }
 0x84c   :  { %v8869_v59 = vpop.eup %4849  ;;  %v8885_v38 = vadd.f32 %v8826_v44, %v8817_v55  ;;  %4857 = vrcp.f32 %v2602_v47  ;;  %v2658_v29 = vsel %vm347_vm6, %v2657_v36, %v8460_v23  ;;  %v3656_v56 = vsel %vm210_vm0, %v3655_v5, %v9770_v25  ;;  %v9780_v55 = vld [vmem:[#allocation23_spill] sm:$0xff] }
 0x84d   :  { %9775 = vst [vmem:[#allocation37_spill] sm:$0xff] %v8869_v59  ;;  %v8881_v33 = vpop.eup %4851  ;;  %v3283_v59 = vmul.f32 %v8847_v40, %v7971_v22  ;;  %v2708_v19 = vsel %vm343_vm4, %v2707_v34, %v9752_v49  ;;  %v8899_v8 = vsel %vm338_vm2, %v2977_v4, %v9777_v39  ;;  %v3296_v23 = vmul.f32 %v8847_v40, %v9740_v24  ;;  %v9779_v34 = vld [vmem:[#allocation46_spill] sm:$0xff]  ;;  %v9782_v49 = vld [vmem:[#allocation39_spill] sm:$0xff] }
 0x84e   :  { %v8891_v35 = vpop.eup %4853  ;;  %v3574_v44 = vadd.f32 %v8881_v33, %v8531_v45  ;;  %v8903_v22 = vpop.permute.xlu1 %3000  ;;  %v8910_v47 = vsel %vm345_vm5, %v2695_v12, %v8356_v43  ;;  %v8914_v5 = vsel %vm343_vm4, %v2720_v28, %v8283_v21  ;;  %v3322_v4 = vmul.f32 %v8847_v40, %v9779_v34  ;;  %v9784_v12 = vld [vmem:[#allocation19_spill] sm:$0xff]  ;;  %v9785_v34 = vld [vmem:[#allocation28_spill] sm:$0xff] }
 0x84f   :  { %9776 = vst [vmem:[#allocation18_spill] sm:$0xff] %v8891_v35  ;;  %v3284_v36 = vmul.f32 %v3283_v59, %v8730_v15  ;;  %9778 = vst [vmem:[#allocation21_spill] sm:$0xff] %v8914_v5  ;;  %v3309_v45 = vmul.f32 %v8847_v40, %v9780_v55  ;;  %v9781_v35 = vld [vmem:[#allocation38_spill] sm:$0xff]  ;;  %v3601_v24 = vsel %vm336_vm1, %v9770_v25, %v9782_v49  ;;  %v8924_v15 = vpop.permute.xlu0 %2942 }
 0x850   :  { %v3575_v30 = vadd.f32 %v9781_v35, %v3574_v44  ;;  %9783 = vst [vmem:[#allocation15_spill] sm:$0xff] %v8924_v15  ;;  %v3297_v59 = vmul.f32 %v3296_v23, %v8741_v50  ;;  %v3335_v21 = vmul.f32 %v8847_v40, %v9784_v12  ;;  %v8931_v28 = vsel %vm345_vm5, %v2708_v19, %v9760_v51  ;;  %v9786_v35 = vld [vmem:[#allocation7_spill] sm:$0xff]  ;;  %v9792_v40 = vld [vmem:[#allocation29_spill] sm:$0xff] }
 0x851   :  { %v3643_v55 = vsel %vm210_vm0, %v3642_v16, %v9782_v49  ;;  %v3323_v44 = vmul.f32 %v3322_v4, %v9785_v34  ;;  %v3310_v5 = vmul.f32 %v3309_v45, %v9786_v35  ;;  %v3657_v15 = vsel %vm343_vm4, %v3656_v56, %v9782_v49  ;;  %v9787_v12 = vld [vmem:[#allocation43_spill] sm:$0xff] }
 0x852   :  { %v3576_v32 = vadd.f32 %v8699_v11, %v3575_v30  ;;  %v3298_v50 = vadd.f32 %v3297_v59, %v3284_v36  ;;  %v2990_v23 = vsel %vm336_vm1, %v8737_v58, %v8666_v42  ;;  %v3602_v19 = vsel %vm338_vm2, %v3601_v24, %v9787_v12  ;;  %v8959_v45 = vpop.permute.xlu1 %3013  ;;  %v9790_v11 = vld [vmem:[#allocation41_spill] sm:$0xff] }
 0x853   :  { %v3614_v16 = vsel %vm336_vm1, %v8384_v10, %v9770_v25  ;;  %v8948_v4 = vpop.eup %4855  ;;  %v3629_v56 = vsel %vm340_vm3, %v8763_v9, %v9782_v49  ;;  %v3666_v36 = vsel %vm336_vm1, %v8804_v13, %v8548_v14  ;;  %v8962_v24 = vmul.f32 %v3335_v21, %v8726_v3  ;;  %v8977_v21 = vpop.permute.xlu0 %2948 }
 0x854   :  { %9788 = vst [vmem:[#allocation16_spill] sm:$0xff] %v8948_v4  ;;  %v3577_v35 = vadd.f32 %v8709_v52, %v3576_v32  ;;  %v3615_v30 = vsel %vm338_vm2, %v3614_v16, %v9782_v49  ;;  %v3644_v59 = vsel %vm343_vm4, %v3643_v55, %v9787_v12  ;;  %v3658_v32 = vsel %vm345_vm5, %v3657_v15, %v9787_v12 }
 0x855   :  { %v3603_v34 = vsel %vm340_vm3, %v3602_v19, %v8715_v57  ;;  %v3645_v9 = vsel %vm345_vm5, %v3644_v59, %v8715_v57  ;;  %v2991_v16 = vsel %vm338_vm2, %v2990_v23, %v8580_v17  ;;  %v3679_v3 = vsel %vm336_vm1, %v8845_v7, %v8804_v13  ;;  %9789 = vst [vmem:[#allocation31_spill] sm:$0xff] %v8977_v21 }
 0x856   :  { %4859 = vrcp.f32 %v3577_v35  ;;  %v8979_v55 = vpop.eup %4857  ;;  %v3311_v52 = vadd.f32 %v3310_v5, %v3298_v50  ;;  %v3616_v15 = vsel %vm340_vm3, %v3615_v30, %v9787_v12  ;;  %v3630_v19 = vsel %vm210_vm0, %v3629_v56, %v9787_v12  ;;  %v9007_v4 = vpop.permute.xlu1 %3026 }
 0x857   :  { %v3667_v35 = vsel %vm338_vm2, %v3666_v36, %v8485_v6  ;;  %v2685_v23 = vmul.f32 %v8979_v55, %v8787_v62  ;;  %v2672_v59 = vmul.f32 %v8979_v55, %v8635_v60  ;;  %v2659_v21 = vmul.f32 %v8979_v55, %v8621_v0  ;;  %v9791_v36 = vld [vmem:[#allocation25_spill] sm:$0xff] }
 0x858   :  { %v3604_v5 = vsel %vm210_vm0, %v3603_v34, %v9790_v11  ;;  %v2646_v50 = vmul.f32 %v8979_v55, %v8594_v46  ;;  %v2633_v30 = vmul.f32 %v8979_v55, %v8573_v48  ;;  %v3617_v56 = vsel %vm210_vm0, %v3616_v15, %v8715_v57 }
 0x859   :  { %v3680_v62 = vsel %vm338_vm2, %v3679_v3, %v8548_v14  ;;  %v2686_v60 = vmul.f32 %v2685_v23, %v8752_v26  ;;  %v2673_v12 = vmul.f32 %v2672_v59, %v9791_v36  ;;  %v2660_v0 = vmul.f32 %v2659_v21, %v2658_v29 }
 0x85a   :  { %v3668_v34 = vsel %vm340_vm3, %v3667_v35, %v8431_v2  ;;  %v2647_v46 = vmul.f32 %v2646_v50, %v8875_v27  ;;  %v2634_v48 = vmul.f32 %v2633_v30, %v8855_v18  ;;  %v3631_v15 = vsel %vm343_vm4, %v3630_v19, %v8715_v57  ;;  %v9023_v35 = vpop.permute.xlu0 %3338  ;;  %v9793_v30 = vld [vmem:[#allocation10_spill] sm:$0xff] }
 0x85b   :  { %v2903_v3 = vsub.f32 %v9792_v40, %v8609_v20  ;;  %v3646_v26 = vsel %vm347_vm6, %v3645_v9, %v9790_v11  ;;  %v3618_v29 = vsel %vm343_vm4, %v3617_v56, %v9790_v11  ;;  %v3605_v21 = vsel %vm343_vm4, %v3604_v5, %v8746_v61 }
 0x85c   :  { %v3681_v27 = vsel %vm340_vm3, %v3680_v62, %v8485_v6  ;;  %v2648_v18 = vadd.f32 %v2647_v46, %v2634_v48  ;;  %v3619_v19 = vsel %vm345_vm5, %v3618_v29, %v8746_v61  ;;  %v3669_v20 = vsel %vm210_vm0, %v3668_v34, %v8384_v10  ;;  %v9794_v34 = vld [vmem:[#allocation48_spill] sm:$0xff]  ;;  %v9795_v48 = vld [vmem:[#allocation42_spill] sm:$0xff]  ;;  %v9797_v29 = vld [vmem:[#allocation45_spill] sm:$0xff] }
 0x85d   :  { %v2904_v40 = vmul.f32 1.442695, %v2903_v3  ;;  %v3324_v9 = vadd.f32 %v3323_v44, %v3311_v52  ;;  %v3659_v23 = vsel %vm347_vm6, %v3658_v32, %v8715_v57  ;;  %v9033_v59 = vsel %vm340_vm3, %v2991_v16, %v9777_v39  ;;  %v9051_v32 = vpop.permute.xlu1 %3039  ;;  %v9796_v3 = vld [vmem:[#allocation36_spill] sm:$0xff] }
 0x85e   :  { %v3632_v5 = vsel %vm345_vm5, %v3631_v15, %v9790_v11  ;;  %v2661_v50 = vadd.f32 %v2660_v0, %v2648_v18  ;;  %v3606_v56 = vsel %vm345_vm5, %v3605_v21, %v9793_v30  ;;  %v3682_v62 = vsel %vm210_vm0, %v3681_v27, %v8431_v2 }
 0x85f   :  { %4861 = vpow2.f32 %v2904_v40  ;;  %v3620_v52 = vsel %vm347_vm6, %v3619_v19, %v9793_v30  ;;  %v3633_v57 = vsel %vm347_vm6, %v3632_v5, %v8746_v61  ;;  %v3607_v44 = vsel %vm347_vm6, %v3606_v56, %v8777_v37 }
 0x860   :  { %v9041_v36 = vpop.eup %4859  ;;  %v3670_v11 = vsel %vm343_vm4, %v3669_v20, %v9770_v25  ;;  %v2674_v16 = vadd.f32 %v2673_v12, %v2661_v50  ;;  %v3683_v21 = vsel %vm343_vm4, %v3682_v62, %v8384_v10  ;;  %v3003_v12 = vsel %vm336_vm1, %v8903_v22, %v8737_v58  ;;  %v9798_v62 = vld [vmem:[#allocation20_spill] sm:$0xff] }
 0x861   :  { %v3660_v0 = vmul.f32 %v9041_v36, %v8881_v33  ;;  %v3634_v46 = vmul.f32 %v9041_v36, %v9794_v34  ;;  %v3608_v15 = vmul.f32 %v9041_v36, %v9795_v48  ;;  %v3621_v61 = vmul.f32 %v9041_v36, %v9796_v3  ;;  %v3352_v33 = vpop.permute.xlu0 %3351  ;;  %v9800_v34 = vld [vmem:[#allocation13_spill] sm:$0xff] }
 0x862   :  { %v3647_v37 = vmul.f32 %v9041_v36, %v9797_v29  ;;  %v2687_v27 = vadd.f32 %v2686_v60, %v2674_v16  ;;  %v2951_v19 = vsel %vm336_vm1, %v9777_v39, %v8815_v63  ;;  %v2964_v20 = vsel %vm336_vm1, %v8580_v17, %v9777_v39  ;;  %v9801_v29 = vld [vmem:[#allocation22_spill] sm:$0xff] }
 0x863   :  { %v3609_v18 = vmul.f32 %v3608_v15, %v3607_v44  ;;  %v9075_v40 = vadd.f32 %v8962_v24, %v3324_v9  ;;  %v3622_v5 = vmul.f32 %v3621_v61, %v3620_v52  ;;  %v9079_v50 = vsel %vm345_vm5, %v3670_v11, %v9782_v49  ;;  %v9799_v11 = vld [vmem:[#allocation44_spill] sm:$0xff]  ;;  %v3690_v15 = vpop.permute.xlu1 %3689 }
 0x864   :  { %v2965_v60 = vsel %vm338_vm2, %v2964_v20, %v8815_v63  ;;  %v9085_v30 = vsel %vm345_vm5, %v3683_v21, %v9770_v25  ;;  %v9089_v56 = vsel %vm338_vm2, %v3003_v12, %v8666_v42  ;;  %v3341_v24 = vsel %vm336_vm1, %v9023_v35, %v9798_v62 }
 0x865   :  { %v3354_v9 = vsel %vm336_vm1, %v3352_v33, %v9023_v35  ;;  %v3635_v52 = vmul.f32 %v3634_v46, %v3633_v57  ;;  %v3623_v44 = vadd.f32 %v3622_v5, %v3609_v18  ;;  %v2952_v16 = vsel %vm338_vm2, %v2951_v19, %v9799_v11  ;;  %v9802_v18 = vld [vmem:[#allocation17_spill] sm:$0xff]  ;;  %v3365_v5 = vpop.permute.xlu0 %3364 }
 0x866   :  { %v3342_v48 = vsel %vm338_vm2, %v3341_v24, %v9800_v34  ;;  %v9102_v3 = vsel %vm340_vm3, %v2952_v16, %v8857_v54  ;;  %v2966_v61 = vsel %vm340_vm3, %v2965_v60, %v9799_v11  ;;  %v3355_v57 = vsel %vm338_vm2, %v3354_v9, %v9798_v62 }
 0x867   :  { %v3343_v21 = vsel %vm340_vm3, %v3342_v48, %v9801_v29  ;;  %v3648_v46 = vmul.f32 %v3647_v37, %v3646_v26  ;;  %v3636_v12 = vadd.f32 %v3635_v52, %v3623_v44  ;;  %v3356_v20 = vsel %vm340_vm3, %v3355_v57, %v9800_v34  ;;  %v9803_v48 = vld [vmem:[#allocation30_spill] sm:$0xff] }
 0x868   :  { %v3344_v19 = vsel %vm210_vm0, %v3343_v21, %v9802_v18  ;;  %v9118_v60 = vsel %vm210_vm0, %v2966_v61, %v8857_v54  ;;  %v9123_v16 = vsel %vm340_vm3, %v8899_v8, %v8815_v63  ;;  %v3357_v26 = vsel %vm210_vm0, %v3356_v20, %v9801_v29 }
 0x869   :  { %v9114_v24 = vpop.eup %4861  ;;  %v3692_v37 = vsel %vm336_vm1, %v3690_v15, %v8845_v7  ;;  %v3661_v9 = vmul.f32 %v3660_v0, %v3659_v23  ;;  %v3649_v52 = vadd.f32 %v3648_v46, %v3636_v12  ;;  %v3345_v61 = vsel %vm343_vm4, %v3344_v19, %v9803_v48  ;;  %v9804_v46 = vld [vmem:[#allocation6_spill] sm:$0xff]  ;;  %v9805_v19 = vld [vmem:[#allocation49_spill] sm:$0xff] }
 0x86a   :  { %v2922_v44 = vadd.f32 %v9114_v24, %v8885_v38  ;;  %v3358_v21 = vsel %vm343_vm4, %v3357_v26, %v9802_v18  ;;  %v3693_v8 = vsel %vm338_vm2, %v3692_v37, %v8804_v13  ;;  %v3367_v57 = vsel %vm336_vm1, %v3365_v5, %v3352_v33  ;;  %v9807_v26 = vld [vmem:[#allocation21_spill] sm:$0xff] }
 0x86b   :  { %v2697_v7 = vsel %vm347_vm6, %v8910_v47, %v8386_v1  ;;  %v3662_v23 = vadd.f32 %v3661_v9, %v3649_v52  ;;  %v3694_v38 = vsel %vm340_vm3, %v3693_v8, %v8548_v14  ;;  %v3368_v15 = vsel %vm338_vm2, %v3367_v57, %v9023_v35  ;;  %v9809_v9 = vld [vmem:[#allocation37_spill] sm:$0xff] }
 0x86c   :  { %v2923_v0 = vadd.f32 %v8836_v53, %v2922_v44  ;;  %v3346_v12 = vsel %vm345_vm5, %v3345_v61, %v9804_v46  ;;  %v3369_v13 = vsel %vm340_vm3, %v3368_v15, %v9798_v62  ;;  %v2698_v33 = vmul.f32 %v8979_v55, %v8647_v31  ;;  %v9806_v31 = vld [vmem:[#allocation8_spill] sm:$0xff] }
 0x86d   :  { %v2710_v1 = vsel %vm347_vm6, %v8931_v28, %v8356_v43  ;;  %v3359_v14 = vsel %vm345_vm5, %v3358_v21, %v9803_v48  ;;  %v3370_v35 = vsel %vm210_vm0, %v3369_v13, %v9800_v34  ;;  %v2711_v20 = vmul.f32 %v8979_v55, %v9805_v19  ;;  %v9808_v43 = vld [vmem:[#allocation11_spill] sm:$0xff]  ;;  %v9812_v15 = vld [vmem:[#allocation32_spill] sm:$0xff] }
 0x86e   :  { %v2924_v47 = vadd.f32 %v8859_v41, %v2923_v0  ;;  %v3695_v62 = vsel %vm210_vm0, %v3694_v38, %v8485_v6  ;;  %v2699_v5 = vmul.f32 %v2698_v33, %v2697_v7  ;;  %v2722_v37 = vsel %vm345_vm5, %v9807_v26, %v9806_v31  ;;  %v9815_v19 = vld [vmem:[#allocation16_spill] sm:$0xff] }
 0x86f   :  { %v2724_v28 = vmul.f32 %v8979_v55, %v9808_v43  ;;  %v3371_v44 = vsel %vm343_vm4, %v3370_v35, %v9801_v29  ;;  %v2712_v34 = vmul.f32 %v2711_v20, %v2710_v1  ;;  %v2723_v61 = vsel %vm347_vm6, %v2722_v37, %v9760_v51  ;;  %v9810_v55 = vld [vmem:[#allocation18_spill] sm:$0xff]  ;;  %v9811_v29 = vld [vmem:[#allocation33_spill] sm:$0xff]  ;;  %v9813_v51 = vld [vmem:[#allocation3_spill] sm:$0xff] }
 0x870   :  { %v2925_v52 = vadd.f32 %v9809_v9, %v2924_v47  ;;  %v3016_v6 = vsel %vm336_vm1, %v8959_v45, %v8903_v22  ;;  %v3029_v21 = vsel %vm336_vm1, %v9007_v4, %v8959_v45  ;;  %v2700_v8 = vadd.f32 %v2699_v5, %v2687_v27  ;;  %v9814_v47 = vld [vmem:[#allocation34_spill] sm:$0xff]  ;;  %v9817_v37 = vld [vmem:[#allocation43_spill] sm:$0xff] }
 0x871   :  { %v2725_v57 = vmul.f32 %v2724_v28, %v2723_v61  ;;  %v3696_v0 = vsel %vm343_vm4, %v3695_v62, %v8431_v2  ;;  %v3347_v38 = vsel %vm347_vm6, %v3346_v12, %v9811_v29  ;;  %v3348_v13 = vmul.f32 %v9813_v51, %v9812_v15  ;;  %v9816_v12 = vld [vmem:[#allocation27_spill] sm:$0xff] }
 0x872   :  { %v2926_v7 = vadd.f32 %v9810_v55, %v2925_v52  ;;  %v2713_v33 = vadd.f32 %v2712_v34, %v2700_v8  ;;  %v3360_v1 = vsel %vm347_vm6, %v3359_v14, %v9804_v46  ;;  %v3361_v35 = vmul.f32 %v9813_v51, %v9814_v47  ;;  %v9818_v14 = vld [vmem:[#allocation38_spill] sm:$0xff]  ;;  %v9820_v8 = vld [vmem:[#allocation40_spill] sm:$0xff]  ;;  %v9822_v15 = vld [vmem:[#allocation15_spill] sm:$0xff] }
 0x873   :  { %v3372_v27 = vsel %vm345_vm5, %v3371_v44, %v9802_v18  ;;  %v3349_v5 = vmul.f32 %v3348_v13, %v3347_v38  ;;  %v3374_v62 = vmul.f32 %v9813_v51, %v9816_v12  ;;  %v3672_v46 = vsel %vm347_vm6, %v9079_v50, %v9817_v37  ;;  %v9819_v44 = vld [vmem:[#allocation50_spill] sm:$0xff]  ;;  %v9824_v37 = vld [vmem:[#allocation31_spill] sm:$0xff] }
 0x874   :  { %v2927_v20 = vadd.f32 %v9815_v19, %v2926_v7  ;;  %v3373_v2 = vsel %vm347_vm6, %v3372_v27, %v9803_v48  ;;  %v9198_v31 = vadd.f32 %v2725_v57, %v2713_v33  ;;  %v3362_v26 = vmul.f32 %v3361_v35, %v3360_v1  ;;  %v9823_v27 = vld [vmem:[#allocation4_spill] sm:$0xff] }
 0x875   :  { %v3673_v43 = vmul.f32 %v9041_v36, %v9818_v14  ;;  %v3350_v18 = vadd.f32 %v3349_v5, %v9075_v40  ;;  %v3375_v28 = vmul.f32 %v3374_v62, %v3373_v2  ;;  %v3685_v48 = vsel %vm347_vm6, %v9085_v30, %v9782_v49 }
 0x876   :  { %4863 = vrcp.f32 %v2927_v20  ;;  %v3686_v34 = vmul.f32 %v9041_v36, %v9819_v44  ;;  %v3697_v61 = vsel %vm345_vm5, %v3696_v0, %v8384_v10  ;;  %v3699_v50 = vmul.f32 %v9041_v36, %v9820_v8 }
 0x877   :  { %v3674_v52 = vmul.f32 %v3673_v43, %v3672_v46  ;;  %v3017_v57 = vsel %vm338_vm2, %v3016_v6, %v8737_v58  ;;  %v3030_v40 = vsel %vm338_vm2, %v3029_v21, %v8903_v22  ;;  %v3042_v49 = vsel %vm336_vm1, %v9051_v32, %v9007_v4  ;;  %v9821_v21 = vld [vmem:[#allocation47_spill] sm:$0xff]  ;;  %v9825_v43 = vld [vmem:[#allocation2_spill] sm:$0xff] }
 0x878   :  { %v3698_v30 = vsel %vm347_vm6, %v3697_v61, %v9770_v25  ;;  %v3363_v7 = vadd.f32 %v3362_v26, %v3350_v18  ;;  %v3687_v38 = vmul.f32 %v3686_v34, %v3685_v48  ;;  %v2993_v36 = vsel %vm210_vm0, %v9033_v59, %v8815_v63 }
 0x879   :  { %v3675_v29 = vadd.f32 %v3674_v52, %v3662_v23  ;;  %v3700_v10 = vmul.f32 %v3699_v50, %v3698_v30  ;;  %v3005_v6 = vsel %vm340_vm3, %v9089_v56, %v8580_v17  ;;  %v2954_v0 = vsel %vm210_vm0, %v9102_v3, %v9821_v21 }
 0x87a   :  { %v3018_v4 = vsel %vm340_vm3, %v3017_v57, %v8666_v42  ;;  %v3043_v25 = vsel %vm338_vm2, %v3042_v49, %v8959_v45  ;;  %v3376_v32 = vadd.f32 %v3375_v28, %v3363_v7  ;;  %v2968_v59 = vsel %vm343_vm4, %v9118_v60, %v9821_v21  ;;  %v9826_v28 = vld [vmem:[#allocation5_spill] sm:$0xff] }
 0x87b   :  { %v3688_v23 = vadd.f32 %v3687_v38, %v3675_v29  ;;  %v2980_v56 = vsel %vm210_vm0, %v9123_v16, %v9799_v11  ;;  %v2955_v51 = vsel %vm343_vm4, %v2954_v0, %v9822_v15  ;;  %v3031_v3 = vsel %vm340_vm3, %v3030_v40, %v8737_v58 }
 0x87c   :  { %v3006_v13 = vsel %vm210_vm0, %v3005_v6, %v9777_v39  ;;  %v2981_v45 = vsel %vm343_vm4, %v2980_v56, %v8857_v54  ;;  %v2969_v33 = vsel %vm345_vm5, %v2968_v59, %v9822_v15  ;;  %v2994_v1 = vsel %vm343_vm4, %v2993_v36, %v9799_v11 }
 0x87d   :  { %v3701_v60 = vadd.f32 %v3700_v10, %v3688_v23  ;;  %v3019_v16 = vsel %vm210_vm0, %v3018_v4, %v8580_v17  ;;  %v3044_v47 = vsel %vm340_vm3, %v3043_v25, %v8903_v22  ;;  %v2995_v35 = vsel %vm345_vm5, %v2994_v1, %v8857_v54 }
 0x87e   :  { %v2956_v20 = vsel %vm345_vm5, %v2955_v51, %v9823_v27  ;;  %v3032_v5 = vsel %vm210_vm0, %v3031_v3, %v8666_v42  ;;  %v3007_v62 = vsel %vm343_vm4, %v3006_v13, %v8815_v63  ;;  %v2982_v26 = vsel %vm345_vm5, %v2981_v45, %v9821_v21 }
 0x87f   :  { %v3708_v2 = vpack.c.bf16 %v3701_v60, %v3376_v32  ;;  %v2970_v22 = vsel %vm347_vm6, %v2969_v33, %v9823_v27  ;;  %v2957_v46 = vsel %vm347_vm6, %v2956_v20, %v9824_v37  ;;  %v3020_v14 = vsel %vm343_vm4, %v3019_v16, %v9777_v39 }
 0x880   :  { %v4864_v12 = vpop.eup %4863  ;;  %v3045_v52 = vsel %vm210_vm0, %v3044_v47, %v8737_v58  ;;  %v2983_v44 = vsel %vm347_vm6, %v2982_v26, %v9822_v15  ;;  %v3033_v34 = vsel %vm343_vm4, %v3032_v5, %v8580_v17  ;;  %v3008_v8 = vsel %vm345_vm5, %v3007_v62, %v9799_v11  ;;  %v9827_v47 = vld [vmem:[#allocation14_spill] sm:$0xff]  ;;  %v9828_v5 = vld [vmem:[#allocation24_spill] sm:$0xff] }
 0x881   :  { %v2958_v18 = vmul.f32 %v4864_v12, %v9825_v43  ;;  %v2971_v48 = vmul.f32 %v4864_v12, %v9826_v28  ;;  %v2984_v61 = vmul.f32 %v4864_v12, %v9114_v24  ;;  %v2996_v40 = vsel %vm347_vm6, %v2995_v35, %v9821_v21 }
 0x882   :  { %v3021_v49 = vsel %vm345_vm5, %v3020_v14, %v8815_v63  ;;  %v3046_v58 = vsel %vm343_vm4, %v3045_v52, %v8666_v42  ;;  %v2997_v29 = vmul.f32 %v4864_v12, %v8836_v53  ;;  %v3034_v24 = vsel %vm345_vm5, %v3033_v34, %v9777_v39 }
 0x883   :  { %v2959_v50 = vmul.f32 %v2958_v18, %v2957_v46  ;;  %v2972_v57 = vmul.f32 %v2971_v48, %v2970_v22  ;;  %v2985_v30 = vmul.f32 %v2984_v61, %v2983_v44  ;;  %v3009_v38 = vsel %vm347_vm6, %v3008_v8, %v8857_v54  ;;  %v9830_v22 = vld [vmem:[#allocation12_spill] sm:$0xff] }
 0x884   :  { %v2998_v36 = vmul.f32 %v2997_v29, %v2996_v40  ;;  %v3010_v6 = vmul.f32 %v4864_v12, %v8859_v41  ;;  %v3047_v21 = vsel %vm345_vm5, %v3046_v58, %v8580_v17  ;;  %v3022_v42 = vsel %vm347_vm6, %v3021_v49, %v9799_v11 }
 0x885   :  { %v2973_v7 = vadd.f32 %v2972_v57, %v2959_v50  ;;  %v3035_v0 = vsel %vm347_vm6, %v3034_v24, %v8815_v63  ;;  %v3023_v25 = vmul.f32 %v4864_v12, %v9809_v9  ;;  %v3036_v32 = vmul.f32 %v4864_v12, %v9810_v55  ;;  %v4710_v9 = vld [vmem:[%s9428_s5 + $0x18] sm:$0xff]   ;;  %v3717_v55 = vpop.permute.xlu0 %3716 }
 0x886   :  { %v3011_v4 = vmul.f32 %v3010_v6, %v3009_v38  ;;  %v3048_v54 = vsel %vm347_vm6, %v3047_v21, %v9777_v39  ;;  %v3049_v17 = vmul.f32 %v4864_v12, %v9815_v19  ;;  %v4711_v39 = vld [vmem:[%s9431_s7 + $0x20] sm:$0xff]   ;;  %v3722_v19 = vpop.permute.xlu1 %3721  ;;  %v9829_v12 = vld [vmem:[#allocation35_spill] sm:$0xff] }
 0x887   :  { %v2986_v10 = vadd.f32 %v2985_v30, %v2973_v7  ;;  %v3024_v41 = vmul.f32 %v3023_v25, %v3022_v42  ;;  %v3037_v59 = vmul.f32 %v3036_v32, %v3035_v0 }
 0x888   :  { %v3050_v15 = vmul.f32 %v3049_v17, %v3048_v54 }
 0x889   :  { %v2999_v53 = vadd.f32 %v2998_v36, %v2986_v10 }
 0x88a   :  { %v3732_v1 = vpop.permute.xlu1 %3731 }
 0x88b   :  { %v3012_v23 = vadd.f32 %v3011_v4, %v2999_v53 }
 0x88d   :  { %v3025_v56 = vadd.f32 %v3024_v41, %v3012_v23 }
 0x88f   :  { %v3038_v11 = vadd.f32 %v3037_v59, %v3025_v56  ;;  %v3863_v59 = vpop.permute.xlu1 %3862 }
 0x891   :  { %v3051_v51 = vadd.f32 %v3050_v15, %v3038_v11 }
 0x893   :  { %v3707_v63 = vpack.c.bf16 %v3051_v51, %v9198_v31  ;;  %v3727_v31 = vpop.permute.xlu0 %3726  ;;  %v3887_v11 = vpop.permute.xlu1 %3886 }
 0x895   :  { %4640 = vmatprep.subr.bf16.mxu0 %v3707_v63 }
 0x896   :  { %4641 = vmatpush3.bf16.msra.mxu0 %v3707_v63 }
 0x897   :  { %4642 = vmatprep.subr.bf16.mxu0 %v3708_v2  ;;  %v3858_v17 = vpop.permute.xlu0 %3857  ;;  %v3873_v63 = vpop.permute.xlu1 %3872 }
 0x89a   :  { %4643 = vmatpush3.bf16.msra.mxu0 %v3708_v2 }
 0x89b   :  { %v3882_v51 = vpop.permute.xlu0 %3881 }
 0x89d   :  { %4645 = vmatmul.mubr.msk.bf16.vlgmr.msra.gmra.mrb[16].mxu0 %vm210_vm0, %v4710_v9 }
 0x89e   :  { %4652 = vmatprep.mubr.msk.bf16.mxu0 %vm210_vm0, %v4711_v39 }
 0x89f   :  { %v3868_v9 = vpop.permute.xlu0 %3867 }
 0x970   :  { %v4646_v3 = vpop.f32.mrb[16].mxu0 }
 0x971   :  { %v3784_v13 = vpop.f32.mrb[17].mxu0  ;;  %v3793_v45 = vadd.f32 %v4646_v3, %v3727_v31 }
 0x972   :  { %v3785_v33 = vadd.f32 %v3784_v13, %v3717_v55  ;;  %v4647_v60 = vpop.f32.mrb[18].mxu0 }
 0x973   :  { %v3787_v16 = vpop.f32.mrb[19].mxu0  ;;  %v3796_v27 = vadd.f32 %v4647_v60, %v3732_v1  ;;  %v3801_v2 = vadd.f32 %v3793_v45, %v9828_v5  ;;  %v3897_v1 = vpop.permute.xlu1 %3896 }
 0x974   :  { %v3799_v35 = vadd.f32 %v3785_v33, %v9827_v47  ;;  %v3788_v20 = vadd.f32 %v3787_v16, %v3722_v19  ;;  %v3892_v16 = vpop.permute.xlu0 %3891 }
 0x975   :  { %v3802_v37 = vadd.f32 %v3796_v27, %v9830_v22  ;;  %v3816_v43 = vsel %vm350_vm7, %v3801_v2, 0.0  ;;  %v4715_v22 = vld [vmem:[%s9432_s9 + $0x10] sm:$0xff]  }
 0x976   :  { %v3800_v62 = vadd.f32 %v3788_v20, %v9829_v12  ;;  %v3813_v26 = vsel %vm350_vm7, %v3799_v35, 0.0  ;;  %v4712_v12 = vld [vmem:[%s9431_s7 + $0x28] sm:$0xff]   ;;  %4668 = vmatprep.mubr.msk.bf16.mxu1 %vm350_vm7, %v4715_v22 }
 0x977   :  { %v3818_v28 = vsel %vm350_vm7, %v3802_v37, 0.0 }
 0x978   :  { %v3814_v46 = vsel %vm350_vm7, %v3800_v62, 0.0 }
 0x979   :  { %v3815_v14 = vadd.f32 %v3814_v46, %v3813_v26  ;;  %v4714_v26 = vld [vmem:[%s9431_s7 + $0x38] sm:$0xff]   ;;  %v3931_v46 = vpop.permute.xlu1 %3930 }
 0x97b   :  { %v3817_v18 = vadd.f32 %v3816_v43, %v3815_v14 }
 0x97d   :  { %v3819_v48 = vadd.f32 %v3818_v28, %v3817_v18  ;;  %v3941_v43 = vpop.permute.xlu1 %3940 }
 0x97f   :  { %v3820_v52 = vrot.slane %v3819_v48, 4 }
 0x981   :  { %v3821_v44 = vadd.f32 %v3820_v52, %v3819_v48 }
 0x983   :  { %v3822_v34 = vrot.slane %v3821_v44, 2 }
 0x985   :  { %v3823_v61 = vadd.f32 %v3822_v34, %v3821_v44 }
 0x987   :  { %v3824_v8 = vrot.slane %v3823_v61, 1 }
 0x989   :  { %v3825_v50 = vadd.f32 %v3824_v8, %v3823_v61 }
 0x98b   :  { %v3826_v57 = vmul.f32 0.03125, %v3825_v50  ;;  %v3951_v50 = vpop.permute.xlu1 %3950 }
 0x98d   :  { %v3827_v40 = vsub.f32 %v3799_v35, %v3826_v57  ;;  %v3828_v49 = vsub.f32 %v3800_v62, %v3826_v57  ;;  %v3829_v58 = vsub.f32 %v3801_v2, %v3826_v57  ;;  %v3830_v30 = vsub.f32 %v3802_v37, %v3826_v57  ;;  %v4713_v62 = vld [vmem:[%s9431_s7 + $0x30] sm:$0xff]   ;;  %v3926_v37 = vpop.permute.xlu0 %3925 }
 0x98f   :  { %v3831_v7 = vmul.f32 %v3827_v40, %v3827_v40  ;;  %v3832_v29 = vmul.f32 %v3828_v49, %v3828_v49  ;;  %v3833_v24 = vmul.f32 %v3829_v58, %v3829_v58  ;;  %v3834_v38 = vmul.f32 %v3830_v30, %v3830_v30 }
 0x991   :  { %v3835_v10 = vsel %vm350_vm7, %v3831_v7, 0.0  ;;  %v3836_v36 = vsel %vm350_vm7, %v3832_v29, 0.0  ;;  %v3838_v21 = vsel %vm350_vm7, %v3833_v24, 0.0  ;;  %v3840_v0 = vsel %vm350_vm7, %v3834_v38, 0.0  ;;  %v3936_v14 = vpop.permute.xlu0 %3935 }
 0x992   :  { %v3837_v6 = vadd.f32 %v3836_v36, %v3835_v10 }
 0x994   :  { %v3839_v42 = vadd.f32 %v3838_v21, %v3837_v6  ;;  %v3961_v6 = vpop.permute.xlu1 %3960 }
 0x995   :  { %v3946_v52 = vpop.permute.xlu0 %3945 }
 0x996   :  { %v3841_v53 = vadd.f32 %v3840_v0, %v3839_v42 }
 0x998   :  { %v3842_v4 = vrot.slane %v3841_v53, 4 }
 0x999   :  { %v3956_v29 = vpop.permute.xlu0 %3955 }
 0x99a   :  { %v3843_v25 = vadd.f32 %v3842_v4, %v3841_v53 }
 0x99c   :  { %v3844_v32 = vrot.slane %v3843_v25, 2 }
 0x99e   :  { %v3845_v54 = vadd.f32 %v3844_v32, %v3843_v25 }
 0x9a0   :  { %v3846_v23 = vrot.slane %v3845_v54, 1 }
 0x9a2   :  { %v3847_v41 = vadd.f32 %v3846_v23, %v3845_v54 }
 0x9a4   :  { %v3848_v56 = vmul.f32 0.03125, %v3847_v41 }
 0x9a6   :  { %v3849_v15 = vadd.f32 1e-05, %v3848_v56  ;;  %v4085_v56 = vpop.permute.xlu0 %4084 }
 0x9a8   :  { %4865 = vrsqrt.f32 %v3849_v15  ;;  %v4090_v15 = vpop.permute.xlu1 %4089 }
 0x9b2   :  { %v4866_v39 = vpop.eup %4865 }
 0x9b3   :  { %v3852_v55 = vmul.f32 %v4866_v39, %v3828_v49  ;;  %v3851_v19 = vmul.f32 %v4866_v39, %v3827_v40  ;;  %v3853_v3 = vmul.f32 %v4866_v39, %v3829_v58  ;;  %v3854_v31 = vmul.f32 %v4866_v39, %v3830_v30 }
 0x9b5   :  { %v3875_v13 = vmul.f32 %v3858_v17, %v3851_v19  ;;  %v3876_v45 = vmul.f32 %v3863_v59, %v3852_v55  ;;  %v3877_v33 = vmul.f32 %v3868_v9, %v3853_v3  ;;  %v3878_v60 = vmul.f32 %v3873_v63, %v3854_v31  ;;  %v4716_v17 = vld [vmem:[%s9432_s9 + $0x18] sm:$0xff]   ;;  %v4100_v19 = vpop.permute.xlu1 %4099 }
 0x9b7   :  { %v9330_v47 = vadd.f32 %v3882_v51, %v3875_v13  ;;  %v9332_v35 = vadd.f32 %v3887_v11, %v3876_v45  ;;  %v9334_v27 = vadd.f32 %v3892_v16, %v3877_v33  ;;  %v9336_v20 = vadd.f32 %v3897_v1, %v3878_v60  ;;  %v4095_v51 = vpop.permute.xlu0 %4094 }
 0x9b9   :  { %v3912_v5 = vpack.c.bf16 %v9332_v35, %v9330_v47  ;;  %v3913_v2 = vpack.c.bf16 %v9336_v20, %v9334_v27 }
 0x9bb   :  { %4648 = vmatprep.subr.bf16.mxu0 %v3912_v5 }
 0x9bc   :  { %4649 = vmatpush3.bf16.msra.mxu0 %v3912_v5 }
 0x9bd   :  { %4650 = vmatprep.subr.bf16.mxu0 %v3913_v2 }
 0x9c0   :  { %4651 = vmatpush3.bf16.msra.mxu0 %v3913_v2 }
 0x9c3   :  { %4653 = vmatmul.mubr.msk.bf16.vlgmr.msra.gmra.mrb[20].mxu0 %vm210_vm0, %v4712_v12 }
 0x9c4   :  { %4656 = vmatprep.mubr.msk.bf16.mxu0 %vm210_vm0, %v4713_v62 }
 0x9cb   :  { %4657 = vmatmul.mubr.msk.bf16.gmra.mrb[24].mxu0 %vm210_vm0, %v4714_v26 }
 0xa96   :  { %v4654_v18 = vpop.f32.mrb[20].mxu0 }
 0xa97   :  { %v4038_v28 = vadd.f32 %v4654_v18, %v3936_v14  ;;  %v4029_v48 = vpop.f32.mrb[21].mxu0 }
 0xa98   :  { %v4030_v44 = vadd.f32 %v4029_v48, %v3926_v37  ;;  %v4655_v34 = vpop.f32.mrb[22].mxu0 }
 0xa99   :  { %v4041_v61 = vadd.f32 %v4655_v34, %v3941_v43  ;;  %v4032_v8 = vpop.f32.mrb[23].mxu0  ;;  %v4062_v40 = vmax.f32 %v4038_v28, 0.0 }
 0xa9a   :  { %v4033_v57 = vadd.f32 %v4032_v8, %v3931_v46  ;;  %v4060_v58 = vmax.f32 %v4030_v44, 0.0 }
 0xa9b   :  { %v4063_v49 = vmax.f32 %v4041_v61, 0.0 }
 0xa9c   :  { %v4061_v30 = vmax.f32 %v4033_v57, 0.0 }
 0xa9d   :  { %v4074_v7 = vpack.c.bf16 %v4063_v49, %v4062_v40 }
 0xa9e   :  { %v4073_v24 = vpack.c.bf16 %v4061_v30, %v4060_v58  ;;  %v4658_v38 = vpop.f32.mrb[24].mxu0 }
 0xa9f   :  { %v4054_v10 = vadd.f32 %v4658_v38, %v3956_v29  ;;  %v4045_v36 = vpop.f32.mrb[25].mxu0 }
 0xaa0   :  { %v4046_v21 = vadd.f32 %v4045_v36, %v3946_v52  ;;  %v4659_v42 = vpop.f32.mrb[26].mxu0  ;;  %4660 = vmatprep.subr.bf16.mxu1 %v4073_v24 }
 0xaa1   :  { %v4057_v0 = vadd.f32 %v4659_v42, %v3961_v6  ;;  %v4048_v53 = vpop.f32.mrb[27].mxu0  ;;  %4661 = vmatpush3.bf16.msra.mxu1 %v4073_v24  ;;  %v4066_v25 = vmax.f32 %v4054_v10, 0.0  ;;  %v4231_v42 = vpop.permute.xlu1 %4230 }
 0xaa2   :  { %v4049_v4 = vadd.f32 %v4048_v53, %v3951_v50  ;;  %4662 = vmatprep.subr.bf16.mxu1 %v4074_v7  ;;  %v4064_v54 = vmax.f32 %v4046_v21, 0.0 }
 0xaa3   :  { %v4067_v32 = vmax.f32 %v4057_v0, 0.0  ;;  %v4226_v0 = vpop.permute.xlu0 %4225 }
 0xaa4   :  { %v4065_v23 = vmax.f32 %v4049_v4, 0.0 }
 0xaa5   :  { %v4076_v41 = vpack.c.bf16 %v4067_v32, %v4066_v25  ;;  %4663 = vmatpush3.bf16.msra.mxu1 %v4074_v7  ;;  %v4241_v53 = vpop.permute.xlu1 %4240 }
 0xaa6   :  { %v4075_v59 = vpack.c.bf16 %v4065_v23, %v4064_v54 }
 0xaa7   :  { %v4236_v4 = vpop.permute.xlu0 %4235 }
 0xaa8   :  { %4664 = vmatprep.subr.bf16.mxu1 %v4075_v59 }
 0xaa9   :  { %4665 = vmatpush3.bf16.msra.mxu1 %v4075_v59  ;;  %v4255_v59 = vpop.permute.xlu1 %4254 }
 0xaaa   :  { %4666 = vmatprep.subr.bf16.mxu1 %v4076_v41 }
 0xaad   :  { %4667 = vmatpush3.bf16.msra.mxu1 %v4076_v41 }
 0xab0   :  { %4669 = vmatmul.mubr.msk.bf16.vlgmr.msra.gmra.mrb[24].mxu1 %vm350_vm7, %v4716_v17  ;;  %v4250_v17 = vpop.permute.xlu0 %4249 }
 0xb83   :  { %v4670_v11 = vpop.f32.mrb[24].mxu1 }
 0xb84   :  { %v4152_v63 = vpop.f32.mrb[25].mxu1  ;;  %v4161_v9 = vadd.f32 %v4670_v11, %v4095_v51 }
 0xb85   :  { %v4153_v39 = vadd.f32 %v4152_v63, %v4085_v56  ;;  %v4671_v55 = vpop.f32.mrb[26].mxu1 }
 0xb86   :  { %v4155_v3 = vpop.f32.mrb[27].mxu1  ;;  %v4164_v13 = vadd.f32 %v4671_v55, %v4100_v19  ;;  %v4169_v33 = vadd.f32 %v4161_v9, %v9334_v27  ;;  %v4260_v55 = vpop.permute.xlu0 %4259 }
 0xb87   :  { %v4167_v31 = vadd.f32 %v4153_v39, %v9330_v47  ;;  %v4156_v45 = vadd.f32 %v4155_v3, %v4090_v15  ;;  %v4265_v39 = vpop.permute.xlu1 %4264 }
 0xb88   :  { %v4170_v16 = vadd.f32 %v4164_v13, %v9336_v20  ;;  %v4184_v12 = vsel %vm350_vm7, %v4169_v33, 0.0 }
 0xb89   :  { %v4168_v60 = vadd.f32 %v4156_v45, %v9332_v35  ;;  %v4181_v1 = vsel %vm350_vm7, %v4167_v31, 0.0 }
 0xb8a   :  { %v4186_v26 = vsel %vm350_vm7, %v4170_v16, 0.0 }
 0xb8b   :  { %v4182_v5 = vsel %vm350_vm7, %v4168_v60, 0.0 }
 0xb8c   :  { %v4183_v2 = vadd.f32 %v4182_v5, %v4181_v1 }
 0xb8e   :  { %v4185_v62 = vadd.f32 %v4184_v12, %v4183_v2 }
 0xb90   :  { %v4187_v22 = vadd.f32 %v4186_v26, %v4185_v62 }
 0xb92   :  { %v4188_v47 = vrot.slane %v4187_v22, 4 }
 0xb94   :  { %v4189_v37 = vadd.f32 %v4188_v47, %v4187_v22 }
 0xb96   :  { %v4190_v46 = vrot.slane %v4189_v37, 2 }
 0xb98   :  { %v4191_v14 = vadd.f32 %v4190_v46, %v4189_v37 }
 0xb9a   :  { %v4192_v27 = vrot.slane %v4191_v14, 1 }
 0xb9c   :  { %v4193_v43 = vadd.f32 %v4192_v27, %v4191_v14 }
 0xb9e   :  { %v4194_v35 = vmul.f32 0.03125, %v4193_v43 }
 0xba0   :  { %v4195_v18 = vsub.f32 %v4167_v31, %v4194_v35  ;;  %v4196_v28 = vsub.f32 %v4168_v60, %v4194_v35  ;;  %v4197_v48 = vsub.f32 %v4169_v33, %v4194_v35  ;;  %v4198_v20 = vsub.f32 %v4170_v16, %v4194_v35 }
 0xba2   :  { %v4199_v52 = vmul.f32 %v4195_v18, %v4195_v18  ;;  %v4200_v44 = vmul.f32 %v4196_v28, %v4196_v28  ;;  %v4201_v34 = vmul.f32 %v4197_v48, %v4197_v48  ;;  %v4202_v61 = vmul.f32 %v4198_v20, %v4198_v20 }
 0xba4   :  { %v4203_v8 = vsel %vm350_vm7, %v4199_v52, 0.0  ;;  %v4204_v50 = vsel %vm350_vm7, %v4200_v44, 0.0  ;;  %v4206_v40 = vsel %vm350_vm7, %v4201_v34, 0.0  ;;  %v4208_v58 = vsel %vm350_vm7, %v4202_v61, 0.0 }
 0xba5   :  { %v4205_v57 = vadd.f32 %v4204_v50, %v4203_v8 }
 0xba7   :  { %v4207_v49 = vadd.f32 %v4206_v40, %v4205_v57 }
 0xba9   :  { %v4209_v30 = vadd.f32 %v4208_v58, %v4207_v49 }
 0xbab   :  { %v4210_v7 = vrot.slane %v4209_v30, 4 }
 0xbad   :  { %v4211_v29 = vadd.f32 %v4210_v7, %v4209_v30 }
 0xbaf   :  { %v4212_v24 = vrot.slane %v4211_v29, 2 }
 0xbb1   :  { %v4213_v38 = vadd.f32 %v4212_v24, %v4211_v29 }
 0xbb3   :  { %v4214_v10 = vrot.slane %v4213_v38, 1 }
 0xbb5   :  { %v4215_v36 = vadd.f32 %v4214_v10, %v4213_v38 }
 0xbb7   :  { %v4216_v6 = vmul.f32 0.03125, %v4215_v36 }
 0xbb9   :  { %v4217_v21 = vadd.f32 1e-05, %v4216_v6 }
 0xbbb   :  { %4867 = vrsqrt.f32 %v4217_v21 }
 0xbc5   :  { %v4868_v25 = vpop.eup %4867 }
 0xbc6   :  { %v4219_v32 = vmul.f32 %v4868_v25, %v4195_v18  ;;  %v4220_v54 = vmul.f32 %v4868_v25, %v4196_v28  ;;  %v4221_v23 = vmul.f32 %v4868_v25, %v4197_v48  ;;  %v4222_v41 = vmul.f32 %v4868_v25, %v4198_v20 }
 0xbc8   :  { %v4243_v56 = vmul.f32 %v4226_v0, %v4219_v32  ;;  %v4244_v15 = vmul.f32 %v4231_v42, %v4220_v54  ;;  %v4245_v11 = vmul.f32 %v4236_v4, %v4221_v23  ;;  %v4246_v51 = vmul.f32 %v4241_v53, %v4222_v41 }
 0xbca   :  { %v4267_v63 = vadd.f32 %v4250_v17, %v4243_v56  ;;  %v4268_v9 = vadd.f32 %v4255_v59, %v4244_v15  ;;  %v4269_v19 = vadd.f32 %v4260_v55, %v4245_v11  ;;  %v4270_v3 = vadd.f32 %v4265_v39, %v4246_v51 }
 0xbcc   :  { %4277 = vrot.lane.b32.xlu1 %v4268_v9, %s4870_s22  ;;  %4275 = vrot.lane.b32.xlu0 %v4267_v63, %s4870_s22 }
 0xbd0   :  { %4281 = vrot.lane.b32.xlu1 %v4270_v3, %s4870_s22  ;;  %4279 = vrot.lane.b32.xlu0 %v4269_v19, %s4870_s22 }
 0xbd4   :  { %4293 = vrot.lane.b32.xlu1 %v4268_v9, %s4872_s24  ;;  %4291 = vrot.lane.b32.xlu0 %v4267_v63, %s4872_s24 }
 0xbd8   :  { %4297 = vrot.lane.b32.xlu1 %v4270_v3, %s4872_s24  ;;  %4295 = vrot.lane.b32.xlu0 %v4269_v19, %s4872_s24 }
 0xbdc   :  { %4309 = vrot.lane.b32.xlu1 %v4268_v9, %s4874_s26  ;;  %4307 = vrot.lane.b32.xlu0 %v4267_v63, %s4874_s26 }
 0xbe0   :  { %4313 = vrot.lane.b32.xlu1 %v4270_v3, %s4874_s26  ;;  %4311 = vrot.lane.b32.xlu0 %v4269_v19, %s4874_s26 }
 0xbe4   :  { %4325 = vrot.lane.b32.xlu1 %v4268_v9, %s4876_s28  ;;  %4323 = vrot.lane.b32.xlu0 %v4267_v63, %s4876_s28 }
 0xbe8   :  { %4329 = vrot.lane.b32.xlu1 %v4270_v3, %s4876_s28  ;;  %4327 = vrot.lane.b32.xlu0 %v4269_v19, %s4876_s28 }
 0xbec   :  { %4341 = vrot.lane.b32.xlu1 %v4268_v9, %s9705_s3  ;;  %4339 = vrot.lane.b32.xlu0 %v4267_v63, %s9705_s3 }
 0xbf0   :  { %4345 = vrot.lane.b32.xlu1 %v4270_v3, %s9705_s3  ;;  %4343 = vrot.lane.b32.xlu0 %v4269_v19, %s9705_s3 }
 0xbf4   :  { %4357 = vrot.lane.b32.xlu1 %v4268_v9, %s9706_s21  ;;  %4355 = vrot.lane.b32.xlu0 %v4267_v63, %s9706_s21 }
 0xbf8   :  { %4361 = vrot.lane.b32.xlu1 %v4270_v3, %s9706_s21  ;;  %4359 = vrot.lane.b32.xlu0 %v4269_v19, %s9706_s21 }
 0xbfc   :  { %4373 = vrot.lane.b32.xlu1 %v4268_v9, %s9707_s17  ;;  %4371 = vrot.lane.b32.xlu0 %v4267_v63, %s9707_s17 }
 0xc00   :  { %4377 = vrot.lane.b32.xlu1 %v4270_v3, %s9707_s17  ;;  %4375 = vrot.lane.b32.xlu0 %v4269_v19, %s9707_s17 }
 0xc3e   :  { %v4278_v31 = vpop.permute.xlu1 %4277  ;;  %v4276_v13 = vpop.permute.xlu0 %4275 }
 0xc3f   :  { %v4288_v18 = vadd.f32 %v4278_v31, %v4268_v9  ;;  %v4287_v28 = vadd.f32 %v4276_v13, %v4267_v63 }
 0xc42   :  { %v4282_v45 = vpop.permute.xlu1 %4281  ;;  %v4280_v33 = vpop.permute.xlu0 %4279 }
 0xc43   :  { %v4290_v34 = vadd.f32 %v4282_v45, %v4270_v3  ;;  %v4289_v61 = vadd.f32 %v4280_v33, %v4269_v19 }
 0xc46   :  { %v4294_v60 = vpop.permute.xlu1 %4293  ;;  %v4292_v1 = vpop.permute.xlu0 %4291 }
 0xc47   :  { %v4304_v48 = vadd.f32 %v4294_v60, %v4288_v18  ;;  %v4303_v20 = vadd.f32 %v4292_v1, %v4287_v28 }
 0xc4a   :  { %v4298_v16 = vpop.permute.xlu1 %4297  ;;  %v4296_v5 = vpop.permute.xlu0 %4295 }
 0xc4b   :  { %v4306_v57 = vadd.f32 %v4298_v16, %v4290_v34  ;;  %v4305_v40 = vadd.f32 %v4296_v5, %v4289_v61 }
 0xc4e   :  { %v4310_v2 = vpop.permute.xlu1 %4309  ;;  %v4308_v12 = vpop.permute.xlu0 %4307 }
 0xc4f   :  { %v4320_v8 = vadd.f32 %v4310_v2, %v4304_v48  ;;  %v4319_v50 = vadd.f32 %v4308_v12, %v4303_v20 }
 0xc52   :  { %v4314_v62 = vpop.permute.xlu1 %4313  ;;  %v4312_v26 = vpop.permute.xlu0 %4311 }
 0xc53   :  { %v4322_v29 = vadd.f32 %v4314_v62, %v4306_v57  ;;  %v4321_v24 = vadd.f32 %v4312_v26, %v4305_v40 }
 0xc56   :  { %v4326_v22 = vpop.permute.xlu1 %4325  ;;  %v4324_v47 = vpop.permute.xlu0 %4323 }
 0xc57   :  { %v4336_v49 = vadd.f32 %v4326_v22, %v4320_v8  ;;  %v4335_v58 = vadd.f32 %v4324_v47, %v4319_v50 }
 0xc5a   :  { %v4330_v37 = vpop.permute.xlu1 %4329  ;;  %v4328_v46 = vpop.permute.xlu0 %4327 }
 0xc5b   :  { %v4338_v36 = vadd.f32 %v4330_v37, %v4322_v29  ;;  %v4337_v6 = vadd.f32 %v4328_v46, %v4321_v24 }
 0xc5e   :  { %v4342_v14 = vpop.permute.xlu1 %4341  ;;  %v4340_v27 = vpop.permute.xlu0 %4339 }
 0xc5f   :  { %v4352_v38 = vadd.f32 %v4342_v14, %v4336_v49  ;;  %v4351_v10 = vadd.f32 %v4340_v27, %v4335_v58 }
 0xc62   :  { %v4346_v43 = vpop.permute.xlu1 %4345  ;;  %v4344_v35 = vpop.permute.xlu0 %4343 }
 0xc63   :  { %v4354_v4 = vadd.f32 %v4346_v43, %v4338_v36  ;;  %v4353_v25 = vadd.f32 %v4344_v35, %v4337_v6 }
 0xc66   :  { %v4358_v52 = vpop.permute.xlu1 %4357  ;;  %v4356_v44 = vpop.permute.xlu0 %4355 }
 0xc67   :  { %v4368_v21 = vadd.f32 %v4358_v52, %v4352_v38  ;;  %v4367_v42 = vadd.f32 %v4356_v44, %v4351_v10 }
 0xc6a   :  { %v4362_v30 = vpop.permute.xlu1 %4361  ;;  %v4360_v7 = vpop.permute.xlu0 %4359 }
 0xc6b   :  { %v4370_v23 = vadd.f32 %v4362_v30, %v4354_v4  ;;  %v4369_v41 = vadd.f32 %v4360_v7, %v4353_v25 }
 0xc6e   :  { %v4374_v0 = vpop.permute.xlu1 %4373  ;;  %v4372_v53 = vpop.permute.xlu0 %4371 }
 0xc6f   :  { %v4384_v32 = vadd.f32 %v4374_v0, %v4368_v21  ;;  %v4383_v54 = vadd.f32 %v4372_v53, %v4367_v42 }
 0xc71   :  { %v4388_v59 = vmul.f32 0.125, %v4384_v32  ;;  %v4387_v17 = vmul.f32 0.125, %v4383_v54 }
 0xc72   :  { %v4378_v56 = vpop.permute.xlu1 %4377  ;;  %v4376_v15 = vpop.permute.xlu0 %4375 }
 0xc73   :  { %4392 = vst.msk [vmem:[%s9433_s15 + $0x8] sm:$0xff] %vm336_vm1, %v4388_v59  ;;  %4391 = vst.msk [vmem:[%s9433_s15] sm:$0xff] %vm336_vm1, %v4387_v17  ;;  %v4386_v11 = vadd.f32 %v4378_v56, %v4370_v23  ;;  %v4385_v51 = vadd.f32 %v4376_v15, %v4369_v41 }
 0xc75   :  { %v4390_v63 = vmul.f32 0.125, %v4386_v11  ;;  %v4389_v9 = vmul.f32 0.125, %v4385_v51 }
 0xc77   :  { %4394 = vst.msk [vmem:[%s9433_s15 + $0x18] sm:$0xff] %vm336_vm1, %v4390_v63  ;;  %4393 = vst.msk [vmem:[%s9433_s15 + $0x10] sm:$0xff] %vm336_vm1, %v4389_v9 }

</bundles_post_ra>
